<compile_context>
chip_gen: v5e
topology: v5e:2x2
jax: 0.10.0
libtpu: 0.0.40
codegen_flags: <defaults>
</compile_context>

<pallas_src>
import functools

import numpy as np
import jax
import jax.numpy as jnp
from jax import lax
from jax.experimental import pallas as pl
from jax.experimental.pallas import tpu as pltpu

CP = 128  # padded channel width = TPU lane width


# ----------------------------------------------------------------------------
# In-kernel helper: 3x3 conv via im2col + a single MXU matmul.
# ----------------------------------------------------------------------------
def _im2col_conv3x3(xpad_ref, col_ref, w_ref, Ho, Wo, stride, Cp, K=3):
    """xpad_ref: (Hp, Wp, Cp) bf16 spatially-padded input (VMEM scratch)
       col_ref : (Ho*Wo, K*K*Cp) bf16 im2col patch matrix (VMEM scratch)
       w_ref   : (K*K*Cp, Cp) bf16 BN-folded weight slab
       returns : (Ho*Wo, Cp) f32 accumulator."""
    for i in range(K):
        for j in range(K):
            t = i * K + j
            if stride == 1:
                win = xpad_ref[i:i + Ho, j:j + Wo, :]          # contiguous window
            else:
                win = xpad_ref[pl.ds(i, Ho, stride), pl.ds(j, Wo, stride), :]
            # lane-aligned (multiple of 128) store into the patch matrix
            col_ref[:, t * Cp:(t + 1) * Cp] = win.reshape(Ho * Wo, Cp)
    # one well-shaped matmul: (Ho*Wo, 9*Cp) @ (9*Cp, Cp), f32 accumulation
    return jnp.dot(col_ref[...], w_ref[...], preferred_element_type=jnp.float32)


# ----------------------------------------------------------------------------
# Fused BasicBlock kernel: relu(skip(x) + conv2(relu(conv1(x))))
# ----------------------------------------------------------------------------
def _basic_block_kernel(*refs, stride, has_skip):
    if has_skip:
        (x_ref, w1_ref, b1_ref, w2_ref, b2_ref, ws_ref, bs_ref,
         o_ref, xpad_ref, ypad_ref, col_ref) = refs
    else:
        (x_ref, w1_ref, b1_ref, w2_ref, b2_ref,
         o_ref, xpad_ref, ypad_ref, col_ref) = refs
        ws_ref = bs_ref = None

    H, W, Cp = x_ref.shape
    Ho, Wo, _ = o_ref.shape

    x = x_ref[...]                                       # (H, W, Cp) bf16

    # ---- conv1: 3x3, stride, pad=1 (halo built in VMEM), BN folded, ReLU ---
    xpad_ref[...] = jnp.zeros_like(xpad_ref)
    xpad_ref[1:H + 1, 1:W + 1, :] = x
    acc1 = _im2col_conv3x3(xpad_ref, col_ref, w1_ref, Ho, Wo, stride, Cp)
    y = jnp.maximum(acc1 + b1_ref[...], 0.0)             # f32 epilogue

    # ---- skip branch: 1x1 conv (stride) + BN, or identity ------------------
    if has_skip:
        if stride == 1:
            xs = x.reshape(H * W, Cp)
        else:
            xs = x[::stride, ::stride, :].reshape(Ho * Wo, Cp)
        skip = jnp.dot(xs, ws_ref[...], preferred_element_type=jnp.float32)
        skip = skip + bs_ref[...]
    else:
        skip = x.reshape(H * W, Cp).astype(jnp.float32)

    # ---- conv2: 3x3, stride 1, pad=1, BN folded; + skip; ReLU --------------
    ypad_ref[...] = jnp.zeros_like(ypad_ref)
    ypad_ref[1:Ho + 1, 1:Wo + 1, :] = y.reshape(Ho, Wo, Cp).astype(ypad_ref.dtype)
    acc2 = _im2col_conv3x3(ypad_ref, col_ref, w2_ref, Ho, Wo, 1, Cp)
    out = jnp.maximum(acc2 + b2_ref[...] + skip, 0.0)    # f32 epilogue
    o_ref[...] = out.reshape(Ho, Wo, Cp).astype(o_ref.dtype)


# ----------------------------------------------------------------------------
# Wrapper: one pallas_call per BasicBlock, grid over batch.
# ----------------------------------------------------------------------------
def basic_block(x_nhwc, params, *, stride, inp_dim, out_dim, cp=CP):
    """x_nhwc: (N, H, W, inp_dim) f32. Returns (N, Ho, Wo, out_dim) f32."""
    N, H, W, _ = x_nhwc.shape
    Ho = (H - 1) // stride + 1
    Wo = (W - 1) // stride + 1
    has_skip = (stride == 2) or (inp_dim != out_dim)

    # Channel-pad to the lane width and cast to bf16 once at the block boundary.
    x = jnp.zeros((N, H, W, cp), jnp.bfloat16)
    x = x.at[..., :inp_dim].set(x_nhwc.astype(jnp.bfloat16))

    inputs = [x, params["w1"], params["b1"], params["w2"], params["b2"]]
    in_specs = [
        pl.BlockSpec((None, H, W, cp), lambda n: (n, 0, 0, 0)),
        pl.BlockSpec((9 * cp, cp), lambda n: (0, 0)),
        pl.BlockSpec((1, cp), lambda n: (0, 0)),
        pl.BlockSpec((9 * cp, cp), lambda n: (0, 0)),
        pl.BlockSpec((1, cp), lambda n: (0, 0)),
    ]
    if has_skip:
        inputs += [params["ws"], params["bs"]]
        in_specs += [pl.BlockSpec((cp, cp), lambda n: (0, 0)),
                     pl.BlockSpec((1, cp), lambda n: (0, 0))]

    kernel = functools.partial(_basic_block_kernel, stride=stride,
                               has_skip=has_skip)
    out = pl.pallas_call(
        kernel,
        out_shape=jax.ShapeDtypeStruct((N, Ho, Wo, cp), jnp.float32),
        grid=(N,),
        in_specs=in_specs,
        out_specs=pl.BlockSpec((None, Ho, Wo, cp), lambda n: (n, 0, 0, 0)),
        scratch_shapes=[
            pltpu.VMEM((H + 2, W + 2, cp), jnp.bfloat16),     # conv1 halo input
            pltpu.VMEM((Ho + 2, Wo + 2, cp), jnp.bfloat16),   # conv2 halo input
            pltpu.VMEM((Ho * Wo, 9 * cp), jnp.bfloat16),      # shared im2col slab
        ],
        compiler_params=pltpu.CompilerParams(
            dimension_semantics=("parallel",),       # even axis -> both v7x TCs
            vmem_limit_bytes=32 * 1024 * 1024),      # well inside v7x's 64 MiB
    )(*inputs)
    return out[..., :out_dim]


# ----------------------------------------------------------------------------
# Parameter init: Conv2d (with bias) + eval-mode BatchNorm folded, channel-padded.
# ----------------------------------------------------------------------------
def init_conv_bn(key, cin, cout, k, cp=CP, eps=1e-5):
    k1, k2, k3, k4, k5, k6 = jax.random.split(key, 6)
    fan_in = cin * k * k
    w = jax.random.normal(k1, (cout, cin, k, k), jnp.float32) / np.sqrt(fan_in)
    b = 0.1 * jax.random.normal(k2, (cout,), jnp.float32)
    gamma = 1.0 + 0.1 * jax.random.normal(k3, (cout,), jnp.float32)
    beta = 0.1 * jax.random.normal(k4, (cout,), jnp.float32)
    running_mean = 0.1 * jax.random.normal(k5, (cout,), jnp.float32)
    running_var = 1.0 + 0.1 * jax.random.uniform(k6, (cout,), jnp.float32)
    # Fold eval-mode BatchNorm (running stats) into conv weight/bias.
    # TODO(synk): training-mode BatchNorm (batch statistics) is not reproduced.
    scale = gamma / jnp.sqrt(running_var + eps)
    w_f = w * scale[:, None, None, None]
    b_f = (b - running_mean) * scale + beta
    w_hwio = jnp.transpose(w_f, (2, 3, 1, 0))                      # (k,k,cin,cout)
    w_pad = jnp.zeros((k, k, cp, cp), jnp.float32).at[:, :, :cin, :cout].set(w_hwio)
    w_pad = w_pad.reshape(k * k * cp, cp).astype(jnp.bfloat16)     # im2col slab
    b_pad = jnp.zeros((1, cp), jnp.float32).at[0, :cout].set(b_f)
    return w_pad, b_pad


def init_basic_block_params(key, inp_dim, out_dim, cp=CP):
    k1, k2, k3 = jax.random.split(key, 3)
    p = {}
    p["w1"], p["b1"] = init_conv_bn(k1, inp_dim, out_dim, 3, cp)
    p["w2"], p["b2"] = init_conv_bn(k2, out_dim, out_dim, 3, cp)
    p["ws"], p["bs"] = init_conv_bn(k3, inp_dim, out_dim, 1, cp)
    return p


# ----------------------------------------------------------------------------
# Pure-JAX reference (same bf16-rounded operands, f32 math).
# ----------------------------------------------------------------------------
def ref_basic_block(x_nhwc, params, *, stride, inp_dim, out_dim, cp=CP):
    f32 = jnp.float32
    xb = x_nhwc.astype(jnp.bfloat16).astype(f32)   # match kernel's bf16 input

    def conv(x, w_packed, b_pad, cin, cout, k, s, pad):
        w = w_packed.astype(f32).reshape(k, k, cp, cp)[:, :, :cin, :cout]
        y = lax.conv_general_dilated(
            x, w, window_strides=(s, s), padding=[(pad, pad), (pad, pad)],
            dimension_numbers=("NHWC", "HWIO", "NHWC"))
        return y + b_pad[0, :cout][None, None, None, :]

    y = jnp.maximum(conv(xb, params["w1"], params["b1"],
                         inp_dim, out_dim, 3, stride, 1), 0.0)
    y = y.astype(jnp.bfloat16).astype(f32)         # match kernel intermediate
    z = conv(y, params["w2"], params["b2"], out_dim, out_dim, 3, 1, 1)
    if stride == 2 or inp_dim != out_dim:
        skip = conv(xb, params["ws"], params["bs"], inp_dim, out_dim, 1, stride, 0)
    else:
        skip = xb
    return jnp.maximum(z + skip, 0.0)


if __name__ == "__main__":
    inp_dim, out_dim, stride = 4, 8, 1
    N, H, W = 2, 16, 16

    key = jax.random.PRNGKey(0)
    kx, kp = jax.random.split(key)
    x_nchw = jax.random.normal(kx, (N, inp_dim, H, W), jnp.float32)
    params = init_basic_block_params(kp, inp_dim, out_dim)

    x_nhwc = jnp.transpose(x_nchw, (0, 2, 3, 1))          # NCHW -> NHWC

    fwd = jax.jit(functools.partial(basic_block, stride=stride,
                                    inp_dim=inp_dim, out_dim=out_dim))
    out_nhwc = fwd(x_nhwc, params)
    out_nchw = jnp.transpose(out_nhwc, (0, 3, 1, 2))      # back to NCHW
    jax.block_until_ready(out_nchw)

    # correctness check against the pure-JAX reference
    ref_nhwc = ref_basic_block(x_nhwc, params, stride=stride,
                               inp_dim=inp_dim, out_dim=out_dim)
    np.testing.assert_allclose(np.asarray(out_nhwc), np.asarray(ref_nhwc),
                               rtol=1e-2, atol=1e-2)

    print("KERNEL_OK")
</pallas_src>

<mosaic_0001>
module attributes {stable_mosaic.version = 11 : i64} {
  func.func @_basic_block_kernel(%arg0: i32, %arg1: memref<1x16x16x128xbf16, #tpu.memory_space<vmem>>, %arg2: memref<1152x128xbf16, #tpu.memory_space<vmem>>, %arg3: memref<1x128xf32, #tpu.memory_space<vmem>>, %arg4: memref<1152x128xbf16, #tpu.memory_space<vmem>>, %arg5: memref<1x128xf32, #tpu.memory_space<vmem>>, %arg6: memref<128x128xbf16, #tpu.memory_space<vmem>>, %arg7: memref<1x128xf32, #tpu.memory_space<vmem>>, %arg8: memref<1x16x16x128xf32, #tpu.memory_space<vmem>>, %arg9: memref<18x18x128xbf16, #tpu.memory_space<vmem>>, %arg10: memref<18x18x128xbf16, #tpu.memory_space<vmem>>, %arg11: memref<256x1152xbf16, #tpu.memory_space<vmem>>) attributes {dimension_semantics = [#tpu.dimension_semantics<parallel>], iteration_bounds = array<i64: 2>, scalar_prefetch = 0 : i64, scratch_operands = 3 : i64, tpu.core_type = #tpu.core_type<tc>, window_params = [{transform_indices = @transform_0, window_bounds = array<i64: 1, 16, 16, 128>}, {pipeline_mode = #tpu.pipeline_mode<synchronous>, transform_indices = @transform_1, window_bounds = array<i64: 1152, 128>}, {pipeline_mode = #tpu.pipeline_mode<synchronous>, transform_indices = @transform_2, window_bounds = array<i64: 1, 128>}, {pipeline_mode = #tpu.pipeline_mode<synchronous>, transform_indices = @transform_3, window_bounds = array<i64: 1152, 128>}, {pipeline_mode = #tpu.pipeline_mode<synchronous>, transform_indices = @transform_4, window_bounds = array<i64: 1, 128>}, {pipeline_mode = #tpu.pipeline_mode<synchronous>, transform_indices = @transform_5, window_bounds = array<i64: 128, 128>}, {pipeline_mode = #tpu.pipeline_mode<synchronous>, transform_indices = @transform_6, window_bounds = array<i64: 1, 128>}, {transform_indices = @transform_7, window_bounds = array<i64: 1, 16, 16, 128>}]} {
    %c0 = arith.constant 0 : index
    %c0_0 = arith.constant 0 : index
    %c0_1 = arith.constant 0 : index
    %c0_2 = arith.constant 0 : index
    %0 = vector.load %arg1[%c0, %c0_0, %c0_1, %c0_2] : memref<1x16x16x128xbf16, #tpu.memory_space<vmem>>, vector<1x16x16x128xbf16>
    %1 = vector.shape_cast %0 : vector<1x16x16x128xbf16> to vector<16x16x128xbf16>
    %cst = arith.constant 0.000000e+00 : bf16
    %2 = vector.broadcast %cst : bf16 to vector<18x18x128xbf16>
    %c0_3 = arith.constant 0 : index
    %c0_4 = arith.constant 0 : index
    %c0_5 = arith.constant 0 : index
    %3 = vector.load %arg9[%c0_3, %c0_4, %c0_5] : memref<18x18x128xbf16, #tpu.memory_space<vmem>>, vector<18x18x128xbf16>
    tpu.vector_store %arg9[%c0_3, %c0_4, %c0_5], %2 {strides = array<i32>} : memref<18x18x128xbf16, #tpu.memory_space<vmem>>, vector<18x18x128xbf16>,
    %c1 = arith.constant 1 : index
    %c1_6 = arith.constant 1 : index
    %c0_7 = arith.constant 0 : index
    %4 = vector.load %arg9[%c1, %c1_6, %c0_7] : memref<18x18x128xbf16, #tpu.memory_space<vmem>>, vector<16x16x128xbf16>
    tpu.vector_store %arg9[%c1, %c1_6, %c0_7], %1 {strides = array<i32>} : memref<18x18x128xbf16, #tpu.memory_space<vmem>>, vector<16x16x128xbf16>,
    %c0_8 = arith.constant 0 : index
    %c0_9 = arith.constant 0 : index
    %c0_10 = arith.constant 0 : index
    %5 = vector.load %arg9[%c0_8, %c0_9, %c0_10] : memref<18x18x128xbf16, #tpu.memory_space<vmem>>, vector<16x16x128xbf16>
    %6 = vector.shape_cast %5 : vector<16x16x128xbf16> to vector<256x128xbf16>
    %c0_11 = arith.constant 0 : index
    %c0_12 = arith.constant 0 : index
    %7 = vector.load %arg11[%c0_11, %c0_12] : memref<256x1152xbf16, #tpu.memory_space<vmem>>, vector<256x128xbf16>
    tpu.vector_store %arg11[%c0_11, %c0_12], %6 {strides = array<i32>} : memref<256x1152xbf16, #tpu.memory_space<vmem>>, vector<256x128xbf16>,
    %c0_13 = arith.constant 0 : index
    %c1_14 = arith.constant 1 : index
    %c0_15 = arith.constant 0 : index
    %8 = vector.load %arg9[%c0_13, %c1_14, %c0_15] : memref<18x18x128xbf16, #tpu.memory_space<vmem>>, vector<16x16x128xbf16>
    %9 = vector.shape_cast %8 : vector<16x16x128xbf16> to vector<256x128xbf16>
    %c0_16 = arith.constant 0 : index
    %c128 = arith.constant 128 : index
    %10 = vector.load %arg11[%c0_16, %c128] : memref<256x1152xbf16, #tpu.memory_space<vmem>>, vector<256x128xbf16>
    tpu.vector_store %arg11[%c0_16, %c128], %9 {strides = array<i32>} : memref<256x1152xbf16, #tpu.memory_space<vmem>>, vector<256x128xbf16>,
    %c0_17 = arith.constant 0 : index
    %c2 = arith.constant 2 : index
    %c0_18 = arith.constant 0 : index
    %11 = vector.load %arg9[%c0_17, %c2, %c0_18] : memref<18x18x128xbf16, #tpu.memory_space<vmem>>, vector<16x16x128xbf16>
    %12 = vector.shape_cast %11 : vector<16x16x128xbf16> to vector<256x128xbf16>
    %c0_19 = arith.constant 0 : index
    %c256 = arith.constant 256 : index
    %13 = vector.load %arg11[%c0_19, %c256] : memref<256x1152xbf16, #tpu.memory_space<vmem>>, vector<256x128xbf16>
    tpu.vector_store %arg11[%c0_19, %c256], %12 {strides = array<i32>} : memref<256x1152xbf16, #tpu.memory_space<vmem>>, vector<256x128xbf16>,
    %c1_20 = arith.constant 1 : index
    %c0_21 = arith.constant 0 : index
    %c0_22 = arith.constant 0 : index
    %14 = vector.load %arg9[%c1_20, %c0_21, %c0_22] : memref<18x18x128xbf16, #tpu.memory_space<vmem>>, vector<16x16x128xbf16>
    %15 = vector.shape_cast %14 : vector<16x16x128xbf16> to vector<256x128xbf16>
    %c0_23 = arith.constant 0 : index
    %c384 = arith.constant 384 : index
    %16 = vector.load %arg11[%c0_23, %c384] : memref<256x1152xbf16, #tpu.memory_space<vmem>>, vector<256x128xbf16>
    tpu.vector_store %arg11[%c0_23, %c384], %15 {strides = array<i32>} : memref<256x1152xbf16, #tpu.memory_space<vmem>>, vector<256x128xbf16>,
    %c1_24 = arith.constant 1 : index
    %c1_25 = arith.constant 1 : index
    %c0_26 = arith.constant 0 : index
    %17 = vector.load %arg9[%c1_24, %c1_25, %c0_26] : memref<18x18x128xbf16, #tpu.memory_space<vmem>>, vector<16x16x128xbf16>
    %18 = vector.shape_cast %17 : vector<16x16x128xbf16> to vector<256x128xbf16>
    %c0_27 = arith.constant 0 : index
    %c512 = arith.constant 512 : index
    %19 = vector.load %arg11[%c0_27, %c512] : memref<256x1152xbf16, #tpu.memory_space<vmem>>, vector<256x128xbf16>
    tpu.vector_store %arg11[%c0_27, %c512], %18 {strides = array<i32>} : memref<256x1152xbf16, #tpu.memory_space<vmem>>, vector<256x128xbf16>,
    %c1_28 = arith.constant 1 : index
    %c2_29 = arith.constant 2 : index
    %c0_30 = arith.constant 0 : index
    %20 = vector.load %arg9[%c1_28, %c2_29, %c0_30] : memref<18x18x128xbf16, #tpu.memory_space<vmem>>, vector<16x16x128xbf16>
    %21 = vector.shape_cast %20 : vector<16x16x128xbf16> to vector<256x128xbf16>
    %c0_31 = arith.constant 0 : index
    %c640 = arith.constant 640 : index
    %22 = vector.load %arg11[%c0_31, %c640] : memref<256x1152xbf16, #tpu.memory_space<vmem>>, vector<256x128xbf16>
    tpu.vector_store %arg11[%c0_31, %c640], %21 {strides = array<i32>} : memref<256x1152xbf16, #tpu.memory_space<vmem>>, vector<256x128xbf16>,
    %c2_32 = arith.constant 2 : index
    %c0_33 = arith.constant 0 : index
    %c0_34 = arith.constant 0 : index
    %23 = vector.load %arg9[%c2_32, %c0_33, %c0_34] : memref<18x18x128xbf16, #tpu.memory_space<vmem>>, vector<16x16x128xbf16>
    %24 = vector.shape_cast %23 : vector<16x16x128xbf16> to vector<256x128xbf16>
    %c0_35 = arith.constant 0 : index
    %c768 = arith.constant 768 : index
    %25 = vector.load %arg11[%c0_35, %c768] : memref<256x1152xbf16, #tpu.memory_space<vmem>>, vector<256x128xbf16>
    tpu.vector_store %arg11[%c0_35, %c768], %24 {strides = array<i32>} : memref<256x1152xbf16, #tpu.memory_space<vmem>>, vector<256x128xbf16>,
    %c2_36 = arith.constant 2 : index
    %c1_37 = arith.constant 1 : index
    %c0_38 = arith.constant 0 : index
    %26 = vector.load %arg9[%c2_36, %c1_37, %c0_38] : memref<18x18x128xbf16, #tpu.memory_space<vmem>>, vector<16x16x128xbf16>
    %27 = vector.shape_cast %26 : vector<16x16x128xbf16> to vector<256x128xbf16>
    %c0_39 = arith.constant 0 : index
    %c896 = arith.constant 896 : index
    %28 = vector.load %arg11[%c0_39, %c896] : memref<256x1152xbf16, #tpu.memory_space<vmem>>, vector<256x128xbf16>
    tpu.vector_store %arg11[%c0_39, %c896], %27 {strides = array<i32>} : memref<256x1152xbf16, #tpu.memory_space<vmem>>, vector<256x128xbf16>,
    %c2_40 = arith.constant 2 : index
    %c2_41 = arith.constant 2 : index
    %c0_42 = arith.constant 0 : index
    %29 = vector.load %arg9[%c2_40, %c2_41, %c0_42] : memref<18x18x128xbf16, #tpu.memory_space<vmem>>, vector<16x16x128xbf16>
    %30 = vector.shape_cast %29 : vector<16x16x128xbf16> to vector<256x128xbf16>
    %c0_43 = arith.constant 0 : index
    %c1024 = arith.constant 1024 : index
    %31 = vector.load %arg11[%c0_43, %c1024] : memref<256x1152xbf16, #tpu.memory_space<vmem>>, vector<256x128xbf16>
    tpu.vector_store %arg11[%c0_43, %c1024], %30 {strides = array<i32>} : memref<256x1152xbf16, #tpu.memory_space<vmem>>, vector<256x128xbf16>,
    %c0_44 = arith.constant 0 : index
    %c0_45 = arith.constant 0 : index
    %32 = vector.load %arg11[%c0_44, %c0_45] : memref<256x1152xbf16, #tpu.memory_space<vmem>>, vector<256x1152xbf16>
    %c0_46 = arith.constant 0 : index
    %c0_47 = arith.constant 0 : index
    %33 = vector.load %arg2[%c0_46, %c0_47] : memref<1152x128xbf16, #tpu.memory_space<vmem>>, vector<1152x128xbf16>
    %cst_48 = arith.constant dense<0.000000e+00> : vector<256x128xf32>
    %34 = tpu.matmul %32, %33, %cst_48 {dimension_numbers = #tpu.dot_dimension_numbers<[1], [0], [0], [1], [0, 0, 1, 1], [], []>} : vector<256x1152xbf16>, vector<1152x128xbf16>, vector<256x128xf32> -> vector<256x128xf32>
    %c0_49 = arith.constant 0 : index
    %c0_50 = arith.constant 0 : index
    %35 = vector.load %arg3[%c0_49, %c0_50] : memref<1x128xf32, #tpu.memory_space<vmem>>, vector<1x128xf32>
    %36 = vector.broadcast %35 : vector<1x128xf32> to vector<256x128xf32>
    %37 = arith.addf %34, %36 : vector<256x128xf32>
    %cst_51 = arith.constant 0.000000e+00 : f32
    %38 = vector.broadcast %cst_51 : f32 to vector<256x128xf32>
    %39 = arith.maximumf %37, %38 : vector<256x128xf32>
    %40 = vector.shape_cast %1 : vector<16x16x128xbf16> to vector<256x128xbf16>
    %c0_52 = arith.constant 0 : index
    %c0_53 = arith.constant 0 : index
    %41 = vector.load %arg6[%c0_52, %c0_53] : memref<128x128xbf16, #tpu.memory_space<vmem>>, vector<128x128xbf16>
    %cst_54 = arith.constant dense<0.000000e+00> : vector<256x128xf32>
    %42 = tpu.matmul %40, %41, %cst_54 {dimension_numbers = #tpu.dot_dimension_numbers<[1], [0], [0], [1], [0, 0, 1, 1], [], []>} : vector<256x128xbf16>, vector<128x128xbf16>, vector<256x128xf32> -> vector<256x128xf32>
    %c0_55 = arith.constant 0 : index
    %c0_56 = arith.constant 0 : index
    %43 = vector.load %arg7[%c0_55, %c0_56] : memref<1x128xf32, #tpu.memory_space<vmem>>, vector<1x128xf32>
    %44 = vector.broadcast %43 : vector<1x128xf32> to vector<256x128xf32>
    %45 = arith.addf %42, %44 : vector<256x128xf32>
    %cst_57 = arith.constant 0.000000e+00 : bf16
    %46 = vector.broadcast %cst_57 : bf16 to vector<18x18x128xbf16>
    %c0_58 = arith.constant 0 : index
    %c0_59 = arith.constant 0 : index
    %c0_60 = arith.constant 0 : index
    %47 = vector.load %arg10[%c0_58, %c0_59, %c0_60] : memref<18x18x128xbf16, #tpu.memory_space<vmem>>, vector<18x18x128xbf16>
    tpu.vector_store %arg10[%c0_58, %c0_59, %c0_60], %46 {strides = array<i32>} : memref<18x18x128xbf16, #tpu.memory_space<vmem>>, vector<18x18x128xbf16>,
    %48 = vector.shape_cast %39 : vector<256x128xf32> to vector<16x16x128xf32>
    %49 = arith.truncf %48 : vector<16x16x128xf32> to vector<16x16x128xbf16>
    %c1_61 = arith.constant 1 : index
    %c1_62 = arith.constant 1 : index
    %c0_63 = arith.constant 0 : index
    %50 = vector.load %arg10[%c1_61, %c1_62, %c0_63] : memref<18x18x128xbf16, #tpu.memory_space<vmem>>, vector<16x16x128xbf16>
    tpu.vector_store %arg10[%c1_61, %c1_62, %c0_63], %49 {strides = array<i32>} : memref<18x18x128xbf16, #tpu.memory_space<vmem>>, vector<16x16x128xbf16>,
    %c0_64 = arith.constant 0 : index
    %c0_65 = arith.constant 0 : index
    %c0_66 = arith.constant 0 : index
    %51 = vector.load %arg10[%c0_64, %c0_65, %c0_66] : memref<18x18x128xbf16, #tpu.memory_space<vmem>>, vector<16x16x128xbf16>
    %52 = vector.shape_cast %51 : vector<16x16x128xbf16> to vector<256x128xbf16>
    %c0_67 = arith.constant 0 : index
    %c0_68 = arith.constant 0 : index
    %53 = vector.load %arg11[%c0_67, %c0_68] : memref<256x1152xbf16, #tpu.memory_space<vmem>>, vector<256x128xbf16>
    tpu.vector_store %arg11[%c0_67, %c0_68], %52 {strides = array<i32>} : memref<256x1152xbf16, #tpu.memory_space<vmem>>, vector<256x128xbf16>,
    %c0_69 = arith.constant 0 : index
    %c1_70 = arith.constant 1 : index
    %c0_71 = arith.constant 0 : index
    %54 = vector.load %arg10[%c0_69, %c1_70, %c0_71] : memref<18x18x128xbf16, #tpu.memory_space<vmem>>, vector<16x16x128xbf16>
    %55 = vector.shape_cast %54 : vector<16x16x128xbf16> to vector<256x128xbf16>
    %c0_72 = arith.constant 0 : index
    %c128_73 = arith.constant 128 : index
    %56 = vector.load %arg11[%c0_72, %c128_73] : memref<256x1152xbf16, #tpu.memory_space<vmem>>, vector<256x128xbf16>
    tpu.vector_store %arg11[%c0_72, %c128_73], %55 {strides = array<i32>} : memref<256x1152xbf16, #tpu.memory_space<vmem>>, vector<256x128xbf16>,
    %c0_74 = arith.constant 0 : index
    %c2_75 = arith.constant 2 : index
    %c0_76 = arith.constant 0 : index
    %57 = vector.load %arg10[%c0_74, %c2_75, %c0_76] : memref<18x18x128xbf16, #tpu.memory_space<vmem>>, vector<16x16x128xbf16>
    %58 = vector.shape_cast %57 : vector<16x16x128xbf16> to vector<256x128xbf16>
    %c0_77 = arith.constant 0 : index
    %c256_78 = arith.constant 256 : index
    %59 = vector.load %arg11[%c0_77, %c256_78] : memref<256x1152xbf16, #tpu.memory_space<vmem>>, vector<256x128xbf16>
    tpu.vector_store %arg11[%c0_77, %c256_78], %58 {strides = array<i32>} : memref<256x1152xbf16, #tpu.memory_space<vmem>>, vector<256x128xbf16>,
    %c1_79 = arith.constant 1 : index
    %c0_80 = arith.constant 0 : index
    %c0_81 = arith.constant 0 : index
    %60 = vector.load %arg10[%c1_79, %c0_80, %c0_81] : memref<18x18x128xbf16, #tpu.memory_space<vmem>>, vector<16x16x128xbf16>
    %61 = vector.shape_cast %60 : vector<16x16x128xbf16> to vector<256x128xbf16>
    %c0_82 = arith.constant 0 : index
    %c384_83 = arith.constant 384 : index
    %62 = vector.load %arg11[%c0_82, %c384_83] : memref<256x1152xbf16, #tpu.memory_space<vmem>>, vector<256x128xbf16>
    tpu.vector_store %arg11[%c0_82, %c384_83], %61 {strides = array<i32>} : memref<256x1152xbf16, #tpu.memory_space<vmem>>, vector<256x128xbf16>,
    %c1_84 = arith.constant 1 : index
    %c1_85 = arith.constant 1 : index
    %c0_86 = arith.constant 0 : index
    %63 = vector.load %arg10[%c1_84, %c1_85, %c0_86] : memref<18x18x128xbf16, #tpu.memory_space<vmem>>, vector<16x16x128xbf16>
    %64 = vector.shape_cast %63 : vector<16x16x128xbf16> to vector<256x128xbf16>
    %c0_87 = arith.constant 0 : index
    %c512_88 = arith.constant 512 : index
    %65 = vector.load %arg11[%c0_87, %c512_88] : memref<256x1152xbf16, #tpu.memory_space<vmem>>, vector<256x128xbf16>
    tpu.vector_store %arg11[%c0_87, %c512_88], %64 {strides = array<i32>} : memref<256x1152xbf16, #tpu.memory_space<vmem>>, vector<256x128xbf16>,
    %c1_89 = arith.constant 1 : index
    %c2_90 = arith.constant 2 : index
    %c0_91 = arith.constant 0 : index
    %66 = vector.load %arg10[%c1_89, %c2_90, %c0_91] : memref<18x18x128xbf16, #tpu.memory_space<vmem>>, vector<16x16x128xbf16>
    %67 = vector.shape_cast %66 : vector<16x16x128xbf16> to vector<256x128xbf16>
    %c0_92 = arith.constant 0 : index
    %c640_93 = arith.constant 640 : index
    %68 = vector.load %arg11[%c0_92, %c640_93] : memref<256x1152xbf16, #tpu.memory_space<vmem>>, vector<256x128xbf16>
    tpu.vector_store %arg11[%c0_92, %c640_93], %67 {strides = array<i32>} : memref<256x1152xbf16, #tpu.memory_space<vmem>>, vector<256x128xbf16>,
    %c2_94 = arith.constant 2 : index
    %c0_95 = arith.constant 0 : index
    %c0_96 = arith.constant 0 : index
    %69 = vector.load %arg10[%c2_94, %c0_95, %c0_96] : memref<18x18x128xbf16, #tpu.memory_space<vmem>>, vector<16x16x128xbf16>
    %70 = vector.shape_cast %69 : vector<16x16x128xbf16> to vector<256x128xbf16>
    %c0_97 = arith.constant 0 : index
    %c768_98 = arith.constant 768 : index
    %71 = vector.load %arg11[%c0_97, %c768_98] : memref<256x1152xbf16, #tpu.memory_space<vmem>>, vector<256x128xbf16>
    tpu.vector_store %arg11[%c0_97, %c768_98], %70 {strides = array<i32>} : memref<256x1152xbf16, #tpu.memory_space<vmem>>, vector<256x128xbf16>,
    %c2_99 = arith.constant 2 : index
    %c1_100 = arith.constant 1 : index
    %c0_101 = arith.constant 0 : index
    %72 = vector.load %arg10[%c2_99, %c1_100, %c0_101] : memref<18x18x128xbf16, #tpu.memory_space<vmem>>, vector<16x16x128xbf16>
    %73 = vector.shape_cast %72 : vector<16x16x128xbf16> to vector<256x128xbf16>
    %c0_102 = arith.constant 0 : index
    %c896_103 = arith.constant 896 : index
    %74 = vector.load %arg11[%c0_102, %c896_103] : memref<256x1152xbf16, #tpu.memory_space<vmem>>, vector<256x128xbf16>
    tpu.vector_store %arg11[%c0_102, %c896_103], %73 {strides = array<i32>} : memref<256x1152xbf16, #tpu.memory_space<vmem>>, vector<256x128xbf16>,
    %c2_104 = arith.constant 2 : index
    %c2_105 = arith.constant 2 : index
    %c0_106 = arith.constant 0 : index
    %75 = vector.load %arg10[%c2_104, %c2_105, %c0_106] : memref<18x18x128xbf16, #tpu.memory_space<vmem>>, vector<16x16x128xbf16>
    %76 = vector.shape_cast %75 : vector<16x16x128xbf16> to vector<256x128xbf16>
    %c0_107 = arith.constant 0 : index
    %c1024_108 = arith.constant 1024 : index
    %77 = vector.load %arg11[%c0_107, %c1024_108] : memref<256x1152xbf16, #tpu.memory_space<vmem>>, vector<256x128xbf16>
    tpu.vector_store %arg11[%c0_107, %c1024_108], %76 {strides = array<i32>} : memref<256x1152xbf16, #tpu.memory_space<vmem>>, vector<256x128xbf16>,
    %c0_109 = arith.constant 0 : index
    %c0_110 = arith.constant 0 : index
    %78 = vector.load %arg11[%c0_109, %c0_110] : memref<256x1152xbf16, #tpu.memory_space<vmem>>, vector<256x1152xbf16>
    %c0_111 = arith.constant 0 : index
    %c0_112 = arith.constant 0 : index
    %79 = vector.load %arg4[%c0_111, %c0_112] : memref<1152x128xbf16, #tpu.memory_space<vmem>>, vector<1152x128xbf16>
    %cst_113 = arith.constant dense<0.000000e+00> : vector<256x128xf32>
    %80 = tpu.matmul %78, %79, %cst_113 {dimension_numbers = #tpu.dot_dimension_numbers<[1], [0], [0], [1], [0, 0, 1, 1], [], []>} : vector<256x1152xbf16>, vector<1152x128xbf16>, vector<256x128xf32> -> vector<256x128xf32>
    %c0_114 = arith.constant 0 : index
    %c0_115 = arith.constant 0 : index
    %81 = vector.load %arg5[%c0_114, %c0_115] : memref<1x128xf32, #tpu.memory_space<vmem>>, vector<1x128xf32>
    %82 = vector.broadcast %81 : vector<1x128xf32> to vector<256x128xf32>
    %83 = arith.addf %80, %82 : vector<256x128xf32>
    %84 = arith.addf %83, %45 : vector<256x128xf32>
    %cst_116 = arith.constant 0.000000e+00 : f32
    %85 = vector.broadcast %cst_116 : f32 to vector<256x128xf32>
    %86 = arith.maximumf %84, %85 : vector<256x128xf32>
    %87 = vector.shape_cast %86 : vector<256x128xf32> to vector<16x16x128xf32>
    %c0_117 = arith.constant 0 : index
    %c0_118 = arith.constant 0 : index
    %c0_119 = arith.constant 0 : index
    %c0_120 = arith.constant 0 : index
    %88 = vector.load %arg8[%c0_117, %c0_118, %c0_119, %c0_120] : memref<1x16x16x128xf32, #tpu.memory_space<vmem>>, vector<1x16x16x128xf32>
    %89 = vector.shape_cast %88 : vector<1x16x16x128xf32> to vector<16x16x128xf32>
    %90 = vector.shape_cast %87 : vector<16x16x128xf32> to vector<1x16x16x128xf32>
    tpu.vector_store %arg8[%c0_117, %c0_118, %c0_119, %c0_120], %90 {strides = array<i32>} : memref<1x16x16x128xf32, #tpu.memory_space<vmem>>, vector<1x16x16x128xf32>,
    return
  }
  func.func @transform_0(%arg0: i32) -> (i32, i32, i32, i32) {
    %c0_i32 = arith.constant 0 : i32
    %c0_i32_0 = arith.constant 0 : i32
    %c0_i32_1 = arith.constant 0 : i32
    %c0_i32_2 = arith.constant 0 : i32
    return %arg0, %c0_i32, %c0_i32_0, %c0_i32_1 : i32, i32, i32, i32
  }
  func.func @transform_1(%arg0: i32) -> (i32, i32) {
    %c0_i32 = arith.constant 0 : i32
    %c0_i32_0 = arith.constant 0 : i32
    %c0_i32_1 = arith.constant 0 : i32
    return %c0_i32, %c0_i32_0 : i32, i32
  }
  func.func @transform_2(%arg0: i32) -> (i32, i32) {
    %c0_i32 = arith.constant 0 : i32
    %c0_i32_0 = arith.constant 0 : i32
    %c0_i32_1 = arith.constant 0 : i32
    return %c0_i32, %c0_i32_0 : i32, i32
  }
  func.func @transform_3(%arg0: i32) -> (i32, i32) {
    %c0_i32 = arith.constant 0 : i32
    %c0_i32_0 = arith.constant 0 : i32
    %c0_i32_1 = arith.constant 0 : i32
    return %c0_i32, %c0_i32_0 : i32, i32
  }
  func.func @transform_4(%arg0: i32) -> (i32, i32) {
    %c0_i32 = arith.constant 0 : i32
    %c0_i32_0 = arith.constant 0 : i32
    %c0_i32_1 = arith.constant 0 : i32
    return %c0_i32, %c0_i32_0 : i32, i32
  }
  func.func @transform_5(%arg0: i32) -> (i32, i32) {
    %c0_i32 = arith.constant 0 : i32
    %c0_i32_0 = arith.constant 0 : i32
    %c0_i32_1 = arith.constant 0 : i32
    return %c0_i32, %c0_i32_0 : i32, i32
  }
  func.func @transform_6(%arg0: i32) -> (i32, i32) {
    %c0_i32 = arith.constant 0 : i32
    %c0_i32_0 = arith.constant 0 : i32
    %c0_i32_1 = arith.constant 0 : i32
    return %c0_i32, %c0_i32_0 : i32, i32
  }
  func.func @transform_7(%arg0: i32) -> (i32, i32, i32, i32) {
    %c0_i32 = arith.constant 0 : i32
    %c0_i32_0 = arith.constant 0 : i32
    %c0_i32_1 = arith.constant 0 : i32
    %c0_i32_2 = arith.constant 0 : i32
    return %arg0, %c0_i32, %c0_i32_0, %c0_i32_1 : i32, i32, i32, i32
  }
}

</mosaic_0001>

<bundles_post_ra>
// kernel: basic_block.1
= control target key start
LH: loop header
LB: loop body
LE: loop exit
PB: predicated region body
PF: predicated region fallthrough
CT: control target
= control target key end

     0   :  { %12 = vsyncpa [#allocation6], 0  ;;  %s13876_s24 = smov 0   ;;  %s16941_s0 = inlined_call_operand.vmem [shape: bf16[2,16,16,128], index: 0, kind: input, shape index: {}]   ;;  %s16942_s1 = inlined_call_operand.vmem [shape: bf16[1152,128], index: 1, kind: input, shape index: {}]   ;;  %s16943_s2 = inlined_call_operand.vmem [shape: f32[1,128], index: 2, kind: input, shape index: {}]   ;;  %s16944_s3 = inlined_call_operand.hbm [shape: bf16[1152,128], index: 3, kind: input, shape index: {}]   ;;  %s16945_s4 = inlined_call_operand.vmem [shape: f32[1,128], index: 4, kind: input, shape index: {}]   ;;  %s16946_s5 = inlined_call_operand.vmem [shape: bf16[128,128], index: 5, kind: input, shape index: {}]   ;;  %s16947_s6 = inlined_call_operand.vmem [shape: f32[1,128], index: 6, kind: input, shape index: {}]   ;;  %s16948_s7 = inlined_call_operand.vmem [shape: f32[2,16,16,128], index: 7, kind: output, shape index: {}]  }
   0x1 LB: > { %s218_s27 = sshll.u32 %s16944_s3, 4  ;;  %s13885_s28 = sadd.s32 4294967295, %s13830_s24   ;;  %s13830_s24 = sphi %s13876_s24, %s18_s24   ;;  %s219_s27 = int_to_ptr.hbm [resolvable:$true] %s218_s27 }
   0x2   : > { %p11347_p0 = scmp.ge.s32.totalorder %s13830_s24, 1  ;;  %p201_p1 = scmp.lt.s32.totalorder %s13830_s24, 3 }
   0x3   : > { %p13768_p2 = scmp.eq.s32.totalorder %s13885_s28, 0  ;;  %s13832_s29 = smov [#allocation5]  }
   0x4   : > { %p202_p3 = pnand %p11347_p0, %p201_p1  ;;  %s220_s30 = sshll.u32 %s13832_s29, 4  ;;  %s221_s30 = int_to_ptr.vmem [resolvable:$true] %s220_s30 }
   0x5   : > { %s13833_s8 = smov 64   ;;  %s13834_s9 = smov 4  }
   0x6   : > { %p13764_p4 = pneg %p202_p3  ;;  %253 = sbr.rel (%p202_p3) target bundleno = 1672 (0x688), region = 48 }
   0x8   : > { %p13765_p5 = pnand %p13768_p2, %p13764_p4 }
   0xa   : > { %13767 = dma.hbm_to_vmem [thread:$0]  (!%p13765_p5), %s219_s27, 9216, %s221_s30, [#allocation6], %s13833_s8, %s13833_s8, %s13834_s9  }
   0xb   : > { %13825 = dma.done.wait (%p13768_p2), [#allocation6], 9216  }
   0xc   : > { %13827 = vsyncadd (%p13768_p2), [#allocation6], 4294958080  ;;  %v13835_v0 = vmov 0   ;;  %v13447_v1 = vld [vmem:[%s16942_s1 + $0x38] sm:$0xff]  ;;  %v13446_v4 = vld [vmem:[%s16942_s1 + $0x30] sm:$0xff]  ;;  %p286_p6 = scmp.lt.s32.totalorder %s13885_s28, 1 }
   0xd   : > { %329 = vst [vmem:[#allocation2] sm:$0xf] %v13835_v0  ;;  %v13902_v2 = vld [vmem:[%s16942_s1 + $0x78] sm:$0xff]  ;;  %4803 = vmatpush.bf16.msra.mxu0 %v13447_v1  ;;  %13736 = vmatpush.bf16.msra.mxu3 %v13447_v1  ;;  %v13920_v5 = vld [vmem:[%s16942_s1 + $0x70] sm:$0xff]  ;;  %v13445_v7 = vld [vmem:[%s16942_s1 + $0x28] sm:$0xff]  ;;  %vm707_vm3 = vcmask 1043456  }
   0xe   : > { %330 = vst [vmem:[#allocation2 + $0x4] sm:$0xf] %v13835_v0  ;;  %v13907_v3 = vld [vmem:[%s16942_s1 + $0xb8] sm:$0xff]  ;;  %4892 = vmatpush.bf16.msra.mxu1 %v13902_v2  ;;  %v13925_v6 = vld [vmem:[%s16942_s1 + $0xb0] sm:$0xff]  ;;  %v13939_v8 = vld [vmem:[%s16942_s1 + $0x68] sm:$0xff]  ;;  %s17159_s28 = smov (!%p286_p6, %s13885_s28), 1 }
   0xf   : > { %5889 = vst [vmem:[#allocation3] sm:$0xf] %v13835_v0  ;;  %4981 = vmatpush.bf16.msra.mxu2 %v13907_v3  ;;  %v13944_v9 = vld [vmem:[%s16942_s1 + $0xa8] sm:$0xff]  ;;  %v13444_v12 = vld [vmem:[%s16942_s1 + $0x20] sm:$0xff]  ;;  %v13443_v15 = vld [vmem:[%s16942_s1 + $0x18] sm:$0xff]  ;;  %s13278_s16 = sshll.u32 %s17159_s28, 7 }
  0x10   : > { %5890 = vst [vmem:[#allocation3 + $0x4] sm:$0xf] %v13835_v0  ;;  %v13955_v13 = vld [vmem:[%s16942_s1 + $0x60] sm:$0xff]  ;;  %v13970_v16 = vld [vmem:[%s16942_s1 + $0x58] sm:$0xff]  ;;  %v13442_v22 = vld [vmem:[%s16942_s1 + $0x10] sm:$0xff]  ;;  %s14094_s19 = scalar_lea.vmem %s16941_s0, %s13278_s16  ;;  %vm1483_vm6 = vcmask 1042432  }
  0x11   : > { %331 = vst [vmem:[#allocation2 + $0x8] sm:$0x1] %v13835_v0  ;;  %4804 = vmatpush.bf16.msra.mxu0 %v13446_v4  ;;  %13737 = vmatpush.bf16.msra.mxu3 %v13446_v4  ;;  %v13960_v14 = vld [vmem:[%s16942_s1 + $0xa0] sm:$0xff]  ;;  %v13975_v17 = vld [vmem:[%s16942_s1 + $0x98] sm:$0xff]  ;;  %v13450_v23 = vld [vmem:[%s16942_s1 + $0x50] sm:$0xff]  ;;  %vm1484_vm8 = vcmask 1046532  }
  0x12   : > { %332 = vst [vmem:[#allocation2 + $0xc] sm:$0xf] %v13835_v0  ;;  %4893 = vmatpush.bf16.msra.mxu1 %v13920_v5  ;;  %v13994_v24 = vld [vmem:[%s16942_s1 + $0x90] sm:$0xff]  ;;  %v13441_v25 = vld [vmem:[%s16942_s1 + $0x8] sm:$0xff]  ;;  %v13440_v28 = vld [vmem:[%s16942_s1] sm:$0xff]  ;;  %vm714_vm12 = vcmask 1040384  }
  0x13   : > { %333 = vst [vmem:[#allocation2 + $0x10] sm:$0xf] %v13835_v0  ;;  %4982 = vmatpush.bf16.msra.mxu2 %v13925_v6  ;;  %v13449_v26 = vld [vmem:[%s16942_s1 + $0x48] sm:$0xff]  ;;  %v13448_v29 = vld [vmem:[%s16942_s1 + $0x40] sm:$0xff]  ;;  %v14100_v32 = vld [vmem:[%s14094_s19 + $0x58] sm:$0xf] }
  0x14   : > { %334 = vst [vmem:[#allocation2 + $0x14] sm:$0x1] %v13835_v0  ;;  %v824_v10 = vld [vmem:[#allocation2] sm:$0xf]  ;;  %v14010_v27 = vld [vmem:[%s16942_s1 + $0x88] sm:$0xff]  ;;  %v574_v36 = vshrl.u32 %v14100_v32, 16  ;;  %vm14209_vm11 = vmor %vm1483_vm6, %vm1484_vm8 }
  0x15   : > { %335 = vst [vmem:[#allocation2 + $0x18] sm:$0xf] %v13835_v0  ;;  %v825_v11 = vld [vmem:[#allocation2 + $0x4] sm:$0xf]  ;;  %4805 = vmatpush.bf16.msra.mxu0 %v13445_v7  ;;  %13738 = vmatpush.bf16.msra.mxu3 %v13445_v7  ;;  %v888_v33 = vld [vmem:[#allocation2] sm:$0xf] }
  0x16   : > { %336 = vst [vmem:[#allocation2 + $0x1c] sm:$0xf] %v13835_v0  ;;  %4894 = vmatpush.bf16.msra.mxu1 %v13939_v8  ;;  %v6408_v18 = vld [vmem:[#allocation3] sm:$0xf]  ;;  %v14026_v30 = vld [vmem:[%s16942_s1 + $0x80] sm:$0xff]  ;;  %v940_v37 = vshrl.u32 %v888_v33, 16 }
  0x17   : > { %337 = vst [vmem:[#allocation2 + $0x20] sm:$0x1] %v13835_v0  ;;  %4983 = vmatpush.bf16.msra.mxu2 %v13944_v9  ;;  %v6409_v19 = vld [vmem:[#allocation3 + $0x4] sm:$0xf]  ;;  %v889_v34 = vld [vmem:[#allocation2 + $0x4] sm:$0xf] }
  0x18   : > { %338 = vst [vmem:[#allocation2 + $0x24] sm:$0xf] %v13835_v0  ;;  %v320_v35 = vld [vmem:[%s14094_s19 + $0x5c] sm:$0xf]  ;;  %v943_v38 = vshll.u32 %v888_v33, 16  ;;  %v949_v39 = vshll.u32 %v889_v34, 16 }
  0x19   : > { %339 = vst [vmem:[#allocation2 + $0x28] sm:$0xf] %v13835_v0  ;;  %4806 = vmatpush.bf16.msra.mxu0 %v13444_v12  ;;  %13739 = vmatpush.bf16.msra.mxu3 %v13444_v12  ;;  %v953_v40 = vshrl.u32 %v889_v34, 16  ;;  %v14111_v41 = vrot.slane %v574_v36, 7  ;;  %v582_v42 = vshrl.u32 %v320_v35, 16  ;;  %v942_v43 = vrot.slane %v940_v37, 4 }
  0x1a   : > { %340 = vst [vmem:[#allocation2 + $0x2c] sm:$0x1] %v13835_v0  ;;  %4895 = vmatpush.bf16.msra.mxu1 %v13955_v13  ;;  %vm383_vm0 = vsmask.f32 256  ;;  %v945_v44 = vrot.slane %v943_v38, 5  ;;  %v14114_v45 = vrot.slane %v949_v39, 5 }
  0x1b   : > { %856 = vst [vmem:[#allocation4] sm:$0xf] %v824_v10  ;;  %4984 = vmatpush.bf16.msra.mxu2 %v13960_v14  ;;  %v955_v46 = vrot.slane %v953_v40, 4  ;;  %vm384_vm1 = vsmask.f32 4368  ;;  %v577_v48 = vshll.u32 %v14100_v32, 16  ;;  %vm14289_vm13 = vmand %vm714_vm12, %vm383_vm0 }
  0x1c   : > { %857 = vst [vmem:[#allocation4 + $0x24] sm:$0xf] %v825_v11  ;;  %v890_v47 = vld [vmem:[#allocation2 + $0x8] sm:$0x1]  ;;  %v585_v49 = vshll.u32 %v320_v35, 16  ;;  %v580_v50 = vrot.slane %v14111_v41, 4  ;;  %v946_v53 = vor.u32 %v945_v44, %v942_v43  ;;  %vm14161_vm7 = vmor %vm383_vm0, %vm384_vm1 }
  0x1d   : > { %341 = vst [vmem:[#allocation2 + $0x30] sm:$0xf] %v13835_v0  ;;  %4807 = vmatpush.bf16.msra.mxu0 %v13443_v15  ;;  %13740 = vmatpush.bf16.msra.mxu3 %v13443_v15  ;;  %vm708_vm2 = vsmask.f32 7938  ;;  %v14122_v51 = vld [vmem:[%s14094_s19] sm:$0xf]  ;;  %v956_v54 = vor.u32 %v955_v46, %v14114_v45  ;;  %v579_v10 = vor.u32 %v577_v48, %v14111_v41 }
  0x1e   : > { %342 = vst [vmem:[#allocation2 + $0x34] sm:$0xf] %v13835_v0  ;;  %4896 = vmatpush.bf16.msra.mxu1 %v13970_v16  ;;  %v14125_v52 = vrot.slane %v582_v42, 7  ;;  %v959_v55 = vshll.u32 %v890_v47, 16  ;;  %v14128_v56 = vld [vmem:[#allocation2 + $0x4] sm:$0xf]  ;;  %vm14172_vm9 = vmand %vm707_vm3, %vm708_vm2 }
  0x1f   : > { %343 = vst [vmem:[#allocation2 + $0x38] sm:$0x1] %v13835_v0  ;;  %4985 = vmatpush.bf16.msra.mxu2 %v13975_v17  ;;  %vm936_vm4 = vsmask.f32 3328  ;;  %v14132_v57 = vld [vmem:[%s14094_s19 + $0x4] sm:$0xf] }
  0x20   : > { %344 = vst [vmem:[#allocation2 + $0x3c] sm:$0xf] %v13835_v0  ;;  %vm937_vm5 = vsmask.f32 7440  ;;  %v6472_v58 = vld [vmem:[#allocation3] sm:$0xf]  ;;  %v587_v11 = vor.u32 %v585_v49, %v14125_v52 }
  0x21   : > { %345 = vst [vmem:[#allocation2 + $0x40] sm:$0xf] %v13835_v0  ;;  %4808 = vmatpush.bf16.msra.mxu0 %v13442_v22  ;;  %13741 = vmatpush.bf16.msra.mxu3 %v13442_v22  ;;  %v14135_v59 = vld [vmem:[#allocation2] sm:$0xe]  ;;  %v6473_v60 = vld [vmem:[#allocation3 + $0x4] sm:$0xf]  ;;  %vm14183_vm10 = vmor %vm936_vm4, %vm937_vm5 }
  0x22   : > { %v11406_v20 = vld [vmem:[#allocation4] sm:$0xf]  ;;  %346 = vst [vmem:[#allocation2 + $0x44] sm:$0x1] %v13835_v0  ;;  %4897 = vmatpush.bf16.msra.mxu1 %v13450_v23  ;;  %v1488_v61 = vrot.slane %v14128_v56, 5  ;;  %v13479_v62 = vld [vmem:[%s16942_s1 + $0x138] sm:$0xff]  ;;  %v588_v38 = vsel %vm14161_vm7, %v580_v50, %v587_v11 }
  0x23   : > { %v13300_v21 = vld [vmem:[#allocation4 + $0x20] sm:$0xf0]  ;;  %6440 = vst [vmem:[#allocation4] sm:$0xf] %v6408_v18  ;;  %4986 = vmatpush.bf16.msra.mxu2 %v13994_v24  ;;  %v14143_v63 = vrot.slane %v946_v53, 4  ;;  %v14145_v1 = vrot.slane %v956_v54, 4 }
  0x24   : > { %6441 = vst [vmem:[#allocation4 + $0x24] sm:$0xf] %v6409_v19  ;;  %v11407_v31 = vor.u32 %v13300_v21, %v11406_v20  ;;  %v387_v4 = vshrl.u32 %v14122_v51, 16  ;;  %v6524_v7 = vshll.u32 %v6472_v58, 16  ;;  %v6534_v15 = vshrl.u32 %v6473_v60, 16  ;;  %s13279_s29 = sshll.u32 %s17159_s28, 8 }
  0x25   : > { %347 = vst [vmem:[#allocation2 + $0x48] sm:$0xf] %v13835_v0  ;;  %4809 = vmatpush.bf16.msra.mxu0 %v13441_v25  ;;  %13742 = vmatpush.bf16.msra.mxu3 %v13441_v25  ;;  %v14156_v18 = vld [vmem:[%s14094_s19 + $0x60] sm:$0xf]  ;;  %v11356_v20 = vrot.slane %v14135_v59, 9  ;;  %v1490_v21 = vrot.slane %v1488_v61, 4  ;;  %v952_v44 = vsel %vm14183_vm10, %v14143_v63, %v14114_v45  ;;  %s16753_s9 = scalar_lea.vmem %s16948_s7, %s13279_s29 }
  0x26   : > { %348 = vst [vmem:[#allocation2 + $0x4c] sm:$0xf] %v13835_v0  ;;  %4898 = vmatpush.bf16.msra.mxu1 %v13449_v26  ;;  %v390_v22 = vshll.u32 %v14122_v51, 16  ;;  %v389_v25 = vrot.slane %v387_v4, 7  ;;  %v6526_v32 = vrot.slane %v6524_v7, 5  ;;  %v591_v34 = vshrl.u32 %v14156_v18, 16 }
  0x27   : > { %349 = vst [vmem:[#allocation2 + $0x50] sm:$0x1] %v13835_v0  ;;  %4987 = vmatpush.bf16.msra.mxu2 %v14010_v27  ;;  %v6536_v37 = vrot.slane %v6534_v15, 4  ;;  %v710_v41 = vld [vmem:[#allocation2 + $0xc] sm:$0xf]  ;;  %v594_v42 = vshll.u32 %v14156_v18, 16 }
  0x28   : > { %350 = vst [vmem:[#allocation2 + $0x54] sm:$0xf] %v13835_v0  ;;  %v14200_v43 = vld [vmem:[%s14094_s19 + $0x8] sm:$0xf]  ;;  %v6969_v47 = vld [vmem:[#allocation3 + $0x4] sm:$0xf]  ;;  %v392_v48 = vor.u32 %v390_v22, %v389_v25 }
  0x29   : > { %351 = vst [vmem:[#allocation2 + $0x58] sm:$0xf] %v13835_v0  ;;  %4810 = vmatpush.bf16.msra.mxu0 %v13440_v28  ;;  %13743 = vmatpush.bf16.msra.mxu3 %v13440_v28  ;;  %v14178_v28 = vld [vmem:[%s14094_s19 + $0x64] sm:$0xf]  ;;  %v14220_v54 = vrot.slane %v591_v34, 7 }
  0x2a   : > { %352 = vst [vmem:[#allocation2 + $0x5c] sm:$0x1] %v13835_v0  ;;  %4899 = vmatpush.bf16.msra.mxu1 %v13448_v29  ;;  %v599_v49 = vshrl.u32 %v14178_v28, 16  ;;  %v602_v50 = vshll.u32 %v14178_v28, 16  ;;  %v6968_v63 = vld [vmem:[#allocation3] sm:$0xe]  ;;  %v711_v7 = vsel %vm14172_vm9, %v392_v48, %v710_v41 }
  0x2b   : > { %353 = vst [vmem:[#allocation2 + $0x60] sm:$0xf] %v13835_v0  ;;  %4988 = vmatpush.bf16.msra.mxu2 %v14026_v30  ;;  %v597_v11 = vrot.slane %v14220_v54, 4  ;;  %v14257_v34 = vld [vmem:[%s14094_s19 + $0x10] sm:$0xf] }
  0x2c   : > { %354 = vst [vmem:[#allocation2 + $0x64] sm:$0xf] %v13835_v0  ;;  %4811 = vmatmul.bf16.vlgmr.msra.gmra.mxu0 %v11407_v31 }
  0x2d   : > { %355 = vst [vmem:[#allocation2 + $0x68] sm:$0x1] %v13835_v0  ;;  %13744 = vmatpush.bf16.msrb.mxu3 %v13902_v2  ;;  %v14147_v2 = vrot.slane %v959_v55, 5  ;;  %5159 = vmatpush.bf16.msrb.mxu0 %v13479_v62  ;;  %v14223_v55 = vld [vmem:[%s14094_s19 + $0xc] sm:$0xf]  ;;  %v1489_v62 = vsel %vm14209_vm11, %v11356_v20, %v1488_v61 }
  0x2e   : > { %356 = vst [vmem:[#allocation2 + $0x6c] sm:$0xf] %v13835_v0  ;;  %v412_v56 = vshrl.u32 %v14223_v55, 16  ;;  %v14250_v20 = vld [vmem:[%s14094_s19 + $0x6c] sm:$0xf] }
  0x2f   : > { %357 = vst [vmem:[#allocation2 + $0x70] sm:$0xf] %v13835_v0  ;;  %v962_v45 = vsel %vm14183_vm10, %v14145_v1, %v14147_v2  ;;  %v7066_v1 = vrot.slane %v6969_v47, 5  ;;  %v421_v47 = vshrl.u32 %v14257_v34, 16 }
  0x30   : > { %358 = vst [vmem:[#allocation2 + $0x74] sm:$0x1] %v13835_v0 }
  0x31   : > { %359 = vst [vmem:[#allocation2 + $0x78] sm:$0xf] %v13835_v0  ;;  %13745 = vmatpush.bf16.msrb.mxu3 %v13920_v5  ;;  %v6521_v5 = vshrl.u32 %v6472_v58, 16  ;;  %v393_v58 = vrot.slane %v389_v25, 4  ;;  %v7068_v22 = vrot.slane %v7066_v1, 4 }
  0x32   : > { %360 = vst [vmem:[#allocation2 + $0x7c] sm:$0xf] %v13835_v0 }
  0x33   : > { %361 = vst [vmem:[#allocation2 + $0x80] sm:$0x1] %v13835_v0  ;;  %v6523_v31 = vrot.slane %v6521_v5, 4 }
  0x34   : > { %362 = vst [vmem:[#allocation2 + $0x84] sm:$0xf] %v13835_v0 }
  0x35   : > { %363 = vst [vmem:[#allocation2 + $0x88] sm:$0xf] %v13835_v0  ;;  %13746 = vmatpush.bf16.msrb.mxu3 %v13939_v8  ;;  %v395_v8 = vshrl.u32 %v14132_v57, 16  ;;  %v6527_v51 = vor.u32 %v6526_v32, %v6523_v31  ;;  %v14253_v31 = vrot.slane %v412_v56, 7  ;;  %v415_v32 = vshll.u32 %v14223_v55, 16 }
  0x36   : > { %364 = vst [vmem:[#allocation2 + $0x8c] sm:$0x1] %v13835_v0 }
  0x37   : > { %365 = vst [vmem:[#allocation2 + $0x90] sm:$0xf] %v13835_v0  ;;  %v14187_v33 = vrot.slane %v395_v8, 7  ;;  %v14240_v8 = vrot.slane %v599_v49, 7  ;;  %v596_v49 = vor.u32 %v594_v42, %v14220_v54  ;;  %v719_v42 = vld [vmem:[#allocation2 + $0x18] sm:$0xf] }
  0x38   : > { %366 = vst [vmem:[#allocation2 + $0x94] sm:$0xf] %v13835_v0 }
  0x39   : > { %367 = vst [vmem:[#allocation2 + $0x98] sm:$0x1] %v13835_v0  ;;  %13747 = vmatpush.bf16.msrb.mxu3 %v13955_v13  ;;  %v6530_v13 = vshll.u32 %v6473_v60, 16  ;;  %v404_v60 = vshrl.u32 %v14200_v43, 16  ;;  %v402_v2 = vrot.slane %v14187_v33, 4  ;;  %v604_v55 = vor.u32 %v602_v50, %v14240_v8 }
  0x3a   : > { %368 = vst [vmem:[#allocation2 + $0x9c] sm:$0xf] %v13835_v0 }
  0x3b   : > { %369 = vst [vmem:[#allocation2 + $0xa0] sm:$0xf] %v13835_v0  ;;  %v14191_v36 = vrot.slane %v6530_v13, 5 }
  0x3c   : > { %370 = vst [vmem:[#allocation2 + $0xa4] sm:$0x1] %v13835_v0 }
  0x3d   : > { %371 = vst [vmem:[#allocation2 + $0xa8] sm:$0xf] %v13835_v0  ;;  %13748 = vmatpush.bf16.msrb.mxu3 %v13970_v16  ;;  %v1389_v16 = vld [vmem:[#allocation2 + $0x8] sm:$0x1] }
  0x3e   : > { %372 = vst [vmem:[#allocation2 + $0xac] sm:$0xf] %v13835_v0  ;;  %v789_v12 = vld [vmem:[#allocation2 + $0x90] sm:$0xf]  ;;  %v1491_v40 = vrot.slane %v1389_v16, 5  ;;  %v14247_v16 = vrot.slane %v404_v60, 7 }
  0x3f   : > { %373 = vst [vmem:[#allocation2 + $0xb0] sm:$0x1] %v13835_v0  ;;  %v790_v39 = vsel %vm14172_vm9, %v579_v10, %v789_v12  ;;  %v6528_v10 = vrot.slane %v6527_v51, 4 }
  0x40   : > { %374 = vst [vmem:[#allocation2 + $0xb4] sm:$0xf] %v13835_v0  ;;  %v1492_v4 = vsel %vm14209_vm11, %v1490_v21, %v1491_v40  ;;  %v12364_v21 = vrot.slane %v6968_v63, 9 }
  0x41   : > { %375 = vst [vmem:[#allocation2 + $0xb8] sm:$0xf] %v13835_v0  ;;  %13749 = vmatpush.bf16.msrb.mxu3 %v13450_v23 }
  0x42   : > { %376 = vst [vmem:[#allocation2 + $0xbc] sm:$0x1] %v13835_v0 }
  0x43   : > { %377 = vst [vmem:[#allocation2 + $0xc0] sm:$0xf] %v13835_v0 }
  0x44   : > { %378 = vst [vmem:[#allocation2 + $0xc4] sm:$0xf] %v13835_v0 }
  0x45   : > { %379 = vst [vmem:[#allocation2 + $0xc8] sm:$0x1] %v13835_v0  ;;  %13750 = vmatpush.bf16.msrb.mxu3 %v13449_v26  ;;  %v398_v26 = vshll.u32 %v14132_v57, 16  ;;  %v6537_v57 = vor.u32 %v6536_v37, %v14191_v36  ;;  %v6533_v37 = vsel %vm14183_vm10, %v6528_v10, %v14191_v36  ;;  %v7067_v36 = vsel %vm14209_vm11, %v12364_v21, %v7066_v1 }
  0x46   : > { %380 = vst [vmem:[#allocation2 + $0xcc] sm:$0xf] %v13835_v0  ;;  %v417_v10 = vor.u32 %v415_v32, %v14253_v31 }
  0x47   : > { %381 = vst [vmem:[#allocation2 + $0xd0] sm:$0xf] %v13835_v0  ;;  %v400_v59 = vor.u32 %v398_v26, %v14187_v33  ;;  %v6538_v13 = vrot.slane %v6537_v57, 4  ;;  %v407_v26 = vshll.u32 %v14200_v43, 16  ;;  %v796_v43 = vld [vmem:[#allocation2 + $0x9c] sm:$0xf] }
  0x48   : > { %382 = vst [vmem:[#allocation2 + $0xd4] sm:$0x1] %v13835_v0  ;;  %v716_v57 = vld [vmem:[#allocation2 + $0x14] sm:$0x1] }
  0x49   : > { %5891 = vst [vmem:[#allocation3 + $0x8] sm:$0x1] %v13835_v0  ;;  %13751 = vmatpush.bf16.msrb.mxu3 %v13448_v29  ;;  %v401_v15 = vsel %vm14161_vm7, %v393_v58, %v400_v59  ;;  %v619_v59 = vshll.u32 %v14250_v20, 16  ;;  %v409_v50 = vor.u32 %v407_v26, %v14247_v16  ;;  %v717_v21 = vsel %vm14289_vm13, %v402_v2, %v716_v57 }
  0x4a   : > { %5892 = vst [vmem:[#allocation3 + $0xc] sm:$0xf] %v13835_v0  ;;  %v424_v57 = vshll.u32 %v14257_v34, 16 }
  0x4b   : > { %5893 = vst [vmem:[#allocation3 + $0x10] sm:$0xf] %v13835_v0 }
  0x4c   : > { %5894 = vst [vmem:[#allocation3 + $0x14] sm:$0x1] %v13835_v0 }
  0x4d   : > { %5895 = vst [vmem:[#allocation3 + $0x18] sm:$0xf] %v13835_v0 }
  0x4e   : > { %5896 = vst [vmem:[#allocation3 + $0x1c] sm:$0xf] %v13835_v0 }
  0x4f   : > { %5897 = vst [vmem:[#allocation3 + $0x20] sm:$0x1] %v13835_v0 }
  0x50   : > { %5898 = vst [vmem:[#allocation3 + $0x24] sm:$0xf] %v13835_v0  ;;  %v6474_v35 = vld [vmem:[#allocation3 + $0x8] sm:$0x1] }
  0x51   : > { %5899 = vst [vmem:[#allocation3 + $0x28] sm:$0xf] %v13835_v0  ;;  %v6540_v53 = vshll.u32 %v6474_v35, 16  ;;  %v6970_v5 = vld [vmem:[#allocation3 + $0x8] sm:$0x1] }
  0x52   : > { %5900 = vst [vmem:[#allocation3 + $0x2c] sm:$0x1] %v13835_v0  ;;  %v7069_v25 = vrot.slane %v6970_v5, 5 }
  0x53   : > { %5901 = vst [vmem:[#allocation3 + $0x30] sm:$0xf] %v13835_v0  ;;  %v6542_v61 = vrot.slane %v6540_v53, 5 }
  0x54   : > { %5902 = vst [vmem:[#allocation3 + $0x34] sm:$0xf] %v13835_v0  ;;  %v7070_v53 = vsel %vm14209_vm11, %v7068_v22, %v7069_v25 }
  0x55   : > { %5903 = vst [vmem:[#allocation3 + $0x38] sm:$0x1] %v13835_v0  ;;  %v6543_v41 = vsel %vm14183_vm10, %v6538_v13, %v6542_v61  ;;  %v803_v61 = vld [vmem:[#allocation2 + $0xa8] sm:$0xf]  ;;  %v605_v13 = vsel %vm14161_vm7, %v597_v11, %v604_v55  ;;  %v720_v11 = vsel %vm14172_vm9, %v409_v50, %v719_v42 }
  0x56   : > { %5904 = vst [vmem:[#allocation3 + $0x3c] sm:$0xf] %v13835_v0 }
  0x57   : > { %5905 = vst [vmem:[#allocation3 + $0x40] sm:$0xf] %v13835_v0 }
  0x58   : > { %5906 = vst [vmem:[#allocation3 + $0x44] sm:$0x1] %v13835_v0 }
  0x59   : > { %5907 = vst [vmem:[#allocation3 + $0x48] sm:$0xf] %v13835_v0 }
  0x5a   : > { %5908 = vst [vmem:[#allocation3 + $0x4c] sm:$0xf] %v13835_v0 }
  0x5b   : > { %5909 = vst [vmem:[#allocation3 + $0x50] sm:$0x1] %v13835_v0 }
  0x5c   : > { %5910 = vst [vmem:[#allocation3 + $0x54] sm:$0xf] %v13835_v0 }
  0x5d   : > { %5911 = vst [vmem:[#allocation3 + $0x58] sm:$0xf] %v13835_v0 }
  0x5e   : > { %5912 = vst [vmem:[#allocation3 + $0x5c] sm:$0x1] %v13835_v0 }
  0x5f   : > { %5913 = vst [vmem:[#allocation3 + $0x60] sm:$0xf] %v13835_v0 }
  0x60   : > { %5914 = vst [vmem:[#allocation3 + $0x64] sm:$0xf] %v13835_v0 }
  0x61   : > { %5915 = vst [vmem:[#allocation3 + $0x68] sm:$0x1] %v13835_v0 }
  0x62   : > { %5916 = vst [vmem:[#allocation3 + $0x6c] sm:$0xf] %v13835_v0 }
  0x63   : > { %5917 = vst [vmem:[#allocation3 + $0x70] sm:$0xf] %v13835_v0 }
  0x64   : > { %5918 = vst [vmem:[#allocation3 + $0x74] sm:$0x1] %v13835_v0 }
  0x65   : > { %5919 = vst [vmem:[#allocation3 + $0x78] sm:$0xf] %v13835_v0 }
  0x66   : > { %5920 = vst [vmem:[#allocation3 + $0x7c] sm:$0xf] %v13835_v0 }
  0x67   : > { %5921 = vst [vmem:[#allocation3 + $0x80] sm:$0x1] %v13835_v0 }
  0x68   : > { %5922 = vst [vmem:[#allocation3 + $0x84] sm:$0xf] %v13835_v0 }
  0x69   : > { %5923 = vst [vmem:[#allocation3 + $0x88] sm:$0xf] %v13835_v0 }
  0x6a   : > { %5924 = vst [vmem:[#allocation3 + $0x8c] sm:$0x1] %v13835_v0 }
  0x6b   : > { %5925 = vst [vmem:[#allocation3 + $0x90] sm:$0xf] %v13835_v0 }
  0x6c   : > { %5926 = vst [vmem:[#allocation3 + $0x94] sm:$0xf] %v13835_v0 }
  0x6d   : > { %5927 = vst [vmem:[#allocation3 + $0x98] sm:$0x1] %v13835_v0 }
  0x6e   : > { %5928 = vst [vmem:[#allocation3 + $0x9c] sm:$0xf] %v13835_v0 }
  0x6f   : > { %5929 = vst [vmem:[#allocation3 + $0xa0] sm:$0xf] %v13835_v0 }
  0x70   : > { %5930 = vst [vmem:[#allocation3 + $0xa4] sm:$0x1] %v13835_v0 }
  0x71   : > { %5931 = vst [vmem:[#allocation3 + $0xa8] sm:$0xf] %v13835_v0 }
  0x72   : > { %5932 = vst [vmem:[#allocation3 + $0xac] sm:$0xf] %v13835_v0 }
  0x73   : > { %5933 = vst [vmem:[#allocation3 + $0xb0] sm:$0x1] %v13835_v0 }
  0x74   : > { %5934 = vst [vmem:[#allocation3 + $0xb4] sm:$0xf] %v13835_v0 }
  0x75   : > { %5935 = vst [vmem:[#allocation3 + $0xb8] sm:$0xf] %v13835_v0 }
  0x76   : > { %5936 = vst [vmem:[#allocation3 + $0xbc] sm:$0x1] %v13835_v0 }
  0x77   : > { %5937 = vst [vmem:[#allocation3 + $0xc0] sm:$0xf] %v13835_v0 }
  0x78   : > { %5938 = vst [vmem:[#allocation3 + $0xc4] sm:$0xf] %v13835_v0 }
  0x79   : > { %5939 = vst [vmem:[#allocation3 + $0xc8] sm:$0x1] %v13835_v0 }
  0x7a   : > { %5940 = vst [vmem:[#allocation3 + $0xcc] sm:$0xf] %v13835_v0 }
  0x7b   : > { %5941 = vst [vmem:[#allocation3 + $0xd0] sm:$0xf] %v13835_v0 }
  0x7c   : > { %5942 = vst [vmem:[#allocation3 + $0xd4] sm:$0x1] %v13835_v0  ;;  %v14229_v0 = vld [vmem:[%s14094_s19 + $0x68] sm:$0xf] }
  0x7d   : > { %791 = vst [vmem:[#allocation2 + $0x90] sm:$0xf] %v790_v39  ;;  %v608_v12 = vshrl.u32 %v14229_v0, 16  ;;  %v616_v39 = vshrl.u32 %v14250_v20, 16  ;;  %v611_v58 = vshll.u32 %v14229_v0, 16  ;;  %v14294_v0 = vrot.slane %v421_v47, 7 }
  0x7e   : > { %792 = vst [vmem:[#allocation2 + $0x94] sm:$0xf] %v588_v38 }
  0x7f   : > { %1355 = vst [vmem:[#allocation4 + $0x4] sm:$0xf] %v952_v44  ;;  %v14262_v38 = vrot.slane %v608_v12, 7  ;;  %v410_v44 = vrot.slane %v14247_v16, 4  ;;  %v427_v42 = vrot.slane %v14294_v0, 4 }
  0x80   : > { %1356 = vst [vmem:[#allocation4 + $0x28] sm:$0xf] %v962_v45  ;;  %v14275_v45 = vld [vmem:[%s14094_s19 + $0x14] sm:$0xf] }
  0x81   : > { %1630 = vst [vmem:[#allocation4 + $0x8] sm:$0xf] %v1489_v62  ;;  %v614_v54 = vrot.slane %v14262_v38, 4  ;;  %v14285_v62 = vrot.slane %v616_v39, 7  ;;  %v429_v1 = vshrl.u32 %v14275_v45, 16  ;;  %v613_v16 = vor.u32 %v611_v58, %v14262_v38 }
  0x82   : > { %1631 = vst [vmem:[#allocation4 + $0x2c] sm:$0xf] %v1492_v4  ;;  %v418_v33 = vsel %vm14161_vm7, %v410_v44, %v417_v10 }
  0x83   : > { %712 = vst [vmem:[#allocation2 + $0xc] sm:$0xf] %v711_v7  ;;  %v797_v7 = vsel %vm14172_vm9, %v596_v49, %v796_v43  ;;  %v14318_v58 = vrot.slane %v429_v1, 7 }
  0x84   : > { %v848_v35 = vld [vmem:[#allocation2 + $0x90] sm:$0xf]  ;;  %713 = vst [vmem:[#allocation2 + $0x10] sm:$0xf] %v401_v15 }
  0x85   : > { %v849_v40 = vld [vmem:[#allocation2 + $0x94] sm:$0xf]  ;;  %880 = vst [vmem:[#allocation4 + $0x360] sm:$0xf] %v848_v35  ;;  %v436_v34 = vrot.slane %v14318_v58, 4 }
  0x86   : > { %881 = vst [vmem:[#allocation4 + $0x384] sm:$0xf] %v849_v40  ;;  %v13296_v48 = vld [vmem:[#allocation4 + $0x4] sm:$0xf] }
  0x87   : > { %v11408_v51 = vld [vmem:[#allocation4 + $0x24] sm:$0xf0]  ;;  %6936 = vst [vmem:[#allocation4 + $0x4] sm:$0xf] %v6533_v37  ;;  %v621_v37 = vor.u32 %v619_v59, %v14285_v62  ;;  %v14321_v59 = vld [vmem:[%s14094_s19 + $0x70] sm:$0xf] }
  0x88   : > { %v11411_v60 = vor.u32 %v13296_v48, %v11408_v51  ;;  %6937 = vst [vmem:[#allocation4 + $0x28] sm:$0xf] %v6543_v41  ;;  %v11414_v18 = vld [vmem:[#allocation4 + $0x8] sm:$0xf]  ;;  %v804_v48 = vsel %vm14172_vm9, %v613_v16, %v803_v61  ;;  %v625_v10 = vshrl.u32 %v14321_v59, 16  ;;  %v628_v61 = vshll.u32 %v14321_v59, 16 }
  0x89   : > { %v13301_v28 = vld [vmem:[#allocation4 + $0x28] sm:$0xf0]  ;;  %7208 = vst [vmem:[#allocation4 + $0x8] sm:$0xf] %v7067_v36  ;;  %v622_v44 = vsel %vm14161_vm7, %v614_v54, %v621_v37  ;;  %v432_v54 = vshll.u32 %v14275_v45, 16 }
  0x8a   : > { %4900 = vmatmul.bf16.vlgmr.msra.gmra.mxu1 %v11411_v60  ;;  %v11415_v4 = vor.u32 %v13301_v28, %v11414_v18  ;;  %7209 = vst [vmem:[#allocation4 + $0x2c] sm:$0xf] %v7070_v53  ;;  %v826_v5 = vld [vmem:[#allocation2 + $0xc] sm:$0xf]  ;;  %v419_v53 = vrot.slane %v14253_v31, 4 }
  0x8b   : > { %v891_v56 = vld [vmem:[#allocation2 + $0xc] sm:$0xf]  ;;  %v827_v12 = vld [vmem:[#allocation2 + $0x10] sm:$0xf]  ;;  %858 = vst [vmem:[#allocation4 + $0x48] sm:$0xf] %v826_v5 }
  0x8c   : > { %v892_v15 = vld [vmem:[#allocation2 + $0x10] sm:$0xf]  ;;  %4989 = vmatmul.bf16.vlgmr.msra.gmra.mxu2 %v11415_v4  ;;  %859 = vst [vmem:[#allocation4 + $0x6c] sm:$0xf] %v827_v12  ;;  %v964_v22 = vshrl.u32 %v891_v56, 16  ;;  %v967_v25 = vshll.u32 %v891_v56, 16 }
  0x8d   : > { %v11838_v20 = vld [vmem:[#allocation4 + $0x360] sm:$0xf]  ;;  %v13408_v26 = vld [vmem:[#allocation4 + $0x380] sm:$0xf0]  ;;  %798 = vst [vmem:[#allocation2 + $0x9c] sm:$0xf] %v797_v7 }
  0x8e   : > { %v973_v32 = vshll.u32 %v892_v15, 16  ;;  %v977_v35 = vshrl.u32 %v892_v15, 16  ;;  %v11839_v38 = vor.u32 %v13408_v26, %v11838_v20  ;;  %799 = vst [vmem:[#allocation2 + $0xa0] sm:$0xf] %v605_v13  ;;  %v966_v39 = vrot.slane %v964_v22, 4 }
  0x8f   : > { %v969_v40 = vrot.slane %v967_v25, 5  ;;  %v1390_v41 = vld [vmem:[#allocation2 + $0xc] sm:$0xe]  ;;  %718 = vst [vmem:[#allocation2 + $0x14] sm:$0x1] %v717_v21 }
  0x90   : > { %v975_v2 = vrot.slane %v973_v32, 5  ;;  %v979_v43 = vrot.slane %v977_v35, 4  ;;  %v1391_v47 = vld [vmem:[#allocation2 + $0x10] sm:$0xf]  ;;  %4871 = vmatmul.bf16.vlgmr.msra.gmra.mxu3 %v11839_v38  ;;  %v11357_v49 = vrot.slane %v1390_v41, 9  ;;  %v434_v38 = vor.u32 %v432_v54, %v14318_v58 }
  0x91   : > { %v970_v36 = vor.u32 %v969_v40, %v966_v39  ;;  %v1495_v51 = vrot.slane %v1391_v47, 5  ;;  %721 = vst [vmem:[#allocation2 + $0x18] sm:$0xf] %v720_v11  ;;  %13752 = vmatpush.bf16.msra.mxu3 %v13907_v3  ;;  %v14332_v56 = vld [vmem:[%s14094_s19 + $0x74] sm:$0xf]  ;;  %v426_v11 = vor.u32 %v424_v57, %v14294_v0  ;;  %v14342_v39 = vrot.slane %v625_v10, 7 }
  0x92   : > { %v980_v55 = vor.u32 %v979_v43, %v975_v2  ;;  %722 = vst [vmem:[#allocation2 + $0x1c] sm:$0xf] %v418_v33  ;;  %v11442_v60 = vld [vmem:[#allocation4 + $0x48] sm:$0xf]  ;;  %v723_v13 = vld [vmem:[#allocation2 + $0x20] sm:$0x1] }
  0x93   : > { %v971_v18 = vrot.slane %v970_v36, 4  ;;  %v1496_v31 = vsel %vm14209_vm11, %v11357_v49, %v1495_v51  ;;  %805 = vst [vmem:[#allocation2 + $0xa8] sm:$0xf] %v804_v48  ;;  %v13309_v28 = vld [vmem:[#allocation4 + $0x68] sm:$0xf0]  ;;  %v1497_v5 = vrot.slane %v1495_v51, 4 }
  0x94   : > { %1632 = vst [vmem:[#allocation4 + $0x50] sm:$0xf] %v1496_v31  ;;  %v11443_v50 = vor.u32 %v13309_v28, %v11442_v60  ;;  %v850_v1 = vld [vmem:[#allocation2 + $0x9c] sm:$0xf]  ;;  %v981_v4 = vrot.slane %v980_v55, 4  ;;  %v633_v40 = vshrl.u32 %v14332_v56, 16 }
  0x95   : > { %v976_v3 = vsel %vm14183_vm10, %v971_v18, %v975_v2  ;;  %806 = vst [vmem:[#allocation2 + $0xac] sm:$0xf] %v622_v44  ;;  %v851_v7 = vld [vmem:[#allocation2 + $0xa0] sm:$0xf]  ;;  %13753 = vmatpush.bf16.msra.mxu3 %v13925_v6  ;;  %v726_v25 = vld [vmem:[#allocation2 + $0x24] sm:$0xf]  ;;  %v724_v2 = vsel %vm14289_vm13, %v419_v53, %v723_v13  ;;  %v435_v18 = vsel %vm14161_vm7, %v427_v42, %v434_v38 }
  0x96   : > { %882 = vst [vmem:[#allocation4 + $0x3a8] sm:$0xf] %v850_v1  ;;  %4816 = vmatmul.bf16.gmra.mxu0 %v11443_v50  ;;  %v893_v45 = vld [vmem:[#allocation2 + $0x14] sm:$0x1]  ;;  %v727_v44 = vsel %vm14172_vm9, %v426_v11, %v726_v25  ;;  %v636_v0 = vshll.u32 %v14332_v56, 16 }
  0x97   : > { %883 = vst [vmem:[#allocation4 + $0x3cc] sm:$0xf] %v851_v7  ;;  %v1392_v12 = vld [vmem:[#allocation2 + $0x14] sm:$0x1]  ;;  %v983_v15 = vshll.u32 %v893_v45, 16 }
  0x98   : > { %1357 = vst [vmem:[#allocation4 + $0x4c] sm:$0xf] %v976_v3  ;;  %v1498_v16 = vrot.slane %v1392_v12, 5  ;;  %v828_v20 = vld [vmem:[#allocation2 + $0x18] sm:$0xf]  ;;  %v13478_v55 = vld [vmem:[%s16942_s1 + $0x130] sm:$0xff]  ;;  %v630_v3 = vor.u32 %v628_v61, %v14342_v39 }
  0x99   : > { %v829_v21 = vld [vmem:[#allocation2 + $0x1c] sm:$0xf]  ;;  %860 = vst [vmem:[#allocation4 + $0x90] sm:$0xf] %v828_v20  ;;  %v894_v22 = vld [vmem:[#allocation2 + $0x18] sm:$0xf]  ;;  %13754 = vmatpush.bf16.msra.mxu3 %v13944_v9  ;;  %5160 = vmatpush.bf16.msrb.mxu0 %v13478_v55 }
  0x9a   : > { %v985_v26 = vrot.slane %v983_v15, 5  ;;  %v1499_v32 = vsel %vm14209_vm11, %v1497_v5, %v1498_v16  ;;  %861 = vst [vmem:[#allocation4 + $0xb4] sm:$0xf] %v829_v21  ;;  %v852_v35 = vld [vmem:[#allocation2 + $0xa8] sm:$0xf]  ;;  %v988_v6 = vshrl.u32 %v894_v22, 16 }
  0x9b   : > { %1633 = vst [vmem:[#allocation4 + $0x74] sm:$0xf] %v1499_v32  ;;  %v895_v37 = vld [vmem:[#allocation2 + $0x1c] sm:$0xf]  ;;  %v991_v47 = vshll.u32 %v894_v22, 16  ;;  %v14366_v20 = vrot.slane %v633_v40, 7 }
  0x9c   : > { %v986_v41 = vsel %vm14183_vm10, %v981_v4, %v985_v26  ;;  %v853_v33 = vld [vmem:[#allocation2 + $0xac] sm:$0xf]  ;;  %884 = vst [vmem:[#allocation4 + $0x3f0] sm:$0xf] %v852_v35  ;;  %v990_v43 = vrot.slane %v988_v6, 4  ;;  %v997_v9 = vshll.u32 %v895_v37, 16 }
  0x9d   : > { %v11874_v48 = vld [vmem:[#allocation4 + $0x3a8] sm:$0xf]  ;;  %1358 = vst [vmem:[#allocation4 + $0x70] sm:$0xf] %v986_v41  ;;  %v1001_v36 = vshrl.u32 %v895_v37, 16  ;;  %v993_v51 = vrot.slane %v991_v47, 5  ;;  %13755 = vmatpush.bf16.msra.mxu3 %v13960_v14  ;;  %v638_v35 = vor.u32 %v636_v0, %v14366_v20 }
  0x9e   : > { %v13417_v49 = vld [vmem:[#allocation4 + $0x3c8] sm:$0xf0]  ;;  %885 = vst [vmem:[#allocation4 + $0x414] sm:$0xf] %v853_v33  ;;  %v11450_v53 = vld [vmem:[#allocation4 + $0x50] sm:$0xf] }
  0x9f   : > { %v11875_v57 = vor.u32 %v13417_v49, %v11874_v48  ;;  %725 = vst [vmem:[#allocation2 + $0x20] sm:$0x1] %v724_v2  ;;  %v999_v59 = vrot.slane %v997_v9, 5  ;;  %v1003_v60 = vrot.slane %v1001_v36, 4  ;;  %v13305_v31 = vld [vmem:[#allocation4 + $0x4c] sm:$0xf]  ;;  %v994_v54 = vor.u32 %v993_v51, %v990_v43 }
  0xa0   : > { %v11478_v28 = vld [vmem:[#allocation4 + $0x90] sm:$0xf]  ;;  %v1393_v50 = vld [vmem:[#allocation2 + $0x18] sm:$0xe]  ;;  %v1394_v1 = vld [vmem:[#allocation2 + $0x1c] sm:$0xf] }
  0xa1   : > { %4876 = vmatmul.bf16.gmra.mxu3 %v11875_v57  ;;  %v13318_v14 = vld [vmem:[#allocation4 + $0xb0] sm:$0xf0]  ;;  %v11358_v4 = vrot.slane %v1393_v50, 9  ;;  %v1502_v5 = vrot.slane %v1394_v1, 5  ;;  %728 = vst [vmem:[#allocation2 + $0x24] sm:$0xf] %v727_v44  ;;  %v1004_v12 = vor.u32 %v1003_v60, %v999_v59 }
  0xa2   : > { %v13310_v7 = vld [vmem:[#allocation4 + $0x70] sm:$0xf0]  ;;  %v995_v10 = vrot.slane %v994_v54, 4  ;;  %729 = vst [vmem:[#allocation2 + $0x28] sm:$0xf] %v435_v18  ;;  %13756 = vmatpush.bf16.msra.mxu3 %v13975_v17  ;;  %v11479_v45 = vor.u32 %v13318_v14, %v11478_v28  ;;  %v631_v32 = vrot.slane %v14342_v39, 4 }
  0xa3   : > { %v11451_v42 = vor.u32 %v13310_v7, %v11450_v53  ;;  %v1503_v13 = vsel %vm14209_vm11, %v11358_v4, %v1502_v5  ;;  %v810_v15 = vld [vmem:[#allocation2 + $0xb4] sm:$0xf]  ;;  %v1504_v17 = vrot.slane %v1502_v5, 4  ;;  %v730_v22 = vld [vmem:[#allocation2 + $0x2c] sm:$0x1]  ;;  %v1005_v11 = vrot.slane %v1004_v12, 4 }
  0xa4   : > { %v11444_v61 = vld [vmem:[#allocation4 + $0x6c] sm:$0xf0]  ;;  %v1000_v16 = vsel %vm14183_vm10, %v995_v10, %v999_v59  ;;  %1634 = vst [vmem:[#allocation4 + $0x98] sm:$0xf] %v1503_v13  ;;  %v811_v21 = vsel %vm14172_vm9, %v630_v3, %v810_v15  ;;  %v731_v6 = vsel %vm14289_vm13, %v436_v34, %v730_v22  ;;  %v13477_v40 = vld [vmem:[%s16942_s1 + $0x128] sm:$0xff]  ;;  %v639_v47 = vsel %vm14161_vm7, %v631_v32, %v638_v35 }
  0xa5   : > { %v11447_v56 = vor.u32 %v13305_v31, %v11444_v61  ;;  %4994 = vmatmul.bf16.gmra.mxu2 %v11451_v42  ;;  %1359 = vst [vmem:[#allocation4 + $0x94] sm:$0xf] %v1000_v16  ;;  %v11910_v39 = vld [vmem:[#allocation4 + $0x3f0] sm:$0xf]  ;;  %v13426_v41 = vld [vmem:[#allocation4 + $0x410] sm:$0xf0]  ;;  %5161 = vmatpush.bf16.msrb.mxu0 %v13477_v40 }
  0xa6   : > { %v896_v25 = vld [vmem:[#allocation2 + $0x20] sm:$0x1]  ;;  %13757 = vmatpush.bf16.msra.mxu3 %v13994_v24  ;;  %4821 = vmatmul.bf16.gmra.mxu0 %v11479_v45  ;;  %812 = vst [vmem:[#allocation2 + $0xb4] sm:$0xf] %v811_v21  ;;  %v11911_v57 = vor.u32 %v13426_v41, %v11910_v39  ;;  %v303_v45 = vld [vmem:[%s14094_s19 + $0x18] sm:$0xf] }
  0xa7   : > { %v1395_v26 = vld [vmem:[#allocation2 + $0x20] sm:$0x1]  ;;  %4905 = vmatmul.bf16.gmra.mxu1 %v11447_v56  ;;  %v1007_v37 = vshll.u32 %v896_v25, 16  ;;  %732 = vst [vmem:[#allocation2 + $0x2c] sm:$0x1] %v731_v6  ;;  %v438_v25 = vshrl.u32 %v303_v45, 16 }
  0xa8   : > { %v1505_v38 = vrot.slane %v1395_v26, 5  ;;  %v830_v33 = vld [vmem:[#allocation2 + $0x24] sm:$0xf]  ;;  %813 = vst [vmem:[#allocation2 + $0xb8] sm:$0xf] %v639_v47  ;;  %v441_v6 = vshll.u32 %v303_v45, 16 }
  0xa9   : > { %v897_v58 = vld [vmem:[#allocation2 + $0x24] sm:$0xf]  ;;  %v1009_v2 = vrot.slane %v1007_v37, 5  ;;  %v831_v24 = vld [vmem:[#allocation2 + $0x28] sm:$0xf]  ;;  %v589_v37 = vrot.slane %v14125_v52, 4 }
  0xaa   : > { %v1506_v34 = vsel %vm14209_vm11, %v1504_v17, %v1505_v38  ;;  %862 = vst [vmem:[#allocation4 + $0xd8] sm:$0xf] %v830_v33  ;;  %v1012_v43 = vshrl.u32 %v897_v58, 16  ;;  %v898_v48 = vld [vmem:[#allocation2 + $0x28] sm:$0xf]  ;;  %v1015_v9 = vshll.u32 %v897_v58, 16  ;;  %13758 = vmatpush.bf16.msra.mxu3 %v14010_v27 }
  0xab   : > { %1635 = vst [vmem:[#allocation4 + $0xbc] sm:$0xf] %v1506_v34  ;;  %v1010_v36 = vsel %vm14183_vm10, %v1005_v11, %v1009_v2  ;;  %v1021_v51 = vshll.u32 %v898_v48, 16  ;;  %v1025_v44 = vshrl.u32 %v898_v48, 16  ;;  %v11486_v53 = vld [vmem:[#allocation4 + $0x98] sm:$0xf] }
  0xac   : > { %863 = vst [vmem:[#allocation4 + $0xfc] sm:$0xf] %v831_v24  ;;  %v1014_v49 = vrot.slane %v1012_v43, 4  ;;  %v1017_v55 = vrot.slane %v1015_v9, 5  ;;  %v1396_v60 = vld [vmem:[#allocation2 + $0x24] sm:$0xe] }
  0xad   : > { %1360 = vst [vmem:[#allocation4 + $0xb8] sm:$0xf] %v1010_v36  ;;  %v1023_v59 = vrot.slane %v1021_v51, 5  ;;  %v854_v18 = vld [vmem:[#allocation2 + $0xb4] sm:$0xf]  ;;  %v1027_v28 = vrot.slane %v1025_v44, 4 }
  0xae   : > { %v1018_v31 = vor.u32 %v1017_v55, %v1014_v49  ;;  %v1397_v54 = vld [vmem:[#allocation2 + $0x28] sm:$0xf]  ;;  %v11359_v27 = vrot.slane %v1396_v60, 9  ;;  %13759 = vmatpush.bf16.msra.mxu3 %v14026_v30  ;;  %v13314_v50 = vld [vmem:[#allocation4 + $0x94] sm:$0xf]  ;;  %v440_v40 = vrot.slane %v438_v25, 7 }
  0xaf   : > { %886 = vst [vmem:[#allocation4 + $0x438] sm:$0xf] %v854_v18  ;;  %v899_v1 = vld [vmem:[#allocation2 + $0x2c] sm:$0x1]  ;;  %v1028_v5 = vor.u32 %v1027_v28, %v1023_v59  ;;  %v1509_v10 = vrot.slane %v1397_v54, 5 }
  0xb0   : > { %v1398_v3 = vld [vmem:[#allocation2 + $0x2c] sm:$0x1]  ;;  %v1019_v4 = vrot.slane %v1018_v31, 4  ;;  %v1031_v7 = vshll.u32 %v899_v1, 16  ;;  %v304_v16 = vld [vmem:[%s14094_s19 + $0x1c] sm:$0xf]  ;;  %v443_v58 = vor.u32 %v441_v6, %v440_v40 }
  0xb1   : > { %v11514_v14 = vld [vmem:[#allocation4 + $0xd8] sm:$0xf]  ;;  %4881 = vmatmul.bf16.gmra.mxu3 %v11911_v57  ;;  %v1512_v42 = vrot.slane %v1398_v3, 5  ;;  %v1029_v30 = vrot.slane %v1028_v5, 4  ;;  %v1510_v17 = vsel %vm14209_vm11, %v11359_v27, %v1509_v10  ;;  %v1511_v22 = vrot.slane %v1509_v10, 4 }
  0xb2   : > { %v13319_v0 = vld [vmem:[#allocation4 + $0xb8] sm:$0xf0]  ;;  %v1024_v15 = vsel %vm14183_vm10, %v1019_v4, %v1023_v59  ;;  %v1033_v61 = vrot.slane %v1031_v7, 5  ;;  %v855_v32 = vld [vmem:[#allocation2 + $0xb8] sm:$0xf]  ;;  %v446_v11 = vshrl.u32 %v304_v16, 16 }
  0xb3   : > { %v11487_v12 = vor.u32 %v13319_v0, %v11486_v53  ;;  %v13327_v13 = vld [vmem:[#allocation4 + $0xf8] sm:$0xf0]  ;;  %1361 = vst [vmem:[#allocation4 + $0xdc] sm:$0xf] %v1024_v15  ;;  %v1513_v38 = vsel %vm14209_vm11, %v1511_v22, %v1512_v42  ;;  %v449_v39 = vshll.u32 %v304_v16, 16  ;;  %v444_v2 = vrot.slane %v440_v40, 4 }
  0xb4   : > { %v11480_v21 = vld [vmem:[#allocation4 + $0xb4] sm:$0xf0]  ;;  %v11515_v56 = vor.u32 %v13327_v13, %v11514_v14  ;;  %v1034_v35 = vsel %vm14183_vm10, %v1029_v30, %v1033_v61  ;;  %1636 = vst [vmem:[#allocation4 + $0xe0] sm:$0xf] %v1510_v17  ;;  %v448_v41 = vrot.slane %v446_v11, 7  ;;  %v606_v14 = vrot.slane %v14240_v8, 4 }
  0xb5   : > { %v11483_v26 = vor.u32 %v13314_v50, %v11480_v21  ;;  %4999 = vmatmul.bf16.gmra.mxu2 %v11487_v12  ;;  %887 = vst [vmem:[#allocation4 + $0x45c] sm:$0xf] %v855_v32  ;;  %v733_v33 = vld [vmem:[#allocation2 + $0x30] sm:$0xf]  ;;  %v737_v34 = vld [vmem:[#allocation2 + $0x38] sm:$0x1] }
  0xb6   : > { %1362 = vst [vmem:[#allocation4 + $0x100] sm:$0xf] %v1034_v35  ;;  %4826 = vmatmul.bf16.gmra.mxu0 %v11515_v56  ;;  %v451_v24 = vor.u32 %v449_v39, %v448_v41  ;;  %v453_v43 = vrot.slane %v448_v41, 4  ;;  %v793_v47 = vld [vmem:[#allocation2 + $0x98] sm:$0x1]  ;;  %v734_v48 = vsel %vm14172_vm9, %v443_v58, %v733_v33 }
  0xb7   : > { %4910 = vmatmul.bf16.gmra.mxu1 %v11483_v26  ;;  %1637 = vst [vmem:[#allocation4 + $0x104] sm:$0xf] %v1513_v38  ;;  %v924_v52 = vld [vmem:[#allocation2 + $0x90] sm:$0xf]  ;;  %v794_v9 = vsel %vm14289_vm13, %v589_v37, %v793_v47  ;;  %v925_v36 = vld [vmem:[#allocation2 + $0x94] sm:$0xf] }
  0xb8   : > { %v1228_v49 = vshrl.u32 %v924_v52, 16  ;;  %v1231_v51 = vshll.u32 %v924_v52, 16  ;;  %v11946_v55 = vld [vmem:[#allocation4 + $0x438] sm:$0xf]  ;;  %v452_v44 = vsel %vm14161_vm7, %v444_v2, %v451_v24  ;;  %735 = vst [vmem:[#allocation2 + $0x30] sm:$0xf] %v734_v48  ;;  %v738_v57 = vsel %vm14289_vm13, %v453_v43, %v737_v34 }
  0xb9   : > { %v1237_v53 = vshll.u32 %v925_v36, 16  ;;  %v1241_v59 = vshrl.u32 %v925_v36, 16  ;;  %736 = vst [vmem:[#allocation2 + $0x34] sm:$0xf] %v452_v44  ;;  %v305_v31 = vld [vmem:[%s14094_s19 + $0x20] sm:$0xf] }
  0xba   : > { %v1230_v60 = vrot.slane %v1228_v49, 4  ;;  %v1233_v18 = vrot.slane %v1231_v51, 5  ;;  %739 = vst [vmem:[#allocation2 + $0x38] sm:$0x1] %v738_v57  ;;  %v306_v3 = vld [vmem:[%s14094_s19 + $0x24] sm:$0xf] }
  0xbb   : > { %v1239_v54 = vrot.slane %v1237_v53, 5  ;;  %v1243_v27 = vrot.slane %v1241_v59, 4  ;;  %795 = vst [vmem:[#allocation2 + $0x98] sm:$0x1] %v794_v9  ;;  %v11522_v4 = vld [vmem:[#allocation4 + $0xe0] sm:$0xf] }
  0xbc   : > { %v13435_v28 = vld [vmem:[#allocation4 + $0x458] sm:$0xf0]  ;;  %v1234_v1 = vor.u32 %v1233_v18, %v1230_v60  ;;  %v455_v10 = vshrl.u32 %v305_v31, 16  ;;  %v458_v12 = vshll.u32 %v305_v31, 16  ;;  %v463_v30 = vshrl.u32 %v306_v3, 16 }
  0xbd   : > { %v11947_v50 = vor.u32 %v13435_v28, %v11946_v55  ;;  %v1244_v7 = vor.u32 %v1243_v27, %v1239_v54  ;;  %v13323_v0 = vld [vmem:[#allocation4 + $0xdc] sm:$0xf]  ;;  %v11516_v42 = vld [vmem:[#allocation4 + $0xfc] sm:$0xf0]  ;;  %v466_v61 = vshll.u32 %v306_v3, 16 }
  0xbe   : > { %v13328_v5 = vld [vmem:[#allocation4 + $0x100] sm:$0xf0]  ;;  %v1235_v45 = vrot.slane %v1234_v1, 4  ;;  %v14410_v15 = vrot.slane %v455_v10, 7  ;;  %v800_v16 = vld [vmem:[#allocation2 + $0xa4] sm:$0x1]  ;;  %v11519_v8 = vor.u32 %v13323_v0, %v11516_v42 }
  0xbf   : > { %v1245_v13 = vrot.slane %v1244_v7, 4  ;;  %v11523_v21 = vor.u32 %v13328_v5, %v11522_v4  ;;  %v832_v56 = vld [vmem:[#allocation2 + $0x30] sm:$0xf]  ;;  %v740_v35 = vld [vmem:[#allocation2 + $0x3c] sm:$0xf]  ;;  %v801_v40 = vsel %vm14289_vm13, %v606_v14, %v800_v16  ;;  %v465_v51 = vrot.slane %v463_v30, 7 }
  0xc0   : > { %v900_v17 = vld [vmem:[#allocation2 + $0x30] sm:$0xf]  ;;  %v833_v25 = vld [vmem:[#allocation2 + $0x34] sm:$0xf]  ;;  %864 = vst [vmem:[#allocation4 + $0x120] sm:$0xf] %v832_v56  ;;  %v1240_v32 = vsel %vm14183_vm10, %v1235_v45, %v1239_v54  ;;  %v460_v38 = vor.u32 %v458_v12, %v14410_v15 }
  0xc1   : > { %4886 = vmatmul.bf16.gmra.mxu3 %v11947_v50  ;;  %v1399_v22 = vld [vmem:[#allocation2 + $0x30] sm:$0xe]  ;;  %v901_v26 = vld [vmem:[#allocation2 + $0x34] sm:$0xf]  ;;  %865 = vst [vmem:[#allocation4 + $0x144] sm:$0xf] %v833_v25  ;;  %v468_v31 = vor.u32 %v466_v61, %v465_v51 }
  0xc2   : > { %v902_v6 = vld [vmem:[#allocation2 + $0x38] sm:$0x1]  ;;  %v1036_v11 = vshrl.u32 %v900_v17, 16  ;;  %v1039_v37 = vshll.u32 %v900_v17, 16  ;;  %v1045_v39 = vshll.u32 %v901_v26, 16  ;;  %v1049_v41 = vshrl.u32 %v901_v26, 16 }
  0xc3   : > { %v1055_v33 = vshll.u32 %v902_v6, 16  ;;  %v926_v58 = vld [vmem:[#allocation2 + $0x98] sm:$0x1]  ;;  %v11360_v2 = vrot.slane %v1399_v22, 9  ;;  %1379 = vst [vmem:[#allocation4 + $0x364] sm:$0xf] %v1240_v32  ;;  %v741_v59 = vsel %vm14172_vm9, %v460_v38, %v740_v35 }
  0xc4   : > { %v1038_v34 = vrot.slane %v1036_v11, 4  ;;  %v1041_v24 = vrot.slane %v1039_v37, 5  ;;  %v1247_v43 = vshll.u32 %v926_v58, 16  ;;  %v461_v47 = vrot.slane %v14410_v15, 4  ;;  %v927_v52 = vld [vmem:[#allocation2 + $0x9c] sm:$0xf] }
  0xc5   : > { %5004 = vmatmul.bf16.gmra.mxu2 %v11523_v21  ;;  %v1047_v48 = vrot.slane %v1045_v39, 5  ;;  %v1051_v9 = vrot.slane %v1049_v41, 4  ;;  %v1057_v36 = vrot.slane %v1055_v33, 5  ;;  %v1400_v49 = vld [vmem:[#allocation2 + $0x34] sm:$0xf]  ;;  %v470_v28 = vrot.slane %v465_v51, 4 }
  0xc6   : > { %v1042_v55 = vor.u32 %v1041_v24, %v1038_v34  ;;  %v1249_v44 = vrot.slane %v1247_v43, 5  ;;  %v1401_v57 = vld [vmem:[#allocation2 + $0x38] sm:$0x1]  ;;  %v1516_v53 = vrot.slane %v1400_v49, 5  ;;  %802 = vst [vmem:[#allocation2 + $0xa4] sm:$0x1] %v801_v40  ;;  %v469_v16 = vsel %vm14161_vm7, %v461_v47, %v468_v31 }
  0xc7   : > { %4915 = vmatmul.bf16.gmra.mxu1 %v11519_v8  ;;  %v1052_v60 = vor.u32 %v1051_v9, %v1047_v48  ;;  %v1519_v18 = vrot.slane %v1401_v57, 5  ;;  %742 = vst [vmem:[#allocation2 + $0x3c] sm:$0xf] %v741_v59  ;;  %v928_v54 = vld [vmem:[#allocation2 + $0xa0] sm:$0xf]  ;;  %v1252_v0 = vshrl.u32 %v927_v52, 16 }
  0xc8   : > { %v11550_v27 = vld [vmem:[#allocation4 + $0x120] sm:$0xf]  ;;  %v1043_v50 = vrot.slane %v1042_v55, 4  ;;  %v1250_v1 = vsel %vm14183_vm10, %v1245_v13, %v1249_v44  ;;  %v1517_v3 = vsel %vm14209_vm11, %v11360_v2, %v1516_v53  ;;  %v1518_v14 = vrot.slane %v1516_v53, 4  ;;  %v744_v4 = vld [vmem:[#allocation2 + $0x44] sm:$0x1] }
  0xc9   : > { %v307_v5 = vld [vmem:[%s14094_s19 + $0x28] sm:$0xf]  ;;  %v13336_v7 = vld [vmem:[#allocation4 + $0x140] sm:$0xf0]  ;;  %v1053_v10 = vrot.slane %v1052_v60, 4  ;;  %v1255_v15 = vshll.u32 %v927_v52, 16  ;;  %v745_v32 = vsel %vm14289_vm13, %v470_v28, %v744_v4 }
  0xca   : > { %1380 = vst [vmem:[#allocation4 + $0x388] sm:$0xf] %v1250_v1  ;;  %v11551_v42 = vor.u32 %v13336_v7, %v11550_v27  ;;  %v1048_v45 = vsel %vm14183_vm10, %v1043_v50, %v1047_v48  ;;  %v1520_v12 = vsel %vm14209_vm11, %v1518_v14, %v1519_v18  ;;  %v13476_v13 = vld [vmem:[%s16942_s1 + $0x120] sm:$0xff]  ;;  %v14433_v30 = vld [vmem:[%s14094_s19 + $0x2c] sm:$0xf]  ;;  %v1254_v21 = vrot.slane %v1252_v0, 4 }
  0xcb   : > { %1638 = vst [vmem:[#allocation4 + $0x128] sm:$0xf] %v1517_v3  ;;  %v1058_v61 = vsel %vm14183_vm10, %v1053_v10, %v1057_v36  ;;  %v1261_v56 = vshll.u32 %v928_v54, 16  ;;  %v13404_v17 = vld [vmem:[#allocation4 + $0x364] sm:$0xf]  ;;  %v1257_v22 = vrot.slane %v1255_v15, 5  ;;  %5162 = vmatpush.bf16.msrb.mxu0 %v13476_v13 }
  0xcc   : > { %1363 = vst [vmem:[#allocation4 + $0x124] sm:$0xf] %v1048_v45  ;;  %4831 = vmatmul.bf16.gmra.mxu0 %v11551_v42  ;;  %v1265_v8 = vshrl.u32 %v928_v54, 16  ;;  %v472_v25 = vshrl.u32 %v307_v5, 16  ;;  %v475_v26 = vshll.u32 %v307_v5, 16  ;;  %v480_v11 = vshrl.u32 %v14433_v30, 16 }
  0xcd   : > { %1364 = vst [vmem:[#allocation4 + $0x148] sm:$0xf] %v1058_v61  ;;  %v929_v35 = vld [vmem:[#allocation2 + $0xa4] sm:$0x1]  ;;  %v1263_v6 = vrot.slane %v1261_v56, 5  ;;  %v1258_v40 = vor.u32 %v1257_v22, %v1254_v21  ;;  %v623_v53 = vrot.slane %v14285_v62, 4 }
  0xce   : > { %1639 = vst [vmem:[#allocation4 + $0x14c] sm:$0xf] %v1520_v12  ;;  %v834_v37 = vld [vmem:[#allocation2 + $0x3c] sm:$0xf]  ;;  %v1267_v33 = vrot.slane %v1265_v8, 4  ;;  %v1271_v58 = vshll.u32 %v929_v35, 16 }
  0xcf   : > { %743 = vst [vmem:[#allocation2 + $0x40] sm:$0xf] %v469_v16  ;;  %v903_v38 = vld [vmem:[#allocation2 + $0x3c] sm:$0xf]  ;;  %v1259_v34 = vrot.slane %v1258_v40, 4  ;;  %v474_v24 = vrot.slane %v472_v25, 7 }
  0xd0   : > { %866 = vst [vmem:[#allocation4 + $0x168] sm:$0xf] %v834_v37  ;;  %v1060_v39 = vshrl.u32 %v903_v38, 16  ;;  %v1063_v41 = vshll.u32 %v903_v38, 16  ;;  %v1268_v9 = vor.u32 %v1267_v33, %v1263_v6  ;;  %v1402_v36 = vld [vmem:[#allocation2 + $0x3c] sm:$0xe] }
  0xd1   : > { %v11840_v2 = vld [vmem:[#allocation4 + $0x384] sm:$0xf0]  ;;  %746 = vst [vmem:[#allocation2 + $0x44] sm:$0x1] %v745_v32  ;;  %v1264_v51 = vsel %vm14183_vm10, %v1259_v34, %v1263_v6  ;;  %v1273_v55 = vrot.slane %v1271_v58, 5  ;;  %v477_v44 = vor.u32 %v475_v26, %v474_v24  ;;  %v11361_v54 = vrot.slane %v1402_v36, 9 }
  0xd2   : > { %v11843_v43 = vor.u32 %v13404_v17, %v11840_v2  ;;  %v11558_v47 = vld [vmem:[#allocation4 + $0x128] sm:$0xf]  ;;  %v1062_v52 = vrot.slane %v1060_v39, 4  ;;  %v1065_v48 = vrot.slane %v1063_v41, 5  ;;  %v747_v57 = vld [vmem:[#allocation2 + $0x48] sm:$0xf] }
  0xd3   : > { %v13332_v49 = vld [vmem:[#allocation4 + $0x124] sm:$0xf]  ;;  %v1269_v18 = vrot.slane %v1268_v9, 4  ;;  %1381 = vst [vmem:[#allocation4 + $0x3ac] sm:$0xf] %v1264_v51  ;;  %v482_v27 = vrot.slane %v480_v11, 7  ;;  %v748_v62 = vsel %vm14172_vm9, %v477_v44, %v747_v57 }
  0xd4   : > { %v11552_v59 = vld [vmem:[#allocation4 + $0x144] sm:$0xf0]  ;;  %4960 = vmatmul.bf16.vlgmr.msrb.gmra.mxu3 %v11843_v43  ;;  %v1066_v60 = vor.u32 %v1065_v48, %v1062_v52  ;;  %v483_v50 = vshll.u32 %v14433_v30, 16  ;;  %v478_v5 = vrot.slane %v474_v24, 4  ;;  %v751_v45 = vld [vmem:[#allocation2 + $0x50] sm:$0x1] }
  0xd5   : > { %v11555_v31 = vor.u32 %v13332_v49, %v11552_v59  ;;  %v13337_v28 = vld [vmem:[#allocation4 + $0x148] sm:$0xf0]  ;;  %v1274_v4 = vsel %vm14183_vm10, %v1269_v18, %v1273_v55  ;;  %v487_v8 = vrot.slane %v482_v27, 4  ;;  %749 = vst [vmem:[#allocation2 + $0x48] sm:$0xf] %v748_v62  ;;  %v640_v52 = vrot.slane %v14366_v20, 4 }
  0xd6   : > { %v11559_v1 = vor.u32 %v13337_v28, %v11558_v47  ;;  %v835_v3 = vld [vmem:[#allocation2 + $0x40] sm:$0xf]  ;;  %v1067_v7 = vrot.slane %v1066_v60, 4  ;;  %v485_v42 = vor.u32 %v483_v50, %v482_v27  ;;  %1382 = vst [vmem:[#allocation4 + $0x3d0] sm:$0xf] %v1274_v4  ;;  %v13475_v37 = vld [vmem:[%s16942_s1 + $0x118] sm:$0xff] }
  0xd7   : > { %v904_v14 = vld [vmem:[#allocation2 + $0x40] sm:$0xf]  ;;  %4920 = vmatmul.bf16.gmra.mxu1 %v11555_v31  ;;  %867 = vst [vmem:[#allocation4 + $0x18c] sm:$0xf] %v835_v3  ;;  %v11586_v56 = vld [vmem:[#allocation4 + $0x168] sm:$0xf]  ;;  %v752_v40 = vsel %vm14289_vm13, %v487_v8, %v751_v45  ;;  %5163 = vmatpush.bf16.msrb.mxu0 %v13475_v37 }
  0xd8   : > { %v1069_v10 = vshll.u32 %v904_v14, 16  ;;  %v1073_v0 = vshrl.u32 %v904_v14, 16  ;;  %5009 = vmatmul.bf16.gmra.mxu2 %v11559_v1  ;;  %v905_v12 = vld [vmem:[#allocation2 + $0x44] sm:$0x1]  ;;  %v1403_v15 = vld [vmem:[#allocation2 + $0x40] sm:$0xf]  ;;  %v486_v22 = vsel %vm14161_vm7, %v478_v5, %v485_v42 }
  0xd9   : > { %v1079_v61 = vshll.u32 %v905_v12, 16  ;;  %v1404_v16 = vld [vmem:[#allocation2 + $0x44] sm:$0x1]  ;;  %v1523_v21 = vrot.slane %v1403_v15, 5  ;;  %v807_v25 = vld [vmem:[#allocation2 + $0xb0] sm:$0x1] }
  0xda   : > { %v1071_v13 = vrot.slane %v1069_v10, 5  ;;  %v1075_v30 = vrot.slane %v1073_v0, 4  ;;  %v1526_v17 = vrot.slane %v1404_v16, 5  ;;  %v13413_v6 = vld [vmem:[#allocation4 + $0x3ac] sm:$0xf]  ;;  %v808_v24 = vsel %vm14289_vm13, %v623_v53, %v807_v25 }
  0xdb   : > { %v1081_v35 = vrot.slane %v1079_v61, 5  ;;  %v1524_v11 = vsel %vm14209_vm11, %v11361_v54, %v1523_v21  ;;  %750 = vst [vmem:[#allocation2 + $0x4c] sm:$0xf] %v486_v22  ;;  %v1525_v38 = vrot.slane %v1523_v21, 4  ;;  %v930_v39 = vld [vmem:[#allocation2 + $0xa8] sm:$0xf] }
  0xdc   : > { %v1072_v26 = vsel %vm14183_vm10, %v1067_v7, %v1071_v13  ;;  %v1076_v32 = vor.u32 %v1075_v30, %v1071_v13  ;;  %1640 = vst [vmem:[#allocation4 + $0x170] sm:$0xf] %v1524_v11  ;;  %v931_v33 = vld [vmem:[#allocation2 + $0xac] sm:$0xf]  ;;  %v1276_v58 = vshrl.u32 %v930_v39, 16  ;;  %v1279_v43 = vshll.u32 %v930_v39, 16 }
  0xdd   : > { %1365 = vst [vmem:[#allocation4 + $0x16c] sm:$0xf] %v1072_v26  ;;  %v1527_v34 = vsel %vm14209_vm11, %v1525_v38, %v1526_v17  ;;  %v1285_v47 = vshll.u32 %v931_v33, 16  ;;  %v11876_v36 = vld [vmem:[#allocation4 + $0x3cc] sm:$0xf0]  ;;  %v1289_v57 = vshrl.u32 %v931_v33, 16 }
  0xde   : > { %v1077_v41 = vrot.slane %v1076_v32, 4  ;;  %v13345_v2 = vld [vmem:[#allocation4 + $0x188] sm:$0xf0]  ;;  %753 = vst [vmem:[#allocation2 + $0x50] sm:$0x1] %v752_v40  ;;  %v1278_v49 = vrot.slane %v1276_v58, 4  ;;  %v11879_v51 = vor.u32 %v13413_v6, %v11876_v36 }
  0xdf   : > { %v11587_v48 = vor.u32 %v13345_v2, %v11586_v56  ;;  %1641 = vst [vmem:[#allocation4 + $0x194] sm:$0xf] %v1527_v34  ;;  %v1281_v55 = vrot.slane %v1279_v43, 5  ;;  %v1287_v44 = vrot.slane %v1285_v47, 5  ;;  %v836_v59 = vld [vmem:[#allocation2 + $0x48] sm:$0xf] }
  0xe0   : > { %v1082_v9 = vsel %vm14183_vm10, %v1077_v41, %v1081_v35  ;;  %v906_v60 = vld [vmem:[#allocation2 + $0x48] sm:$0xf]  ;;  %809 = vst [vmem:[#allocation2 + $0xb0] sm:$0x1] %v808_v24  ;;  %v1291_v4 = vrot.slane %v1289_v57, 4 }
  0xe1   : > { %1366 = vst [vmem:[#allocation4 + $0x190] sm:$0xf] %v1082_v9  ;;  %4836 = vmatmul.bf16.gmra.mxu0 %v11587_v48  ;;  %v1282_v31 = vor.u32 %v1281_v55, %v1278_v49  ;;  %v1084_v54 = vshrl.u32 %v906_v60, 16  ;;  %v1087_v27 = vshll.u32 %v906_v60, 16  ;;  %v1405_v10 = vld [vmem:[#allocation2 + $0x48] sm:$0xe] }
  0xe2   : > { %v837_v53 = vld [vmem:[#allocation2 + $0x4c] sm:$0xf]  ;;  %868 = vst [vmem:[#allocation4 + $0x1b0] sm:$0xf] %v836_v59  ;;  %v1292_v16 = vor.u32 %v1291_v4, %v1287_v44  ;;  %v309_v56 = vld [vmem:[%s14094_s19 + $0x30] sm:$0xf] }
  0xe3   : > { %v907_v18 = vld [vmem:[#allocation2 + $0x4c] sm:$0xf]  ;;  %869 = vst [vmem:[#allocation4 + $0x1d4] sm:$0xf] %v837_v53  ;;  %v11594_v50 = vld [vmem:[#allocation4 + $0x170] sm:$0xf] }
  0xe4   : > { %v13341_v28 = vld [vmem:[#allocation4 + $0x16c] sm:$0xf]  ;;  %4965 = vmatmul.bf16.gmra.mxu3 %v11879_v51  ;;  %v1093_v1 = vshll.u32 %v907_v18, 16  ;;  %v1097_v3 = vshrl.u32 %v907_v18, 16  ;;  %v1283_v14 = vrot.slane %v1282_v31, 4  ;;  %v1086_v62 = vrot.slane %v1084_v54, 4 }
  0xe5   : > { %v908_v5 = vld [vmem:[#allocation2 + $0x50] sm:$0x1]  ;;  %v1089_v7 = vrot.slane %v1087_v27, 5  ;;  %v1406_v21 = vld [vmem:[#allocation2 + $0x4c] sm:$0xf]  ;;  %v11362_v32 = vrot.slane %v1405_v10, 9 }
  0xe6   : > { %v13346_v0 = vld [vmem:[#allocation4 + $0x190] sm:$0xf0]  ;;  %v1095_v42 = vrot.slane %v1093_v1, 5  ;;  %v1099_v45 = vrot.slane %v1097_v3, 4  ;;  %v1103_v12 = vshll.u32 %v908_v5, 16  ;;  %v1288_v15 = vsel %vm14183_vm10, %v1283_v14, %v1287_v44 }
  0xe7   : > { %v11595_v30 = vor.u32 %v13346_v0, %v11594_v50  ;;  %v1090_v61 = vor.u32 %v1089_v7, %v1086_v62  ;;  %1383 = vst [vmem:[#allocation4 + $0x3f4] sm:$0xf] %v1288_v15  ;;  %v932_v25 = vld [vmem:[#allocation2 + $0xb0] sm:$0x1]  ;;  %v1293_v11 = vrot.slane %v1292_v16, 4  ;;  %v1530_v38 = vrot.slane %v1406_v21, 5 }
  0xe8   : > { %v11588_v13 = vld [vmem:[#allocation4 + $0x18c] sm:$0xf0]  ;;  %v1100_v22 = vor.u32 %v1099_v45, %v1095_v42  ;;  %v1105_v8 = vrot.slane %v1103_v12, 5  ;;  %v1407_v26 = vld [vmem:[#allocation2 + $0x50] sm:$0x1]  ;;  %v1295_v37 = vshll.u32 %v932_v25, 16 }
  0xe9   : > { %v11591_v17 = vor.u32 %v13341_v28, %v11588_v13  ;;  %5014 = vmatmul.bf16.gmra.mxu2 %v11595_v30  ;;  %v11622_v35 = vld [vmem:[#allocation4 + $0x1b0] sm:$0xf]  ;;  %v1091_v6 = vrot.slane %v1090_v61, 4  ;;  %v1533_v41 = vrot.slane %v1407_v26, 5  ;;  %v310_v33 = vld [vmem:[%s14094_s19 + $0x34] sm:$0xf]  ;;  %v1531_v34 = vsel %vm14209_vm11, %v11362_v32, %v1530_v38 }
  0xea   : > { %v13354_v40 = vld [vmem:[#allocation4 + $0x1d0] sm:$0xf0]  ;;  %v1101_v39 = vrot.slane %v1100_v22, 4  ;;  %v1297_v2 = vrot.slane %v1295_v37, 5  ;;  %v1532_v43 = vrot.slane %v1530_v38, 4  ;;  %v489_v47 = vshrl.u32 %v309_v56, 16 }
  0xeb   : > { %4925 = vmatmul.bf16.gmra.mxu1 %v11591_v17  ;;  %v1096_v58 = vsel %vm14183_vm10, %v1091_v6, %v1095_v42  ;;  %v492_v48 = vshll.u32 %v309_v56, 16  ;;  %v11623_v9 = vor.u32 %v13354_v40, %v11622_v35  ;;  %v497_v49 = vshrl.u32 %v310_v33, 16  ;;  %v754_v55 = vld [vmem:[#allocation2 + $0x54] sm:$0xf]  ;;  %v814_v44 = vld [vmem:[#allocation2 + $0xbc] sm:$0x1] }
  0xec   : > { %v1106_v24 = vsel %vm14183_vm10, %v1101_v39, %v1105_v8  ;;  %1367 = vst [vmem:[#allocation4 + $0x1b4] sm:$0xf] %v1096_v58  ;;  %v1298_v36 = vsel %vm14183_vm10, %v1293_v11, %v1297_v2  ;;  %v500_v51 = vshll.u32 %v310_v33, 16  ;;  %v1534_v57 = vsel %vm14209_vm11, %v1532_v43, %v1533_v41  ;;  %v758_v60 = vld [vmem:[#allocation2 + $0x5c] sm:$0x1] }
  0xed   : > { %1368 = vst [vmem:[#allocation4 + $0x1d8] sm:$0xf] %v1106_v24  ;;  %v491_v59 = vrot.slane %v489_v47, 7  ;;  %v815_v53 = vsel %vm14289_vm13, %v640_v52, %v814_v44  ;;  %v499_v18 = vrot.slane %v497_v49, 7  ;;  %v933_v31 = vld [vmem:[#allocation2 + $0xb4] sm:$0xf] }
  0xee   : > { %1384 = vst [vmem:[#allocation4 + $0x418] sm:$0xf] %v1298_v36  ;;  %v934_v27 = vld [vmem:[#allocation2 + $0xb8] sm:$0xf]  ;;  %v1300_v50 = vshrl.u32 %v933_v31, 16  ;;  %v1303_v14 = vshll.u32 %v933_v31, 16 }
  0xef   : > { %1642 = vst [vmem:[#allocation4 + $0x1b8] sm:$0xf] %v1531_v34  ;;  %v494_v28 = vor.u32 %v492_v48, %v491_v59  ;;  %v495_v54 = vrot.slane %v491_v59, 4  ;;  %v502_v1 = vor.u32 %v500_v51, %v499_v18  ;;  %v504_v3 = vrot.slane %v499_v18, 4  ;;  %v13422_v5 = vld [vmem:[#allocation4 + $0x3f4] sm:$0xf] }
  0xf0   : > { %1643 = vst [vmem:[#allocation4 + $0x1dc] sm:$0xf] %v1534_v57  ;;  %v1309_v4 = vshll.u32 %v934_v27, 16  ;;  %v1302_v52 = vrot.slane %v1300_v50, 4  ;;  %v1313_v62 = vshrl.u32 %v934_v27, 16  ;;  %v1305_v45 = vrot.slane %v1303_v14, 5 }
  0xf1   : > { %4841 = vmatmul.bf16.gmra.mxu0 %v11623_v9  ;;  %816 = vst [vmem:[#allocation2 + $0xbc] sm:$0x1] %v815_v53  ;;  %v755_v20 = vsel %vm14172_vm9, %v494_v28, %v754_v55  ;;  %v311_v7 = vld [vmem:[%s14094_s19 + $0x38] sm:$0xf]  ;;  %v503_v0 = vsel %vm14161_vm7, %v495_v54, %v502_v1  ;;  %v759_v42 = vsel %vm14289_vm13, %v504_v3, %v758_v60  ;;  %v312_v56 = vld [vmem:[%s14094_s19 + $0x3c] sm:$0xf] }
  0xf2   : > { %756 = vst [vmem:[#allocation2 + $0x54] sm:$0xf] %v755_v20  ;;  %v1311_v12 = vrot.slane %v1309_v4, 5  ;;  %v1315_v13 = vrot.slane %v1313_v62, 4  ;;  %v506_v30 = vshrl.u32 %v311_v7, 16  ;;  %v1306_v21 = vor.u32 %v1305_v45, %v1302_v52 }
  0xf3   : > { %v13350_v10 = vld [vmem:[#allocation4 + $0x1b4] sm:$0xf]  ;;  %757 = vst [vmem:[#allocation2 + $0x58] sm:$0xf] %v503_v0  ;;  %v509_v26 = vshll.u32 %v311_v7, 16  ;;  %v514_v6 = vshrl.u32 %v312_v56, 16 }
  0xf4   : > { %v11624_v15 = vld [vmem:[#allocation4 + $0x1d4] sm:$0xf0]  ;;  %760 = vst [vmem:[#allocation2 + $0x5c] sm:$0x1] %v759_v42  ;;  %v1316_v8 = vor.u32 %v1315_v13, %v1311_v12  ;;  %v508_v25 = vrot.slane %v506_v30, 7  ;;  %v1307_v35 = vrot.slane %v1306_v21, 4 }
  0xf5   : > { %v11627_v61 = vor.u32 %v13350_v10, %v11624_v15  ;;  %v11912_v16 = vld [vmem:[#allocation4 + $0x414] sm:$0xf0]  ;;  %v517_v11 = vshll.u32 %v312_v56, 16  ;;  %v516_v2 = vrot.slane %v514_v6, 7  ;;  %v761_v34 = vld [vmem:[#allocation2 + $0x60] sm:$0xf]  ;;  %v4812_v10 = vpop.f32.mrf.mxu0 }
  0xf6   : > { %v11915_v17 = vor.u32 %v13422_v5, %v11912_v16  ;;  %v11630_v22 = vld [vmem:[#allocation4 + $0x1b8] sm:$0xf]  ;;  %v1317_v40 = vrot.slane %v1316_v8, 4  ;;  %v511_v39 = vor.u32 %v509_v26, %v508_v25  ;;  %v1312_v41 = vsel %vm14183_vm10, %v1307_v35, %v1311_v12  ;;  %v14498_v44 = vld [vmem:[#allocation2 + $0x90] sm:$0xe] }
  0xf7   : > { %v13355_v32 = vld [vmem:[#allocation4 + $0x1d8] sm:$0xf0]  ;;  %v512_v58 = vrot.slane %v508_v25, 4  ;;  %1385 = vst [vmem:[#allocation4 + $0x43c] sm:$0xf] %v1312_v41  ;;  %v519_v9 = vor.u32 %v517_v11, %v516_v2  ;;  %v521_v12 = vrot.slane %v516_v2, 4 }
  0xf8   : > { %4970 = vmatmul.bf16.gmra.mxu3 %v11915_v17  ;;  %v11631_v37 = vor.u32 %v13355_v32, %v11630_v22  ;;  %v935_v38 = vld [vmem:[#allocation2 + $0xbc] sm:$0x1]  ;;  %v762_v55 = vsel %vm14172_vm9, %v511_v39, %v761_v34  ;;  %v765_v1 = vld [vmem:[#allocation2 + $0x68] sm:$0x1]  ;;  %v14504_v5 = vld [vmem:[#allocation2 + $0x94] sm:$0xf] }
  0xf9   : > { %v1319_v33 = vshll.u32 %v935_v38, 16  ;;  %v838_v24 = vld [vmem:[#allocation2 + $0x54] sm:$0xf]  ;;  %v520_v50 = vsel %vm14161_vm7, %v512_v58, %v519_v9  ;;  %763 = vst [vmem:[#allocation2 + $0x60] sm:$0xf] %v762_v55  ;;  %v11368_v15 = vrot.slane %v14498_v44, 9  ;;  %v766_v8 = vsel %vm14289_vm13, %v521_v12, %v765_v1 }
  0xfa   : > { %5019 = vmatmul.bf16.gmra.mxu2 %v11631_v37  ;;  %v909_v43 = vld [vmem:[#allocation2 + $0x54] sm:$0xf]  ;;  %v839_v47 = vld [vmem:[#allocation2 + $0x58] sm:$0xf]  ;;  %870 = vst [vmem:[#allocation4 + $0x1f8] sm:$0xf] %v838_v24 }
  0xfb   : > { %4930 = vmatmul.bf16.gmra.mxu1 %v11627_v61  ;;  %v910_v48 = vld [vmem:[#allocation2 + $0x58] sm:$0xf]  ;;  %871 = vst [vmem:[#allocation4 + $0x21c] sm:$0xf] %v839_v47  ;;  %v911_v36 = vld [vmem:[#allocation2 + $0x5c] sm:$0x1] }
  0xfc   : > { %v1108_v49 = vshrl.u32 %v909_v43, 16  ;;  %v1111_v51 = vshll.u32 %v909_v43, 16  ;;  %v1117_v57 = vshll.u32 %v910_v48, 16  ;;  %v1121_v59 = vshrl.u32 %v910_v48, 16  ;;  %v1408_v18 = vld [vmem:[#allocation2 + $0x54] sm:$0xe] }
  0xfd   : > { %v1127_v60 = vshll.u32 %v911_v36, 16  ;;  %v1321_v53 = vrot.slane %v1319_v33, 5  ;;  %v1409_v54 = vld [vmem:[#allocation2 + $0x58] sm:$0xf]  ;;  %v1410_v27 = vld [vmem:[#allocation2 + $0x5c] sm:$0x1] }
  0xfe   : > { %v1110_v31 = vrot.slane %v1108_v49, 4  ;;  %v1113_v28 = vrot.slane %v1111_v51, 5  ;;  %v1119_v3 = vrot.slane %v1117_v57, 5  ;;  %v1123_v14 = vrot.slane %v1121_v59, 4  ;;  %v14509_v45 = vld [vmem:[%s16943_s2] ss:$0 sm:$0xff] }
  0xff   : > { %v1322_v4 = vsel %vm14183_vm10, %v1317_v40, %v1321_v53  ;;  %v11363_v52 = vrot.slane %v1408_v18, 9  ;;  %v1537_v62 = vrot.slane %v1409_v54, 5  ;;  %v1540_v7 = vrot.slane %v1410_v27, 5  ;;  %764 = vst [vmem:[#allocation2 + $0x64] sm:$0xf] %v520_v50  ;;  %v13471_v11 = vld [vmem:[%s16942_s1 + $0xf8] sm:$0xff]  ;;  %v14534_v53 = vpop.f32.mrf.mxu0 }
 0x100   : > { %v1114_v20 = vor.u32 %v1113_v28, %v1110_v31  ;;  %1386 = vst [vmem:[#allocation4 + $0x460] sm:$0xf] %v1322_v4  ;;  %v1124_v0 = vor.u32 %v1123_v14, %v1119_v3  ;;  %v1129_v42 = vrot.slane %v1127_v60, 5  ;;  %v1425_v21 = vld [vmem:[#allocation2 + $0x98] sm:$0x1]  ;;  %v1572_v25 = vrot.slane %v14504_v5, 5  ;;  %5070 = vmatpush.bf16.msrb.mxu3 %v13471_v11 }
 0x101   : > { %v11658_v13 = vld [vmem:[#allocation4 + $0x1f8] sm:$0xf]  ;;  %v1538_v61 = vsel %vm14209_vm11, %v11363_v52, %v1537_v62  ;;  %v1539_v16 = vrot.slane %v1537_v62, 4  ;;  %v13431_v22 = vld [vmem:[#allocation4 + $0x43c] sm:$0xf]  ;;  %v1575_v6 = vrot.slane %v1425_v21, 5  ;;  %v4813_v40 = vadd.f32 %v14509_v45, %v4812_v10 }
 0x102   : > { %v1115_v30 = vrot.slane %v1114_v20, 4  ;;  %v13363_v56 = vld [vmem:[#allocation4 + $0x218] sm:$0xf0]  ;;  %v1125_v17 = vrot.slane %v1124_v0, 4  ;;  %1644 = vst [vmem:[#allocation4 + $0x200] sm:$0xf] %v1538_v61  ;;  %v1573_v1 = vsel %vm14209_vm11, %v11368_v15, %v1572_v25 }
 0x103   : > { %v11659_v26 = vor.u32 %v13363_v56, %v11658_v13  ;;  %v1541_v35 = vsel %vm14209_vm11, %v1539_v16, %v1540_v7  ;;  %767 = vst [vmem:[#allocation2 + $0x68] sm:$0x1] %v766_v8  ;;  %v13474_v37 = vld [vmem:[%s16942_s1 + $0x110] sm:$0xff]  ;;  %v1574_v39 = vrot.slane %v1572_v25, 4  ;;  %v313_v33 = vld [vmem:[%s14094_s19 + $0x40] sm:$0xf] }
 0x104   : > { %v1120_v32 = vsel %vm14183_vm10, %v1115_v30, %v1119_v3  ;;  %v1130_v38 = vsel %vm14183_vm10, %v1125_v17, %v1129_v42  ;;  %v13470_v41 = vld [vmem:[%s16942_s1 + $0xf0] sm:$0xff]  ;;  %v840_v58 = vld [vmem:[#allocation2 + $0x60] sm:$0xf]  ;;  %1645 = vst [vmem:[#allocation4 + $0x224] sm:$0xf] %v1541_v35  ;;  %5164 = vmatpush.bf16.msrb.mxu0 %v13474_v37  ;;  %v523_v18 = vshrl.u32 %v313_v33, 16 }
 0x105   : > { %1369 = vst [vmem:[#allocation4 + $0x1fc] sm:$0xf] %v1120_v32  ;;  %4846 = vmatmul.bf16.gmra.mxu0 %v11659_v26  ;;  %v912_v2 = vld [vmem:[#allocation2 + $0x60] sm:$0xf]  ;;  %5071 = vmatpush.bf16.msrb.mxu3 %v13470_v41  ;;  %v1576_v20 = vsel %vm14209_vm11, %v1574_v39, %v1575_v6  ;;  %v526_v61 = vshll.u32 %v313_v33, 16 }
 0x106   : > { %1370 = vst [vmem:[#allocation4 + $0x220] sm:$0xf] %v1130_v38  ;;  %v1132_v24 = vshrl.u32 %v912_v2, 16  ;;  %v1135_v43 = vshll.u32 %v912_v2, 16  ;;  %v841_v9 = vld [vmem:[#allocation2 + $0x64] sm:$0xf] }
 0x107   : > { %v11948_v34 = vld [vmem:[#allocation4 + $0x45c] sm:$0xf0]  ;;  %v4901_v48 = vpop.f32.mrf.mxu1  ;;  %872 = vst [vmem:[#allocation4 + $0x240] sm:$0xf] %v840_v58  ;;  %v913_v36 = vld [vmem:[#allocation2 + $0x64] sm:$0xf] }
 0x108   : > { %v11951_v47 = vor.u32 %v13431_v22, %v11948_v34  ;;  %v4902_v49 = vadd.f32 %v4901_v48, %v4813_v40  ;;  %873 = vst [vmem:[#allocation4 + $0x264] sm:$0xf] %v841_v9  ;;  %v1134_v51 = vrot.slane %v1132_v24, 4  ;;  %v1137_v55 = vrot.slane %v1135_v43, 5  ;;  %v1411_v60 = vld [vmem:[#allocation2 + $0x60] sm:$0xe] }
 0x109   : > { %v1141_v44 = vshll.u32 %v913_v36, 16  ;;  %v11666_v57 = vld [vmem:[#allocation4 + $0x200] sm:$0xf]  ;;  %v1145_v59 = vshrl.u32 %v913_v36, 16  ;;  %v1412_v27 = vld [vmem:[#allocation2 + $0x64] sm:$0xf] }
 0x10a   : > { %4975 = vmatmul.bf16.gmra.mxu3 %v11951_v47  ;;  %v914_v31 = vld [vmem:[#allocation2 + $0x68] sm:$0x1]  ;;  %v1138_v28 = vor.u32 %v1137_v55, %v1134_v51  ;;  %v11364_v50 = vrot.slane %v1411_v60, 9  ;;  %v1544_v7 = vrot.slane %v1412_v27, 5  ;;  %v525_v0 = vrot.slane %v523_v18, 7  ;;  %v13495_v18 = vld [vmem:[%s16942_s1 + $0x1b8] sm:$0xff] }
 0x10b   : > { %v1143_v54 = vrot.slane %v1141_v44, 5  ;;  %v1147_v14 = vrot.slane %v1145_v59, 4  ;;  %v1151_v4 = vshll.u32 %v914_v31, 16  ;;  %v1413_v5 = vld [vmem:[#allocation2 + $0x68] sm:$0x1]  ;;  %5337 = vmatpush.bf16.msrb.mxu2 %v13495_v18 }
 0x10c   : > { %v13359_v3 = vld [vmem:[#allocation4 + $0x1fc] sm:$0xf]  ;;  %v1139_v62 = vrot.slane %v1138_v28, 4  ;;  %v1547_v10 = vrot.slane %v1413_v5, 5  ;;  %v13364_v12 = vld [vmem:[#allocation4 + $0x220] sm:$0xf0]  ;;  %v1545_v56 = vsel %vm14209_vm11, %v11364_v50, %v1544_v7  ;;  %v528_v26 = vor.u32 %v526_v61, %v525_v0 }
 0x10d   : > { %v11660_v52 = vld [vmem:[#allocation4 + $0x21c] sm:$0xf0]  ;;  %v1148_v13 = vor.u32 %v1147_v14, %v1143_v54  ;;  %v1153_v30 = vrot.slane %v1151_v4, 5  ;;  %1654 = vst [vmem:[#allocation4 + $0x368] sm:$0xf] %v1573_v1  ;;  %v11667_v15 = vor.u32 %v13364_v12, %v11666_v57  ;;  %v1546_v17 = vrot.slane %v1544_v7, 4 }
 0x10e   : > { %v11663_v42 = vor.u32 %v13359_v3, %v11660_v52  ;;  %v11694_v16 = vld [vmem:[#allocation4 + $0x240] sm:$0xf]  ;;  %v1144_v21 = vsel %vm14183_vm10, %v1139_v62, %v1143_v54  ;;  %1655 = vst [vmem:[#allocation4 + $0x38c] sm:$0xf] %v1576_v20  ;;  %v529_v32 = vrot.slane %v525_v0, 4  ;;  %v13469_v51 = vld [vmem:[%s16942_s1 + $0xe8] sm:$0xff] }
 0x10f   : > { %v13372_v22 = vld [vmem:[#allocation4 + $0x260] sm:$0xf0]  ;;  %v1149_v8 = vrot.slane %v1148_v13, 4  ;;  %1371 = vst [vmem:[#allocation4 + $0x244] sm:$0xf] %v1144_v21  ;;  %v4990_v25 = vpop.f32.mrf.mxu2  ;;  %5024 = vmatmul.bf16.gmra.mxu2 %v11667_v15  ;;  %v1548_v35 = vsel %vm14209_vm11, %v1546_v17, %v1547_v10  ;;  %v13473_v60 = vld [vmem:[%s16942_s1 + $0x108] sm:$0xff]  ;;  %5072 = vmatpush.bf16.msrb.mxu3 %v13469_v51  ;;  %v14577_v10 = vpop.f32.mrf.mxu1 }
 0x110   : > { %4935 = vmatmul.bf16.gmra.mxu1 %v11663_v42  ;;  %1646 = vst [vmem:[#allocation4 + $0x248] sm:$0xf] %v1545_v56  ;;  %v14546_v6 = vadd.f32 %v4990_v25, %v4902_v49  ;;  %v314_v11 = vld [vmem:[%s14094_s19 + $0x44] sm:$0xf]  ;;  %v768_v37 = vld [vmem:[#allocation2 + $0x6c] sm:$0xf]  ;;  %v11695_v38 = vor.u32 %v13372_v22, %v11694_v16  ;;  %5165 = vmatpush.bf16.msrb.mxu0 %v13473_v60 }
 0x111   : > { %v1154_v40 = vsel %vm14183_vm10, %v1149_v8, %v1153_v30  ;;  %1647 = vst [vmem:[#allocation4 + $0x26c] sm:$0xf] %v1548_v35  ;;  %v531_v39 = vshrl.u32 %v314_v11, 16  ;;  %v534_v41 = vshll.u32 %v314_v11, 16  ;;  %v769_v33 = vsel %vm14172_vm9, %v528_v26, %v768_v37  ;;  %v1426_v58 = vld [vmem:[#allocation2 + $0x9c] sm:$0xe] }
 0x112   : > { %1372 = vst [vmem:[#allocation4 + $0x268] sm:$0xf] %v1154_v40  ;;  %v1427_v2 = vld [vmem:[#allocation2 + $0xa0] sm:$0xf]  ;;  %v1428_v47 = vld [vmem:[#allocation2 + $0xa4] sm:$0x1] }
 0x113   : > { %v14553_v34 = vpop.f32.mrf.mxu3  ;;  %v14555_v24 = vpop.f32.mrf.mxu0  ;;  %v533_v43 = vrot.slane %v531_v39, 7  ;;  %770 = vst [vmem:[#allocation2 + $0x6c] sm:$0xf] %v769_v33  ;;  %v11369_v48 = vrot.slane %v1426_v58, 9  ;;  %v772_v36 = vld [vmem:[#allocation2 + $0x74] sm:$0x1] }
 0x114   : > { %v11846_v9 = vld [vmem:[#allocation4 + $0x368] sm:$0xf]  ;;  %v1579_v49 = vrot.slane %v1427_v2, 5  ;;  %v1582_v59 = vrot.slane %v1428_v47, 5  ;;  %v13468_v50 = vld [vmem:[%s16942_s1 + $0xe0] sm:$0xff] }
 0x115   : > { %4851 = vmatmul.bf16.gmra.mxu0 %v11695_v38  ;;  %v13409_v55 = vld [vmem:[#allocation4 + $0x388] sm:$0xf0]  ;;  %v536_v44 = vor.u32 %v534_v41, %v533_v43  ;;  %v538_v57 = vrot.slane %v533_v43, 4  ;;  %v315_v1 = vld [vmem:[%s14094_s19 + $0x48] sm:$0xf]  ;;  %5073 = vmatpush.bf16.msrb.mxu3 %v13468_v50 }
 0x116   : > { %v13368_v31 = vld [vmem:[#allocation4 + $0x244] sm:$0xf]  ;;  %v11847_v28 = vor.u32 %v13409_v55, %v11846_v9  ;;  %v1580_v54 = vsel %vm14209_vm11, %v11369_v48, %v1579_v49  ;;  %v1581_v27 = vrot.slane %v1579_v49, 4  ;;  %v316_v5 = vld [vmem:[%s14094_s19 + $0x4c] sm:$0xf]  ;;  %v540_v52 = vshrl.u32 %v315_v1, 16 }
 0x117   : > { %v11702_v3 = vld [vmem:[#allocation4 + $0x248] sm:$0xf]  ;;  %v537_v14 = vsel %vm14161_vm7, %v529_v32, %v536_v44  ;;  %v773_v4 = vsel %vm14289_vm13, %v538_v57, %v772_v36  ;;  %1656 = vst [vmem:[#allocation4 + $0x3b0] sm:$0xf] %v1580_v54  ;;  %v543_v62 = vshll.u32 %v315_v1, 16  ;;  %v548_v42 = vshrl.u32 %v316_v5, 16  ;;  %v14585_v26 = vpop.f32.mrf.mxu2 }
 0x118   : > { %v13373_v20 = vld [vmem:[#allocation4 + $0x268] sm:$0xf0]  ;;  %771 = vst [vmem:[#allocation2 + $0x70] sm:$0xf] %v537_v14  ;;  %v1583_v0 = vsel %vm14209_vm11, %v1581_v27, %v1582_v59  ;;  %v551_v12 = vshll.u32 %v316_v5, 16  ;;  %v542_v22 = vrot.slane %v540_v52, 7  ;;  %v4818_v48 = vadd.f32 %v14509_v45, %v14555_v24 }
 0x119   : > { %v11696_v7 = vld [vmem:[#allocation4 + $0x264] sm:$0xf0]  ;;  %774 = vst [vmem:[#allocation2 + $0x74] sm:$0x1] %v773_v4  ;;  %v11703_v8 = vor.u32 %v13373_v20, %v11702_v3  ;;  %v550_v25 = vrot.slane %v548_v42, 7 }
 0x11a   : > { %5049 = vmatmul.bf16.vlgmr.msra.gmra.mxu3 %v11847_v28  ;;  %v842_v13 = vld [vmem:[#allocation2 + $0x6c] sm:$0xf]  ;;  %v11699_v15 = vor.u32 %v13368_v31, %v11696_v7  ;;  %1657 = vst [vmem:[#allocation4 + $0x3d4] sm:$0xf] %v1583_v0  ;;  %v545_v11 = vor.u32 %v543_v62, %v542_v22  ;;  %v775_v37 = vld [vmem:[#allocation2 + $0x78] sm:$0xf] }
 0x11b   : > { %v915_v30 = vld [vmem:[#allocation2 + $0x6c] sm:$0xf]  ;;  %v14581_v16 = vpop.f32.mrf.mxu3  ;;  %874 = vst [vmem:[#allocation4 + $0x288] sm:$0xf] %v842_v13  ;;  %v14583_v17 = vpop.f32.mrf.mxu0  ;;  %v546_v40 = vrot.slane %v542_v22, 4  ;;  %v555_v39 = vrot.slane %v550_v25, 4  ;;  %v553_v43 = vor.u32 %v551_v12, %v550_v25 }
 0x11c   : > { %v1414_v61 = vld [vmem:[#allocation2 + $0x6c] sm:$0xe]  ;;  %v1156_v21 = vshrl.u32 %v915_v30, 16  ;;  %v1159_v56 = vshll.u32 %v915_v30, 16  ;;  %v779_v47 = vld [vmem:[#allocation2 + $0x80] sm:$0x1]  ;;  %v776_v55 = vsel %vm14172_vm9, %v545_v11, %v775_v37 }
 0x11d   : > { %v11365_v38 = vrot.slane %v1414_v61, 9  ;;  %v1429_v54 = vld [vmem:[#allocation2 + $0xa8] sm:$0xe]  ;;  %v13487_v24 = vld [vmem:[%s16942_s1 + $0x178] sm:$0xff]  ;;  %v554_v20 = vsel %vm14161_vm7, %v546_v40, %v553_v43  ;;  %777 = vst [vmem:[#allocation2 + $0x78] sm:$0xf] %v776_v55  ;;  %v780_v42 = vsel %vm14289_vm13, %v555_v39, %v779_v47 }
 0x11e   : > { %v1158_v32 = vrot.slane %v1156_v21, 4  ;;  %v1161_v35 = vrot.slane %v1159_v56, 5  ;;  %v11882_v51 = vld [vmem:[#allocation4 + $0x3b0] sm:$0xf]  ;;  %v1430_v12 = vld [vmem:[#allocation2 + $0xac] sm:$0xf]  ;;  %5248 = vmatpush.bf16.msrb.mxu1 %v13487_v24 }
 0x11f   : > { %v843_v41 = vld [vmem:[#allocation2 + $0x70] sm:$0xf]  ;;  %5029 = vmatmul.bf16.gmra.mxu2 %v11703_v8  ;;  %v1586_v21 = vrot.slane %v1430_v12, 5  ;;  %v13467_v56 = vld [vmem:[%s16942_s1 + $0xd8] sm:$0xff]  ;;  %778 = vst [vmem:[#allocation2 + $0x7c] sm:$0xf] %v554_v20 }
 0x120   : > { %4940 = vmatmul.bf16.gmra.mxu1 %v11699_v15  ;;  %v916_v33 = vld [vmem:[#allocation2 + $0x70] sm:$0xf]  ;;  %v1162_v58 = vor.u32 %v1161_v35, %v1158_v32  ;;  %875 = vst [vmem:[#allocation4 + $0x2ac] sm:$0xf] %v843_v41  ;;  %v917_v9 = vld [vmem:[#allocation2 + $0x74] sm:$0x1]  ;;  %5074 = vmatpush.bf16.msrb.mxu3 %v13467_v56 }
 0x121   : > { %v1415_v2 = vld [vmem:[#allocation2 + $0x70] sm:$0xf]  ;;  %v1165_v36 = vshll.u32 %v916_v33, 16  ;;  %v1169_v49 = vshrl.u32 %v916_v33, 16  ;;  %v1175_v57 = vshll.u32 %v917_v9, 16  ;;  %v11370_v15 = vrot.slane %v1429_v54, 9 }
 0x122   : > { %v1163_v44 = vrot.slane %v1162_v58, 4  ;;  %v1416_v59 = vld [vmem:[#allocation2 + $0x74] sm:$0x1]  ;;  %v1551_v60 = vrot.slane %v1415_v2, 5  ;;  %v11730_v50 = vld [vmem:[#allocation4 + $0x288] sm:$0xf] }
 0x123   : > { %v1167_v18 = vrot.slane %v1165_v36, 5  ;;  %v1171_v31 = vrot.slane %v1169_v49, 4  ;;  %v1554_v28 = vrot.slane %v1416_v59, 5  ;;  %v1177_v1 = vrot.slane %v1175_v57, 5  ;;  %v13418_v4 = vld [vmem:[#allocation4 + $0x3d0] sm:$0xf0]  ;;  %v14602_v0 = vpop.f32.mrf.mxu0 }
 0x124   : > { %v4906_v27 = vpop.f32.mrf.mxu1  ;;  %v1552_v3 = vsel %vm14209_vm11, %v11365_v38, %v1551_v60  ;;  %v1553_v14 = vrot.slane %v1551_v60, 4  ;;  %v14596_v5 = vpop.f32.mrf.mxu3  ;;  %v1431_v13 = vld [vmem:[#allocation2 + $0xb0] sm:$0x1]  ;;  %v11883_v61 = vor.u32 %v13418_v4, %v11882_v51  ;;  %v1588_v37 = vrot.slane %v1586_v21, 4  ;;  %781 = vst [vmem:[#allocation2 + $0x80] sm:$0x1] %v780_v42 }
 0x125   : > { %v4907_v52 = vadd.f32 %v4906_v27, %v4818_v48  ;;  %v1168_v62 = vsel %vm14183_vm10, %v1163_v44, %v1167_v18  ;;  %v1172_v7 = vor.u32 %v1171_v31, %v1167_v18  ;;  %1648 = vst [vmem:[#allocation4 + $0x290] sm:$0xf] %v1552_v3  ;;  %v13486_v22 = vld [vmem:[%s16942_s1 + $0x170] sm:$0xff]  ;;  %v1589_v25 = vrot.slane %v1431_v13, 5  ;;  %v13493_v33 = vld [vmem:[%s16942_s1 + $0x1a8] sm:$0xff]  ;;  %v13484_v18 = vld [vmem:[%s16942_s1 + $0x160] sm:$0xff] }
 0x126   : > { %1373 = vst [vmem:[#allocation4 + $0x28c] sm:$0xf] %v1168_v62  ;;  %v1555_v30 = vsel %vm14209_vm11, %v1553_v14, %v1554_v28  ;;  %v13494_v32 = vld [vmem:[%s16942_s1 + $0x1b0] sm:$0xff]  ;;  %v1587_v2 = vsel %vm14209_vm11, %v11370_v15, %v1586_v21  ;;  %5249 = vmatpush.bf16.msrb.mxu1 %v13486_v22  ;;  %v13485_v43 = vld [vmem:[%s16942_s1 + $0x168] sm:$0xff]  ;;  %v844_v9 = vld [vmem:[#allocation2 + $0x78] sm:$0xf] }
 0x127   : > { %v1173_v8 = vrot.slane %v1172_v7, 4  ;;  %1649 = vst [vmem:[#allocation4 + $0x2b4] sm:$0xf] %v1555_v30  ;;  %v13381_v35 = vld [vmem:[#allocation4 + $0x2a8] sm:$0xf0]  ;;  %v13466_v38 = vld [vmem:[%s16942_s1 + $0xd0] sm:$0xff]  ;;  %5338 = vmatpush.bf16.msrb.mxu2 %v13494_v32  ;;  %v1590_v51 = vsel %vm14209_vm11, %v1588_v37, %v1589_v25 }
 0x128   : > { %v4995_v11 = vpop.f32.mrf.mxu2  ;;  %v11731_v40 = vor.u32 %v13381_v35, %v11730_v50  ;;  %v317_v58 = vld [vmem:[%s14094_s19 + $0x50] sm:$0xf]  ;;  %v918_v36 = vld [vmem:[#allocation2 + $0x78] sm:$0xf]  ;;  %876 = vst [vmem:[#allocation4 + $0x2d0] sm:$0xf] %v844_v9  ;;  %5075 = vmatpush.bf16.msrb.mxu3 %v13466_v38 }
 0x129   : > { %v1178_v39 = vsel %vm14183_vm10, %v1173_v8, %v1177_v1  ;;  %v14622_v41 = vadd.f32 %v4995_v11, %v4907_v52  ;;  %v557_v47 = vshrl.u32 %v317_v58, 16  ;;  %v560_v48 = vshll.u32 %v317_v58, 16  ;;  %v1417_v49 = vld [vmem:[#allocation2 + $0x78] sm:$0xe]  ;;  %1658 = vst [vmem:[#allocation4 + $0x3f8] sm:$0xf] %v1587_v2 }
 0x12a   : > { %1374 = vst [vmem:[#allocation4 + $0x2b0] sm:$0xf] %v1178_v39  ;;  %5054 = vmatmul.bf16.gmra.mxu3 %v11883_v61  ;;  %4856 = vmatmul.bf16.gmra.mxu0 %v11731_v40  ;;  %v1180_v59 = vshrl.u32 %v918_v36, 16  ;;  %v1183_v60 = vshll.u32 %v918_v36, 16  ;;  %v11366_v28 = vrot.slane %v1417_v49, 9  ;;  %v4823_v61 = vadd.f32 %v14509_v45, %v14602_v0 }
 0x12b   : > { %v14642_v54 = vpop.f32.mrf.mxu0  ;;  %5339 = vmatpush.bf16.msrb.mxu2 %v13493_v33  ;;  %v14644_v24 = vrot.slane %v557_v47, 7  ;;  %1659 = vst [vmem:[#allocation4 + $0x41c] sm:$0xf] %v1590_v51  ;;  %5250 = vmatpush.bf16.msrb.mxu1 %v13485_v43  ;;  %v845_v14 = vld [vmem:[#allocation2 + $0x7c] sm:$0xf] }
 0x12c   : > { %v11738_v55 = vld [vmem:[#allocation4 + $0x290] sm:$0xf]  ;;  %v14635_v44 = vpop.f32.mrf.mxu1  ;;  %v14637_v57 = vpop.f32.mrf.mxu3  ;;  %v1182_v50 = vrot.slane %v1180_v59, 4  ;;  %v1185_v1 = vrot.slane %v1183_v60, 5  ;;  %v919_v4 = vld [vmem:[#allocation2 + $0x7c] sm:$0xf] }
 0x12d   : > { %v13377_v31 = vld [vmem:[#allocation4 + $0x28c] sm:$0xf]  ;;  %v318_v52 = vld [vmem:[%s14094_s19 + $0x54] sm:$0xf]  ;;  %877 = vst [vmem:[#allocation4 + $0x2f4] sm:$0xf] %v845_v14  ;;  %v562_v22 = vor.u32 %v560_v48, %v14644_v24 }
 0x12e   : > { %v13382_v27 = vld [vmem:[#allocation4 + $0x2b0] sm:$0xf0]  ;;  %v1418_v20 = vld [vmem:[#allocation2 + $0x7c] sm:$0xf]  ;;  %v920_v7 = vld [vmem:[#allocation2 + $0x80] sm:$0x1]  ;;  %v1186_v42 = vor.u32 %v1185_v1, %v1182_v50 }
 0x12f   : > { %v11739_v3 = vor.u32 %v13382_v27, %v11738_v55  ;;  %v1189_v12 = vshll.u32 %v919_v4, 16  ;;  %v1193_v13 = vshrl.u32 %v919_v4, 16  ;;  %v1199_v15 = vshll.u32 %v920_v7, 16  ;;  %v1419_v21 = vld [vmem:[#allocation2 + $0x80] sm:$0x1]  ;;  %5251 = vmatpush.bf16.msrb.mxu1 %v13484_v18  ;;  %v13483_v59 = vld [vmem:[%s16942_s1 + $0x158] sm:$0xff] }
 0x130   : > { %v14647_v62 = vpop.f32.mrf.mxu2  ;;  %v1558_v56 = vrot.slane %v1418_v20, 5  ;;  %v1187_v25 = vrot.slane %v1186_v42, 4  ;;  %v782_v11 = vld [vmem:[#allocation2 + $0x84] sm:$0xf]  ;;  %v11766_v37 = vld [vmem:[#allocation4 + $0x2d0] sm:$0xf] }
 0x131   : > { %v11732_v30 = vld [vmem:[#allocation4 + $0x2ac] sm:$0xf0]  ;;  %5034 = vmatmul.bf16.gmra.mxu2 %v11739_v3  ;;  %v1191_v32 = vrot.slane %v1189_v12, 5  ;;  %v1195_v35 = vrot.slane %v1193_v13, 4  ;;  %v1201_v38 = vrot.slane %v1199_v15, 5  ;;  %v1561_v33 = vrot.slane %v1419_v21, 5 }
 0x132   : > { %v11735_v8 = vor.u32 %v13377_v31, %v11732_v30  ;;  %v1559_v40 = vsel %vm14209_vm11, %v11366_v28, %v1558_v56  ;;  %v1560_v39 = vrot.slane %v1558_v56, 4  ;;  %v11918_v43 = vld [vmem:[#allocation4 + $0x3f8] sm:$0xf]  ;;  %v563_v48 = vrot.slane %v14644_v24, 4  ;;  %v13427_v51 = vld [vmem:[#allocation4 + $0x418] sm:$0xf0] }
 0x133   : > { %v1192_v58 = vsel %vm14183_vm10, %v1187_v25, %v1191_v32  ;;  %v1196_v2 = vor.u32 %v1195_v35, %v1191_v32  ;;  %1650 = vst [vmem:[#allocation4 + $0x2d8] sm:$0xf] %v1559_v40  ;;  %v565_v9 = vshrl.u32 %v318_v52, 16  ;;  %v568_v55 = vshll.u32 %v318_v52, 16  ;;  %v14664_v31 = vpop.f32.mrf.mxu0  ;;  %v786_v27 = vld [vmem:[#allocation2 + $0x8c] sm:$0x1]  ;;  %5252 = vmatpush.bf16.msrb.mxu1 %v13483_v59 }
 0x134   : > { %4945 = vmatmul.bf16.gmra.mxu1 %v11735_v8  ;;  %v4911_v0 = vpop.f32.mrf.mxu1  ;;  %v14656_v47 = vpop.f32.mrf.mxu3  ;;  %1375 = vst [vmem:[#allocation4 + $0x2d4] sm:$0xf] %v1192_v58  ;;  %v1562_v49 = vsel %vm14209_vm11, %v1560_v39, %v1561_v33  ;;  %v11919_v18 = vor.u32 %v13427_v51, %v11918_v43  ;;  %v13390_v24 = vld [vmem:[#allocation4 + $0x2f0] sm:$0xf0]  ;;  %v783_v50 = vsel %vm14172_vm9, %v562_v22, %v782_v11  ;;  %v1432_v1 = vld [vmem:[#allocation2 + $0xb4] sm:$0xe] }
 0x135   : > { %v4912_v36 = vadd.f32 %v4911_v0, %v4823_v61  ;;  %v1197_v60 = vrot.slane %v1196_v2, 4  ;;  %1651 = vst [vmem:[#allocation4 + $0x2fc] sm:$0xf] %v1562_v49  ;;  %v567_v28 = vrot.slane %v565_v9, 7  ;;  %v1433_v3 = vld [vmem:[#allocation2 + $0xb8] sm:$0xf]  ;;  %v11767_v14 = vor.u32 %v13390_v24, %v11766_v37 }
 0x136   : > { %784 = vst [vmem:[#allocation2 + $0x84] sm:$0xf] %v783_v50  ;;  %v1434_v42 = vld [vmem:[#allocation2 + $0xbc] sm:$0x1]  ;;  %v13465_v12 = vld [vmem:[%s16942_s1 + $0xc8] sm:$0xff]  ;;  %v11371_v30 = vrot.slane %v1432_v1, 9  ;;  %v4828_v24 = vadd.f32 %v14509_v45, %v14664_v31 }
 0x137   : > { %v1202_v4 = vsel %vm14183_vm10, %v1197_v60, %v1201_v38  ;;  %v570_v52 = vor.u32 %v568_v55, %v567_v28  ;;  %v572_v7 = vrot.slane %v567_v28, 4  ;;  %v1593_v61 = vrot.slane %v1433_v3, 5  ;;  %v13472_v21 = vld [vmem:[%s16942_s1 + $0x100] sm:$0xff]  ;;  %v13482_v25 = vld [vmem:[%s16942_s1 + $0x150] sm:$0xff]  ;;  %5076 = vmatpush.bf16.msrb.mxu3 %v13465_v12  ;;  %v13491_v33 = vld [vmem:[%s16942_s1 + $0x198] sm:$0xff] }
 0x138   : > { %v5000_v20 = vpop.f32.mrf.mxu2  ;;  %1376 = vst [vmem:[#allocation4 + $0x2f8] sm:$0xf] %v1202_v4  ;;  %v1596_v15 = vrot.slane %v1434_v42, 5  ;;  %v13492_v8 = vld [vmem:[%s16942_s1 + $0x1a0] sm:$0xff]  ;;  %5166 = vmatpush.bf16.msrb.mxu0 %v13472_v21  ;;  %5253 = vmatpush.bf16.msrb.mxu1 %v13482_v25  ;;  %v13481_v2 = vld [vmem:[%s16942_s1 + $0x148] sm:$0xff] }
 0x139   : > { %v14673_v13 = vadd.f32 %v5000_v20, %v4912_v36  ;;  %v571_v56 = vsel %vm14161_vm7, %v563_v48, %v570_v52  ;;  %v787_v22 = vsel %vm14289_vm13, %v572_v7, %v786_v27  ;;  %v1594_v35 = vsel %vm14209_vm11, %v11371_v30, %v1593_v61  ;;  %v13464_v37 = vld [vmem:[%s16942_s1 + $0xc0] sm:$0xff]  ;;  %5340 = vmatpush.bf16.msrb.mxu2 %v13492_v8  ;;  %v13490_v48 = vld [vmem:[%s16942_s1 + $0x190] sm:$0xff]  ;;  %v1662_v9 = vld [vmem:[#allocation2 + $0xc] sm:$0xf] }
 0x13a   : > { %5059 = vmatmul.bf16.gmra.mxu3 %v11919_v18  ;;  %4861 = vmatmul.bf16.gmra.mxu0 %v11767_v14  ;;  %v11774_v32 = vld [vmem:[#allocation4 + $0x2d8] sm:$0xf]  ;;  %785 = vst [vmem:[#allocation2 + $0x88] sm:$0xf] %v571_v56  ;;  %v1595_v11 = vrot.slane %v1593_v61, 4  ;;  %v13480_v1 = vld [vmem:[%s16942_s1 + $0x140] sm:$0xff] }
 0x13b   : > { %v13386_v38 = vld [vmem:[#allocation4 + $0x2d4] sm:$0xf]  ;;  %788 = vst [vmem:[#allocation2 + $0x8c] sm:$0x1] %v787_v22  ;;  %5077 = vmatpush.bf16.msrb.mxu3 %v13464_v37  ;;  %v14710_v28 = vpop.f32.mrf.mxu0  ;;  %v14717_v3 = vld [vmem:[#allocation2 + $0xc] sm:$0xf] }
 0x13c   : > { %v14693_v40 = vpop.f32.mrf.mxu1  ;;  %v14695_v39 = vpop.f32.mrf.mxu3  ;;  %v13391_v0 = vld [vmem:[#allocation4 + $0x2f8] sm:$0xf0]  ;;  %v1597_v58 = vsel %vm14209_vm11, %v1595_v11, %v1596_v15  ;;  %1660 = vst [vmem:[#allocation4 + $0x440] sm:$0xf] %v1594_v35  ;;  %5254 = vmatpush.bf16.msrb.mxu1 %v13481_v2  ;;  %v1663_v42 = vld [vmem:[#allocation2 + $0x10] sm:$0xf] }
 0x13d   : > { %v11775_v43 = vor.u32 %v13391_v0, %v11774_v32  ;;  %1661 = vst [vmem:[#allocation4 + $0x464] sm:$0xf] %v1597_v58  ;;  %v846_v36 = vld [vmem:[#allocation2 + $0x84] sm:$0xf]  ;;  %5341 = vmatpush.bf16.msrb.mxu2 %v13491_v33  ;;  %v13489_v7 = vld [vmem:[%s16942_s1 + $0x188] sm:$0xff]  ;;  %v1775_v25 = vshrl.u32 %v14717_v3, 16 }
 0x13e   : > { %v921_v49 = vld [vmem:[#allocation2 + $0x84] sm:$0xf]  ;;  %878 = vst [vmem:[#allocation4 + $0x318] sm:$0xf] %v846_v36 }
 0x13f   : > { %v1420_v51 = vld [vmem:[#allocation2 + $0x84] sm:$0xe]  ;;  %v11768_v55 = vld [vmem:[#allocation4 + $0x2f4] sm:$0xf0]  ;;  %v1204_v60 = vshrl.u32 %v921_v49, 16  ;;  %v1207_v18 = vshll.u32 %v921_v49, 16 }
 0x140   : > { %v14708_v59 = vpop.f32.mrf.mxu2  ;;  %v11771_v27 = vor.u32 %v13386_v38, %v11768_v55  ;;  %v11367_v50 = vrot.slane %v1420_v51, 9  ;;  %1694 = vst [vmem:[#allocation4 + $0xc] sm:$0xf] %v1662_v9  ;;  %5255 = vmatpush.bf16.msrb.mxu1 %v13480_v1 }
 0x141   : > { %5039 = vmatmul.bf16.gmra.mxu2 %v11775_v43  ;;  %v847_v14 = vld [vmem:[#allocation2 + $0x88] sm:$0xf]  ;;  %v1206_v20 = vrot.slane %v1204_v60, 4  ;;  %v1209_v52 = vrot.slane %v1207_v18, 5  ;;  %v13503_v43 = vld [vmem:[%s16942_s1 + $0x1f8] sm:$0xff] }
 0x142   : > { %v922_v4 = vld [vmem:[#allocation2 + $0x88] sm:$0xf]  ;;  %879 = vst [vmem:[#allocation4 + $0x33c] sm:$0xf] %v847_v14  ;;  %v923_v31 = vld [vmem:[#allocation2 + $0x8c] sm:$0x1]  ;;  %5342 = vmatpush.bf16.msrb.mxu2 %v13490_v48  ;;  %5426 = vmatpush.bf16.msra.mxu3 %v13503_v43 }
 0x143   : > { %v1213_v12 = vshll.u32 %v922_v4, 16  ;;  %v1217_v30 = vshrl.u32 %v922_v4, 16  ;;  %v1210_v15 = vor.u32 %v1209_v52, %v1206_v20  ;;  %v1223_v21 = vshll.u32 %v923_v31, 16  ;;  %v1421_v56 = vld [vmem:[#allocation2 + $0x88] sm:$0xf] }
 0x144   : > { %4950 = vmatmul.bf16.gmra.mxu1 %v11771_v27  ;;  %v4916_v61 = vpop.f32.mrf.mxu1  ;;  %v1422_v22 = vld [vmem:[#allocation2 + $0x8c] sm:$0x1]  ;;  %v14722_v8 = vpop.f32.mrf.mxu3  ;;  %v1565_v37 = vrot.slane %v1421_v56, 5  ;;  %v11954_v38 = vld [vmem:[#allocation4 + $0x440] sm:$0xf]  ;;  %v13488_v27 = vld [vmem:[%s16942_s1 + $0x180] sm:$0xff] }
 0x145   : > { %v4917_v32 = vadd.f32 %v4916_v61, %v4828_v24  ;;  %v1215_v35 = vrot.slane %v1213_v12, 5  ;;  %v1219_v11 = vrot.slane %v1217_v30, 4  ;;  %v1211_v33 = vrot.slane %v1210_v15, 4  ;;  %v13436_v2 = vld [vmem:[#allocation4 + $0x460] sm:$0xf0] }
 0x146   : > { %v1225_v0 = vrot.slane %v1223_v21, 5  ;;  %v1568_v58 = vrot.slane %v1422_v22, 5  ;;  %v11802_v9 = vld [vmem:[#allocation4 + $0x318] sm:$0xf]  ;;  %v1566_v48 = vsel %vm14209_vm11, %v11367_v50, %v1565_v37  ;;  %v1567_v49 = vrot.slane %v1565_v37, 4  ;;  %5343 = vmatpush.bf16.msrb.mxu2 %v13489_v7  ;;  %v13511_v21 = vld [vmem:[%s16942_s1 + $0x238] sm:$0xff] }
 0x147   : > { %v1220_v36 = vor.u32 %v1219_v11, %v1215_v35  ;;  %v11955_v51 = vor.u32 %v13436_v2, %v11954_v38  ;;  %1695 = vst [vmem:[#allocation4 + $0x30] sm:$0xf] %v1663_v42  ;;  %v1216_v55 = vsel %vm14183_vm10, %v1211_v33, %v1215_v35  ;;  %v1727_v18 = vld [vmem:[#allocation2 + $0x10] sm:$0xf]  ;;  %v1728_v14 = vld [vmem:[#allocation2 + $0x14] sm:$0x1]  ;;  %5515 = vmatpush.bf16.msra.mxu0 %v13511_v21 }
 0x148   : > { %1652 = vst [vmem:[#allocation4 + $0x320] sm:$0xf] %v1566_v48  ;;  %v5005_v60 = vpop.f32.mrf.mxu2  ;;  %v1569_v50 = vsel %vm14209_vm11, %v1567_v49, %v1568_v58  ;;  %v1777_v4 = vrot.slane %v1775_v25, 4  ;;  %v1778_v7 = vshll.u32 %v14717_v3, 16  ;;  %v1784_v42 = vshll.u32 %v1727_v18, 16 }
 0x149   : > { %v1221_v24 = vrot.slane %v1220_v36, 4  ;;  %1377 = vst [vmem:[#allocation4 + $0x31c] sm:$0xf] %v1216_v55  ;;  %v14737_v1 = vadd.f32 %v5005_v60, %v4917_v32  ;;  %v13399_v20 = vld [vmem:[#allocation4 + $0x338] sm:$0xf0]  ;;  %v4832_v52 = vpop.f32.mrf.mxu0  ;;  %v1788_v30 = vshrl.u32 %v1727_v18, 16 }
 0x14a   : > { %1653 = vst [vmem:[#allocation4 + $0x344] sm:$0xf] %v1569_v50  ;;  %5064 = vmatmul.bf16.gmra.mxu3 %v11955_v51  ;;  %v11803_v31 = vor.u32 %v13399_v20, %v11802_v9  ;;  %v2222_v61 = vld [vmem:[#allocation2 + $0xc] sm:$0xe]  ;;  %v2223_v15 = vld [vmem:[#allocation2 + $0x10] sm:$0xf]  ;;  %5344 = vmatpush.bf16.msrb.mxu2 %v13488_v27  ;;  %v4833_v27 = vadd.f32 %v14509_v45, %v4832_v52 }
 0x14b   : > { %v1226_v12 = vsel %vm14183_vm10, %v1221_v24, %v1225_v0  ;;  %v1780_v22 = vrot.slane %v1778_v7, 5  ;;  %v1786_v25 = vrot.slane %v1784_v42, 5  ;;  %v1794_v32 = vshll.u32 %v1728_v14, 16  ;;  %v2224_v37 = vld [vmem:[#allocation2 + $0x14] sm:$0x1] }
 0x14c   : > { %1378 = vst [vmem:[#allocation4 + $0x340] sm:$0xf] %v1226_v12  ;;  %v14745_v56 = vpop.f32.mrf.mxu1  ;;  %v11372_v35 = vrot.slane %v2222_v61, 9  ;;  %4866 = vmatmul.bf16.gmra.mxu0 %v11803_v31  ;;  %v14747_v3 = vpop.f32.mrf.mxu3  ;;  %v1790_v11 = vrot.slane %v1788_v30, 4  ;;  %v2320_v38 = vrot.slane %v2223_v15, 5  ;;  %v2323_v58 = vrot.slane %v2224_v37, 5 }
 0x14d   : > { %v2495_v33 = vld [vmem:[#allocation2 + $0x18] sm:$0xf]  ;;  %v1781_v0 = vor.u32 %v1780_v22, %v1777_v4  ;;  %v2496_v2 = vld [vmem:[#allocation2 + $0x1c] sm:$0xf]  ;;  %v1796_v36 = vrot.slane %v1794_v32, 5 }
 0x14e   : > { %v1791_v9 = vor.u32 %v1790_v11, %v1786_v25  ;;  %v2321_v48 = vsel %vm14209_vm11, %v11372_v35, %v2320_v38  ;;  %v2322_v49 = vrot.slane %v2320_v38, 4  ;;  %2527 = vst [vmem:[#allocation4 + $0x18] sm:$0xf] %v2495_v33  ;;  %v13297_v24 = vld [vmem:[#allocation4 + $0xc] sm:$0xf]  ;;  %v4873_v38 = vadd.f32 %v14509_v45, %v14553_v34 }
 0x14f   : > { %v11810_v43 = vld [vmem:[#allocation4 + $0x320] sm:$0xf]  ;;  %v1782_v55 = vrot.slane %v1781_v0, 4  ;;  %2462 = vst [vmem:[#allocation4 + $0x14] sm:$0xf] %v2321_v48 }
 0x150   : > { %v13395_v51 = vld [vmem:[#allocation4 + $0x31c] sm:$0xf]  ;;  %v14751_v18 = vpop.f32.mrf.mxu2  ;;  %v11416_v50 = vld [vmem:[#allocation4 + $0x2c] sm:$0xf0]  ;;  %v1792_v14 = vrot.slane %v1791_v9, 4  ;;  %v2324_v4 = vsel %vm14209_vm11, %v2322_v49, %v2323_v58 }
 0x151   : > { %v13400_v60 = vld [vmem:[#allocation4 + $0x340] sm:$0xf0]  ;;  %2528 = vst [vmem:[#allocation4 + $0x3c] sm:$0xf] %v2496_v2  ;;  %v1787_v7 = vsel %vm14183_vm10, %v1782_v55, %v1786_v25  ;;  %v1664_v42 = vld [vmem:[#allocation2 + $0x18] sm:$0xf]  ;;  %v14760_v21 = vpop.f32.mrf.mxu0  ;;  %v11419_v33 = vor.u32 %v13297_v24, %v11416_v50 }
 0x152   : > { %v11811_v20 = vor.u32 %v13400_v60, %v11810_v43  ;;  %2463 = vst [vmem:[#allocation4 + $0x38] sm:$0xf] %v2324_v4  ;;  %v1665_v31 = vld [vmem:[#allocation2 + $0x1c] sm:$0xf]  ;;  %v1797_v30 = vsel %vm14183_vm10, %v1792_v14, %v1796_v36  ;;  %v1729_v52 = vld [vmem:[#allocation2 + $0x18] sm:$0xf] }
 0x153   : > { %v11804_v12 = vld [vmem:[#allocation4 + $0x33c] sm:$0xf0]  ;;  %2190 = vst [vmem:[#allocation4 + $0x10] sm:$0xf] %v1787_v7  ;;  %v1730_v22 = vld [vmem:[#allocation2 + $0x1c] sm:$0xf] }
 0x154   : > { %v11807_v61 = vor.u32 %v13395_v51, %v11804_v12  ;;  %5044 = vmatmul.bf16.gmra.mxu2 %v11811_v20  ;;  %v4921_v15 = vpop.f32.mrf.mxu1  ;;  %2191 = vst [vmem:[#allocation4 + $0x34] sm:$0xf] %v1797_v30  ;;  %v1731_v32 = vld [vmem:[#allocation2 + $0x20] sm:$0x1]  ;;  %v1799_v25 = vshrl.u32 %v1729_v52, 16  ;;  %v1802_v11 = vshll.u32 %v1729_v52, 16 }
 0x155   : > { %v4922_v35 = vadd.f32 %v4921_v15, %v4833_v27  ;;  %1696 = vst [vmem:[#allocation4 + $0x54] sm:$0xf] %v1664_v42  ;;  %v1808_v37 = vshll.u32 %v1730_v22, 16  ;;  %v1812_v0 = vshrl.u32 %v1730_v22, 16  ;;  %v1818_v58 = vshll.u32 %v1731_v32, 16 }
 0x156   : > { %4955 = vmatmul.bf16.gmra.mxu1 %v11807_v61  ;;  %1697 = vst [vmem:[#allocation4 + $0x78] sm:$0xf] %v1665_v31  ;;  %v1801_v43 = vrot.slane %v1799_v25, 4  ;;  %v1804_v9 = vrot.slane %v1802_v11, 5  ;;  %v2225_v51 = vld [vmem:[#allocation2 + $0x18] sm:$0xe] }
 0x157   : > { %v4961_v2 = vpop.f32.mrf.mxu3  ;;  %v1810_v36 = vrot.slane %v1808_v37, 5  ;;  %v1814_v49 = vrot.slane %v1812_v0, 4  ;;  %v1820_v60 = vrot.slane %v1818_v58, 5  ;;  %v2226_v27 = vld [vmem:[#allocation2 + $0x1c] sm:$0xf]  ;;  %v11373_v34 = vrot.slane %v2225_v51, 9 }
 0x158   : > { %v14764_v48 = vadd.f32 %v4961_v2, %v4873_v38  ;;  %v1805_v55 = vor.u32 %v1804_v9, %v1801_v43  ;;  %v2227_v14 = vld [vmem:[#allocation2 + $0x20] sm:$0x1]  ;;  %v2327_v24 = vrot.slane %v2226_v27, 5  ;;  %v2497_v50 = vld [vmem:[#allocation2 + $0x24] sm:$0xf] }
 0x159   : > { %v1815_v45 = vor.u32 %v1814_v49, %v1810_v36  ;;  %v11430_v42 = vld [vmem:[#allocation4 + $0x18] sm:$0xf]  ;;  %v2330_v12 = vrot.slane %v2227_v14, 5  ;;  %v13303_v61 = vld [vmem:[#allocation4 + $0x38] sm:$0xf0] }
 0x15a   : > { %5078 = vmatmul.bf16.vlgmr.msrb.gmra.mxu3 %v11419_v33  ;;  %v11422_v4 = vld [vmem:[#allocation4 + $0x10] sm:$0xf]  ;;  %v1806_v31 = vrot.slane %v1805_v55, 4  ;;  %v2328_v22 = vsel %vm14209_vm11, %v11373_v34, %v2327_v24  ;;  %2529 = vst [vmem:[#allocation4 + $0x60] sm:$0xf] %v2497_v50  ;;  %v2329_v38 = vrot.slane %v2327_v24, 4  ;;  %v11431_v27 = vor.u32 %v13303_v61, %v11430_v42 }
 0x15b   : > { %v13302_v20 = vld [vmem:[#allocation4 + $0x30] sm:$0xf0]  ;;  %v5010_v7 = vpop.f32.mrf.mxu2  ;;  %v1816_v15 = vrot.slane %v1815_v45, 4  ;;  %v11424_v25 = vld [vmem:[#allocation4 + $0x34] sm:$0xf0] }
 0x15c   : > { %v11423_v30 = vor.u32 %v13302_v20, %v11422_v4  ;;  %v14766_v52 = vadd.f32 %v5010_v7, %v4922_v35  ;;  %v13298_v32 = vld [vmem:[#allocation4 + $0x14] sm:$0xf]  ;;  %v14770_v11 = vpop.f32.mrf.mxu1  ;;  %v1811_v37 = vsel %vm14183_vm10, %v1806_v31, %v1810_v36  ;;  %2464 = vst [vmem:[#allocation4 + $0x5c] sm:$0xf] %v2328_v22  ;;  %v2498_v33 = vld [vmem:[#allocation2 + $0x28] sm:$0xf]  ;;  %v2331_v49 = vsel %vm14209_vm11, %v2329_v38, %v2330_v12 }
 0x15d   : > { %v14777_v35 = vld [vmem:[%s16943_s2] ss:$0 sm:$0xff]  ;;  %v1821_v2 = vsel %vm14183_vm10, %v1816_v15, %v1820_v60  ;;  %2192 = vst [vmem:[#allocation4 + $0x58] sm:$0xf] %v1811_v37  ;;  %v1666_v43 = vld [vmem:[#allocation2 + $0x24] sm:$0xf]  ;;  %v11427_v20 = vor.u32 %v13298_v32, %v11424_v25 }
 0x15e   : > { %v4875_v0 = vadd.f32 %v14777_v35, %v14581_v16  ;;  %5167 = vmatmul.bf16.vlgmr.msrb.gmra.mxu0 %v11423_v30  ;;  %v4837_v58 = vpop.f32.mrf.mxu0  ;;  %v1667_v9 = vld [vmem:[#allocation2 + $0x28] sm:$0xf]  ;;  %2193 = vst [vmem:[#allocation4 + $0x7c] sm:$0xf] %v1821_v2  ;;  %v1732_v51 = vld [vmem:[#allocation2 + $0x24] sm:$0xf]  ;;  %v4878_v25 = vadd.f32 %v14777_v35, %v14596_v5 }
 0x15f   : > { %v4963_v36 = vpop.f32.mrf.mxu3  ;;  %v1733_v55 = vld [vmem:[#allocation2 + $0x28] sm:$0xf]  ;;  %2465 = vst [vmem:[#allocation4 + $0x80] sm:$0xf] %v2331_v49  ;;  %v1734_v16 = vld [vmem:[#allocation2 + $0x2c] sm:$0x1]  ;;  %v4838_v22 = vadd.f32 %v14777_v35, %v4837_v58 }
 0x160   : > { %v14785_v14 = vadd.f32 %v4963_v36, %v4875_v0  ;;  %v1823_v4 = vshrl.u32 %v1732_v51, 16  ;;  %v1826_v45 = vshll.u32 %v1732_v51, 16  ;;  %v13306_v34 = vld [vmem:[#allocation4 + $0x54] sm:$0xf]  ;;  %2530 = vst [vmem:[#allocation4 + $0x84] sm:$0xf] %v2498_v33 }
 0x161   : > { %v1832_v60 = vshll.u32 %v1733_v55, 16  ;;  %v1836_v24 = vshrl.u32 %v1733_v55, 16  ;;  %v1842_v50 = vshll.u32 %v1734_v16, 16  ;;  %1698 = vst [vmem:[#allocation4 + $0x9c] sm:$0xf] %v1666_v43  ;;  %v13502_v51 = vld [vmem:[%s16942_s1 + $0x1f0] sm:$0xff] }
 0x162   : > { %v1825_v7 = vrot.slane %v1823_v4, 4  ;;  %v1828_v31 = vrot.slane %v1826_v45, 5  ;;  %v2228_v30 = vld [vmem:[#allocation2 + $0x24] sm:$0xe]  ;;  %v11452_v15 = vld [vmem:[#allocation4 + $0x74] sm:$0xf0]  ;;  %5427 = vmatpush.bf16.msra.mxu3 %v13502_v51 }
 0x163   : > { %v14787_v12 = vpop.f32.mrf.mxu2  ;;  %1699 = vst [vmem:[#allocation4 + $0xc0] sm:$0xf] %v1667_v9  ;;  %v1834_v42 = vrot.slane %v1832_v60, 5  ;;  %v1838_v61 = vrot.slane %v1836_v24, 4  ;;  %v2229_v38 = vld [vmem:[#allocation2 + $0x28] sm:$0xf]  ;;  %v11455_v43 = vor.u32 %v13306_v34, %v11452_v15 }
 0x164   : > { %16960 = vst [vmem:[#allocation8_spill] sm:$0xff] %v14787_v12  ;;  %5345 = vmatmul.bf16.vlgmr.msrb.gmra.mxu2 %v11431_v27  ;;  %v1829_v37 = vor.u32 %v1828_v31, %v1825_v7  ;;  %v11374_v33 = vrot.slane %v2228_v30, 9  ;;  %v1844_v2 = vrot.slane %v1842_v50, 5  ;;  %v2230_v36 = vld [vmem:[#allocation2 + $0x2c] sm:$0x1]  ;;  %v2334_v32 = vrot.slane %v2229_v38, 5 }
 0x165   : > { %v1839_v0 = vor.u32 %v1838_v61, %v1834_v42  ;;  %v13510_v58 = vld [vmem:[%s16942_s1 + $0x230] sm:$0xff]  ;;  %v11458_v27 = vld [vmem:[#allocation4 + $0x58] sm:$0xf]  ;;  %v13311_v16 = vld [vmem:[#allocation4 + $0x78] sm:$0xf0]  ;;  %v2337_v34 = vrot.slane %v2230_v36, 5 }
 0x166   : > { %5256 = vmatmul.bf16.vlgmr.msrb.gmra.mxu1 %v11427_v20  ;;  %v14792_v49 = vpop.f32.mrf.mxu0  ;;  %v1830_v9 = vrot.slane %v1829_v37, 4  ;;  %v2335_v5 = vsel %vm14209_vm11, %v11374_v33, %v2334_v32  ;;  %v2499_v20 = vld [vmem:[#allocation2 + $0x30] sm:$0xf]  ;;  %v2336_v31 = vrot.slane %v2334_v32, 4  ;;  %5516 = vmatpush.bf16.msra.mxu0 %v13510_v58  ;;  %v11459_v30 = vor.u32 %v13311_v16, %v11458_v27  ;;  %v2500_v15 = vld [vmem:[#allocation2 + $0x34] sm:$0xf] }
 0x167   : > { %16961 = vst [vmem:[#allocation9_spill] sm:$0xff] %v14792_v49  ;;  %v4966_v4 = vpop.f32.mrf.mxu3  ;;  %v1840_v45 = vrot.slane %v1839_v0, 4  ;;  %v1735_v61 = vld [vmem:[#allocation2 + $0x30] sm:$0xf]  ;;  %v13312_v37 = vld [vmem:[#allocation4 + $0x80] sm:$0xf0] }
 0x168   : > { %v4926_v55 = vpop.f32.mrf.mxu1  ;;  %v14802_v24 = vadd.f32 %v4966_v4, %v4878_v25  ;;  %v1835_v50 = vsel %vm14183_vm10, %v1830_v9, %v1834_v42  ;;  %2466 = vst [vmem:[#allocation4 + $0xa4] sm:$0xf] %v2335_v5  ;;  %v2338_v38 = vsel %vm14209_vm11, %v2336_v31, %v2337_v34  ;;  %v1668_v42 = vld [vmem:[#allocation2 + $0x30] sm:$0xf]  ;;  %v1669_v33 = vld [vmem:[#allocation2 + $0x34] sm:$0xf] }
 0x169   : > { %v4927_v60 = vadd.f32 %v4926_v55, %v4838_v22  ;;  %v1845_v7 = vsel %vm14183_vm10, %v1840_v45, %v1844_v2  ;;  %2194 = vst [vmem:[#allocation4 + $0xa0] sm:$0xf] %v1835_v50  ;;  %v11466_v22 = vld [vmem:[#allocation4 + $0x60] sm:$0xf]  ;;  %v13307_v0 = vld [vmem:[#allocation4 + $0x5c] sm:$0xf]  ;;  %v4880_v55 = vadd.f32 %v14777_v35, %v14637_v57 }
 0x16a   : > { %5083 = vmatmul.bf16.gmra.mxu3 %v11455_v43  ;;  %2195 = vst [vmem:[#allocation4 + $0xc4] sm:$0xf] %v1845_v7  ;;  %v11460_v36 = vld [vmem:[#allocation4 + $0x7c] sm:$0xf0]  ;;  %v1736_v32 = vld [vmem:[#allocation2 + $0x34] sm:$0xf] }
 0x16b   : > { %2531 = vst [vmem:[#allocation4 + $0xa8] sm:$0xf] %v2499_v20  ;;  %v1737_v25 = vld [vmem:[#allocation2 + $0x38] sm:$0x1]  ;;  %v1847_v43 = vshrl.u32 %v1735_v61, 16  ;;  %v1850_v51 = vshll.u32 %v1735_v61, 16  ;;  %v11467_v20 = vor.u32 %v13312_v37, %v11466_v22 }
 0x16c   : > { %v5015_v2 = vpop.f32.mrf.mxu2  ;;  %2467 = vst [vmem:[#allocation4 + $0xc8] sm:$0xf] %v2338_v38  ;;  %v1856_v58 = vshll.u32 %v1736_v32, 16  ;;  %v1860_v16 = vshrl.u32 %v1736_v32, 16  ;;  %v1866_v4 = vshll.u32 %v1737_v25, 16  ;;  %v11463_v38 = vor.u32 %v13307_v0, %v11460_v36 }
 0x16d   : > { %v14810_v9 = vadd.f32 %v5015_v2, %v4927_v60  ;;  %2532 = vst [vmem:[#allocation4 + $0xcc] sm:$0xf] %v2500_v15  ;;  %v2231_v45 = vld [vmem:[#allocation2 + $0x30] sm:$0xe]  ;;  %v1849_v50 = vrot.slane %v1847_v43, 4  ;;  %v1852_v60 = vrot.slane %v1850_v51, 5 }
 0x16e   : > { %5172 = vmatmul.bf16.gmra.mxu0 %v11459_v30  ;;  %v4842_v27 = vpop.f32.mrf.mxu0  ;;  %1700 = vst [vmem:[#allocation4 + $0xe4] sm:$0xf] %v1668_v42  ;;  %v1858_v31 = vrot.slane %v1856_v58, 5  ;;  %v1862_v15 = vrot.slane %v1860_v16, 4  ;;  %v2232_v61 = vld [vmem:[#allocation2 + $0x34] sm:$0xf] }
 0x16f   : > { %16962 = vst [vmem:[#allocation10_spill] sm:$0xff] %v14810_v9  ;;  %v4968_v34 = vpop.f32.mrf.mxu3  ;;  %v1853_v57 = vor.u32 %v1852_v60, %v1849_v50  ;;  %v2233_v30 = vld [vmem:[#allocation2 + $0x38] sm:$0x1]  ;;  %v11375_v2 = vrot.slane %v2231_v45, 9  ;;  %v1868_v32 = vrot.slane %v1866_v4, 5  ;;  %v2341_v25 = vrot.slane %v2232_v61, 5 }
 0x170   : > { %v14814_v5 = vpop.f32.mrf.mxu1  ;;  %1701 = vst [vmem:[#allocation4 + $0x108] sm:$0xf] %v1669_v33  ;;  %v14816_v7 = vadd.f32 %v4968_v34, %v4880_v55  ;;  %v1863_v42 = vor.u32 %v1862_v15, %v1858_v31  ;;  %v2344_v9 = vrot.slane %v2233_v30, 5  ;;  %v2501_v49 = vld [vmem:[#allocation2 + $0x3c] sm:$0xf]  ;;  %v4843_v22 = vadd.f32 %v14777_v35, %v4842_v27 }
 0x171   : > { %16963 = vst [vmem:[#allocation11_spill] sm:$0xff] %v14814_v5  ;;  %v13315_v5 = vld [vmem:[#allocation4 + $0x9c] sm:$0xf]  ;;  %v11488_v12 = vld [vmem:[#allocation4 + $0xbc] sm:$0xf0]  ;;  %v1854_v33 = vrot.slane %v1853_v57, 4  ;;  %v2342_v0 = vsel %vm14209_vm11, %v11375_v2, %v2341_v25 }
 0x172   : > { %v1864_v37 = vrot.slane %v1863_v42, 4  ;;  %v2343_v36 = vrot.slane %v2341_v25, 4  ;;  %2533 = vst [vmem:[#allocation4 + $0xf0] sm:$0xf] %v2501_v49  ;;  %v11494_v51 = vld [vmem:[#allocation4 + $0xa0] sm:$0xf]  ;;  %v11491_v4 = vor.u32 %v13315_v5, %v11488_v12 }
 0x173   : > { %v13320_v58 = vld [vmem:[#allocation4 + $0xc0] sm:$0xf0]  ;;  %v1859_v55 = vsel %vm14183_vm10, %v1854_v33, %v1858_v31  ;;  %2468 = vst [vmem:[#allocation4 + $0xec] sm:$0xf] %v2342_v0  ;;  %v1738_v16 = vld [vmem:[#allocation2 + $0x3c] sm:$0xf] }
 0x174   : > { %5350 = vmatmul.bf16.gmra.mxu2 %v11467_v20  ;;  %v14818_v43 = vpop.f32.mrf.mxu2  ;;  %v1869_v45 = vsel %vm14183_vm10, %v1864_v37, %v1868_v32  ;;  %2196 = vst [vmem:[#allocation4 + $0xe8] sm:$0xf] %v1859_v55  ;;  %v2345_v27 = vsel %vm14209_vm11, %v2343_v36, %v2344_v9  ;;  %v2502_v34 = vld [vmem:[#allocation2 + $0x40] sm:$0xf]  ;;  %v1740_v49 = vld [vmem:[#allocation2 + $0x44] sm:$0x1]  ;;  %v4883_v9 = vadd.f32 %v14777_v35, %v14656_v47 }
 0x175   : > { %v1739_v50 = vld [vmem:[#allocation2 + $0x40] sm:$0xf]  ;;  %2197 = vst [vmem:[#allocation4 + $0x10c] sm:$0xf] %v1869_v45  ;;  %v1871_v20 = vshrl.u32 %v1738_v16, 16  ;;  %v1874_v15 = vshll.u32 %v1738_v16, 16  ;;  %v11495_v42 = vor.u32 %v13320_v58, %v11494_v51 }
 0x176   : > { %5261 = vmatmul.bf16.gmra.mxu1 %v11463_v38  ;;  %2469 = vst [vmem:[#allocation4 + $0x110] sm:$0xf] %v2345_v27  ;;  %v1880_v31 = vshll.u32 %v1739_v50, 16  ;;  %v1884_v57 = vshrl.u32 %v1739_v50, 16  ;;  %v1890_v38 = vshll.u32 %v1740_v49, 16  ;;  %v14829_v12 = vpop.f32.mrf.mxu0 }
 0x177   : > { %2534 = vst [vmem:[#allocation4 + $0x114] sm:$0xf] %v2502_v34  ;;  %v1873_v5 = vrot.slane %v1871_v20, 4  ;;  %v1876_v30 = vrot.slane %v1874_v15, 5  ;;  %v2234_v2 = vld [vmem:[#allocation2 + $0x3c] sm:$0xe] }
 0x178   : > { %v4931_v60 = vpop.f32.mrf.mxu1  ;;  %v1882_v32 = vrot.slane %v1880_v31, 5  ;;  %v1886_v25 = vrot.slane %v1884_v57, 4  ;;  %v2235_v33 = vld [vmem:[#allocation2 + $0x40] sm:$0xf]  ;;  %v1670_v0 = vld [vmem:[#allocation2 + $0x3c] sm:$0xf] }
 0x179   : > { %v4932_v61 = vadd.f32 %v4931_v60, %v4843_v22  ;;  %v11502_v22 = vld [vmem:[#allocation4 + $0xa8] sm:$0xf]  ;;  %v1671_v36 = vld [vmem:[#allocation2 + $0x40] sm:$0xf]  ;;  %v1877_v55 = vor.u32 %v1876_v30, %v1873_v5  ;;  %v11376_v16 = vrot.slane %v2234_v2, 9  ;;  %v1892_v34 = vrot.slane %v1890_v38, 5 }
 0x17a   : > { %5088 = vmatmul.bf16.gmra.mxu3 %v11491_v4  ;;  %1702 = vst [vmem:[#allocation4 + $0x12c] sm:$0xf] %v1670_v0  ;;  %v1887_v27 = vor.u32 %v1886_v25, %v1882_v32  ;;  %v2236_v50 = vld [vmem:[#allocation2 + $0x44] sm:$0x1]  ;;  %v13321_v49 = vld [vmem:[#allocation4 + $0xc8] sm:$0xf0] }
 0x17b   : > { %v4971_v37 = vpop.f32.mrf.mxu3  ;;  %1703 = vst [vmem:[#allocation4 + $0x150] sm:$0xf] %v1671_v36  ;;  %v1878_v47 = vrot.slane %v1877_v55, 4  ;;  %v2348_v51 = vrot.slane %v2235_v33, 5  ;;  %v2351_v20 = vrot.slane %v2236_v50, 5  ;;  %v11503_v30 = vor.u32 %v13321_v49, %v11502_v22 }
 0x17c   : > { %v14833_v45 = vadd.f32 %v4971_v37, %v4883_v9  ;;  %v1888_v4 = vrot.slane %v1887_v27, 4  ;;  %v13316_v15 = vld [vmem:[#allocation4 + $0xa4] sm:$0xf]  ;;  %v11496_v31 = vld [vmem:[#allocation4 + $0xc4] sm:$0xf0]  ;;  %v4885_v33 = vadd.f32 %v14777_v35, %v14695_v39 }
 0x17d   : > { %v5020_v60 = vpop.f32.mrf.mxu2  ;;  %v1883_v57 = vsel %vm14183_vm10, %v1878_v47, %v1882_v32  ;;  %v2349_v5 = vsel %vm14209_vm11, %v11376_v16, %v2348_v51  ;;  %v2350_v38 = vrot.slane %v2348_v51, 4  ;;  %v13324_v9 = vld [vmem:[#allocation4 + $0xe4] sm:$0xf]  ;;  %v2504_v25 = vld [vmem:[#allocation2 + $0x4c] sm:$0xf]  ;;  %v11499_v32 = vor.u32 %v13316_v15, %v11496_v31 }
 0x17e   : > { %5177 = vmatmul.bf16.gmra.mxu0 %v11495_v42  ;;  %v14835_v58 = vadd.f32 %v5020_v60, %v4932_v61  ;;  %v1893_v2 = vsel %vm14183_vm10, %v1888_v4, %v1892_v34  ;;  %2198 = vst [vmem:[#allocation4 + $0x130] sm:$0xf] %v1883_v57  ;;  %v2503_v42 = vld [vmem:[#allocation2 + $0x48] sm:$0xf]  ;;  %v1742_v22 = vld [vmem:[#allocation2 + $0x4c] sm:$0xf] }
 0x17f   : > { %2199 = vst [vmem:[#allocation4 + $0x154] sm:$0xf] %v1893_v2  ;;  %v2352_v61 = vsel %vm14209_vm11, %v2350_v38, %v2351_v20  ;;  %v1741_v0 = vld [vmem:[#allocation2 + $0x48] sm:$0xf]  ;;  %v11524_v16 = vld [vmem:[#allocation4 + $0x104] sm:$0xf0] }
 0x180   : > { %16964 = vst [vmem:[#allocation12_spill] sm:$0xff] %v14835_v58  ;;  %v14847_v37 = vpop.f32.mrf.mxu1  ;;  %v1895_v27 = vshrl.u32 %v1741_v0, 16  ;;  %v1898_v34 = vshll.u32 %v1741_v0, 16  ;;  %v11530_v60 = vld [vmem:[#allocation4 + $0xe8] sm:$0xf]  ;;  %v1904_v49 = vshll.u32 %v1742_v22, 16  ;;  %v11527_v20 = vor.u32 %v13324_v9, %v11524_v16 }
 0x181   : > { %16965 = vst [vmem:[#allocation13_spill] sm:$0xff] %v14847_v37  ;;  %v1908_v47 = vshrl.u32 %v1742_v22, 16  ;;  %v13329_v39 = vld [vmem:[#allocation4 + $0x108] sm:$0xf0]  ;;  %v13501_v15 = vld [vmem:[%s16942_s1 + $0x1e8] sm:$0xff] }
 0x182   : > { %2470 = vst [vmem:[#allocation4 + $0x134] sm:$0xf] %v2349_v5  ;;  %v4847_v55 = vpop.f32.mrf.mxu0  ;;  %v1897_v51 = vrot.slane %v1895_v27, 4  ;;  %v1900_v4 = vrot.slane %v1898_v34, 5  ;;  %v13509_v31 = vld [vmem:[%s16942_s1 + $0x228] sm:$0xff]  ;;  %v1906_v5 = vrot.slane %v1904_v49, 5  ;;  %5428 = vmatpush.bf16.msra.mxu3 %v13501_v15  ;;  %v11531_v9 = vor.u32 %v13329_v39, %v11530_v60 }
 0x183   : > { %v4973_v36 = vpop.f32.mrf.mxu3  ;;  %2471 = vst [vmem:[#allocation4 + $0x158] sm:$0xf] %v2352_v61  ;;  %v1743_v57 = vld [vmem:[#allocation2 + $0x50] sm:$0x1]  ;;  %v1910_v38 = vrot.slane %v1908_v47, 4  ;;  %5517 = vmatpush.bf16.msra.mxu0 %v13509_v31  ;;  %v4848_v16 = vadd.f32 %v14777_v35, %v4847_v55  ;;  %v4888_v60 = vadd.f32 %v14777_v35, %v14722_v8 }
 0x184   : > { %5355 = vmatmul.bf16.gmra.mxu2 %v11503_v30  ;;  %v14849_v50 = vadd.f32 %v4973_v36, %v4885_v33  ;;  %2535 = vst [vmem:[#allocation4 + $0x138] sm:$0xf] %v2503_v42  ;;  %v1901_v30 = vor.u32 %v1900_v4, %v1897_v51  ;;  %v1914_v2 = vshll.u32 %v1743_v57, 16  ;;  %v2238_v61 = vld [vmem:[#allocation2 + $0x4c] sm:$0xf] }
 0x185   : > { %2536 = vst [vmem:[#allocation4 + $0x15c] sm:$0xf] %v2504_v25  ;;  %v1911_v42 = vor.u32 %v1910_v38, %v1906_v5  ;;  %v2237_v25 = vld [vmem:[#allocation2 + $0x48] sm:$0xe]  ;;  %v2239_v33 = vld [vmem:[#allocation2 + $0x50] sm:$0x1]  ;;  %v14857_v36 = vpop.f32.mrf.mxu2 }
 0x186   : > { %5266 = vmatmul.bf16.gmra.mxu1 %v11499_v32  ;;  %v1902_v32 = vrot.slane %v1901_v30, 4  ;;  %v1916_v0 = vrot.slane %v1914_v2, 5  ;;  %v11377_v22 = vrot.slane %v2237_v25, 9  ;;  %16966 = vst [vmem:[#allocation14_spill] sm:$0xff] %v14857_v36  ;;  %v2355_v34 = vrot.slane %v2238_v61, 5 }
 0x187   : > { %v1912_v27 = vrot.slane %v1911_v42, 4  ;;  %v2358_v49 = vrot.slane %v2239_v33, 5  ;;  %v1672_v51 = vld [vmem:[#allocation2 + $0x48] sm:$0xf]  ;;  %v1673_v4 = vld [vmem:[#allocation2 + $0x4c] sm:$0xf] }
 0x188   : > { %v1907_v15 = vsel %vm14183_vm10, %v1902_v32, %v1906_v5  ;;  %1704 = vst [vmem:[#allocation4 + $0x174] sm:$0xf] %v1672_v51  ;;  %v2357_v31 = vrot.slane %v2355_v34, 4  ;;  %v13330_v38 = vld [vmem:[#allocation4 + $0x110] sm:$0xf0]  ;;  %v2356_v30 = vsel %vm14209_vm11, %v11377_v22, %v2355_v34 }
 0x189   : > { %v1917_v39 = vsel %vm14183_vm10, %v1912_v27, %v1916_v0  ;;  %1705 = vst [vmem:[#allocation4 + $0x198] sm:$0xf] %v1673_v4  ;;  %v13325_v5 = vld [vmem:[#allocation4 + $0xec] sm:$0xf]  ;;  %v11532_v42 = vld [vmem:[#allocation4 + $0x10c] sm:$0xf0] }
 0x18a   : > { %5093 = vmatmul.bf16.gmra.mxu3 %v11527_v20  ;;  %v4849_v47 = vpop.f32.mrf.mxu0  ;;  %v11538_v20 = vld [vmem:[#allocation4 + $0xf0] sm:$0xf]  ;;  %2200 = vst [vmem:[#allocation4 + $0x178] sm:$0xf] %v1907_v15  ;;  %v2359_v8 = vsel %vm14209_vm11, %v2357_v31, %v2358_v49  ;;  %v13333_v33 = vld [vmem:[#allocation4 + $0x12c] sm:$0xf]  ;;  %v11535_v27 = vor.u32 %v13325_v5, %v11532_v42  ;;  %v4890_v49 = vadd.f32 %v14777_v35, %v14747_v3 }
 0x18b   : > { %2201 = vst [vmem:[#allocation4 + $0x19c] sm:$0xf] %v1917_v39  ;;  %v11539_v25 = vor.u32 %v13330_v38, %v11538_v20  ;;  %v2505_v32 = vld [vmem:[#allocation2 + $0x54] sm:$0xf]  ;;  %v2506_v0 = vld [vmem:[#allocation2 + $0x58] sm:$0xf] }
 0x18c   : > { %2472 = vst [vmem:[#allocation4 + $0x17c] sm:$0xf] %v2356_v30  ;;  %v1744_v22 = vld [vmem:[#allocation2 + $0x54] sm:$0xf]  ;;  %v11566_v20 = vld [vmem:[#allocation4 + $0x130] sm:$0xf] }
 0x18d   : > { %v4936_v57 = vpop.f32.mrf.mxu1  ;;  %v4976_v55 = vpop.f32.mrf.mxu3  ;;  %2473 = vst [vmem:[#allocation4 + $0x1a0] sm:$0xf] %v2359_v8  ;;  %v1919_v34 = vshrl.u32 %v1744_v22, 16  ;;  %v1922_v51 = vshll.u32 %v1744_v22, 16  ;;  %v13338_v42 = vld [vmem:[#allocation4 + $0x150] sm:$0xf0] }
 0x18e   : > { %v4937_v2 = vadd.f32 %v4936_v57, %v4848_v16  ;;  %5182 = vmatmul.bf16.gmra.mxu0 %v11531_v9  ;;  %v14868_v61 = vadd.f32 %v4976_v55, %v4888_v60  ;;  %2537 = vst [vmem:[#allocation4 + $0x180] sm:$0xf] %v2505_v32  ;;  %v1745_v16 = vld [vmem:[#allocation2 + $0x58] sm:$0xf]  ;;  %v11560_v9 = vld [vmem:[#allocation4 + $0x14c] sm:$0xf0]  ;;  %v11567_v37 = vor.u32 %v13338_v42, %v11566_v20 }
 0x18f   : > { %2538 = vst [vmem:[#allocation4 + $0x1a4] sm:$0xf] %v2506_v0  ;;  %v1928_v60 = vshll.u32 %v1745_v16, 16  ;;  %v1932_v39 = vshrl.u32 %v1745_v16, 16  ;;  %v1921_v38 = vrot.slane %v1919_v34, 4  ;;  %v1924_v30 = vrot.slane %v1922_v51, 5 }
 0x190   : > { %v11563_v5 = vor.u32 %v13333_v33, %v11560_v9  ;;  %v1746_v32 = vld [vmem:[#allocation2 + $0x5c] sm:$0x1]  ;;  %v2241_v16 = vld [vmem:[#allocation2 + $0x58] sm:$0xf] }
 0x191   : > { %v1930_v0 = vrot.slane %v1928_v60, 5  ;;  %v1934_v3 = vrot.slane %v1932_v39, 4  ;;  %v1925_v22 = vor.u32 %v1924_v30, %v1921_v38  ;;  %v1938_v36 = vshll.u32 %v1746_v32, 16  ;;  %v1674_v39 = vld [vmem:[#allocation2 + $0x54] sm:$0xf] }
 0x192   : > { %v5025_v4 = vpop.f32.mrf.mxu2  ;;  %v4852_v15 = vpop.f32.mrf.mxu0  ;;  %v2362_v9 = vrot.slane %v2241_v16, 5  ;;  %1706 = vst [vmem:[#allocation4 + $0x1bc] sm:$0xf] %v1674_v39  ;;  %v13339_v32 = vld [vmem:[#allocation4 + $0x158] sm:$0xf0] }
 0x193   : > { %v14874_v31 = vadd.f32 %v5025_v4, %v4937_v2  ;;  %v1935_v2 = vor.u32 %v1934_v3, %v1930_v0  ;;  %v2240_v4 = vld [vmem:[#allocation2 + $0x54] sm:$0xe]  ;;  %v1926_v58 = vrot.slane %v1925_v22, 4  ;;  %v1940_v34 = vrot.slane %v1938_v36, 5  ;;  %v11568_v22 = vld [vmem:[#allocation4 + $0x154] sm:$0xf0] }
 0x194   : > { %5360 = vmatmul.bf16.gmra.mxu2 %v11539_v25  ;;  %v4850_v25 = vadd.f32 %v14777_v35, %v4849_v47  ;;  %v11378_v51 = vrot.slane %v2240_v4, 9  ;;  %v2364_v30 = vrot.slane %v2362_v9, 4  ;;  %v2507_v4 = vld [vmem:[#allocation2 + $0x60] sm:$0xf] }
 0x195   : > { %16967 = vst [vmem:[#allocation15_spill] sm:$0xff] %v14874_v31  ;;  %v4938_v57 = vpop.f32.mrf.mxu1  ;;  %v4978_v55 = vpop.f32.mrf.mxu3  ;;  %v2242_v31 = vld [vmem:[#allocation2 + $0x5c] sm:$0x1]  ;;  %v1936_v33 = vrot.slane %v1935_v2, 4  ;;  %v1931_v47 = vsel %vm14183_vm10, %v1926_v58, %v1930_v0  ;;  %v13342_v2 = vld [vmem:[#allocation4 + $0x174] sm:$0xf] }
 0x196   : > { %5271 = vmatmul.bf16.gmra.mxu1 %v11535_v27  ;;  %v14876_v8 = vadd.f32 %v4978_v55, %v4890_v49  ;;  %v4853_v27 = vadd.f32 %v14777_v35, %v4852_v15  ;;  %v2365_v49 = vrot.slane %v2242_v31, 5  ;;  %v4939_v60 = vadd.f32 %v4938_v57, %v4850_v25  ;;  %v1675_v55 = vld [vmem:[#allocation2 + $0x58] sm:$0xf]  ;;  %2202 = vst [vmem:[#allocation4 + $0x1c0] sm:$0xf] %v1931_v47 }
 0x197   : > { %v1941_v20 = vsel %vm14183_vm10, %v1936_v33, %v1940_v34  ;;  %1707 = vst [vmem:[#allocation4 + $0x1e0] sm:$0xf] %v1675_v55  ;;  %v2363_v31 = vsel %vm14209_vm11, %v11378_v51, %v2362_v9  ;;  %v13334_v25 = vld [vmem:[#allocation4 + $0x134] sm:$0xf] }
 0x198   : > { %v2366_v3 = vsel %vm14209_vm11, %v2364_v30, %v2365_v49  ;;  %2203 = vst [vmem:[#allocation4 + $0x1e4] sm:$0xf] %v1941_v20  ;;  %v2508_v34 = vld [vmem:[#allocation2 + $0x64] sm:$0xf]  ;;  %v11571_v51 = vor.u32 %v13334_v25, %v11568_v22 }
 0x199   : > { %2474 = vst [vmem:[#allocation4 + $0x1c4] sm:$0xf] %v2363_v31 }
 0x19a   : > { %5098 = vmatmul.bf16.gmra.mxu3 %v11563_v5  ;;  %v5027_v38 = vpop.f32.mrf.mxu2  ;;  %v11574_v5 = vld [vmem:[#allocation4 + $0x138] sm:$0xf]  ;;  %v4854_v0 = vpop.f32.mrf.mxu0  ;;  %2475 = vst [vmem:[#allocation4 + $0x1e8] sm:$0xf] %v2366_v3 }
 0x19b   : > { %v14884_v36 = vadd.f32 %v5027_v38, %v4939_v60  ;;  %v11575_v16 = vor.u32 %v13339_v32, %v11574_v5  ;;  %2539 = vst [vmem:[#allocation4 + $0x1c8] sm:$0xf] %v2507_v4  ;;  %v13500_v5 = vld [vmem:[%s16942_s1 + $0x1e0] sm:$0xff]  ;;  %v1749_v32 = vld [vmem:[#allocation2 + $0x68] sm:$0x1]  ;;  %v4855_v3 = vadd.f32 %v14777_v35, %v4854_v0 }
 0x19c   : > { %2540 = vst [vmem:[#allocation4 + $0x1ec] sm:$0xf] %v2508_v34  ;;  %v1962_v4 = vshll.u32 %v1749_v32, 16  ;;  %v2244_v34 = vld [vmem:[#allocation2 + $0x64] sm:$0xf]  ;;  %5429 = vmatpush.bf16.msra.mxu3 %v13500_v5 }
 0x19d   : > { %v4941_v42 = vpop.f32.mrf.mxu1  ;;  %v5050_v15 = vpop.f32.mrf.mxu3 }
 0x19e   : > { %v4942_v57 = vadd.f32 %v4941_v42, %v4853_v27  ;;  %5187 = vmatmul.bf16.gmra.mxu0 %v11567_v37  ;;  %v14889_v58 = vadd.f32 %v5050_v15, %v14764_v48  ;;  %v1747_v37 = vld [vmem:[#allocation2 + $0x60] sm:$0xf]  ;;  %v1748_v27 = vld [vmem:[#allocation2 + $0x64] sm:$0xf]  ;;  %v11596_v48 = vld [vmem:[#allocation4 + $0x194] sm:$0xf0] }
 0x19f   : > { %v1943_v33 = vshrl.u32 %v1747_v37, 16  ;;  %v1946_v9 = vshll.u32 %v1747_v37, 16  ;;  %v1952_v49 = vshll.u32 %v1748_v27, 16  ;;  %v1956_v39 = vshrl.u32 %v1748_v27, 16  ;;  %v11602_v15 = vld [vmem:[#allocation4 + $0x178] sm:$0xf] }
 0x1a0   : > { %v11599_v42 = vor.u32 %v13342_v2, %v11596_v48  ;;  %v2245_v37 = vld [vmem:[#allocation2 + $0x68] sm:$0x1] }
 0x1a1   : > { %v1945_v38 = vrot.slane %v1943_v33, 4  ;;  %v1948_v20 = vrot.slane %v1946_v9, 5  ;;  %v1954_v31 = vrot.slane %v1952_v49, 5  ;;  %v13508_v33 = vld [vmem:[%s16942_s1 + $0x220] sm:$0xff]  ;;  %v1964_v9 = vrot.slane %v1962_v4, 5 }
 0x1a2   : > { %v5030_v60 = vpop.f32.mrf.mxu2  ;;  %v2372_v5 = vrot.slane %v2245_v37, 5  ;;  %5518 = vmatpush.bf16.msra.mxu0 %v13508_v33  ;;  %v11604_v37 = vld [vmem:[#allocation4 + $0x19c] sm:$0xf0]  ;;  %v13351_v33 = vld [vmem:[#allocation4 + $0x1bc] sm:$0xf] }
 0x1a3   : > { %v14893_v55 = vadd.f32 %v5030_v60, %v4942_v57  ;;  %v13347_v57 = vld [vmem:[#allocation4 + $0x198] sm:$0xf0]  ;;  %v1949_v22 = vor.u32 %v1948_v20, %v1945_v38  ;;  %v2369_v60 = vrot.slane %v2244_v34, 5 }
 0x1a4   : > { %5365 = vmatmul.bf16.gmra.mxu2 %v11575_v16  ;;  %v1958_v16 = vrot.slane %v1956_v39, 4  ;;  %v11603_v48 = vor.u32 %v13347_v57, %v11602_v15  ;;  %v1677_v39 = vld [vmem:[#allocation2 + $0x64] sm:$0xf] }
 0x1a5   : > { %v5052_v47 = vpop.f32.mrf.mxu3  ;;  %v4943_v25 = vpop.f32.mrf.mxu1  ;;  %v1950_v2 = vrot.slane %v1949_v22, 4  ;;  %v11610_v22 = vld [vmem:[#allocation4 + $0x180] sm:$0xf]  ;;  %1709 = vst [vmem:[#allocation4 + $0x228] sm:$0xf] %v1677_v39 }
 0x1a6   : > { %5276 = vmatmul.bf16.gmra.mxu1 %v11571_v51  ;;  %v14896_v30 = vadd.f32 %v5052_v47, %v14785_v14  ;;  %v2243_v14 = vld [vmem:[#allocation2 + $0x60] sm:$0xe]  ;;  %v1959_v27 = vor.u32 %v1958_v16, %v1954_v31  ;;  %v4944_v49 = vadd.f32 %v4943_v25, %v4855_v3  ;;  %v13348_v16 = vld [vmem:[#allocation4 + $0x1a0] sm:$0xf0] }
 0x1a7   : > { %v4857_v51 = vpop.f32.mrf.mxu0  ;;  %v11379_v0 = vrot.slane %v2243_v14, 9  ;;  %v1676_v47 = vld [vmem:[#allocation2 + $0x60] sm:$0xf]  ;;  %v1955_v38 = vsel %vm14183_vm10, %v1950_v2, %v1954_v31  ;;  %v13343_v14 = vld [vmem:[#allocation4 + $0x17c] sm:$0xf] }
 0x1a8   : > { %16968 = vst [vmem:[#allocation16_spill] sm:$0xff] %v14896_v30  ;;  %v1960_v20 = vrot.slane %v1959_v27, 4  ;;  %v4858_v31 = vadd.f32 %v14777_v35, %v4857_v51  ;;  %v11611_v27 = vor.u32 %v13348_v16, %v11610_v22  ;;  %v2510_v51 = vld [vmem:[#allocation2 + $0x70] sm:$0xf] }
 0x1a9   : > { %1708 = vst [vmem:[#allocation4 + $0x204] sm:$0xf] %v1676_v47  ;;  %v2370_v25 = vsel %vm14209_vm11, %v11379_v0, %v2369_v60  ;;  %v2509_v0 = vld [vmem:[#allocation2 + $0x6c] sm:$0xf]  ;;  %v1751_v47 = vld [vmem:[#allocation2 + $0x70] sm:$0xf] }
 0x1aa   : > { %5103 = vmatmul.bf16.gmra.mxu3 %v11599_v42  ;;  %v5032_v32 = vpop.f32.mrf.mxu2  ;;  %v2371_v42 = vrot.slane %v2369_v60, 4  ;;  %v1965_v3 = vsel %vm14183_vm10, %v1960_v20, %v1964_v9  ;;  %2204 = vst [vmem:[#allocation4 + $0x208] sm:$0xf] %v1955_v38  ;;  %v11632_v9 = vld [vmem:[#allocation4 + $0x1dc] sm:$0xf0]  ;;  %v11607_v60 = vor.u32 %v13343_v14, %v11604_v37 }
 0x1ab   : > { %v14907_v15 = vadd.f32 %v5032_v32, %v4944_v49  ;;  %2205 = vst [vmem:[#allocation4 + $0x22c] sm:$0xf] %v1965_v3  ;;  %v1980_v32 = vshrl.u32 %v1751_v47, 16  ;;  %v11635_v22 = vor.u32 %v13351_v33, %v11632_v9  ;;  %v11638_v16 = vld [vmem:[#allocation4 + $0x1c0] sm:$0xf] }
 0x1ac   : > { %v2373_v34 = vsel %vm14209_vm11, %v2371_v42, %v2372_v5  ;;  %2476 = vst [vmem:[#allocation4 + $0x20c] sm:$0xf] %v2370_v25  ;;  %v1976_v5 = vshll.u32 %v1751_v47, 16  ;;  %v13356_v14 = vld [vmem:[#allocation4 + $0x1e0] sm:$0xf0] }
 0x1ad   : > { %v5055_v57 = vpop.f32.mrf.mxu3  ;;  %2477 = vst [vmem:[#allocation4 + $0x230] sm:$0xf] %v2373_v34  ;;  %v1752_v37 = vld [vmem:[#allocation2 + $0x74] sm:$0x1]  ;;  %v1679_v30 = vld [vmem:[#allocation2 + $0x70] sm:$0xf] }
 0x1ae   : > { %5192 = vmatmul.bf16.gmra.mxu0 %v11603_v48  ;;  %v14915_v4 = vadd.f32 %v5055_v57, %v14802_v24  ;;  %2541 = vst [vmem:[#allocation4 + $0x210] sm:$0xf] %v2509_v0  ;;  %v1750_v24 = vld [vmem:[#allocation2 + $0x6c] sm:$0xf]  ;;  %v1982_v0 = vrot.slane %v1980_v32, 4 }
 0x1af   : > { %v4859_v2 = vpop.f32.mrf.mxu0  ;;  %2542 = vst [vmem:[#allocation4 + $0x234] sm:$0xf] %v2510_v51  ;;  %v1967_v39 = vshrl.u32 %v1750_v24, 16  ;;  %v1970_v38 = vshll.u32 %v1750_v24, 16  ;;  %v1986_v51 = vshll.u32 %v1752_v37, 16 }
 0x1b0   : > { %16969 = vst [vmem:[#allocation17_spill] sm:$0xff] %v14915_v4  ;;  %v2247_v24 = vld [vmem:[#allocation2 + $0x70] sm:$0xf]  ;;  %v2248_v33 = vld [vmem:[#allocation2 + $0x74] sm:$0x1] }
 0x1b1   : > { %v4946_v49 = vpop.f32.mrf.mxu1  ;;  %v1969_v3 = vrot.slane %v1967_v39, 4  ;;  %v1972_v25 = vrot.slane %v1970_v38, 5  ;;  %v11639_v39 = vor.u32 %v13356_v14, %v11638_v16  ;;  %v2379_v32 = vrot.slane %v2248_v33, 5  ;;  %1711 = vst [vmem:[#allocation4 + $0x270] sm:$0xf] %v1679_v30 }
 0x1b2   : > { %v4947_v48 = vadd.f32 %v4946_v49, %v4858_v31  ;;  %v4860_v31 = vadd.f32 %v14777_v35, %v4859_v2  ;;  %v1978_v49 = vrot.slane %v1976_v5, 5  ;;  %v2511_v33 = vld [vmem:[#allocation2 + $0x78] sm:$0xf] }
 0x1b3   : > { %2543 = vst [vmem:[#allocation4 + $0x258] sm:$0xf] %v2511_v33 }
 0x1b4   : > { %v5035_v20 = vpop.f32.mrf.mxu2  ;;  %5370 = vmatmul.bf16.gmra.mxu2 %v11611_v27  ;;  %v1973_v27 = vor.u32 %v1972_v25, %v1969_v3  ;;  %v1983_v47 = vor.u32 %v1982_v0, %v1978_v49 }
 0x1b5   : > { %v14919_v42 = vadd.f32 %v5035_v20, %v4947_v48  ;;  %v5057_v57 = vpop.f32.mrf.mxu3  ;;  %v2246_v20 = vld [vmem:[#allocation2 + $0x6c] sm:$0xe] }
 0x1b6   : > { %5281 = vmatmul.bf16.gmra.mxu1 %v11607_v60  ;;  %v14923_v34 = vadd.f32 %v5057_v57, %v14816_v7  ;;  %v1974_v38 = vrot.slane %v1973_v27, 4  ;;  %v1988_v60 = vrot.slane %v1986_v51, 5  ;;  %v1984_v2 = vrot.slane %v1983_v47, 4  ;;  %v13352_v51 = vld [vmem:[#allocation4 + $0x1c4] sm:$0xf] }
 0x1b7   : > { %v4862_v48 = vpop.f32.mrf.mxu0  ;;  %v11380_v7 = vrot.slane %v2246_v20, 9  ;;  %v2376_v57 = vrot.slane %v2247_v24, 5  ;;  %v13360_v20 = vld [vmem:[#allocation4 + $0x204] sm:$0xf] }
 0x1b8   : > { %16970 = vst [vmem:[#allocation18_spill] sm:$0xff] %v14923_v34  ;;  %v1678_v34 = vld [vmem:[#allocation2 + $0x6c] sm:$0xf]  ;;  %v1979_v5 = vsel %vm14183_vm10, %v1974_v38, %v1978_v49  ;;  %v1989_v25 = vsel %vm14183_vm10, %v1984_v2, %v1988_v60  ;;  %v4863_v27 = vadd.f32 %v14777_v35, %v4862_v48  ;;  %v1754_v38 = vld [vmem:[#allocation2 + $0x7c] sm:$0xf] }
 0x1b9   : > { %v4948_v9 = vpop.f32.mrf.mxu1  ;;  %1710 = vst [vmem:[#allocation4 + $0x24c] sm:$0xf] %v1678_v34  ;;  %v2378_v37 = vrot.slane %v2376_v57, 4  ;;  %v2377_v0 = vsel %vm14209_vm11, %v11380_v7, %v2376_v57  ;;  %v11668_v60 = vld [vmem:[#allocation4 + $0x224] sm:$0xf0] }
 0x1ba   : > { %v4949_v4 = vadd.f32 %v4948_v9, %v4860_v31  ;;  %5108 = vmatmul.bf16.gmra.mxu3 %v11635_v22  ;;  %v11646_v31 = vld [vmem:[#allocation4 + $0x1c8] sm:$0xf]  ;;  %v13357_v22 = vld [vmem:[#allocation4 + $0x1e8] sm:$0xf0]  ;;  %2206 = vst [vmem:[#allocation4 + $0x250] sm:$0xf] %v1979_v5 }
 0x1bb   : > { %v2380_v34 = vsel %vm14209_vm11, %v2378_v37, %v2379_v32  ;;  %2207 = vst [vmem:[#allocation4 + $0x274] sm:$0xf] %v1989_v25  ;;  %v11647_v47 = vor.u32 %v13357_v22, %v11646_v31  ;;  %v2512_v9 = vld [vmem:[#allocation2 + $0x7c] sm:$0xf]  ;;  %v2000_v5 = vshll.u32 %v1754_v38, 16  ;;  %v2004_v32 = vshrl.u32 %v1754_v38, 16 }
 0x1bc   : > { %v5037_v3 = vpop.f32.mrf.mxu2  ;;  %2478 = vst [vmem:[#allocation4 + $0x254] sm:$0xf] %v2377_v0  ;;  %v11674_v37 = vld [vmem:[#allocation4 + $0x208] sm:$0xf] }
 0x1bd   : > { %v14929_v16 = vadd.f32 %v5037_v3, %v4949_v4  ;;  %v5060_v14 = vpop.f32.mrf.mxu3  ;;  %v11640_v4 = vld [vmem:[#allocation4 + $0x1e4] sm:$0xf0]  ;;  %2479 = vst [vmem:[#allocation4 + $0x278] sm:$0xf] %v2380_v34  ;;  %v13365_v34 = vld [vmem:[#allocation4 + $0x228] sm:$0xf0] }
 0x1be   : > { %5197 = vmatmul.bf16.gmra.mxu0 %v11639_v39  ;;  %v14935_v49 = vadd.f32 %v5060_v14, %v14833_v45  ;;  %v11643_v39 = vor.u32 %v13352_v51, %v11640_v4  ;;  %v1753_v45 = vld [vmem:[#allocation2 + $0x78] sm:$0xf]  ;;  %2544 = vst [vmem:[#allocation4 + $0x27c] sm:$0xf] %v2512_v9  ;;  %v1755_v4 = vld [vmem:[#allocation2 + $0x80] sm:$0x1] }
 0x1bf   : > { %v4864_v24 = vpop.f32.mrf.mxu0  ;;  %v1991_v2 = vshrl.u32 %v1753_v45, 16  ;;  %v1994_v7 = vshll.u32 %v1753_v45, 16  ;;  %v13499_v51 = vld [vmem:[%s16942_s1 + $0x1d8] sm:$0xff]  ;;  %v2006_v33 = vrot.slane %v2004_v32, 4  ;;  %v2010_v9 = vshll.u32 %v1755_v4, 16 }
 0x1c0   : > { %v4865_v22 = vadd.f32 %v14777_v35, %v4864_v24  ;;  %5430 = vmatpush.bf16.msra.mxu3 %v13499_v51  ;;  %v2249_v45 = vld [vmem:[#allocation2 + $0x78] sm:$0xe]  ;;  %v11675_v35 = vor.u32 %v13365_v34, %v11674_v37 }
 0x1c1   : > { %v4951_v30 = vpop.f32.mrf.mxu1  ;;  %v1993_v14 = vrot.slane %v1991_v2, 4  ;;  %v1996_v31 = vrot.slane %v1994_v7, 5  ;;  %v2012_v2 = vrot.slane %v2010_v9, 5  ;;  %v11381_v7 = vrot.slane %v2249_v45, 9  ;;  %v1680_v32 = vld [vmem:[#allocation2 + $0x78] sm:$0xf] }
 0x1c2   : > { %v4952_v48 = vadd.f32 %v4951_v30, %v4863_v27  ;;  %v11671_v27 = vor.u32 %v13360_v20, %v11668_v60  ;;  %1712 = vst [vmem:[#allocation4 + $0x294] sm:$0xf] %v1680_v32  ;;  %v13361_v45 = vld [vmem:[#allocation4 + $0x20c] sm:$0xf]  ;;  %v11704_v32 = vld [vmem:[#allocation4 + $0x26c] sm:$0xf0] }
 0x1c3   : > { %v1997_v30 = vor.u32 %v1996_v31, %v1993_v14  ;;  %v1681_v14 = vld [vmem:[#allocation2 + $0x7c] sm:$0xf] }
 0x1c4   : > { %v5040_v57 = vpop.f32.mrf.mxu2  ;;  %5375 = vmatmul.bf16.gmra.mxu2 %v11647_v47  ;;  %v2002_v47 = vrot.slane %v2000_v5, 5  ;;  %v13507_v5 = vld [vmem:[%s16942_s1 + $0x218] sm:$0xff]  ;;  %1713 = vst [vmem:[#allocation4 + $0x2b8] sm:$0xf] %v1681_v14 }
 0x1c5   : > { %v14939_v3 = vadd.f32 %v5040_v57, %v4952_v48  ;;  %v5062_v25 = vpop.f32.mrf.mxu3  ;;  %v2250_v48 = vld [vmem:[#allocation2 + $0x7c] sm:$0xf]  ;;  %v1998_v24 = vrot.slane %v1997_v30, 4  ;;  %v13366_v30 = vld [vmem:[#allocation4 + $0x230] sm:$0xf0]  ;;  %5519 = vmatpush.bf16.msra.mxu0 %v13507_v5 }
 0x1c6   : > { %5286 = vmatmul.bf16.gmra.mxu1 %v11643_v39  ;;  %v14943_v0 = vadd.f32 %v5062_v25, %v14849_v50  ;;  %v2251_v39 = vld [vmem:[#allocation2 + $0x80] sm:$0x1]  ;;  %v2007_v50 = vor.u32 %v2006_v33, %v2002_v47  ;;  %v2383_v57 = vrot.slane %v2250_v48, 5 }
 0x1c7   : > { %v2386_v25 = vrot.slane %v2251_v39, 5  ;;  %v2003_v31 = vsel %vm14183_vm10, %v1998_v24, %v2002_v47  ;;  %v11676_v39 = vld [vmem:[#allocation4 + $0x22c] sm:$0xf0] }
 0x1c8   : > { %16971 = vst [vmem:[#allocation19_spill] sm:$0xff] %v14943_v0  ;;  %v2008_v51 = vrot.slane %v2007_v50, 4  ;;  %v2385_v34 = vrot.slane %v2383_v57, 4  ;;  %v2384_v9 = vsel %vm14209_vm11, %v11381_v7, %v2383_v57  ;;  %v1756_v57 = vld [vmem:[#allocation2 + $0x84] sm:$0xf] }
 0x1c9   : > { %v4953_v38 = vpop.f32.mrf.mxu1  ;;  %v4867_v60 = vpop.f32.mrf.mxu0  ;;  %2208 = vst [vmem:[#allocation4 + $0x298] sm:$0xf] %v2003_v31  ;;  %v2015_v14 = vshrl.u32 %v1756_v57, 16  ;;  %v2018_v31 = vshll.u32 %v1756_v57, 16 }
 0x1ca   : > { %v4954_v20 = vadd.f32 %v4953_v38, %v4865_v22  ;;  %5113 = vmatmul.bf16.gmra.mxu3 %v11671_v27  ;;  %v11682_v27 = vld [vmem:[#allocation4 + $0x210] sm:$0xf]  ;;  %v2013_v33 = vsel %vm14183_vm10, %v2008_v51, %v2012_v2  ;;  %v2387_v48 = vsel %vm14209_vm11, %v2385_v34, %v2386_v25  ;;  %2480 = vst [vmem:[#allocation4 + $0x29c] sm:$0xf] %v2384_v9  ;;  %v2514_v2 = vld [vmem:[#allocation2 + $0x88] sm:$0xf] }
 0x1cb   : > { %2209 = vst [vmem:[#allocation4 + $0x2bc] sm:$0xf] %v2013_v33  ;;  %v14967_v38 = vld [vmem:[%s16943_s2] ss:$0 sm:$0xff]  ;;  %v11683_v50 = vor.u32 %v13366_v30, %v11682_v27  ;;  %v1757_v25 = vld [vmem:[#allocation2 + $0x88] sm:$0xf] }
 0x1cc   : > { %v5042_v37 = vpop.f32.mrf.mxu2  ;;  %v4868_v24 = vadd.f32 %v14967_v38, %v4867_v60  ;;  %2481 = vst [vmem:[#allocation4 + $0x2c0] sm:$0xf] %v2387_v48  ;;  %v2028_v60 = vshrl.u32 %v1757_v25, 16  ;;  %v2020_v27 = vrot.slane %v2018_v31, 5  ;;  %v11710_v9 = vld [vmem:[#allocation4 + $0x250] sm:$0xf] }
 0x1cd   : > { %v14953_v4 = vadd.f32 %v5042_v37, %v4954_v20  ;;  %v5065_v22 = vpop.f32.mrf.mxu3  ;;  %v11679_v20 = vor.u32 %v13361_v45, %v11676_v39  ;;  %2546 = vst [vmem:[#allocation4 + $0x2c4] sm:$0xf] %v2514_v2  ;;  %v2024_v37 = vshll.u32 %v1757_v25, 16  ;;  %v1758_v48 = vld [vmem:[#allocation2 + $0x8c] sm:$0x1] }
 0x1ce   : > { %5202 = vmatmul.bf16.gmra.mxu0 %v11675_v35  ;;  %v14960_v47 = vadd.f32 %v5065_v22, %v14868_v61  ;;  %v13369_v35 = vld [vmem:[#allocation4 + $0x24c] sm:$0xf]  ;;  %v2513_v61 = vld [vmem:[#allocation2 + $0x84] sm:$0xf]  ;;  %v2017_v22 = vrot.slane %v2015_v14, 4  ;;  %v2030_v39 = vrot.slane %v2028_v60, 4 }
 0x1cf   : > { %2545 = vst [vmem:[#allocation4 + $0x2a0] sm:$0xf] %v2513_v61  ;;  %v11707_v33 = vor.u32 %v13369_v35, %v11704_v32  ;;  %v2026_v45 = vrot.slane %v2024_v37, 5  ;;  %v13374_v2 = vld [vmem:[#allocation4 + $0x270] sm:$0xf0]  ;;  %v2034_v57 = vshll.u32 %v1758_v48, 16 }
 0x1d0   : > { %16972 = vst [vmem:[#allocation20_spill] sm:$0xff] %v14960_v47  ;;  %v2021_v47 = vor.u32 %v2020_v27, %v2017_v22  ;;  %v2252_v14 = vld [vmem:[#allocation2 + $0x84] sm:$0xe]  ;;  %v11711_v35 = vor.u32 %v13374_v2, %v11710_v9  ;;  %v1683_v27 = vld [vmem:[#allocation2 + $0x88] sm:$0xf] }
 0x1d1   : > { %v4869_v7 = vpop.f32.mrf.mxu0  ;;  %v1682_v22 = vld [vmem:[#allocation2 + $0x84] sm:$0xf]  ;;  %1715 = vst [vmem:[#allocation4 + $0x300] sm:$0xf] %v1683_v27  ;;  %v11740_v27 = vld [vmem:[#allocation4 + $0x2b4] sm:$0xf0] }
 0x1d2   : > { %v4870_v25 = vadd.f32 %v14967_v38, %v4869_v7  ;;  %v2022_v31 = vrot.slane %v2021_v47, 4  ;;  %1714 = vst [vmem:[#allocation4 + $0x2dc] sm:$0xf] %v1682_v22 }
 0x1d3   : > { %v4956_v5 = vpop.f32.mrf.mxu1 }
 0x1d4   : > { %v4957_v51 = vadd.f32 %v4956_v5, %v4868_v24  ;;  %5380 = vmatmul.bf16.gmra.mxu2 %v11683_v50  ;;  %v2253_v24 = vld [vmem:[#allocation2 + $0x88] sm:$0xf]  ;;  %v2031_v5 = vor.u32 %v2030_v39, %v2026_v45 }
 0x1d5   : > { %v5067_v34 = vpop.f32.mrf.mxu3  ;;  %v2390_v37 = vrot.slane %v2253_v24, 5  ;;  %v11718_v39 = vld [vmem:[#allocation4 + $0x258] sm:$0xf]  ;;  %v13370_v24 = vld [vmem:[#allocation4 + $0x254] sm:$0xf] }
 0x1d6   : > { %5291 = vmatmul.bf16.gmra.mxu1 %v11679_v20  ;;  %v14971_v30 = vadd.f32 %v5067_v34, %v14876_v8  ;;  %v2254_v20 = vld [vmem:[#allocation2 + $0x8c] sm:$0x1]  ;;  %v2036_v8 = vrot.slane %v2034_v57, 5  ;;  %v11382_v34 = vrot.slane %v2252_v14, 9  ;;  %v2032_v32 = vrot.slane %v2031_v5, 4 }
 0x1d7   : > { %v5045_v61 = vpop.f32.mrf.mxu2  ;;  %v2393_v60 = vrot.slane %v2254_v20, 5  ;;  %v2392_v47 = vrot.slane %v2390_v37, 4 }
 0x1d8   : > { %16973 = vst [vmem:[#allocation21_spill] sm:$0xff] %v14971_v30  ;;  %v14973_v50 = vadd.f32 %v5045_v61, %v4957_v51  ;;  %v2027_v51 = vsel %vm14183_vm10, %v2022_v31, %v2026_v45  ;;  %v2037_v7 = vsel %vm14183_vm10, %v2032_v32, %v2036_v8  ;;  %v13375_v61 = vld [vmem:[#allocation4 + $0x278] sm:$0xf0]  ;;  %v2391_v2 = vsel %vm14209_vm11, %v11382_v34, %v2390_v37  ;;  %v13378_v31 = vld [vmem:[#allocation4 + $0x294] sm:$0xf] }
 0x1d9   : > { %2210 = vst [vmem:[#allocation4 + $0x2e0] sm:$0xf] %v2027_v51  ;;  %v11719_v14 = vor.u32 %v13375_v61, %v11718_v39  ;;  %v2515_v8 = vld [vmem:[#allocation2 + $0x90] sm:$0xf]  ;;  %v2516_v34 = vld [vmem:[#allocation2 + $0x94] sm:$0xf] }
 0x1da   : > { %5118 = vmatmul.bf16.gmra.mxu3 %v11707_v33  ;;  %v4815_v33 = vadd.f32 %v14967_v38, %v14534_v53  ;;  %2211 = vst [vmem:[#allocation4 + $0x304] sm:$0xf] %v2037_v7  ;;  %v1760_v32 = vld [vmem:[#allocation2 + $0x94] sm:$0xf]  ;;  %v13671_v51 = vld [vmem:[#allocation5 + $0x38] sm:$0xff] }
 0x1db   : > { %v4958_v30 = vpop.f32.mrf.mxu1  ;;  %v5168_v0 = vpop.f32.mrf.mxu0  ;;  %2482 = vst [vmem:[#allocation4 + $0x2e4] sm:$0xf] %v2391_v2  ;;  %10381 = vmatpush.bf16.msra.mxu2 %v13671_v51  ;;  %v11743_v2 = vor.u32 %v13378_v31, %v11740_v27  ;;  %v2257_v51 = vld [vmem:[#allocation2 + $0x98] sm:$0x1] }
 0x1dc   : > { %v4959_v48 = vadd.f32 %v4958_v30, %v4870_v25  ;;  %v2394_v30 = vsel %vm14209_vm11, %v2392_v47, %v2393_v60  ;;  %v11712_v25 = vld [vmem:[#allocation4 + $0x274] sm:$0xf0]  ;;  %v4904_v20 = vadd.f32 %v14577_v10, %v4815_v33  ;;  %2547 = vst [vmem:[#allocation4 + $0x2e8] sm:$0xf] %v2515_v8  ;;  %v2048_v10 = vshll.u32 %v1760_v32, 16 }
 0x1dd   : > { %v5079_v9 = vpop.f32.mrf.mxu3  ;;  %2483 = vst [vmem:[#allocation4 + $0x308] sm:$0xf] %v2394_v30  ;;  %v2052_v47 = vshrl.u32 %v1760_v32, 16  ;;  %v13519_v30 = vld [vmem:[%s16946_s5 + $0x38] sm:$0xff] }
 0x1de   : > { %5207 = vmatmul.bf16.gmra.mxu0 %v11711_v35  ;;  %v5080_v57 = vadd.f32 %v5079_v9, %v14546_v6  ;;  %v11715_v6 = vor.u32 %v13370_v24, %v11712_v25  ;;  %v1759_v35 = vld [vmem:[#allocation2 + $0x90] sm:$0xf]  ;;  %v4993_v37 = vadd.f32 %v14585_v26, %v4904_v20  ;;  %2548 = vst [vmem:[#allocation4 + $0x30c] sm:$0xf] %v2516_v34  ;;  %v11746_v9 = vld [vmem:[#allocation4 + $0x298] sm:$0xf] }
 0x1df   : > { %v5047_v45 = vpop.f32.mrf.mxu2  ;;  %v2042_v7 = vshll.u32 %v1759_v35, 16  ;;  %v13498_v26 = vld [vmem:[%s16942_s1 + $0x1d0] sm:$0xff]  ;;  %v2050_v24 = vrot.slane %v2048_v10, 5  ;;  %5800 = vmatpush.bf16.msra.mxu1 %v13519_v30 }
 0x1e0   : > { %v14987_v5 = vadd.f32 %v5047_v45, %v4959_v48  ;;  %v5169_v53 = vadd.f32 %v5168_v0, %v5080_v57  ;;  %v2039_v0 = vshrl.u32 %v1759_v35, 16  ;;  %v13383_v57 = vld [vmem:[#allocation4 + $0x2b8] sm:$0xf0]  ;;  %5431 = vmatpush.bf16.msra.mxu3 %v13498_v26  ;;  %v11754_v26 = vld [vmem:[#allocation4 + $0x2a0] sm:$0xf] }
 0x1e1   : > { %v2044_v45 = vrot.slane %v2042_v7, 5  ;;  %v11747_v35 = vor.u32 %v13383_v57, %v11746_v9  ;;  %v13384_v30 = vld [vmem:[#allocation4 + $0x2c0] sm:$0xf0] }
 0x1e2   : > { %v2041_v39 = vrot.slane %v2039_v0, 4 }
 0x1e3   : > { %v5257_v60 = vpop.f32.mrf.mxu1  ;;  %v5170_v22 = vpop.f32.mrf.mxu0 }
 0x1e4   : > { %5385 = vmatmul.bf16.gmra.mxu2 %v11719_v14  ;;  %v5258_v48 = vadd.f32 %v5257_v60, %v5169_v53  ;;  %v1761_v53 = vld [vmem:[#allocation2 + $0x98] sm:$0x1]  ;;  %v2054_v14 = vrot.slane %v2052_v47, 4  ;;  %v2045_v31 = vor.u32 %v2044_v45, %v2041_v39  ;;  %v1685_v47 = vld [vmem:[#allocation2 + $0x94] sm:$0xf] }
 0x1e5   : > { %v5081_v33 = vpop.f32.mrf.mxu3  ;;  %v2058_v34 = vshll.u32 %v1761_v53, 16  ;;  %1717 = vst [vmem:[#allocation4 + $0x348] sm:$0xf] %v1685_v47  ;;  %v2400_v53 = vrot.slane %v2257_v51, 5  ;;  %v2517_v51 = vld [vmem:[#allocation2 + $0x9c] sm:$0xf] }
 0x1e6   : > { %5296 = vmatmul.bf16.gmra.mxu1 %v11715_v6  ;;  %v5082_v61 = vadd.f32 %v5081_v33, %v4993_v37  ;;  %v2255_v6 = vld [vmem:[#allocation2 + $0x90] sm:$0xe]  ;;  %v2055_v32 = vor.u32 %v2054_v14, %v2050_v24  ;;  %v2256_v37 = vld [vmem:[#allocation2 + $0x94] sm:$0xf]  ;;  %v2046_v60 = vrot.slane %v2045_v31, 4  ;;  %v4820_v14 = vadd.f32 %v14967_v38, %v14583_v17 }
 0x1e7   : > { %v5346_v25 = vpop.f32.mrf.mxu2  ;;  %v2060_v27 = vrot.slane %v2058_v34, 5  ;;  %v11383_v0 = vrot.slane %v2255_v6, 9  ;;  %v2397_v7 = vrot.slane %v2256_v37, 5  ;;  %v11748_v31 = vld [vmem:[#allocation4 + $0x2bc] sm:$0xf0] }
 0x1e8   : > { %v14997_v20 = vadd.f32 %v5346_v25, %v5258_v48  ;;  %v5171_v8 = vadd.f32 %v5170_v22, %v5082_v61  ;;  %v13506_v22 = vld [vmem:[%s16942_s1 + $0x210] sm:$0xff]  ;;  %v2056_v39 = vrot.slane %v2055_v32, 4  ;;  %v2051_v9 = vsel %vm14183_vm10, %v2046_v60, %v2050_v24  ;;  %v13379_v24 = vld [vmem:[#allocation4 + $0x29c] sm:$0xf]  ;;  %v2518_v17 = vld [vmem:[#allocation2 + $0xa0] sm:$0xf] }
 0x1e9   : > { %v1684_v48 = vld [vmem:[#allocation2 + $0x90] sm:$0xf]  ;;  %5520 = vmatpush.bf16.msra.mxu0 %v13506_v22  ;;  %v2398_v25 = vsel %vm14209_vm11, %v11383_v0, %v2397_v7  ;;  %2212 = vst [vmem:[#allocation4 + $0x328] sm:$0xf] %v2051_v9  ;;  %v11755_v60 = vor.u32 %v13384_v30, %v11754_v26  ;;  %v1762_v0 = vld [vmem:[#allocation2 + $0x9c] sm:$0xf] }
 0x1ea   : > { %5123 = vmatmul.bf16.gmra.mxu3 %v11743_v2  ;;  %1716 = vst [vmem:[#allocation4 + $0x324] sm:$0xf] %v1684_v48  ;;  %v2399_v2 = vrot.slane %v2397_v7, 4  ;;  %v2061_v45 = vsel %vm14183_vm10, %v2056_v39, %v2060_v27  ;;  %v13387_v27 = vld [vmem:[#allocation4 + $0x2dc] sm:$0xf]  ;;  %v2063_v47 = vshrl.u32 %v1762_v0, 16 }
 0x1eb   : > { %v5259_v10 = vpop.f32.mrf.mxu1  ;;  %v5173_v33 = vpop.f32.mrf.mxu0  ;;  %2213 = vst [vmem:[#allocation4 + $0x34c] sm:$0xf] %v2061_v45  ;;  %v1763_v7 = vld [vmem:[#allocation2 + $0xa0] sm:$0xf]  ;;  %v11776_v48 = vld [vmem:[#allocation4 + $0x2fc] sm:$0xf0] }
 0x1ec   : > { %v5260_v61 = vadd.f32 %v5259_v10, %v5171_v8  ;;  %v2401_v6 = vsel %vm14209_vm11, %v2399_v2, %v2400_v53  ;;  %2484 = vst [vmem:[#allocation4 + $0x32c] sm:$0xf] %v2398_v25  ;;  %v2066_v39 = vshll.u32 %v1762_v0, 16  ;;  %v2072_v26 = vshll.u32 %v1763_v7, 16  ;;  %v11782_v25 = vld [vmem:[#allocation4 + $0x2e0] sm:$0xf] }
 0x1ed   : > { %v5084_v57 = vpop.f32.mrf.mxu3  ;;  %2485 = vst [vmem:[#allocation4 + $0x350] sm:$0xf] %v2401_v6  ;;  %v2076_v9 = vshrl.u32 %v1763_v7, 16  ;;  %v11779_v45 = vor.u32 %v13387_v27, %v11776_v48  ;;  %v1764_v53 = vld [vmem:[#allocation2 + $0xa4] sm:$0x1] }
 0x1ee   : > { %5212 = vmatmul.bf16.gmra.mxu0 %v11747_v35  ;;  %v5085_v8 = vadd.f32 %v5084_v57, %v14622_v41  ;;  %v4909_v35 = vadd.f32 %v14635_v44, %v4820_v14  ;;  %v11751_v41 = vor.u32 %v13379_v24, %v11748_v31  ;;  %2549 = vst [vmem:[#allocation4 + $0x330] sm:$0xf] %v2517_v51  ;;  %v2065_v57 = vrot.slane %v2063_v47, 4  ;;  %v13392_v31 = vld [vmem:[#allocation4 + $0x300] sm:$0xf0] }
 0x1ef   : > { %v5348_v34 = vpop.f32.mrf.mxu2  ;;  %2550 = vst [vmem:[#allocation4 + $0x354] sm:$0xf] %v2518_v17  ;;  %v2068_v30 = vrot.slane %v2066_v39, 5  ;;  %v2074_v14 = vrot.slane %v2072_v26, 5  ;;  %v2082_v6 = vshll.u32 %v1764_v53, 16  ;;  %v11783_v27 = vor.u32 %v13392_v31, %v11782_v25 }
 0x1f0   : > { %v15013_v32 = vadd.f32 %v5348_v34, %v5260_v61  ;;  %v5174_v37 = vadd.f32 %v5173_v33, %v5085_v8  ;;  %v4998_v33 = vadd.f32 %v14647_v62, %v4909_v35  ;;  %v2078_v8 = vrot.slane %v2076_v9, 4  ;;  %v2259_v51 = vld [vmem:[#allocation2 + $0xa0] sm:$0xf]  ;;  %v2258_v17 = vld [vmem:[#allocation2 + $0x9c] sm:$0xe] }
 0x1f1   : > { %v2069_v34 = vor.u32 %v2068_v30, %v2065_v57  ;;  %v2260_v35 = vld [vmem:[#allocation2 + $0xa4] sm:$0x1]  ;;  %v2084_v7 = vrot.slane %v2082_v6, 5  ;;  %v2404_v48 = vrot.slane %v2259_v51, 5  ;;  %v1686_v26 = vld [vmem:[#allocation2 + $0x9c] sm:$0xf]  ;;  %v4825_v30 = vadd.f32 %v14967_v38, %v14642_v54 }
 0x1f2   : > { %v2407_v47 = vrot.slane %v2260_v35, 5  ;;  %v1687_v9 = vld [vmem:[#allocation2 + $0xa0] sm:$0xf]  ;;  %1718 = vst [vmem:[#allocation4 + $0x36c] sm:$0xf] %v1686_v26 }
 0x1f3   : > { %v5262_v10 = vpop.f32.mrf.mxu1  ;;  %v5175_v22 = vpop.f32.mrf.mxu0  ;;  %v2070_v0 = vrot.slane %v2069_v34, 4  ;;  %v2406_v57 = vrot.slane %v2404_v48, 4  ;;  %v13393_v25 = vld [vmem:[#allocation4 + $0x308] sm:$0xf0]  ;;  %1719 = vst [vmem:[#allocation4 + $0x390] sm:$0xf] %v1687_v9 }
 0x1f4   : > { %5390 = vmatmul.bf16.gmra.mxu2 %v11755_v60  ;;  %v5263_v61 = vadd.f32 %v5262_v10, %v5174_v37  ;;  %v2079_v60 = vor.u32 %v2078_v8, %v2074_v14  ;;  %v11784_v31 = vld [vmem:[#allocation4 + $0x304] sm:$0xf0]  ;;  %v2520_v35 = vld [vmem:[#allocation2 + $0xac] sm:$0xf] }
 0x1f5   : > { %v5086_v2 = vpop.f32.mrf.mxu3  ;;  %2552 = vst [vmem:[#allocation4 + $0x39c] sm:$0xf] %v2520_v35  ;;  %v2262_v35 = vld [vmem:[#allocation2 + $0xac] sm:$0xf] }
 0x1f6   : > { %5301 = vmatmul.bf16.gmra.mxu1 %v11751_v41  ;;  %v5087_v44 = vadd.f32 %v5086_v2, %v4998_v33  ;;  %v11384_v41 = vrot.slane %v2258_v17, 9  ;;  %v2080_v10 = vrot.slane %v2079_v60, 4  ;;  %v13396_v60 = vld [vmem:[#allocation4 + $0x324] sm:$0xf]  ;;  %v2519_v17 = vld [vmem:[#allocation2 + $0xa8] sm:$0xf] }
 0x1f7   : > { %v5351_v24 = vpop.f32.mrf.mxu2  ;;  %2551 = vst [vmem:[#allocation4 + $0x378] sm:$0xf] %v2519_v17 }
 0x1f8   : > { %v15017_v62 = vadd.f32 %v5351_v24, %v5263_v61  ;;  %v5176_v37 = vadd.f32 %v5175_v22, %v5087_v44  ;;  %v2075_v61 = vsel %vm14183_vm10, %v2070_v0, %v2074_v14  ;;  %v2085_v22 = vsel %vm14183_vm10, %v2080_v10, %v2084_v7  ;;  %v13388_v24 = vld [vmem:[#allocation4 + $0x2e4] sm:$0xf]  ;;  %v1765_v0 = vld [vmem:[#allocation2 + $0xa8] sm:$0xf]  ;;  %v1766_v7 = vld [vmem:[#allocation2 + $0xac] sm:$0xf] }
 0x1f9   : > { %v2405_v53 = vsel %vm14209_vm11, %v11384_v41, %v2404_v48  ;;  %2214 = vst [vmem:[#allocation4 + $0x370] sm:$0xf] %v2075_v61  ;;  %v2408_v14 = vsel %vm14209_vm11, %v2406_v57, %v2407_v47  ;;  %v11812_v48 = vld [vmem:[#allocation4 + $0x344] sm:$0xf0]  ;;  %v13670_v47 = vld [vmem:[#allocation5 + $0x30] sm:$0xff]  ;;  %v2090_v26 = vshll.u32 %v1765_v0, 16 }
 0x1fa   : > { %5128 = vmatmul.bf16.gmra.mxu3 %v11779_v45  ;;  %v11790_v45 = vld [vmem:[#allocation4 + $0x2e8] sm:$0xf]  ;;  %2215 = vst [vmem:[#allocation4 + $0x394] sm:$0xf] %v2085_v22  ;;  %v2100_v9 = vshrl.u32 %v1766_v7, 16  ;;  %10382 = vmatpush.bf16.msra.mxu2 %v13670_v47 }
 0x1fb   : > { %v5264_v39 = vpop.f32.mrf.mxu1  ;;  %v5178_v33 = vpop.f32.mrf.mxu0  ;;  %v11791_v51 = vor.u32 %v13393_v25, %v11790_v45  ;;  %2486 = vst [vmem:[#allocation4 + $0x374] sm:$0xf] %v2405_v53  ;;  %v13518_v45 = vld [vmem:[%s16946_s5 + $0x30] sm:$0xff]  ;;  %v2092_v25 = vrot.slane %v2090_v26, 5 }
 0x1fc   : > { %v5265_v2 = vadd.f32 %v5264_v39, %v5176_v37  ;;  %v4914_v37 = vadd.f32 %v14693_v40, %v4825_v30  ;;  %2487 = vst [vmem:[#allocation4 + $0x398] sm:$0xf] %v2408_v14  ;;  %v2087_v39 = vshrl.u32 %v1765_v0, 16  ;;  %v2096_v40 = vshll.u32 %v1766_v7, 16  ;;  %v1767_v14 = vld [vmem:[#allocation2 + $0xb0] sm:$0x1]  ;;  %5801 = vmatpush.bf16.msra.mxu1 %v13518_v45 }
 0x1fd   : > { %v5089_v44 = vpop.f32.mrf.mxu3  ;;  %v11815_v30 = vor.u32 %v13396_v60, %v11812_v48  ;;  %v2263_v7 = vld [vmem:[#allocation2 + $0xb0] sm:$0x1]  ;;  %v4830_v45 = vadd.f32 %v14967_v38, %v14710_v28  ;;  %v2522_v28 = vld [vmem:[#allocation2 + $0xb8] sm:$0xf] }
 0x1fe   : > { %5217 = vmatmul.bf16.gmra.mxu0 %v11783_v27  ;;  %v5090_v8 = vadd.f32 %v5089_v44, %v14673_v13  ;;  %v11787_v13 = vor.u32 %v13388_v24, %v11784_v31  ;;  %v5003_v41 = vadd.f32 %v14708_v59, %v4914_v37  ;;  %v2089_v22 = vrot.slane %v2087_v39, 4  ;;  %v13401_v44 = vld [vmem:[#allocation4 + $0x348] sm:$0xf0]  ;;  %v13497_v59 = vld [vmem:[%s16942_s1 + $0x1c8] sm:$0xff]  ;;  %2554 = vst [vmem:[#allocation4 + $0x3e4] sm:$0xf] %v2522_v28 }
 0x1ff   : > { %v5353_v34 = vpop.f32.mrf.mxu2  ;;  %v2098_v53 = vrot.slane %v2096_v40, 5  ;;  %v2102_v24 = vrot.slane %v2100_v9, 4  ;;  %5432 = vmatpush.bf16.msra.mxu3 %v13497_v59  ;;  %v2261_v37 = vld [vmem:[#allocation2 + $0xa8] sm:$0xe]  ;;  %v11826_v9 = vld [vmem:[#allocation4 + $0x330] sm:$0xf] }
 0x200   : > { %v15030_v6 = vadd.f32 %v5353_v34, %v5265_v2  ;;  %v5179_v54 = vadd.f32 %v5178_v33, %v5090_v8  ;;  %v11818_v2 = vld [vmem:[#allocation4 + $0x328] sm:$0xf]  ;;  %v1688_v39 = vld [vmem:[#allocation2 + $0xa8] sm:$0xf]  ;;  %v2414_v59 = vrot.slane %v2263_v7, 5 }
 0x201   : > { %v11819_v60 = vor.u32 %v13401_v44, %v11818_v2  ;;  %v2103_v17 = vor.u32 %v2102_v24, %v2098_v53  ;;  %1720 = vst [vmem:[#allocation4 + $0x3b4] sm:$0xf] %v1688_v39  ;;  %v328_v28 = vld [vmem:[%s14094_s19 + $0x7c] sm:$0xf] }
 0x203   : > { %v5267_v27 = vpop.f32.mrf.mxu1  ;;  %v5180_v10 = vpop.f32.mrf.mxu0  ;;  %v2104_v26 = vrot.slane %v2103_v17, 4  ;;  %v2521_v17 = vld [vmem:[#allocation2 + $0xb4] sm:$0xf] }
 0x204   : > { %5395 = vmatmul.bf16.gmra.mxu2 %v11791_v51  ;;  %v5268_v33 = vadd.f32 %v5267_v27, %v5179_v54  ;;  %v2093_v54 = vor.u32 %v2092_v25, %v2089_v22  ;;  %v2106_v51 = vshll.u32 %v1767_v14, 16  ;;  %v2411_v27 = vrot.slane %v2262_v35, 5  ;;  %2553 = vst [vmem:[#allocation4 + $0x3c0] sm:$0xf] %v2521_v17  ;;  %v1768_v35 = vld [vmem:[#allocation2 + $0xb4] sm:$0xf] }
 0x205   : > { %v5091_v61 = vpop.f32.mrf.mxu3  ;;  %v2266_v17 = vld [vmem:[#allocation2 + $0xbc] sm:$0x1] }
 0x206   : > { %5306 = vmatmul.bf16.gmra.mxu1 %v11787_v13  ;;  %v5092_v57 = vadd.f32 %v5091_v61, %v5003_v41  ;;  %v2094_v13 = vrot.slane %v2093_v54, 4  ;;  %v2108_v0 = vrot.slane %v2106_v51, 5  ;;  %v11385_v41 = vrot.slane %v2261_v37, 9  ;;  %v13405_v37 = vld [vmem:[#allocation4 + $0x36c] sm:$0xf] }
 0x207   : > { %v5356_v8 = vpop.f32.mrf.mxu2  ;;  %v2413_v2 = vrot.slane %v2411_v27, 4 }
 0x208   : > { %v15040_v31 = vadd.f32 %v5356_v8, %v5268_v33  ;;  %v5181_v34 = vadd.f32 %v5180_v10, %v5092_v57  ;;  %v13505_v10 = vld [vmem:[%s16942_s1 + $0x208] sm:$0xff]  ;;  %v2099_v61 = vsel %vm14183_vm10, %v2094_v13, %v2098_v53  ;;  %v13402_v57 = vld [vmem:[#allocation4 + $0x350] sm:$0xf0]  ;;  %v2412_v44 = vsel %vm14209_vm11, %v11385_v41, %v2411_v27  ;;  %v13397_v53 = vld [vmem:[#allocation4 + $0x32c] sm:$0xf] }
 0x209   : > { %v1689_v33 = vld [vmem:[#allocation2 + $0xac] sm:$0xf]  ;;  %5521 = vmatpush.bf16.msra.mxu0 %v13505_v10  ;;  %2216 = vst [vmem:[#allocation4 + $0x3b8] sm:$0xf] %v2099_v61  ;;  %v11820_v8 = vld [vmem:[#allocation4 + $0x34c] sm:$0xf0]  ;;  %v2415_v24 = vsel %vm14209_vm11, %v2413_v2, %v2414_v59  ;;  %v11827_v51 = vor.u32 %v13402_v57, %v11826_v9 }
 0x20a   : > { %5133 = vmatmul.bf16.gmra.mxu3 %v11815_v30  ;;  %1721 = vst [vmem:[#allocation4 + $0x3d8] sm:$0xf] %v1689_v33  ;;  %v2109_v30 = vsel %vm14183_vm10, %v2104_v26, %v2108_v0  ;;  %v1769_v13 = vld [vmem:[#allocation2 + $0xb8] sm:$0xf]  ;;  %v11848_v41 = vld [vmem:[#allocation4 + $0x38c] sm:$0xf0] }
 0x20b   : > { %v5269_v48 = vpop.f32.mrf.mxu1  ;;  %v5183_v47 = vpop.f32.mrf.mxu0  ;;  %2217 = vst [vmem:[#allocation4 + $0x3dc] sm:$0xf] %v2109_v30  ;;  %v2111_v27 = vshrl.u32 %v1768_v35, 16  ;;  %v2120_v39 = vshll.u32 %v1769_v13, 16  ;;  %v2124_v33 = vshrl.u32 %v1769_v13, 16 }
 0x20c   : > { %v5270_v40 = vadd.f32 %v5269_v48, %v5181_v34  ;;  %2488 = vst [vmem:[#allocation4 + $0x3bc] sm:$0xf] %v2412_v44  ;;  %v2114_v48 = vshll.u32 %v1768_v35, 16  ;;  %v327_v26 = vld [vmem:[%s14094_s19 + $0x78] sm:$0xf] }
 0x20d   : > { %v5094_v22 = vpop.f32.mrf.mxu3  ;;  %2489 = vst [vmem:[#allocation4 + $0x3e0] sm:$0xf] %v2415_v24  ;;  %v2113_v9 = vrot.slane %v2111_v27, 4  ;;  %v13410_v57 = vld [vmem:[#allocation4 + $0x390] sm:$0xf0]  ;;  %v2122_v44 = vrot.slane %v2120_v39, 5 }
 0x20e   : > { %5222 = vmatmul.bf16.gmra.mxu0 %v11819_v60  ;;  %v5095_v25 = vadd.f32 %v5094_v22, %v14737_v1  ;;  %v4919_v60 = vadd.f32 %v14745_v56, %v4830_v45  ;;  %v11823_v1 = vor.u32 %v13397_v53, %v11820_v8  ;;  %v11854_v56 = vld [vmem:[#allocation4 + $0x370] sm:$0xf]  ;;  %v2116_v61 = vrot.slane %v2114_v48, 5  ;;  %v1770_v30 = vld [vmem:[#allocation2 + $0xbc] sm:$0x1] }
 0x20f   : > { %v5358_v14 = vpop.f32.mrf.mxu2  ;;  %v11851_v22 = vor.u32 %v13405_v37, %v11848_v41  ;;  %v2126_v59 = vrot.slane %v2124_v33, 4  ;;  %v2265_v53 = vld [vmem:[#allocation2 + $0xb8] sm:$0xf]  ;;  %v642_v8 = vshrl.u32 %v327_v26, 16  ;;  %v2421_v41 = vrot.slane %v2266_v17, 5 }
 0x210   : > { %v15056_v34 = vadd.f32 %v5358_v14, %v5270_v40  ;;  %v5184_v54 = vadd.f32 %v5183_v47, %v5095_v25  ;;  %v5008_v47 = vadd.f32 %v14751_v18, %v4919_v60  ;;  %v2117_v25 = vor.u32 %v2116_v61, %v2113_v9  ;;  %v11862_v39 = vld [vmem:[#allocation4 + $0x378] sm:$0xf]  ;;  %v13411_v33 = vld [vmem:[#allocation4 + $0x398] sm:$0xf0] }
 0x211   : > { %v2130_v18 = vshll.u32 %v1770_v30, 16  ;;  %v11855_v60 = vor.u32 %v13410_v57, %v11854_v56  ;;  %v644_v27 = vrot.slane %v642_v8, 7  ;;  %v645_v9 = vshll.u32 %v327_v26, 16  ;;  %v817_v30 = vld [vmem:[#allocation2 + $0xc0] sm:$0xf] }
 0x212   : > { %v650_v61 = vshrl.u32 %v328_v28, 16  ;;  %v4835_v26 = vadd.f32 %v14967_v38, %v14760_v21 }
 0x213   : > { %v5272_v0 = vpop.f32.mrf.mxu1  ;;  %v5185_v7 = vpop.f32.mrf.mxu0  ;;  %v2132_v35 = vrot.slane %v2130_v18, 5 }
 0x214   : > { %5400 = vmatmul.bf16.gmra.mxu2 %v11827_v51  ;;  %v5273_v10 = vadd.f32 %v5272_v0, %v5184_v54  ;;  %v2127_v54 = vor.u32 %v2126_v59, %v2122_v44  ;;  %v2264_v51 = vld [vmem:[#allocation2 + $0xb4] sm:$0xe]  ;;  %v2418_v0 = vrot.slane %v2265_v53, 5  ;;  %v652_v18 = vrot.slane %v650_v61, 7 }
 0x215   : > { %v5096_v40 = vpop.f32.mrf.mxu3  ;;  %v11386_v37 = vrot.slane %v2264_v51, 9  ;;  %v653_v53 = vshll.u32 %v328_v28, 16  ;;  %v11856_v51 = vld [vmem:[#allocation4 + $0x394] sm:$0xf0] }
 0x216   : > { %5311 = vmatmul.bf16.gmra.mxu1 %v11823_v1  ;;  %v5097_v2 = vadd.f32 %v5096_v40, %v5008_v47  ;;  %v2118_v1 = vrot.slane %v2117_v25, 4  ;;  %v2128_v13 = vrot.slane %v2127_v54, 4  ;;  %v1691_v40 = vld [vmem:[#allocation2 + $0xb8] sm:$0xf]  ;;  %v2420_v57 = vrot.slane %v2418_v0, 4 }
 0x217   : > { %v5361_v45 = vpop.f32.mrf.mxu2  ;;  %1723 = vst [vmem:[#allocation4 + $0x420] sm:$0xf] %v1691_v40  ;;  %v648_v25 = vrot.slane %v644_v27, 4  ;;  %v821_v54 = vld [vmem:[#allocation2 + $0xc8] sm:$0x1] }
 0x218   : > { %v15061_v14 = vadd.f32 %v5361_v45, %v5273_v10  ;;  %v5186_v24 = vadd.f32 %v5185_v7, %v5097_v2  ;;  %v1690_v10 = vld [vmem:[#allocation2 + $0xb4] sm:$0xf]  ;;  %v2123_v7 = vsel %vm14183_vm10, %v2118_v1, %v2122_v44  ;;  %v2133_v2 = vsel %vm14183_vm10, %v2128_v13, %v2132_v35  ;;  %v13406_v44 = vld [vmem:[#allocation4 + $0x374] sm:$0xf]  ;;  %v11884_v40 = vld [vmem:[#allocation4 + $0x3d4] sm:$0xf0] }
 0x219   : > { %1722 = vst [vmem:[#allocation4 + $0x3fc] sm:$0xf] %v1690_v10  ;;  %v647_v45 = vor.u32 %v645_v9, %v644_v27  ;;  %v655_v1 = vor.u32 %v653_v53, %v652_v18  ;;  %v657_v35 = vrot.slane %v652_v18, 4  ;;  %v13414_v27 = vld [vmem:[#allocation4 + $0x3b4] sm:$0xf] }
 0x21a   : > { %5138 = vmatmul.bf16.gmra.mxu3 %v11851_v22  ;;  %v2419_v22 = vsel %vm14209_vm11, %v11386_v37, %v2418_v0  ;;  %2218 = vst [vmem:[#allocation4 + $0x400] sm:$0xf] %v2123_v7  ;;  %v4924_v0 = vadd.f32 %v14770_v11, %v4835_v26  ;;  %v13669_v7 = vld [vmem:[#allocation5 + $0x28] sm:$0xff]  ;;  %v13496_v11 = vld [vmem:[%s16942_s1 + $0x1c0] sm:$0xff] }
 0x21b   : > { %v5274_v48 = vpop.f32.mrf.mxu1  ;;  %v5188_v47 = vpop.f32.mrf.mxu0  ;;  %2219 = vst [vmem:[#allocation4 + $0x424] sm:$0xf] %v2133_v2  ;;  %v818_v28 = vsel %vm14172_vm9, %v647_v45, %v817_v30  ;;  %v822_v13 = vsel %vm14289_vm13, %v657_v35, %v821_v54  ;;  %10383 = vmatpush.bf16.msra.mxu2 %v13669_v7  ;;  %v13517_v2 = vld [vmem:[%s16946_s5 + $0x28] sm:$0xff]  ;;  %5433 = vmatpush.bf16.msra.mxu3 %v13496_v11  ;;  %v11892_v11 = vld [vmem:[#allocation4 + $0x3dc] sm:$0xf0] }
 0x21c   : > { %v5275_v56 = vadd.f32 %v5274_v48, %v5186_v24  ;;  %v2422_v24 = vsel %vm14209_vm11, %v2420_v57, %v2421_v41  ;;  %2490 = vst [vmem:[#allocation4 + $0x404] sm:$0xf] %v2419_v22  ;;  %v11859_v41 = vor.u32 %v13406_v44, %v11856_v51  ;;  %v11890_v57 = vld [vmem:[#allocation4 + $0x3b8] sm:$0xf]  ;;  %v13419_v30 = vld [vmem:[#allocation4 + $0x3d8] sm:$0xf0]  ;;  %5802 = vmatpush.bf16.msra.mxu1 %v13517_v2 }
 0x21d   : > { %v5099_v59 = vpop.f32.mrf.mxu3  ;;  %2491 = vst [vmem:[#allocation4 + $0x428] sm:$0xf] %v2422_v24  ;;  %v11891_v26 = vor.u32 %v13419_v30, %v11890_v57  ;;  %v11898_v51 = vld [vmem:[#allocation4 + $0x3c0] sm:$0xf] }
 0x21e   : > { %5227 = vmatmul.bf16.gmra.mxu0 %v11855_v60  ;;  %v5100_v8 = vadd.f32 %v5099_v59, %v14766_v52  ;;  %v11863_v60 = vor.u32 %v13411_v33, %v11862_v39  ;;  %v656_v52 = vsel %vm14161_vm7, %v648_v25, %v655_v1  ;;  %819 = vst [vmem:[#allocation2 + $0xc0] sm:$0xf] %v818_v28  ;;  %v13504_v1 = vld [vmem:[%s16942_s1 + $0x200] sm:$0xff] }
 0x21f   : > { %v5363_v17 = vpop.f32.mrf.mxu2  ;;  %820 = vst [vmem:[#allocation2 + $0xc4] sm:$0xf] %v656_v52  ;;  %5522 = vmatpush.bf16.msra.mxu0 %v13504_v1 }
 0x220   : > { %v15077_v37 = vadd.f32 %v5363_v17, %v5275_v56  ;;  %v5189_v21 = vadd.f32 %v5188_v47, %v5100_v8  ;;  %v16974_v47 = vld [vmem:[#allocation8_spill] sm:$0xff]  ;;  %823 = vst [vmem:[#allocation2 + $0xc8] sm:$0x1] %v822_v13  ;;  %v11887_v56 = vor.u32 %v13414_v27, %v11884_v40  ;;  %v13415_v13 = vld [vmem:[#allocation4 + $0x3bc] sm:$0xf]  ;;  %v16975_v40 = vld [vmem:[#allocation9_spill] sm:$0xff] }
 0x221   : > { %v5013_v39 = vadd.f32 %v16974_v47, %v4924_v0  ;;  %v13420_v17 = vld [vmem:[#allocation4 + $0x3e0] sm:$0xf0]  ;;  %v4840_v7 = vadd.f32 %v14967_v38, %v16975_v40  ;;  %v16976_v47 = vld [vmem:[#allocation10_spill] sm:$0xff] }
 0x222   : > { %v13516_v38 = vld [vmem:[%s16946_s5 + $0x20] sm:$0xff] }
 0x223   : > { %v5277_v48 = vpop.f32.mrf.mxu1  ;;  %v5190_v10 = vpop.f32.mrf.mxu0  ;;  %5803 = vmatpush.bf16.msra.mxu1 %v13516_v38 }
 0x224   : > { %5405 = vmatmul.bf16.gmra.mxu2 %v11863_v60  ;;  %v5278_v33 = vadd.f32 %v5277_v48, %v5189_v21 }
 0x225   : > { %v5101_v9 = vpop.f32.mrf.mxu3  ;;  %v2523_v25 = vld [vmem:[#allocation2 + $0xc0] sm:$0xf] }
 0x226   : > { %5316 = vmatmul.bf16.gmra.mxu1 %v11859_v41  ;;  %v5102_v61 = vadd.f32 %v5101_v9, %v5013_v39  ;;  %v1771_v18 = vld [vmem:[#allocation2 + $0xc0] sm:$0xf]  ;;  %v2524_v44 = vld [vmem:[#allocation2 + $0xc4] sm:$0xf]  ;;  %2555 = vst [vmem:[#allocation4 + $0x408] sm:$0xf] %v2523_v25 }
 0x227   : > { %v5366_v22 = vpop.f32.mrf.mxu2  ;;  %v2267_v53 = vld [vmem:[#allocation2 + $0xc0] sm:$0xe]  ;;  %v1772_v8 = vld [vmem:[#allocation2 + $0xc4] sm:$0xf]  ;;  %2556 = vst [vmem:[#allocation4 + $0x42c] sm:$0xf] %v2524_v44 }
 0x228   : > { %v15091_v59 = vadd.f32 %v5366_v22, %v5278_v33  ;;  %v5191_v45 = vadd.f32 %v5190_v10, %v5102_v61  ;;  %v1692_v35 = vld [vmem:[#allocation2 + $0xc0] sm:$0xf]  ;;  %v2135_v28 = vshrl.u32 %v1771_v18, 16  ;;  %v1693_v60 = vld [vmem:[#allocation2 + $0xc4] sm:$0xf]  ;;  %v2138_v27 = vshll.u32 %v1771_v18, 16 }
 0x229   : > { %1724 = vst [vmem:[#allocation4 + $0x444] sm:$0xf] %v1692_v35  ;;  %v1773_v52 = vld [vmem:[#allocation2 + $0xc8] sm:$0x1]  ;;  %v2144_v48 = vshll.u32 %v1772_v8, 16  ;;  %v2148_v10 = vshrl.u32 %v1772_v8, 16  ;;  %v11899_v18 = vor.u32 %v13420_v17, %v11898_v51 }
 0x22a   : > { %5143 = vmatmul.bf16.gmra.mxu3 %v11887_v56  ;;  %1725 = vst [vmem:[#allocation4 + $0x468] sm:$0xf] %v1693_v60  ;;  %v2137_v41 = vrot.slane %v2135_v28, 4  ;;  %v2154_v33 = vshll.u32 %v1773_v52, 16  ;;  %v2268_v9 = vld [vmem:[#allocation2 + $0xc4] sm:$0xf]  ;;  %v11895_v52 = vor.u32 %v13415_v13, %v11892_v11 }
 0x22b   : > { %v5279_v24 = vpop.f32.mrf.mxu1  ;;  %v5193_v54 = vpop.f32.mrf.mxu0  ;;  %v2269_v61 = vld [vmem:[#allocation2 + $0xc8] sm:$0x1]  ;;  %v11387_v56 = vrot.slane %v2267_v53, 9  ;;  %v2140_v22 = vrot.slane %v2138_v27, 5  ;;  %v2146_v57 = vrot.slane %v2144_v48, 5  ;;  %v2150_v30 = vrot.slane %v2148_v10, 4 }
 0x22c   : > { %v15096_v21 = vadd.f32 %v5279_v24, %v5191_v45  ;;  %v2425_v45 = vrot.slane %v2268_v9, 5  ;;  %v2156_v44 = vrot.slane %v2154_v33, 5  ;;  %v2428_v8 = vrot.slane %v2269_v61, 5  ;;  %v2525_v35 = vld [vmem:[#allocation2 + $0xcc] sm:$0xf] }
 0x22d   : > { %v5104_v0 = vpop.f32.mrf.mxu3  ;;  %v2151_v24 = vor.u32 %v2150_v30, %v2146_v57  ;;  %v16977_v28 = vld [vmem:[#allocation11_spill] sm:$0xff]  ;;  %v11920_v27 = vld [vmem:[#allocation4 + $0x41c] sm:$0xf0]  ;;  %2557 = vst [vmem:[#allocation4 + $0x450] sm:$0xf] %v2525_v35 }
 0x22e   : > { %5232 = vmatmul.bf16.gmra.mxu0 %v11891_v26  ;;  %v5105_v39 = vadd.f32 %v5104_v0, %v16976_v47  ;;  %v2141_v26 = vor.u32 %v2140_v22, %v2137_v41  ;;  %v2426_v53 = vsel %vm14209_vm11, %v11387_v56, %v2425_v45  ;;  %v2427_v1 = vrot.slane %v2425_v45, 4  ;;  %v13423_v0 = vld [vmem:[#allocation4 + $0x3fc] sm:$0xf]  ;;  %v13428_v33 = vld [vmem:[#allocation4 + $0x420] sm:$0xf0]  ;;  %v13515_v56 = vld [vmem:[%s16946_s5 + $0x18] sm:$0xff] }
 0x22f   : > { %v15101_v2 = vpop.f32.mrf.mxu2  ;;  %v4929_v60 = vadd.f32 %v16977_v28, %v4840_v7  ;;  %2492 = vst [vmem:[#allocation4 + $0x44c] sm:$0xf] %v2426_v53  ;;  %v2152_v10 = vrot.slane %v2151_v24, 4  ;;  %v2559_v7 = vld [vmem:[#allocation2 + $0x18] sm:$0xf]  ;;  %v11923_v30 = vor.u32 %v13423_v0, %v11920_v27  ;;  %5804 = vmatpush.bf16.msra.mxu1 %v13515_v56 }
 0x230   : > { %v5194_v25 = vadd.f32 %v5193_v54, %v5105_v39  ;;  %v2526_v54 = vld [vmem:[#allocation2 + $0xd0] sm:$0xf]  ;;  %v2142_v48 = vrot.slane %v2141_v26, 4  ;;  %v2429_v41 = vsel %vm14209_vm11, %v2427_v1, %v2428_v8  ;;  %v2560_v11 = vld [vmem:[#allocation2 + $0x1c] sm:$0xf] }
 0x231   : > { %v5018_v40 = vadd.f32 %v14818_v43, %v4929_v60  ;;  %2493 = vst [vmem:[#allocation4 + $0x470] sm:$0xf] %v2429_v41  ;;  %v11926_v39 = vld [vmem:[#allocation4 + $0x400] sm:$0xf]  ;;  %v2157_v61 = vsel %vm14183_vm10, %v2152_v10, %v2156_v44  ;;  %v2608_v43 = vshrl.u32 %v2559_v7, 16  ;;  %v2621_v38 = vshrl.u32 %v2560_v11, 16 }
 0x232   : > { %v2147_v9 = vsel %vm14183_vm10, %v2142_v48, %v2146_v57  ;;  %2558 = vst [vmem:[#allocation4 + $0x474] sm:$0xf] %v2526_v54  ;;  %v2561_v45 = vld [vmem:[#allocation2 + $0x20] sm:$0x1]  ;;  %v3055_v35 = vld [vmem:[#allocation2 + $0x18] sm:$0xe]  ;;  %v11927_v54 = vor.u32 %v13428_v33, %v11926_v39 }
 0x233   : > { %v5282_v51 = vpop.f32.mrf.mxu1  ;;  %v5195_v17 = vpop.f32.mrf.mxu0  ;;  %2220 = vst [vmem:[#allocation4 + $0x448] sm:$0xf] %v2147_v9  ;;  %v2610_v57 = vrot.slane %v2608_v43, 4  ;;  %v2627_v44 = vshll.u32 %v2561_v45, 16  ;;  %v3056_v28 = vld [vmem:[#allocation2 + $0x1c] sm:$0xf] }
 0x234   : > { %5410 = vmatmul.bf16.gmra.mxu2 %v11899_v18  ;;  %v5283_v47 = vadd.f32 %v5282_v51, %v5194_v25  ;;  %v2611_v25 = vshll.u32 %v2559_v7, 16  ;;  %v2617_v18 = vshll.u32 %v2560_v11, 16  ;;  %2221 = vst [vmem:[#allocation4 + $0x46c] sm:$0xf] %v2157_v61  ;;  %v13514_v60 = vld [vmem:[%s16946_s5 + $0x10] sm:$0xff]  ;;  %v11388_v0 = vrot.slane %v3055_v35, 9 }
 0x235   : > { %v5106_v13 = vpop.f32.mrf.mxu3  ;;  %v15124_v51 = vld [vmem:[#allocation4 + $0x450] sm:$0xf]  ;;  %v2629_v48 = vrot.slane %v2627_v44, 5  ;;  %v3153_v10 = vrot.slane %v3056_v28, 5  ;;  %5805 = vmatpush.bf16.msra.mxu1 %v13514_v60  ;;  %v8104_v7 = vld [vmem:[#allocation3 + $0xd0] sm:$0xf] }
 0x236   : > { %5321 = vmatmul.bf16.gmra.mxu1 %v11895_v52  ;;  %v5107_v22 = vadd.f32 %v5106_v13, %v5018_v40  ;;  %v2613_v53 = vrot.slane %v2611_v25, 5  ;;  %v2619_v1 = vrot.slane %v2617_v18, 5  ;;  %v2623_v52 = vrot.slane %v2621_v38, 4  ;;  %v3057_v9 = vld [vmem:[#allocation2 + $0x20] sm:$0x1]  ;;  %v13513_v39 = vld [vmem:[%s16946_s5 + $0x8] sm:$0xff] }
 0x237   : > { %v5371_v8 = vpop.f32.mrf.mxu2  ;;  %v3154_v11 = vsel %vm14209_vm11, %v11388_v0, %v3153_v10  ;;  %v3155_v45 = vrot.slane %v3153_v10, 4  ;;  %v13787_v25 = vld [vmem:[%s16943_s2] ss:$0 sm:$0xff]  ;;  %v3156_v44 = vrot.slane %v3057_v9, 5  ;;  %v13432_v0 = vld [vmem:[#allocation4 + $0x444] sm:$0xf] }
 0x238   : > { %v15119_v26 = vadd.f32 %v5371_v8, %v5283_v47  ;;  %v5196_v24 = vadd.f32 %v5195_v17, %v5107_v22  ;;  %v2614_v27 = vor.u32 %v2613_v53, %v2610_v57  ;;  %v11934_v17 = vld [vmem:[#allocation4 + $0x408] sm:$0xf]  ;;  %v8103_v47 = vld [vmem:[#allocation3 + $0xcc] sm:$0xf]  ;;  %v2624_v13 = vor.u32 %v2623_v52, %v2619_v1  ;;  %v13429_v22 = vld [vmem:[#allocation4 + $0x428] sm:$0xf0] }
 0x239   : > { %v15128_v56 = vld [vmem:[#allocation4 + $0x470] sm:$0xf0]  ;;  %8135 = vst [vmem:[#allocation4 + $0x450] sm:$0xf] %v8103_v47  ;;  %v4845_v18 = vadd.f32 %v13787_v25, %v14829_v12  ;;  %v16978_v8 = vld [vmem:[#allocation12_spill] sm:$0xff]  ;;  %5806 = vmatpush.bf16.msra.mxu1 %v13513_v39  ;;  %v11935_v52 = vor.u32 %v13429_v22, %v11934_v17  ;;  %v3157_v12 = vsel %vm14209_vm11, %v3155_v45, %v3156_v44 }
 0x23a   : > { %5148 = vmatmul.bf16.gmra.mxu3 %v11923_v30  ;;  %v2615_v33 = vrot.slane %v2614_v27, 4  ;;  %8136 = vst [vmem:[#allocation4 + $0x474] sm:$0xf] %v8104_v7  ;;  %v2625_v30 = vrot.slane %v2624_v13, 4  ;;  %v11928_v53 = vld [vmem:[#allocation4 + $0x424] sm:$0xf0] }
 0x23b   : > { %v5284_v41 = vpop.f32.mrf.mxu1  ;;  %v5198_v40 = vpop.f32.mrf.mxu0  ;;  %3295 = vst [vmem:[#allocation4 + $0x20] sm:$0xf] %v3154_v11  ;;  %v2562_v47 = vld [vmem:[#allocation2 + $0x24] sm:$0xf]  ;;  %v2563_v7 = vld [vmem:[#allocation2 + $0x28] sm:$0xf] }
 0x23c   : > { %v15126_v61 = vadd.f32 %v5284_v41, %v5196_v24  ;;  %v2620_v38 = vsel %vm14183_vm10, %v2615_v33, %v2619_v1  ;;  %v13424_v24 = vld [vmem:[#allocation4 + $0x404] sm:$0xf]  ;;  %v2630_v28 = vsel %vm14183_vm10, %v2625_v30, %v2629_v48  ;;  %v13512_v1 = vld [vmem:[%s16946_s5] sm:$0xff]  ;;  %3296 = vst [vmem:[#allocation4 + $0x44] sm:$0xf] %v3157_v12  ;;  %v2632_v17 = vshrl.u32 %v2562_v47, 16 }
 0x23d   : > { %v5109_v43 = vpop.f32.mrf.mxu3  ;;  %3023 = vst [vmem:[#allocation4 + $0x1c] sm:$0xf] %v2620_v38  ;;  %v11931_v10 = vor.u32 %v13424_v24, %v11928_v53  ;;  %v11956_v41 = vld [vmem:[#allocation4 + $0x464] sm:$0xf0]  ;;  %5807 = vmatpush.bf16.msra.mxu1 %v13512_v1  ;;  %v2635_v9 = vshll.u32 %v2562_v47, 16  ;;  %v2641_v39 = vshll.u32 %v2563_v7, 16 }
 0x23e   : > { %5237 = vmatmul.bf16.gmra.mxu0 %v11927_v54  ;;  %v5110_v57 = vadd.f32 %v5109_v43, %v16978_v8  ;;  %3024 = vst [vmem:[#allocation4 + $0x40] sm:$0xf] %v2630_v28  ;;  %v16979_v54 = vld [vmem:[#allocation13_spill] sm:$0xff]  ;;  %v2645_v33 = vshrl.u32 %v2563_v7, 16  ;;  %v16980_v11 = vld [vmem:[#allocation14_spill] sm:$0xff]  ;;  %v2634_v45 = vrot.slane %v2632_v17, 4  ;;  %v11959_v38 = vor.u32 %v13432_v0, %v11956_v41 }
 0x23f   : > { %v15142_v35 = vpop.f32.mrf.mxu2  ;;  %v4934_v27 = vadd.f32 %v16979_v54, %v4845_v18  ;;  %v2637_v25 = vrot.slane %v2635_v9, 5  ;;  %v2643_v18 = vrot.slane %v2641_v39, 5  ;;  %v2564_v44 = vld [vmem:[#allocation2 + $0x2c] sm:$0x1]  ;;  %v3059_v24 = vld [vmem:[#allocation2 + $0x28] sm:$0xf] }
 0x240   : > { %v5199_v60 = vadd.f32 %v5198_v40, %v5110_v57  ;;  %v13668_v40 = vld [vmem:[#allocation5 + $0x20] sm:$0xff]  ;;  %v2647_v8 = vrot.slane %v2645_v33, 4  ;;  %v11962_v28 = vld [vmem:[#allocation4 + $0x448] sm:$0xf]  ;;  %v13437_v12 = vld [vmem:[#allocation4 + $0x468] sm:$0xf0] }
 0x241   : > { %v5023_v43 = vadd.f32 %v16980_v11, %v4934_v27  ;;  %10384 = vmatpush.bf16.msra.mxu2 %v13668_v40  ;;  %v2638_v1 = vor.u32 %v2637_v25, %v2634_v45  ;;  %v2651_v47 = vshll.u32 %v2564_v44, 16  ;;  %v3160_v27 = vrot.slane %v3059_v24, 5  ;;  %v3058_v7 = vld [vmem:[#allocation2 + $0x24] sm:$0xe] }
 0x242   : > { %v2648_v54 = vor.u32 %v2647_v8, %v2643_v18  ;;  %v11389_v0 = vrot.slane %v3058_v7, 9  ;;  %v16981_v8 = vld [vmem:[#allocation15_spill] sm:$0xff] }
 0x243   : > { %v5287_v48 = vpop.f32.mrf.mxu1  ;;  %v5200_v13 = vpop.f32.mrf.mxu0  ;;  %v2639_v40 = vrot.slane %v2638_v1, 4  ;;  %v2653_v9 = vrot.slane %v2651_v47, 5  ;;  %v3162_v41 = vrot.slane %v3160_v27, 4  ;;  %v2565_v1 = vld [vmem:[#allocation2 + $0x30] sm:$0xf] }
 0x244   : > { %5415 = vmatmul.bf16.gmra.mxu2 %v11935_v52  ;;  %v5288_v22 = vadd.f32 %v5287_v48, %v5199_v60  ;;  %v3060_v48 = vld [vmem:[#allocation2 + $0x2c] sm:$0x1]  ;;  %v2649_v17 = vrot.slane %v2648_v54, 4  ;;  %v2566_v54 = vld [vmem:[#allocation2 + $0x34] sm:$0xf]  ;;  %v2656_v7 = vshrl.u32 %v2565_v1, 16 }
 0x245   : > { %v5111_v30 = vpop.f32.mrf.mxu3  ;;  %v3163_v39 = vrot.slane %v3060_v48, 5  ;;  %v2659_v48 = vshll.u32 %v2565_v1, 16 }
 0x246   : > { %5326 = vmatmul.bf16.gmra.mxu1 %v11931_v10  ;;  %v5112_v57 = vadd.f32 %v5111_v30, %v5023_v43  ;;  %v11963_v10 = vor.u32 %v13437_v12, %v11962_v28  ;;  %v2644_v43 = vsel %vm14183_vm10, %v2639_v40, %v2643_v18  ;;  %v11964_v18 = vld [vmem:[#allocation4 + $0x46c] sm:$0xf0]  ;;  %v13299_v12 = vld [vmem:[#allocation4 + $0x1c] sm:$0xf]  ;;  %v2665_v40 = vshll.u32 %v2566_v54, 16 }
 0x247   : > { %v5376_v53 = vpop.f32.mrf.mxu2  ;;  %3025 = vst [vmem:[#allocation4 + $0x64] sm:$0xf] %v2644_v43  ;;  %v3164_v45 = vsel %vm14209_vm11, %v3162_v41, %v3163_v39  ;;  %v2661_v41 = vrot.slane %v2659_v48, 5 }
 0x248   : > { %v15153_v52 = vadd.f32 %v5376_v53, %v5288_v22  ;;  %v5201_v60 = vadd.f32 %v5200_v13, %v5112_v57  ;;  %v2654_v22 = vsel %vm14183_vm10, %v2649_v17, %v2653_v9  ;;  %v3161_v13 = vsel %vm14209_vm11, %v11389_v0, %v3160_v27  ;;  %3298 = vst [vmem:[#allocation4 + $0x8c] sm:$0xf] %v3164_v45 }
 0x249   : > { %3026 = vst [vmem:[#allocation4 + $0x88] sm:$0xf] %v2654_v22  ;;  %v11971_v53 = vor.u32 %v15128_v56, %v15124_v51  ;;  %v2669_v9 = vshrl.u32 %v2566_v54, 16  ;;  %v2658_v0 = vrot.slane %v2656_v7, 4  ;;  %v2667_v39 = vrot.slane %v2665_v40, 5 }
 0x24a   : > { %5153 = vmatmul.bf16.gmra.mxu3 %v11959_v38  ;;  %3297 = vst [vmem:[#allocation4 + $0x68] sm:$0xf] %v3161_v13  ;;  %v13433_v38 = vld [vmem:[#allocation4 + $0x44c] sm:$0xf]  ;;  %v13304_v13 = vld [vmem:[#allocation4 + $0x40] sm:$0xf0] }
 0x24b   : > { %v5289_v33 = vpop.f32.mrf.mxu1  ;;  %v5203_v11 = vpop.f32.mrf.mxu0  ;;  %v11967_v28 = vor.u32 %v13433_v38, %v11964_v18  ;;  %v2671_v43 = vrot.slane %v2669_v9, 4  ;;  %v2662_v45 = vor.u32 %v2661_v41, %v2658_v0 }
 0x24c   : > { %v15159_v30 = vadd.f32 %v5289_v33, %v5201_v60  ;;  %v11432_v60 = vld [vmem:[#allocation4 + $0x3c] sm:$0xf0] }
 0x24d   : > { %v5114_v25 = vpop.f32.mrf.mxu3  ;;  %v11435_v56 = vor.u32 %v13299_v12, %v11432_v60  ;;  %v11438_v33 = vld [vmem:[#allocation4 + $0x20] sm:$0xf]  ;;  %v2672_v18 = vor.u32 %v2671_v43, %v2667_v39  ;;  %v2663_v54 = vrot.slane %v2662_v45, 4  ;;  %v2568_v43 = vld [vmem:[#allocation2 + $0x3c] sm:$0xf] }
 0x24e   : > { %5242 = vmatmul.bf16.gmra.mxu0 %v11963_v10  ;;  %v5115_v57 = vadd.f32 %v5114_v25, %v16981_v8  ;;  %v3062_v8 = vld [vmem:[#allocation2 + $0x34] sm:$0xf]  ;;  %v11439_v12 = vor.u32 %v13304_v13, %v11438_v33  ;;  %v13280_v33 = vld [vmem:[%s14094_s19] sm:$0xff] }
 0x24f   : > { %v15166_v44 = vpop.f32.mrf.mxu2  ;;  %v3167_v1 = vrot.slane %v3062_v8, 5  ;;  %v2673_v60 = vrot.slane %v2672_v18, 4  ;;  %v13667_v8 = vld [vmem:[#allocation5 + $0x18] sm:$0xff]  ;;  %v2683_v18 = vshll.u32 %v2568_v43, 16 }
 0x250   : > { %v5204_v24 = vadd.f32 %v5203_v11, %v5115_v57  ;;  %v2567_v11 = vld [vmem:[#allocation2 + $0x38] sm:$0x1]  ;;  %10385 = vmatpush.bf16.msra.mxu2 %v13667_v8 }
 0x251   : > { %v2675_v25 = vshll.u32 %v2567_v11, 16  ;;  %v3169_v7 = vrot.slane %v3167_v1, 4  ;;  %v13308_v11 = vld [vmem:[#allocation4 + $0x64] sm:$0xf] }
 0x253   : > { %v5292_v47 = vpop.f32.mrf.mxu1  ;;  %v5205_v27 = vpop.f32.mrf.mxu0 }
 0x254   : > { %5420 = vmatmul.bf16.gmra.mxu2 %v11971_v53  ;;  %v5293_v17 = vadd.f32 %v5292_v47, %v5204_v24  ;;  %v3061_v24 = vld [vmem:[#allocation2 + $0x30] sm:$0xe]  ;;  %v3063_v53 = vld [vmem:[#allocation2 + $0x38] sm:$0x1] }
 0x255   : > { %v5116_v10 = vpop.f32.mrf.mxu3  ;;  %v11390_v47 = vrot.slane %v3061_v24, 9 }
 0x256   : > { %5331 = vmatmul.bf16.gmra.mxu1 %v11967_v28  ;;  %v5117_v51 = vadd.f32 %v5116_v10, %v14884_v36  ;;  %v2677_v28 = vrot.slane %v2675_v25, 5  ;;  %v3170_v36 = vrot.slane %v3063_v53, 5  ;;  %v11468_v25 = vld [vmem:[#allocation4 + $0x84] sm:$0xf0] }
 0x257   : > { %v5381_v22 = vpop.f32.mrf.mxu2 }
 0x258   : > { %v15171_v57 = vadd.f32 %v5381_v22, %v5293_v17  ;;  %v5206_v38 = vadd.f32 %v5205_v27, %v5117_v51  ;;  %v2668_v17 = vsel %vm14183_vm10, %v2663_v54, %v2667_v39  ;;  %v3168_v27 = vsel %vm14209_vm11, %v11390_v47, %v3167_v1  ;;  %v2569_v22 = vld [vmem:[#allocation2 + $0x40] sm:$0xf] }
 0x259   : > { %v2678_v10 = vsel %vm14183_vm10, %v2673_v60, %v2677_v28  ;;  %3027 = vst [vmem:[#allocation4 + $0xac] sm:$0xf] %v2668_v17  ;;  %v3171_v0 = vsel %vm14209_vm11, %v3169_v7, %v3170_v36  ;;  %v2689_v53 = vshll.u32 %v2569_v22, 16  ;;  %v2693_v1 = vshrl.u32 %v2569_v22, 16  ;;  %v2570_v60 = vld [vmem:[#allocation2 + $0x44] sm:$0x1] }
 0x25a   : > { %5434 = vmatmul.bf16.vlgmr.msra.gmra.mxu3 %v11435_v56  ;;  %3028 = vst [vmem:[#allocation4 + $0xd0] sm:$0xf] %v2678_v10  ;;  %v2685_v28 = vrot.slane %v2683_v18, 5  ;;  %v11471_v36 = vor.u32 %v13308_v11, %v11468_v25  ;;  %v13313_v17 = vld [vmem:[#allocation4 + $0x88] sm:$0xf0]  ;;  %v2699_v10 = vshll.u32 %v2570_v60, 16 }
 0x25b   : > { %v5294_v48 = vpop.f32.mrf.mxu1  ;;  %v5208_v40 = vpop.f32.mrf.mxu0  ;;  %3299 = vst [vmem:[#allocation4 + $0xb0] sm:$0xf] %v3168_v27  ;;  %v2691_v7 = vrot.slane %v2689_v53, 5  ;;  %v3066_v22 = vld [vmem:[#allocation2 + $0x44] sm:$0x1] }
 0x25c   : > { %v15177_v9 = vadd.f32 %v5294_v48, %v5206_v38  ;;  %3300 = vst [vmem:[#allocation4 + $0xd4] sm:$0xf] %v3171_v0  ;;  %v2680_v38 = vshrl.u32 %v2568_v43, 16  ;;  %v2695_v48 = vrot.slane %v2693_v1, 4  ;;  %v3065_v0 = vld [vmem:[#allocation2 + $0x40] sm:$0xf] }
 0x25d   : > { %v5119_v41 = vpop.f32.mrf.mxu3  ;;  %v3064_v43 = vld [vmem:[#allocation2 + $0x3c] sm:$0xe]  ;;  %v2701_v8 = vrot.slane %v2699_v10, 5  ;;  %v3177_v11 = vrot.slane %v3066_v22, 5 }
 0x25e   : > { %5523 = vmatmul.bf16.vlgmr.msra.gmra.mxu0 %v11439_v12  ;;  %v5120_v51 = vadd.f32 %v5119_v41, %v14893_v55  ;;  %v2682_v55 = vrot.slane %v2680_v38, 4  ;;  %v11474_v12 = vld [vmem:[#allocation4 + $0x68] sm:$0xf] }
 0x25f   : > { %v15184_v56 = vpop.f32.mrf.mxu2  ;;  %v11475_v25 = vor.u32 %v13313_v17, %v11474_v12  ;;  %v2572_v17 = vld [vmem:[#allocation2 + $0x4c] sm:$0xf] }
 0x260   : > { %v5209_v39 = vadd.f32 %v5208_v40, %v5120_v51  ;;  %v2686_v27 = vor.u32 %v2685_v28, %v2682_v55 }
 0x263   : > { %v5297_v13 = vpop.f32.mrf.mxu1  ;;  %v5210_v45 = vpop.f32.mrf.mxu0 }
 0x264   : > { %v5298_v24 = vadd.f32 %v5297_v13, %v5209_v39  ;;  %v2696_v39 = vor.u32 %v2695_v48, %v2691_v7  ;;  %v3174_v13 = vrot.slane %v3065_v0, 5  ;;  %v13317_v48 = vld [vmem:[#allocation4 + $0xac] sm:$0xf]  ;;  %v11504_v0 = vld [vmem:[#allocation4 + $0xcc] sm:$0xf0] }
 0x265   : > { %v5121_v54 = vpop.f32.mrf.mxu3 }
 0x266   : > { %5808 = vmatmul.bf16.vlgmr.msra.gmra.mxu1 %v13280_v33  ;;  %v5122_v47 = vadd.f32 %v5121_v54, %v14907_v15  ;;  %v2687_v33 = vrot.slane %v2686_v27, 4  ;;  %v11391_v15 = vrot.slane %v3064_v43, 9  ;;  %v2697_v38 = vrot.slane %v2696_v39, 4 }
 0x267   : > { %v5386_v40 = vpop.f32.mrf.mxu2  ;;  %v3176_v18 = vrot.slane %v3174_v13, 4  ;;  %v2713_v43 = vshll.u32 %v2572_v17, 16 }
 0x268   : > { %v15188_v41 = vadd.f32 %v5386_v40, %v5298_v24  ;;  %v5211_v51 = vadd.f32 %v5210_v45, %v5122_v47  ;;  %v2692_v24 = vsel %vm14183_vm10, %v2687_v33, %v2691_v7  ;;  %v3175_v45 = vsel %vm14209_vm11, %v11391_v15, %v3174_v13  ;;  %v13281_v7 = vld [vmem:[%s14094_s19 + $0x8] sm:$0xff] }
 0x269   : > { %v2702_v55 = vsel %vm14183_vm10, %v2697_v38, %v2701_v8  ;;  %3029 = vst [vmem:[#allocation4 + $0xf4] sm:$0xf] %v2692_v24  ;;  %v3178_v28 = vsel %vm14209_vm11, %v3176_v18, %v3177_v11  ;;  %v2571_v40 = vld [vmem:[#allocation2 + $0x48] sm:$0xf]  ;;  %v2717_v13 = vshrl.u32 %v2572_v17, 16  ;;  %v2715_v15 = vrot.slane %v2713_v43, 5 }
 0x26a   : > { %5439 = vmatmul.bf16.gmra.mxu3 %v11471_v36  ;;  %3030 = vst [vmem:[#allocation4 + $0x118] sm:$0xf] %v2702_v55  ;;  %v2707_v39 = vshll.u32 %v2571_v40, 16  ;;  %v11510_v38 = vld [vmem:[#allocation4 + $0xb0] sm:$0xf] }
 0x26b   : > { %v5299_v53 = vpop.f32.mrf.mxu1  ;;  %v5213_v1 = vpop.f32.mrf.mxu0  ;;  %3301 = vst [vmem:[#allocation4 + $0xf8] sm:$0xf] %v3175_v45  ;;  %v2573_v18 = vld [vmem:[#allocation2 + $0x50] sm:$0x1]  ;;  %v13322_v24 = vld [vmem:[#allocation4 + $0xd0] sm:$0xf0] }
 0x26c   : > { %v15194_v54 = vadd.f32 %v5299_v53, %v5211_v51  ;;  %3302 = vst [vmem:[#allocation4 + $0x11c] sm:$0xf] %v3178_v28  ;;  %v2704_v51 = vshrl.u32 %v2571_v40, 16  ;;  %v2719_v53 = vrot.slane %v2717_v13, 4  ;;  %v2723_v55 = vshll.u32 %v2573_v18, 16 }
 0x26d   : > { %v5124_v47 = vpop.f32.mrf.mxu3  ;;  %v3068_v28 = vld [vmem:[#allocation2 + $0x4c] sm:$0xf]  ;;  %v3067_v40 = vld [vmem:[#allocation2 + $0x48] sm:$0xe]  ;;  %v3069_v17 = vld [vmem:[#allocation2 + $0x50] sm:$0x1] }
 0x26e   : > { %5528 = vmatmul.bf16.gmra.mxu0 %v11475_v25  ;;  %v5125_v36 = vadd.f32 %v5124_v47, %v14919_v42  ;;  %v2706_v8 = vrot.slane %v2704_v51, 4  ;;  %v2709_v42 = vrot.slane %v2707_v39, 5  ;;  %v11507_v25 = vor.u32 %v13317_v48, %v11504_v0 }
 0x26f   : > { %v15201_v12 = vpop.f32.mrf.mxu2  ;;  %v11392_v39 = vrot.slane %v3067_v40, 9  ;;  %v11511_v48 = vor.u32 %v13322_v24, %v11510_v38  ;;  %v2574_v24 = vld [vmem:[#allocation2 + $0x54] sm:$0xf] }
 0x270   : > { %v5214_v60 = vadd.f32 %v5213_v1, %v5125_v36  ;;  %v2710_v45 = vor.u32 %v2709_v42, %v2706_v8  ;;  %v2728_v40 = vshrl.u32 %v2574_v24, 16 }
 0x272   : > { %v2711_v51 = vrot.slane %v2710_v45, 4  ;;  %v2575_v45 = vld [vmem:[#allocation2 + $0x58] sm:$0xf] }
 0x273   : > { %v5302_v27 = vpop.f32.mrf.mxu1  ;;  %v5215_v10 = vpop.f32.mrf.mxu0 }
 0x274   : > { %v5303_v22 = vadd.f32 %v5302_v27, %v5214_v60  ;;  %v2720_v60 = vor.u32 %v2719_v53, %v2715_v15  ;;  %v3181_v27 = vrot.slane %v3068_v28, 5  ;;  %v13282_v53 = vld [vmem:[%s14094_s19 + $0x10] sm:$0xff] }
 0x275   : > { %v5126_v33 = vpop.f32.mrf.mxu3 }
 0x276   : > { %5813 = vmatmul.bf16.gmra.mxu1 %v13281_v7  ;;  %v5127_v11 = vadd.f32 %v5126_v33, %v14929_v16  ;;  %v2725_v7 = vrot.slane %v2723_v55, 5  ;;  %v3184_v16 = vrot.slane %v3069_v17, 5  ;;  %v2721_v0 = vrot.slane %v2720_v60, 4  ;;  %v13666_v60 = vld [vmem:[#allocation5 + $0x10] sm:$0xff] }
 0x277   : > { %v5391_v1 = vpop.f32.mrf.mxu2  ;;  %v3183_v43 = vrot.slane %v3181_v27, 4  ;;  %v2731_v17 = vshll.u32 %v2574_v24, 16  ;;  %10386 = vmatpush.bf16.msra.mxu2 %v13666_v60  ;;  %v3072_v60 = vld [vmem:[#allocation2 + $0x5c] sm:$0x1] }
 0x278   : > { %v15205_v47 = vadd.f32 %v5391_v1, %v5303_v22  ;;  %v5216_v36 = vadd.f32 %v5215_v10, %v5127_v11  ;;  %v2716_v22 = vsel %vm14183_vm10, %v2711_v51, %v2715_v15  ;;  %v3182_v10 = vsel %vm14209_vm11, %v11392_v39, %v3181_v27  ;;  %v13326_v1 = vld [vmem:[#allocation4 + $0xf4] sm:$0xf] }
 0x279   : > { %v2726_v42 = vsel %vm14183_vm10, %v2721_v0, %v2725_v7  ;;  %3031 = vst [vmem:[#allocation4 + $0x13c] sm:$0xf] %v2716_v22  ;;  %v3185_v11 = vsel %vm14209_vm11, %v3183_v43, %v3184_v16  ;;  %v2737_v51 = vshll.u32 %v2575_v45, 16  ;;  %v2741_v7 = vshrl.u32 %v2575_v45, 16  ;;  %v11546_v43 = vld [vmem:[#allocation4 + $0xf8] sm:$0xf] }
 0x27a   : > { %5444 = vmatmul.bf16.gmra.mxu3 %v11507_v25  ;;  %3032 = vst [vmem:[#allocation4 + $0x160] sm:$0xf] %v2726_v42  ;;  %v2733_v16 = vrot.slane %v2731_v17, 5  ;;  %v13331_v42 = vld [vmem:[#allocation4 + $0x118] sm:$0xf0] }
 0x27b   : > { %v5304_v13 = vpop.f32.mrf.mxu1  ;;  %v5218_v33 = vpop.f32.mrf.mxu0  ;;  %3303 = vst [vmem:[#allocation4 + $0x140] sm:$0xf] %v3182_v10  ;;  %v2743_v22 = vrot.slane %v2741_v7, 4 }
 0x27c   : > { %v15211_v8 = vadd.f32 %v5304_v13, %v5216_v36  ;;  %3304 = vst [vmem:[#allocation4 + $0x164] sm:$0xf] %v3185_v11  ;;  %v11540_v36 = vld [vmem:[#allocation4 + $0x114] sm:$0xf0]  ;;  %v2576_v13 = vld [vmem:[#allocation2 + $0x5c] sm:$0x1] }
 0x27d   : > { %v5129_v25 = vpop.f32.mrf.mxu3  ;;  %v11543_v0 = vor.u32 %v13326_v1, %v11540_v36  ;;  %v3191_v1 = vrot.slane %v3072_v60, 5  ;;  %v11547_v36 = vor.u32 %v13331_v42, %v11546_v43 }
 0x27e   : > { %5533 = vmatmul.bf16.gmra.mxu0 %v11511_v48  ;;  %v5130_v38 = vadd.f32 %v5129_v25, %v14939_v3  ;;  %v2730_v3 = vrot.slane %v2728_v40, 4  ;;  %v2747_v25 = vshll.u32 %v2576_v13, 16 }
 0x27f   : > { %v15218_v18 = vpop.f32.mrf.mxu2 }
 0x280   : > { %v5219_v15 = vadd.f32 %v5218_v33, %v5130_v38  ;;  %v2739_v33 = vrot.slane %v2737_v51, 5  ;;  %v2734_v11 = vor.u32 %v2733_v16, %v2730_v3  ;;  %v3071_v38 = vld [vmem:[#allocation2 + $0x58] sm:$0xf]  ;;  %v2749_v17 = vrot.slane %v2747_v25, 5  ;;  %v13335_v42 = vld [vmem:[#allocation4 + $0x13c] sm:$0xf] }
 0x281   : > { %v3188_v40 = vrot.slane %v3071_v38, 5  ;;  %v2578_v25 = vld [vmem:[#allocation2 + $0x64] sm:$0xf] }
 0x282   : > { %v2744_v45 = vor.u32 %v2743_v22, %v2739_v33 }
 0x283   : > { %v5307_v55 = vpop.f32.mrf.mxu1  ;;  %v5220_v28 = vpop.f32.mrf.mxu0  ;;  %v3190_v7 = vrot.slane %v3188_v40, 4 }
 0x284   : > { %v5308_v27 = vadd.f32 %v5307_v55, %v5219_v15  ;;  %v3070_v55 = vld [vmem:[#allocation2 + $0x54] sm:$0xe]  ;;  %v2745_v51 = vrot.slane %v2744_v45, 4  ;;  %v11576_v45 = vld [vmem:[#allocation4 + $0x15c] sm:$0xf0] }
 0x285   : > { %v5131_v39 = vpop.f32.mrf.mxu3 }
 0x286   : > { %5818 = vmatmul.bf16.gmra.mxu1 %v13282_v53  ;;  %v5132_v48 = vadd.f32 %v5131_v39, %v14953_v4  ;;  %v2735_v53 = vrot.slane %v2734_v11, 4  ;;  %v11393_v4 = vrot.slane %v3070_v55, 9  ;;  %v2577_v11 = vld [vmem:[#allocation2 + $0x60] sm:$0xf] }
 0x287   : > { %v5396_v10 = vpop.f32.mrf.mxu2  ;;  %v2752_v55 = vshrl.u32 %v2577_v11, 16  ;;  %v2755_v60 = vshll.u32 %v2577_v11, 16 }
 0x288   : > { %v15222_v15 = vadd.f32 %v5396_v10, %v5308_v27  ;;  %v5221_v24 = vadd.f32 %v5220_v28, %v5132_v48  ;;  %v2740_v27 = vsel %vm14183_vm10, %v2735_v53, %v2739_v33  ;;  %v3189_v28 = vsel %vm14209_vm11, %v11393_v4, %v3188_v40  ;;  %v13283_v10 = vld [vmem:[%s14094_s19 + $0x18] sm:$0xff] }
 0x289   : > { %v2750_v48 = vsel %vm14183_vm10, %v2745_v51, %v2749_v17  ;;  %3033 = vst [vmem:[#allocation4 + $0x184] sm:$0xf] %v2740_v27  ;;  %v2761_v40 = vshll.u32 %v2578_v25, 16  ;;  %v2765_v17 = vshrl.u32 %v2578_v25, 16 }
 0x28a   : > { %5449 = vmatmul.bf16.gmra.mxu3 %v11543_v0  ;;  %v3192_v0 = vsel %vm14209_vm11, %v3190_v7, %v3191_v1  ;;  %3034 = vst [vmem:[#allocation4 + $0x1a8] sm:$0xf] %v2750_v48  ;;  %v2754_v1 = vrot.slane %v2752_v55, 4  ;;  %v11579_v7 = vor.u32 %v13335_v42, %v11576_v45  ;;  %v13340_v48 = vld [vmem:[#allocation4 + $0x160] sm:$0xf0] }
 0x28b   : > { %v5309_v39 = vpop.f32.mrf.mxu1  ;;  %v5223_v3 = vpop.f32.mrf.mxu0  ;;  %3305 = vst [vmem:[#allocation4 + $0x188] sm:$0xf] %v3189_v28  ;;  %v2767_v27 = vrot.slane %v2765_v17, 4  ;;  %v3075_v55 = vld [vmem:[#allocation2 + $0x68] sm:$0x1] }
 0x28c   : > { %v15228_v16 = vadd.f32 %v5309_v39, %v5221_v24  ;;  %3306 = vst [vmem:[#allocation4 + $0x1ac] sm:$0xf] %v3192_v0  ;;  %v11582_v39 = vld [vmem:[#allocation4 + $0x140] sm:$0xf] }
 0x28d   : > { %v5134_v43 = vpop.f32.mrf.mxu3  ;;  %v11583_v42 = vor.u32 %v13340_v48, %v11582_v39  ;;  %v2580_v48 = vld [vmem:[#allocation2 + $0x6c] sm:$0xf] }
 0x28e   : > { %5538 = vmatmul.bf16.gmra.mxu0 %v11547_v36  ;;  %v5135_v13 = vadd.f32 %v5134_v43, %v14973_v50  ;;  %v2757_v50 = vrot.slane %v2755_v60, 5  ;;  %v2763_v36 = vrot.slane %v2761_v40, 5 }
 0x28f   : > { %v15235_v22 = vpop.f32.mrf.mxu2 }
 0x290   : > { %16982 = vst [vmem:[#allocation8_spill] sm:$0xff] %v15235_v22  ;;  %v5224_v33 = vadd.f32 %v5223_v3, %v5135_v13  ;;  %v2579_v3 = vld [vmem:[#allocation2 + $0x68] sm:$0x1]  ;;  %v2758_v0 = vor.u32 %v2757_v50, %v2754_v1  ;;  %v3074_v13 = vld [vmem:[#allocation2 + $0x64] sm:$0xf]  ;;  %v2768_v25 = vor.u32 %v2767_v27, %v2763_v36 }
 0x291   : > { %v2771_v43 = vshll.u32 %v2579_v3, 16  ;;  %v3195_v60 = vrot.slane %v3074_v13, 5 }
 0x292   : > { %v2759_v40 = vrot.slane %v2758_v0, 4  ;;  %v2769_v45 = vrot.slane %v2768_v25, 4  ;;  %v2581_v0 = vld [vmem:[#allocation2 + $0x70] sm:$0xf]  ;;  %v13665_v25 = vld [vmem:[#allocation5 + $0x8] sm:$0xff] }
 0x293   : > { %v5312_v38 = vpop.f32.mrf.mxu1  ;;  %v5225_v24 = vpop.f32.mrf.mxu0  ;;  %v3197_v17 = vrot.slane %v3195_v60, 4  ;;  %10387 = vmatpush.bf16.msra.mxu2 %v13665_v25  ;;  %v3076_v25 = vld [vmem:[#allocation2 + $0x6c] sm:$0xe] }
 0x294   : > { %v5313_v53 = vadd.f32 %v5312_v38, %v5224_v33  ;;  %v3073_v38 = vld [vmem:[#allocation2 + $0x60] sm:$0xe] }
 0x295   : > { %v5136_v4 = vpop.f32.mrf.mxu3  ;;  %v11394_v22 = vrot.slane %v3073_v38, 9  ;;  %v2776_v38 = vshrl.u32 %v2580_v48, 16 }
 0x296   : > { %5823 = vmatmul.bf16.gmra.mxu1 %v13283_v10  ;;  %v5137_v51 = vadd.f32 %v5136_v4, %v14987_v5  ;;  %v2773_v10 = vrot.slane %v2771_v43, 5  ;;  %v3198_v5 = vrot.slane %v3075_v55, 5  ;;  %v2779_v55 = vshll.u32 %v2580_v48, 16  ;;  %v3077_v48 = vld [vmem:[#allocation2 + $0x70] sm:$0xf] }
 0x297   : > { %v5401_v28 = vpop.f32.mrf.mxu2 }
 0x298   : > { %v15239_v11 = vadd.f32 %v5401_v28, %v5313_v53  ;;  %v5226_v33 = vadd.f32 %v5225_v24, %v5137_v51  ;;  %v2764_v53 = vsel %vm14183_vm10, %v2759_v40, %v2763_v36  ;;  %v3196_v24 = vsel %vm14209_vm11, %v11394_v22, %v3195_v60  ;;  %v13284_v22 = vld [vmem:[%s14094_s19 + $0x20] sm:$0xff]  ;;  %v13344_v28 = vld [vmem:[#allocation4 + $0x184] sm:$0xf] }
 0x299   : > { %v2774_v51 = vsel %vm14183_vm10, %v2769_v45, %v2773_v10  ;;  %3035 = vst [vmem:[#allocation4 + $0x1cc] sm:$0xf] %v2764_v53  ;;  %v2785_v40 = vshll.u32 %v2581_v0, 16  ;;  %v2789_v10 = vshrl.u32 %v2581_v0, 16  ;;  %v16985_v45 = vld [vmem:[#allocation16_spill] sm:$0xff] }
 0x29a   : > { %5454 = vmatmul.bf16.gmra.mxu3 %v11579_v7  ;;  %v3199_v7 = vsel %vm14209_vm11, %v3197_v17, %v3198_v5  ;;  %3036 = vst [vmem:[#allocation4 + $0x1f0] sm:$0xf] %v2774_v51  ;;  %v2582_v53 = vld [vmem:[#allocation2 + $0x74] sm:$0x1] }
 0x29b   : > { %v5314_v4 = vpop.f32.mrf.mxu1  ;;  %v5228_v1 = vpop.f32.mrf.mxu0  ;;  %3307 = vst [vmem:[#allocation4 + $0x1d0] sm:$0xf] %v3196_v24  ;;  %v2787_v24 = vrot.slane %v2785_v40, 5  ;;  %v2791_v51 = vrot.slane %v2789_v10, 4 }
 0x29c   : > { %v15245_v50 = vadd.f32 %v5314_v4, %v5226_v33  ;;  %3308 = vst [vmem:[#allocation4 + $0x1f4] sm:$0xf] %v3199_v7  ;;  %v11612_v33 = vld [vmem:[#allocation4 + $0x1a4] sm:$0xf0] }
 0x29d   : > { %v5139_v39 = vpop.f32.mrf.mxu3  ;;  %v11615_v4 = vor.u32 %v13344_v28, %v11612_v33 }
 0x29e   : > { %16983 = vst [vmem:[#allocation9_spill] sm:$0xff] %v15245_v50  ;;  %5543 = vmatmul.bf16.gmra.mxu0 %v11583_v42  ;;  %v5140_v3 = vadd.f32 %v5139_v39, %v14889_v58  ;;  %v2778_v58 = vrot.slane %v2776_v38, 4  ;;  %v2781_v42 = vrot.slane %v2779_v55, 5  ;;  %v13349_v39 = vld [vmem:[#allocation4 + $0x1a8] sm:$0xf0]  ;;  %v3202_v55 = vrot.slane %v3077_v48, 5 }
 0x29f   : > { %v15252_v27 = vpop.f32.mrf.mxu2  ;;  %v3078_v38 = vld [vmem:[#allocation2 + $0x74] sm:$0x1]  ;;  %v2584_v48 = vld [vmem:[#allocation2 + $0x7c] sm:$0xf] }
 0x2a0   : > { %16984 = vst [vmem:[#allocation10_spill] sm:$0xff] %v15252_v27  ;;  %v5229_v36 = vadd.f32 %v5228_v1, %v5140_v3  ;;  %v11618_v1 = vld [vmem:[#allocation4 + $0x188] sm:$0xf]  ;;  %v2782_v3 = vor.u32 %v2781_v42, %v2778_v58  ;;  %v2795_v27 = vshll.u32 %v2582_v53, 16  ;;  %v3205_v28 = vrot.slane %v3078_v38, 5 }
 0x2a1   : > { %v11619_v33 = vor.u32 %v13349_v39, %v11618_v1  ;;  %v3204_v10 = vrot.slane %v3202_v55, 4  ;;  %v16988_v1 = vld [vmem:[#allocation17_spill] sm:$0xff] }
 0x2a2   : > { %v2797_v50 = vrot.slane %v2795_v27, 5  ;;  %v13353_v39 = vld [vmem:[#allocation4 + $0x1cc] sm:$0xf] }
 0x2a3   : > { %v5317_v43 = vpop.f32.mrf.mxu1  ;;  %v5230_v13 = vpop.f32.mrf.mxu0 }
 0x2a4   : > { %v5318_v60 = vadd.f32 %v5317_v43, %v5229_v36  ;;  %v2792_v43 = vor.u32 %v2791_v51, %v2787_v24 }
 0x2a5   : > { %v5141_v5 = vpop.f32.mrf.mxu3 }
 0x2a6   : > { %5828 = vmatmul.bf16.gmra.mxu1 %v13284_v22  ;;  %v5142_v17 = vadd.f32 %v5141_v5, %v16985_v45  ;;  %v2783_v22 = vrot.slane %v2782_v3, 4  ;;  %v11395_v5 = vrot.slane %v3076_v25, 9  ;;  %v2793_v40 = vrot.slane %v2792_v43, 4  ;;  %v2583_v3 = vld [vmem:[#allocation2 + $0x78] sm:$0xf] }
 0x2a7   : > { %v5406_v7 = vpop.f32.mrf.mxu2  ;;  %v11648_v43 = vld [vmem:[#allocation4 + $0x1ec] sm:$0xf0]  ;;  %v2800_v25 = vshrl.u32 %v2583_v3, 16  ;;  %v2803_v38 = vshll.u32 %v2583_v3, 16 }
 0x2a8   : > { %v15256_v36 = vadd.f32 %v5406_v7, %v5318_v60  ;;  %v5231_v0 = vadd.f32 %v5230_v13, %v5142_v17  ;;  %v2788_v60 = vsel %vm14183_vm10, %v2783_v22, %v2787_v24  ;;  %v3203_v13 = vsel %vm14209_vm11, %v11395_v5, %v3202_v55  ;;  %v13285_v7 = vld [vmem:[%s14094_s19 + $0x28] sm:$0xff] }
 0x2a9   : > { %v2798_v27 = vsel %vm14183_vm10, %v2793_v40, %v2797_v50  ;;  %3037 = vst [vmem:[#allocation4 + $0x214] sm:$0xf] %v2788_v60  ;;  %v3206_v17 = vsel %vm14209_vm11, %v3204_v10, %v3205_v28  ;;  %v2809_v55 = vshll.u32 %v2584_v48, 16  ;;  %v2813_v5 = vshrl.u32 %v2584_v48, 16 }
 0x2aa   : > { %16986 = vst [vmem:[#allocation11_spill] sm:$0xff] %v15256_v36  ;;  %5459 = vmatmul.bf16.gmra.mxu3 %v11615_v4  ;;  %v2805_v40 = vrot.slane %v2803_v38, 5 }
 0x2ab   : > { %v5319_v45 = vpop.f32.mrf.mxu1  ;;  %v5233_v58 = vpop.f32.mrf.mxu0  ;;  %3038 = vst [vmem:[#allocation4 + $0x238] sm:$0xf] %v2798_v27  ;;  %v2811_v10 = vrot.slane %v2809_v55, 5  ;;  %v2585_v27 = vld [vmem:[#allocation2 + $0x80] sm:$0x1] }
 0x2ac   : > { %v15262_v42 = vadd.f32 %v5319_v45, %v5231_v0  ;;  %3309 = vst [vmem:[#allocation4 + $0x218] sm:$0xf] %v3203_v13  ;;  %v16990_v45 = vld [vmem:[#allocation18_spill] sm:$0xff] }
 0x2ad   : > { %v5144_v4 = vpop.f32.mrf.mxu3  ;;  %3310 = vst [vmem:[#allocation4 + $0x23c] sm:$0xf] %v3206_v17  ;;  %v11654_v13 = vld [vmem:[#allocation4 + $0x1d0] sm:$0xf]  ;;  %v2815_v17 = vrot.slane %v2813_v5, 4 }
 0x2ae   : > { %16987 = vst [vmem:[#allocation12_spill] sm:$0xff] %v15262_v42  ;;  %5548 = vmatmul.bf16.gmra.mxu0 %v11619_v33  ;;  %v5145_v53 = vadd.f32 %v5144_v4, %v16988_v1  ;;  %v2802_v33 = vrot.slane %v2800_v25, 4  ;;  %v13358_v1 = vld [vmem:[#allocation4 + $0x1f0] sm:$0xf0]  ;;  %v3080_v42 = vld [vmem:[#allocation2 + $0x7c] sm:$0xf] }
 0x2af   : > { %v15269_v51 = vpop.f32.mrf.mxu2  ;;  %v2816_v48 = vor.u32 %v2815_v17, %v2811_v10  ;;  %v3081_v25 = vld [vmem:[#allocation2 + $0x80] sm:$0x1]  ;;  %v3209_v38 = vrot.slane %v3080_v42, 5  ;;  %v2586_v17 = vld [vmem:[#allocation2 + $0x84] sm:$0xf] }
 0x2b0   : > { %16989 = vst [vmem:[#allocation13_spill] sm:$0xff] %v15269_v51  ;;  %v5234_v24 = vadd.f32 %v5233_v58, %v5145_v53  ;;  %v11651_v58 = vor.u32 %v13353_v39, %v11648_v43  ;;  %v2806_v53 = vor.u32 %v2805_v40, %v2802_v33  ;;  %v2819_v51 = vshll.u32 %v2585_v27, 16  ;;  %v13362_v27 = vld [vmem:[#allocation4 + $0x214] sm:$0xf] }
 0x2b1   : > { %v11655_v39 = vor.u32 %v13358_v1, %v11654_v13  ;;  %v2817_v43 = vrot.slane %v2816_v48, 4  ;;  %v3211_v5 = vrot.slane %v3209_v38, 4  ;;  %v2824_v48 = vshrl.u32 %v2586_v17, 16 }
 0x2b2   : > { %v2807_v55 = vrot.slane %v2806_v53, 4 }
 0x2b3   : > { %v5322_v0 = vpop.f32.mrf.mxu1  ;;  %v5235_v50 = vpop.f32.mrf.mxu0 }
 0x2b4   : > { %v5323_v22 = vadd.f32 %v5322_v0, %v5234_v24  ;;  %v3079_v0 = vld [vmem:[#allocation2 + $0x78] sm:$0xe] }
 0x2b5   : > { %v5146_v28 = vpop.f32.mrf.mxu3  ;;  %v11396_v36 = vrot.slane %v3079_v0, 9  ;;  %v2827_v0 = vshll.u32 %v2586_v17, 16 }
 0x2b6   : > { %5833 = vmatmul.bf16.gmra.mxu1 %v13285_v7  ;;  %v5147_v60 = vadd.f32 %v5146_v28, %v16990_v45  ;;  %v2821_v7 = vrot.slane %v2819_v51, 5  ;;  %v3212_v28 = vrot.slane %v3081_v25, 5 }
 0x2b7   : > { %v5411_v4 = vpop.f32.mrf.mxu2 }
 0x2b8   : > { %v15273_v3 = vadd.f32 %v5411_v4, %v5323_v22  ;;  %v5236_v24 = vadd.f32 %v5235_v50, %v5147_v60  ;;  %v2812_v22 = vsel %vm14183_vm10, %v2807_v55, %v2811_v10  ;;  %v3210_v50 = vsel %vm14209_vm11, %v11396_v36, %v3209_v38  ;;  %v13286_v36 = vld [vmem:[%s14094_s19 + $0x30] sm:$0xff]  ;;  %v2587_v4 = vld [vmem:[#allocation2 + $0x88] sm:$0xf] }
 0x2b9   : > { %v2822_v42 = vsel %vm14183_vm10, %v2817_v43, %v2821_v7  ;;  %3039 = vst [vmem:[#allocation4 + $0x25c] sm:$0xf] %v2812_v22  ;;  %v3213_v51 = vsel %vm14209_vm11, %v3211_v5, %v3212_v28  ;;  %v2833_v25 = vshll.u32 %v2587_v4, 16  ;;  %v2837_v38 = vshrl.u32 %v2587_v4, 16  ;;  %v13664_v7 = vld [vmem:[#allocation5] sm:$0xff]  ;;  %v16994_v5 = vld [vmem:[#allocation19_spill] sm:$0xff] }
 0x2ba   : > { %16991 = vst [vmem:[#allocation14_spill] sm:$0xff] %v15273_v3  ;;  %5464 = vmatmul.bf16.gmra.mxu3 %v11651_v58  ;;  %v11690_v22 = vld [vmem:[#allocation4 + $0x218] sm:$0xf]  ;;  %10388 = vmatpush.bf16.msra.mxu2 %v13664_v7 }
 0x2bb   : > { %v5324_v45 = vpop.f32.mrf.mxu1  ;;  %v5238_v33 = vpop.f32.mrf.mxu0  ;;  %3040 = vst [vmem:[#allocation4 + $0x280] sm:$0xf] %v2822_v42  ;;  %v2835_v43 = vrot.slane %v2833_v25, 5  ;;  %v2839_v42 = vrot.slane %v2837_v38, 4 }
 0x2bc   : > { %v15279_v40 = vadd.f32 %v5324_v45, %v5236_v24  ;;  %3311 = vst [vmem:[#allocation4 + $0x260] sm:$0xf] %v3210_v50  ;;  %v11684_v24 = vld [vmem:[#allocation4 + $0x234] sm:$0xf0]  ;;  %v2588_v50 = vld [vmem:[#allocation2 + $0x8c] sm:$0x1] }
 0x2bd   : > { %v5149_v60 = vpop.f32.mrf.mxu3  ;;  %3312 = vst [vmem:[#allocation4 + $0x284] sm:$0xf] %v3213_v51  ;;  %v2843_v17 = vshll.u32 %v2588_v50, 16 }
 0x2be   : > { %16992 = vst [vmem:[#allocation15_spill] sm:$0xff] %v15279_v40  ;;  %5553 = vmatmul.bf16.gmra.mxu0 %v11655_v39  ;;  %v5150_v58 = vadd.f32 %v5149_v60, %v14935_v49  ;;  %v2826_v49 = vrot.slane %v2824_v48, 4  ;;  %v2829_v39 = vrot.slane %v2827_v0, 5  ;;  %v13367_v60 = vld [vmem:[#allocation4 + $0x238] sm:$0xf0] }
 0x2bf   : > { %v15286_v13 = vpop.f32.mrf.mxu2  ;;  %v3082_v48 = vld [vmem:[#allocation2 + $0x84] sm:$0xe]  ;;  %v3084_v0 = vld [vmem:[#allocation2 + $0x8c] sm:$0x1]  ;;  %v2845_v40 = vrot.slane %v2843_v17, 5 }
 0x2c0   : > { %16993 = vst [vmem:[#allocation16_spill] sm:$0xff] %v15286_v13  ;;  %v5239_v10 = vadd.f32 %v5238_v33, %v5150_v58  ;;  %v11687_v33 = vor.u32 %v13362_v27, %v11684_v24  ;;  %v2830_v58 = vor.u32 %v2829_v39, %v2826_v49  ;;  %v3083_v13 = vld [vmem:[#allocation2 + $0x88] sm:$0xf]  ;;  %v3219_v27 = vrot.slane %v3084_v0, 5  ;;  %v2590_v17 = vld [vmem:[#allocation2 + $0x94] sm:$0xf] }
 0x2c1   : > { %v3216_v25 = vrot.slane %v3083_v13, 5  ;;  %v11691_v24 = vor.u32 %v13367_v60, %v11690_v22  ;;  %v16997_v22 = vld [vmem:[#allocation20_spill] sm:$0xff]  ;;  %v13371_v60 = vld [vmem:[#allocation4 + $0x25c] sm:$0xf] }
 0x2c3   : > { %v5327_v1 = vpop.f32.mrf.mxu1  ;;  %v5240_v53 = vpop.f32.mrf.mxu0  ;;  %v3218_v38 = vrot.slane %v3216_v25, 4 }
 0x2c4   : > { %v5328_v55 = vadd.f32 %v5327_v1, %v5239_v10  ;;  %v2840_v1 = vor.u32 %v2839_v42, %v2835_v43 }
 0x2c5   : > { %v5151_v28 = vpop.f32.mrf.mxu3 }
 0x2c6   : > { %5838 = vmatmul.bf16.gmra.mxu1 %v13286_v36  ;;  %v5152_v45 = vadd.f32 %v5151_v28, %v16994_v5  ;;  %v2831_v36 = vrot.slane %v2830_v58, 4  ;;  %v11397_v28 = vrot.slane %v3082_v48, 9  ;;  %v2841_v7 = vrot.slane %v2840_v1, 4  ;;  %v2589_v58 = vld [vmem:[#allocation2 + $0x90] sm:$0xf] }
 0x2c7   : > { %v5416_v51 = vpop.f32.mrf.mxu2  ;;  %v11720_v1 = vld [vmem:[#allocation4 + $0x27c] sm:$0xf0]  ;;  %v2848_v48 = vshrl.u32 %v2589_v58, 16  ;;  %v2851_v0 = vshll.u32 %v2589_v58, 16 }
 0x2c8   : > { %v15290_v4 = vadd.f32 %v5416_v51, %v5328_v55  ;;  %v5241_v10 = vadd.f32 %v5240_v53, %v5152_v45  ;;  %v2836_v55 = vsel %vm14183_vm10, %v2831_v36, %v2835_v43  ;;  %v3217_v53 = vsel %vm14209_vm11, %v11397_v28, %v3216_v25  ;;  %v13287_v51 = vld [vmem:[%s14094_s19 + $0x38] sm:$0xff] }
 0x2c9   : > { %v2846_v13 = vsel %vm14183_vm10, %v2841_v7, %v2845_v40  ;;  %3041 = vst [vmem:[#allocation4 + $0x2a4] sm:$0xf] %v2836_v55  ;;  %v3220_v45 = vsel %vm14209_vm11, %v3218_v38, %v3219_v27  ;;  %v2857_v25 = vshll.u32 %v2590_v17, 16  ;;  %v2861_v36 = vshrl.u32 %v2590_v17, 16 }
 0x2ca   : > { %16995 = vst [vmem:[#allocation17_spill] sm:$0xff] %v15290_v4  ;;  %5469 = vmatmul.bf16.gmra.mxu3 %v11687_v33  ;;  %v2853_v7 = vrot.slane %v2851_v0, 5  ;;  %v3085_v0 = vld [vmem:[#allocation2 + $0x90] sm:$0xe] }
 0x2cb   : > { %v5329_v5 = vpop.f32.mrf.mxu1  ;;  %v5243_v49 = vpop.f32.mrf.mxu0  ;;  %3042 = vst [vmem:[#allocation4 + $0x2c8] sm:$0xf] %v2846_v13  ;;  %v2859_v38 = vrot.slane %v2857_v25, 5  ;;  %v2591_v13 = vld [vmem:[#allocation2 + $0x98] sm:$0x1] }
 0x2cc   : > { %v15296_v39 = vadd.f32 %v5329_v5, %v5241_v10  ;;  %3313 = vst [vmem:[#allocation4 + $0x2a8] sm:$0xf] %v3217_v53  ;;  %v16999_v5 = vld [vmem:[#allocation21_spill] sm:$0xff]  ;;  %v11726_v53 = vld [vmem:[#allocation4 + $0x260] sm:$0xf] }
 0x2cd   : > { %v5154_v33 = vpop.f32.mrf.mxu3  ;;  %3314 = vst [vmem:[#allocation4 + $0x2cc] sm:$0xf] %v3220_v45  ;;  %v2863_v45 = vrot.slane %v2861_v36, 4 }
 0x2ce   : > { %16996 = vst [vmem:[#allocation18_spill] sm:$0xff] %v15296_v39  ;;  %5558 = vmatmul.bf16.gmra.mxu0 %v11691_v24  ;;  %v5155_v50 = vadd.f32 %v5154_v33, %v16997_v22  ;;  %v2850_v24 = vrot.slane %v2848_v48, 4  ;;  %v13376_v22 = vld [vmem:[#allocation4 + $0x280] sm:$0xf0] }
 0x2cf   : > { %v15303_v42 = vpop.f32.mrf.mxu2  ;;  %v3086_v39 = vld [vmem:[#allocation2 + $0x94] sm:$0xf]  ;;  %v2864_v48 = vor.u32 %v2863_v45, %v2859_v38 }
 0x2d0   : > { %16998 = vst [vmem:[#allocation19_spill] sm:$0xff] %v15303_v42  ;;  %v5244_v43 = vadd.f32 %v5243_v49, %v5155_v50  ;;  %v11723_v49 = vor.u32 %v13371_v60, %v11720_v1  ;;  %v2854_v50 = vor.u32 %v2853_v7, %v2850_v24  ;;  %v2867_v42 = vshll.u32 %v2591_v13, 16  ;;  %v13380_v45 = vld [vmem:[#allocation4 + $0x2a4] sm:$0xf] }
 0x2d1   : > { %v11398_v60 = vrot.slane %v3085_v0, 9  ;;  %v11727_v1 = vor.u32 %v13376_v22, %v11726_v53  ;;  %v2865_v36 = vrot.slane %v2864_v48, 4 }
 0x2d2   : > { %v2869_v4 = vrot.slane %v2867_v42, 5 }
 0x2d3   : > { %v5332_v10 = vpop.f32.mrf.mxu1  ;;  %v5245_v40 = vpop.f32.mrf.mxu0 }
 0x2d4   : > { %v5333_v28 = vadd.f32 %v5332_v10, %v5244_v43  ;;  %v12414_v43 = vld [vmem:[#allocation4] sm:$0xf]  ;;  %v13524_v10 = vld [vmem:[#allocation4 + $0x20] sm:$0xf0] }
 0x2d5   : > { %v5156_v27 = vpop.f32.mrf.mxu3  ;;  %v12415_v25 = vor.u32 %v13524_v10, %v12414_v43  ;;  %v11756_v10 = vld [vmem:[#allocation4 + $0x2c4] sm:$0xf0] }
 0x2d6   : > { %5843 = vmatmul.bf16.gmra.mxu1 %v13287_v51  ;;  %v5157_v55 = vadd.f32 %v5156_v27, %v16999_v5  ;;  %v2855_v51 = vrot.slane %v2854_v50, 4  ;;  %v3087_v27 = vld [vmem:[#allocation2 + $0x98] sm:$0x1]  ;;  %v3223_v5 = vrot.slane %v3086_v39, 5  ;;  %v2593_v50 = vld [vmem:[#allocation2 + $0xa0] sm:$0xf] }
 0x2d7   : > { %v5421_v33 = vpop.f32.mrf.mxu2  ;;  %v3226_v3 = vrot.slane %v3087_v27, 5  ;;  %10389 = vmatmul.bf16.vlgmr.msra.gmra.mxu2 %v12415_v25  ;;  %v2881_v25 = vshll.u32 %v2593_v50, 16 }
 0x2d8   : > { %v15307_v58 = vadd.f32 %v5421_v33, %v5333_v28  ;;  %v5246_v17 = vadd.f32 %v5245_v40, %v5157_v55  ;;  %v2860_v40 = vsel %vm14183_vm10, %v2855_v51, %v2859_v38  ;;  %v2870_v55 = vsel %vm14183_vm10, %v2865_v36, %v2869_v4  ;;  %v13288_v33 = vld [vmem:[%s14094_s19 + $0x40] sm:$0xff]  ;;  %v2592_v4 = vld [vmem:[#allocation2 + $0x9c] sm:$0xf] }
 0x2d9   : > { %3043 = vst [vmem:[#allocation4 + $0x2ec] sm:$0xf] %v2860_v40  ;;  %v3224_v42 = vsel %vm14209_vm11, %v11398_v60, %v3223_v5  ;;  %v2872_v48 = vshrl.u32 %v2592_v4, 16  ;;  %v2875_v0 = vshll.u32 %v2592_v4, 16  ;;  %v2885_v51 = vshrl.u32 %v2593_v50, 16 }
 0x2da   : > { %17000 = vst [vmem:[#allocation20_spill] sm:$0xff] %v15307_v58  ;;  %5474 = vmatmul.bf16.gmra.mxu3 %v11723_v49  ;;  %v3225_v49 = vrot.slane %v3223_v5, 4  ;;  %v11762_v60 = vld [vmem:[#allocation4 + $0x2a8] sm:$0xf]  ;;  %v2883_v36 = vrot.slane %v2881_v25, 5 }
 0x2db   : > { %v5334_v24 = vpop.f32.mrf.mxu1  ;;  %v5524_v7 = vpop.f32.mrf.mxu0  ;;  %3044 = vst [vmem:[#allocation4 + $0x310] sm:$0xf] %v2870_v55  ;;  %v13385_v40 = vld [vmem:[#allocation4 + $0x2c8] sm:$0xf0]  ;;  %v2594_v55 = vld [vmem:[#allocation2 + $0xa4] sm:$0x1] }
 0x2dc   : > { %v15311_v28 = vadd.f32 %v5334_v24, %v5246_v17  ;;  %v3227_v13 = vsel %vm14209_vm11, %v3225_v49, %v3226_v3  ;;  %3315 = vst [vmem:[#allocation4 + $0x2f0] sm:$0xf] %v3224_v42  ;;  %v2874_v3 = vrot.slane %v2872_v48, 4  ;;  %v3090_v50 = vld [vmem:[#allocation2 + $0xa4] sm:$0x1] }
 0x2dd   : > { %v5435_v53 = vpop.f32.mrf.mxu3  ;;  %3316 = vst [vmem:[#allocation4 + $0x314] sm:$0xf] %v3227_v13  ;;  %v3089_v13 = vld [vmem:[#allocation2 + $0xa0] sm:$0xf]  ;;  %v6296_v48 = vld [vmem:[#allocation3 + $0xc] sm:$0xf] }
 0x2de   : > { %17001 = vst [vmem:[#allocation21_spill] sm:$0xff] %v15311_v28  ;;  %5563 = vmatmul.bf16.gmra.mxu0 %v11727_v1  ;;  %v5436_v39 = vadd.f32 %v5435_v53, %v14997_v20  ;;  %v2877_v1 = vrot.slane %v2875_v0, 5  ;;  %v2887_v53 = vrot.slane %v2885_v51, 4 }
 0x2e0   : > { %v5525_v38 = vadd.f32 %v5524_v7, %v5436_v39  ;;  %v11759_v7 = vor.u32 %v13380_v45, %v11756_v10  ;;  %v2878_v49 = vor.u32 %v2877_v1, %v2874_v3  ;;  %v2891_v39 = vshll.u32 %v2594_v55, 16 }
 0x2e1   : > { %v2888_v25 = vor.u32 %v2887_v53, %v2883_v36  ;;  %v11763_v45 = vor.u32 %v13385_v40, %v11762_v60  ;;  %v3233_v3 = vrot.slane %v3090_v50, 5 }
 0x2e2   : > { %v5604_v22 = vmax.f32 %v5525_v38, 0.0  ;;  %v2879_v0 = vrot.slane %v2878_v49, 4 }
 0x2e3   : > { %v15321_v17 = vpop.f32.mrf.mxu1  ;;  %v5526_v43 = vpop.f32.mrf.mxu0 }
 0x2e4   : > { %17002 = vst [vmem:[#allocation22_spill] sm:$0xff] %v15321_v17  ;;  %v5943_v20 = vpack.c.bf16 %v5604_v22, %v5604_v22  ;;  %v3088_v22 = vld [vmem:[#allocation2 + $0x9c] sm:$0xe]  ;;  %v3230_v17 = vrot.slane %v3089_v13, 5 }
 0x2e5   : > { %v5437_v27 = vpop.f32.mrf.mxu3  ;;  %v11399_v28 = vrot.slane %v3088_v22, 9 }
 0x2e6   : > { %5848 = vmatmul.bf16.gmra.mxu1 %v13288_v33  ;;  %v5976_v5 = vshrl.u32 %v5943_v20, 16  ;;  %v5438_v24 = vadd.f32 %v5437_v27, %v15013_v32  ;;  %v5979_v42 = vshll.u32 %v5943_v20, 16  ;;  %v2893_v33 = vrot.slane %v2891_v39, 5 }
 0x2e7   : > { %v3232_v10 = vrot.slane %v3230_v17, 4  ;;  %v2884_v27 = vsel %vm14183_vm10, %v2879_v0, %v2883_v36  ;;  %v13389_v0 = vld [vmem:[#allocation4 + $0x2ec] sm:$0xf] }
 0x2e8   : > { %v5978_v38 = vrot.slane %v5976_v5, 7  ;;  %v5527_v4 = vadd.f32 %v5526_v43, %v5438_v24  ;;  %v2889_v43 = vrot.slane %v2888_v25, 4  ;;  %3045 = vst [vmem:[#allocation4 + $0x334] sm:$0xf] %v2884_v27  ;;  %v3231_v24 = vsel %vm14209_vm11, %v11399_v28, %v3230_v17  ;;  %v6300_v28 = vld [vmem:[#allocation3 + $0x14] sm:$0x1] }
 0x2e9   : > { %v3234_v40 = vsel %vm14209_vm11, %v3232_v10, %v3233_v3  ;;  %3317 = vst [vmem:[#allocation4 + $0x338] sm:$0xf] %v3231_v24  ;;  %v11792_v25 = vld [vmem:[#allocation4 + $0x30c] sm:$0xf0]  ;;  %v2595_v10 = vld [vmem:[#allocation2 + $0xa8] sm:$0xf] }
 0x2ea   : > { %v5981_v58 = vor.u32 %v5979_v42, %v5978_v38  ;;  %v5605_v32 = vmax.f32 %v5527_v4, 0.0  ;;  %5479 = vmatmul.bf16.gmra.mxu3 %v11759_v7  ;;  %v2894_v60 = vsel %vm14183_vm10, %v2889_v43, %v2893_v33  ;;  %3318 = vst [vmem:[#allocation4 + $0x35c] sm:$0xf] %v3234_v40  ;;  %v5982_v17 = vrot.slane %v5978_v38, 4  ;;  %v13289_v4 = vld [vmem:[%s14094_s19 + $0x48] sm:$0xff] }
 0x2eb   : > { %v15324_v20 = vpop.f32.mrf.mxu1  ;;  %v5529_v51 = vpop.f32.mrf.mxu0  ;;  %3046 = vst [vmem:[#allocation4 + $0x358] sm:$0xf] %v2894_v60  ;;  %v13703_v3 = vld [vmem:[#allocation5 + $0x138] sm:$0xff]  ;;  %v2896_v60 = vshrl.u32 %v2595_v10, 16  ;;  %v2899_v40 = vshll.u32 %v2595_v10, 16 }
 0x2ec   : > { %17003 = vst [vmem:[#allocation23_spill] sm:$0xff] %v15324_v20  ;;  %v6297_v1 = vsel %vm14172_vm9, %v5981_v58, %v6296_v48  ;;  %v5944_v5 = vpack.c.bf16 %v5605_v32, %v5605_v32  ;;  %v13679_v58 = vld [vmem:[#allocation5 + $0x78] sm:$0xff]  ;;  %10737 = vmatpush.bf16.msrb.mxu2 %v13703_v3 }
 0x2ed   : > { %6298 = vst [vmem:[#allocation3 + $0xc] sm:$0xf] %v6297_v1  ;;  %v5440_v7 = vpop.f32.mrf.mxu3  ;;  %10470 = vmatpush.bf16.msrb.mxu3 %v13679_v58  ;;  %v11795_v1 = vor.u32 %v13389_v0, %v11792_v25  ;;  %v13687_v24 = vld [vmem:[#allocation5 + $0xb8] sm:$0xff] }
 0x2ee   : > { %v5984_v36 = vshrl.u32 %v5944_v5, 16  ;;  %5568 = vmatmul.bf16.gmra.mxu0 %v11763_v45  ;;  %v5441_v55 = vadd.f32 %v5440_v7, %v15017_v62  ;;  %v5987_v49 = vshll.u32 %v5944_v5, 16  ;;  %v13394_v5 = vld [vmem:[#allocation4 + $0x310] sm:$0xf0]  ;;  %v13695_v7 = vld [vmem:[#allocation5 + $0xf8] sm:$0xff] }
 0x2ef   : > { %10559 = vmatpush.bf16.msrb.mxu0 %v13687_v24  ;;  %10648 = vmatpush.bf16.msrb.mxu1 %v13695_v7 }
 0x2f0   : > { %v5986_v42 = vrot.slane %v5984_v36, 7  ;;  %v5530_v53 = vadd.f32 %v5529_v51, %v5441_v55  ;;  %v11798_v51 = vld [vmem:[#allocation4 + $0x2f0] sm:$0xf] }
 0x2f2   : > { %v5989_v39 = vor.u32 %v5987_v49, %v5986_v42  ;;  %v5991_v13 = vrot.slane %v5986_v42, 4  ;;  %v5606_v22 = vmax.f32 %v5530_v53, 0.0  ;;  %v6303_v42 = vld [vmem:[#allocation3 + $0x18] sm:$0xf] }
 0x2f3   : > { %v15338_v50 = vpop.f32.mrf.mxu1  ;;  %v5531_v48 = vpop.f32.mrf.mxu0 }
 0x2f4   : > { %17004 = vst [vmem:[#allocation24_spill] sm:$0xff] %v15338_v50  ;;  %v7240_v62 = vld [vmem:[#allocation3 + $0xc] sm:$0xf]  ;;  %v5990_v33 = vsel %vm14161_vm7, %v5982_v17, %v5989_v39  ;;  %v6301_v32 = vsel %vm14289_vm13, %v5991_v13, %v6300_v28  ;;  %v5945_v45 = vpack.c.bf16 %v5606_v22, %v5606_v22  ;;  %v2596_v17 = vld [vmem:[#allocation2 + $0xac] sm:$0xf]  ;;  %v2901_v22 = vrot.slane %v2899_v40, 5 }
 0x2f5   : > { %7272 = vst [vmem:[#allocation4 + $0xc] sm:$0xf] %v7240_v62  ;;  %v5442_v38 = vpop.f32.mrf.mxu3  ;;  %v6410_v49 = vld [vmem:[#allocation3 + $0xc] sm:$0xf] }
 0x2f6   : > { %6299 = vst [vmem:[#allocation3 + $0x10] sm:$0xf] %v5990_v33  ;;  %5853 = vmatmul.bf16.gmra.mxu1 %v13289_v4  ;;  %v5993_v27 = vshrl.u32 %v5945_v45, 16  ;;  %v5443_v43 = vadd.f32 %v5442_v38, %v15030_v6  ;;  %v5996_v55 = vshll.u32 %v5945_v45, 16  ;;  %v11799_v6 = vor.u32 %v13394_v5, %v11798_v51  ;;  %v13290_v51 = vld [vmem:[%s14094_s19 + $0x50] sm:$0xff] }
 0x2f7   : > { %6302 = vst [vmem:[#allocation3 + $0x14] sm:$0x1] %v6301_v32  ;;  %v2898_v4 = vrot.slane %v2896_v60, 4  ;;  %v2905_v32 = vshll.u32 %v2596_v17, 16  ;;  %v2909_v38 = vshrl.u32 %v2596_v17, 16 }
 0x2f8   : > { %v5995_v36 = vrot.slane %v5993_v27, 7  ;;  %v5532_v58 = vadd.f32 %v5531_v48, %v5443_v43  ;;  %6442 = vst [vmem:[#allocation4 + $0x48] sm:$0xf] %v6410_v49  ;;  %v6307_v60 = vld [vmem:[#allocation3 + $0x20] sm:$0x1] }
 0x2f9   : > { %v2902_v33 = vor.u32 %v2901_v22, %v2898_v4  ;;  %v2907_v24 = vrot.slane %v2905_v32, 5  ;;  %v13398_v49 = vld [vmem:[#allocation4 + $0x334] sm:$0xf] }
 0x2fa   : > { %v5998_v53 = vor.u32 %v5996_v55, %v5995_v36  ;;  %v5607_v28 = vmax.f32 %v5532_v58, 0.0  ;;  %5484 = vmatmul.bf16.gmra.mxu3 %v11795_v1  ;;  %v5999_v7 = vrot.slane %v5995_v36, 4 }
 0x2fb   : > { %v15345_v39 = vpop.f32.mrf.mxu1  ;;  %v5534_v13 = vpop.f32.mrf.mxu0  ;;  %v2903_v5 = vrot.slane %v2902_v33, 4  ;;  %v13678_v33 = vld [vmem:[#allocation5 + $0x70] sm:$0xff] }
 0x2fc   : > { %17005 = vst [vmem:[#allocation25_spill] sm:$0xff] %v15345_v39  ;;  %v5946_v0 = vpack.c.bf16 %v5607_v28, %v5607_v28  ;;  %v6304_v48 = vsel %vm14172_vm9, %v5998_v53, %v6303_v42  ;;  %v11828_v53 = vld [vmem:[#allocation4 + $0x354] sm:$0xf0]  ;;  %10471 = vmatpush.bf16.msrb.mxu3 %v13678_v33 }
 0x2fd   : > { %v7241_v25 = vld [vmem:[#allocation3 + $0x10] sm:$0xf]  ;;  %v5445_v62 = vpop.f32.mrf.mxu3  ;;  %6305 = vst [vmem:[#allocation3 + $0x18] sm:$0xf] %v6304_v48  ;;  %v2908_v28 = vsel %vm14183_vm10, %v2903_v5, %v2907_v24  ;;  %v11831_v48 = vor.u32 %v13398_v49, %v11828_v53 }
 0x2fe   : > { %5573 = vmatmul.bf16.gmra.mxu0 %v11799_v6  ;;  %v5446_v45 = vadd.f32 %v5445_v62, %v15040_v31  ;;  %7273 = vst [vmem:[#allocation4 + $0x30] sm:$0xf] %v7241_v25  ;;  %v6001_v10 = vshrl.u32 %v5946_v0, 16  ;;  %v6004_v3 = vshll.u32 %v5946_v0, 16  ;;  %v6411_v1 = vld [vmem:[#allocation3 + $0x10] sm:$0xf] }
 0x2ff   : > { %6443 = vst [vmem:[#allocation4 + $0x6c] sm:$0xf] %v6411_v1  ;;  %v2911_v6 = vrot.slane %v2909_v38, 4  ;;  %v11834_v62 = vld [vmem:[#allocation4 + $0x338] sm:$0xf] }
 0x300   : > { %v5535_v27 = vadd.f32 %v5534_v13, %v5446_v45  ;;  %v6003_v43 = vrot.slane %v6001_v10, 7  ;;  %v2597_v13 = vld [vmem:[#allocation2 + $0xb0] sm:$0x1]  ;;  %3047 = vst [vmem:[#allocation4 + $0x37c] sm:$0xf] %v2908_v28  ;;  %v13686_v28 = vld [vmem:[#allocation5 + $0xb0] sm:$0xff] }
 0x301   : > { %v13403_v45 = vld [vmem:[#allocation4 + $0x358] sm:$0xf0]  ;;  %v2912_v10 = vor.u32 %v2911_v6, %v2907_v24  ;;  %v2915_v38 = vshll.u32 %v2597_v13, 16  ;;  %10560 = vmatpush.bf16.msrb.mxu0 %v13686_v28 }
 0x302   : > { %v5608_v40 = vmax.f32 %v5535_v27, 0.0  ;;  %v6006_v55 = vor.u32 %v6004_v3, %v6003_v43  ;;  %v6008_v58 = vrot.slane %v6003_v43, 4  ;;  %v6310_v27 = vld [vmem:[#allocation3 + $0x24] sm:$0xf]  ;;  %v3091_v3 = vld [vmem:[#allocation2 + $0xa8] sm:$0xe] }
 0x303   : > { %v15351_v42 = vpop.f32.mrf.mxu1  ;;  %v5536_v31 = vpop.f32.mrf.mxu0  ;;  %v2913_v6 = vrot.slane %v2912_v10, 4  ;;  %v3093_v10 = vld [vmem:[#allocation2 + $0xb0] sm:$0x1] }
 0x304   : > { %17006 = vst [vmem:[#allocation26_spill] sm:$0xff] %v15351_v42  ;;  %v5947_v17 = vpack.c.bf16 %v5608_v40, %v5608_v40  ;;  %v6007_v36 = vsel %vm14161_vm7, %v5999_v7, %v6006_v55  ;;  %v6308_v22 = vsel %vm14289_vm13, %v6008_v58, %v6307_v60  ;;  %v8073_v32 = vld [vmem:[#allocation3 + $0x18] sm:$0xf]  ;;  %v12450_v7 = vld [vmem:[#allocation4 + $0x48] sm:$0xf]  ;;  %v13702_v40 = vld [vmem:[#allocation5 + $0x130] sm:$0xff] }
 0x305   : > { %v5447_v4 = vpop.f32.mrf.mxu3  ;;  %6306 = vst [vmem:[#allocation3 + $0x1c] sm:$0xf] %v6007_v36  ;;  %v3092_v55 = vld [vmem:[#allocation2 + $0xac] sm:$0xf]  ;;  %v6412_v53 = vld [vmem:[#allocation3 + $0x18] sm:$0xf]  ;;  %10738 = vmatpush.bf16.msrb.mxu2 %v13702_v40 }
 0x306   : > { %5858 = vmatmul.bf16.gmra.mxu1 %v13290_v51  ;;  %v6010_v0 = vshrl.u32 %v5947_v17, 16  ;;  %v5448_v25 = vadd.f32 %v5447_v4, %v15056_v34  ;;  %8105 = vst [vmem:[#allocation4 + $0x18] sm:$0xf] %v8073_v32  ;;  %v6013_v5 = vshll.u32 %v5947_v17, 16  ;;  %v13533_v60 = vld [vmem:[#allocation4 + $0x68] sm:$0xf0]  ;;  %v11835_v34 = vor.u32 %v13403_v45, %v11834_v62 }
 0x307   : > { %6309 = vst [vmem:[#allocation3 + $0x20] sm:$0x1] %v6308_v22  ;;  %v12451_v36 = vor.u32 %v13533_v60, %v12450_v7  ;;  %v11400_v17 = vrot.slane %v3091_v3, 9  ;;  %v13694_v4 = vld [vmem:[#allocation5 + $0xf0] sm:$0xff]  ;;  %v3237_v62 = vrot.slane %v3092_v55, 5  ;;  %v3240_v60 = vrot.slane %v3093_v10, 5 }
 0x308   : > { %v5537_v43 = vadd.f32 %v5536_v31, %v5448_v25  ;;  %v6012_v1 = vrot.slane %v6010_v0, 7  ;;  %v2917_v31 = vrot.slane %v2915_v38, 5  ;;  %6444 = vst [vmem:[#allocation4 + $0x90] sm:$0xf] %v6412_v53  ;;  %10649 = vmatpush.bf16.msrb.mxu1 %v13694_v4  ;;  %v6314_v38 = vld [vmem:[#allocation3 + $0x2c] sm:$0x1] }
 0x309   : > { %10394 = vmatmul.bf16.gmra.mxu2 %v12451_v36  ;;  %v2599_v36 = vld [vmem:[#allocation2 + $0xb8] sm:$0xf] }
 0x30a   : > { %v5609_v51 = vmax.f32 %v5537_v43, 0.0  ;;  %5489 = vmatmul.bf16.gmra.mxu3 %v11831_v48  ;;  %v6015_v58 = vor.u32 %v6013_v5, %v6012_v1  ;;  %v2918_v45 = vsel %vm14183_vm10, %v2913_v6, %v2917_v31  ;;  %v13291_v5 = vld [vmem:[%s14094_s19 + $0x58] sm:$0xff] }
 0x30b   : > { %v15360_v49 = vpop.f32.mrf.mxu1  ;;  %v5539_v24 = vpop.f32.mrf.mxu0  ;;  %3048 = vst [vmem:[#allocation4 + $0x3a0] sm:$0xf] %v2918_v45 }
 0x30c   : > { %17007 = vst [vmem:[#allocation27_spill] sm:$0xff] %v15360_v49  ;;  %v5948_v13 = vpack.c.bf16 %v5609_v51, %v5609_v51  ;;  %v8074_v22 = vld [vmem:[#allocation3 + $0x1c] sm:$0xf]  ;;  %v6311_v0 = vsel %vm14172_vm9, %v6015_v58, %v6310_v27  ;;  %v3238_v27 = vsel %vm14209_vm11, %v11400_v17, %v3237_v62  ;;  %v3239_v51 = vrot.slane %v3237_v62, 4 }
 0x30d   : > { %v5450_v25 = vpop.f32.mrf.mxu3  ;;  %8106 = vst [vmem:[#allocation4 + $0x3c] sm:$0xf] %v8074_v22  ;;  %v6413_v32 = vld [vmem:[#allocation3 + $0x1c] sm:$0xf] }
 0x30e   : > { %v6018_v48 = vshrl.u32 %v5948_v13, 16  ;;  %5578 = vmatmul.bf16.gmra.mxu0 %v11835_v34  ;;  %6312 = vst [vmem:[#allocation3 + $0x24] sm:$0xf] %v6311_v0  ;;  %v5451_v33 = vadd.f32 %v5450_v25, %v15061_v14  ;;  %v6021_v3 = vshll.u32 %v5948_v13, 16  ;;  %v2598_v34 = vld [vmem:[#allocation2 + $0xb4] sm:$0xf]  ;;  %v3241_v6 = vsel %vm14209_vm11, %v3239_v51, %v3240_v60 }
 0x30f   : > { %6445 = vst [vmem:[#allocation4 + $0xb4] sm:$0xf] %v6413_v32  ;;  %v6016_v14 = vrot.slane %v6012_v1, 4  ;;  %v2920_v1 = vshrl.u32 %v2598_v34, 16  ;;  %v2923_v17 = vshll.u32 %v2598_v34, 16  ;;  %v2929_v34 = vshll.u32 %v2599_v36, 16 }
 0x310   : > { %v6020_v43 = vrot.slane %v6018_v48, 7  ;;  %v5540_v7 = vadd.f32 %v5539_v24, %v5451_v33  ;;  %3319 = vst [vmem:[#allocation4 + $0x380] sm:$0xf] %v3238_v27  ;;  %v12486_v0 = vld [vmem:[#allocation4 + $0x90] sm:$0xf] }
 0x311   : > { %3320 = vst [vmem:[#allocation4 + $0x3a4] sm:$0xf] %v3241_v6  ;;  %v13407_v25 = vld [vmem:[#allocation4 + $0x37c] sm:$0xf]  ;;  %v2600_v48 = vld [vmem:[#allocation2 + $0xbc] sm:$0x1] }
 0x312   : > { %v6023_v40 = vor.u32 %v6021_v3, %v6020_v43  ;;  %v6025_v55 = vrot.slane %v6020_v43, 4  ;;  %v5610_v28 = vmax.f32 %v5540_v7, 0.0  ;;  %v3094_v33 = vld [vmem:[#allocation2 + $0xb4] sm:$0xe]  ;;  %v11864_v43 = vld [vmem:[#allocation4 + $0x39c] sm:$0xf0] }
 0x313   : > { %v15370_v58 = vpop.f32.mrf.mxu1  ;;  %v5541_v53 = vpop.f32.mrf.mxu0  ;;  %v2922_v3 = vrot.slane %v2920_v1, 4  ;;  %v2925_v7 = vrot.slane %v2923_v17, 5  ;;  %v11867_v60 = vor.u32 %v13407_v25, %v11864_v43  ;;  %v2933_v6 = vshrl.u32 %v2599_v36, 16 }
 0x314   : > { %17008 = vst [vmem:[#allocation28_spill] sm:$0xff] %v15370_v58  ;;  %v6024_v31 = vsel %vm14161_vm7, %v6016_v14, %v6023_v40  ;;  %v6315_v24 = vsel %vm14289_vm13, %v6025_v55, %v6314_v38  ;;  %v5949_v4 = vpack.c.bf16 %v5610_v28, %v5610_v28  ;;  %v6317_v14 = vld [vmem:[#allocation3 + $0x30] sm:$0xf]  ;;  %v11401_v1 = vrot.slane %v3094_v33, 9 }
 0x315   : > { %v5452_v13 = vpop.f32.mrf.mxu3  ;;  %6313 = vst [vmem:[#allocation3 + $0x28] sm:$0xf] %v6024_v31  ;;  %v6414_v62 = vld [vmem:[#allocation3 + $0x24] sm:$0xf]  ;;  %v2926_v28 = vor.u32 %v2925_v7, %v2922_v3  ;;  %v2939_v31 = vshll.u32 %v2600_v48, 16  ;;  %v2931_v25 = vrot.slane %v2929_v34, 5 }
 0x316   : > { %5863 = vmatmul.bf16.gmra.mxu1 %v13291_v5  ;;  %v5453_v22 = vadd.f32 %v5452_v13, %v15077_v37  ;;  %6316 = vst [vmem:[#allocation3 + $0x2c] sm:$0x1] %v6315_v24  ;;  %v6027_v32 = vshrl.u32 %v5949_v4, 16  ;;  %v6030_v45 = vshll.u32 %v5949_v4, 16  ;;  %v13542_v38 = vld [vmem:[#allocation4 + $0xb0] sm:$0xf0] }
 0x317   : > { %v12487_v27 = vor.u32 %v13542_v38, %v12486_v0  ;;  %6446 = vst [vmem:[#allocation4 + $0xd8] sm:$0xf] %v6414_v62  ;;  %v11870_v37 = vld [vmem:[#allocation4 + $0x380] sm:$0xf]  ;;  %v2927_v62 = vrot.slane %v2926_v28, 4 }
 0x318   : > { %v5542_v10 = vadd.f32 %v5541_v53, %v5453_v22  ;;  %v6029_v5 = vrot.slane %v6027_v32, 7  ;;  %v13412_v4 = vld [vmem:[#allocation4 + $0x3a0] sm:$0xf0]  ;;  %v3095_v22 = vld [vmem:[#allocation2 + $0xb8] sm:$0xf]  ;;  %v2935_v32 = vrot.slane %v2933_v6, 4 }
 0x319   : > { %v11871_v17 = vor.u32 %v13412_v4, %v11870_v37  ;;  %10399 = vmatmul.bf16.gmra.mxu2 %v12487_v27  ;;  %v6321_v7 = vld [vmem:[#allocation3 + $0x38] sm:$0x1]  ;;  %v2932_v33 = vsel %vm14183_vm10, %v2927_v62, %v2931_v25  ;;  %v15386_v28 = vld [vmem:[#allocation2 + $0xc4] sm:$0xf] }
 0x31a   : > { %v5611_v51 = vmax.f32 %v5542_v10, 0.0  ;;  %v6032_v24 = vor.u32 %v6030_v45, %v6029_v5  ;;  %v6033_v53 = vrot.slane %v6029_v5, 4  ;;  %5494 = vmatmul.bf16.gmra.mxu3 %v11867_v60  ;;  %v3096_v10 = vld [vmem:[#allocation2 + $0xbc] sm:$0x1]  ;;  %v2601_v45 = vld [vmem:[#allocation2 + $0xc0] sm:$0xf]  ;;  %v2936_v5 = vor.u32 %v2935_v32, %v2931_v25 }
 0x31b   : > { %v15379_v40 = vpop.f32.mrf.mxu1  ;;  %v5544_v55 = vpop.f32.mrf.mxu0  ;;  %v3244_v60 = vrot.slane %v3095_v22, 5  ;;  %3049 = vst [vmem:[#allocation4 + $0x3c4] sm:$0xf] %v2932_v33 }
 0x31c   : > { %17009 = vst [vmem:[#allocation29_spill] sm:$0xff] %v15379_v40  ;;  %v5950_v13 = vpack.c.bf16 %v5611_v51, %v5611_v51  ;;  %v6318_v38 = vsel %vm14172_vm9, %v6032_v24, %v6317_v14  ;;  %v6415_v48 = vld [vmem:[#allocation3 + $0x28] sm:$0xf]  ;;  %v2941_v51 = vrot.slane %v2939_v31, 5  ;;  %v3247_v14 = vrot.slane %v3096_v10, 5 }
 0x31d   : > { %v5455_v0 = vpop.f32.mrf.mxu3  ;;  %6319 = vst [vmem:[#allocation3 + $0x30] sm:$0xf] %v6318_v38  ;;  %v2937_v27 = vrot.slane %v2936_v5, 4  ;;  %v3246_v6 = vrot.slane %v3244_v60, 4  ;;  %v2944_v24 = vshrl.u32 %v2601_v45, 16  ;;  %v2947_v31 = vshll.u32 %v2601_v45, 16 }
 0x31e   : > { %v6035_v43 = vshrl.u32 %v5950_v13, 16  ;;  %v6038_v3 = vshll.u32 %v5950_v13, 16  ;;  %v5456_v36 = vadd.f32 %v5455_v0, %v15091_v59  ;;  %5583 = vmatmul.bf16.gmra.mxu0 %v11871_v17  ;;  %6447 = vst [vmem:[#allocation4 + $0xfc] sm:$0xf] %v6415_v48  ;;  %v3245_v59 = vsel %vm14209_vm11, %v11401_v1, %v3244_v60  ;;  %v13292_v17 = vld [vmem:[%s14094_s19 + $0x60] sm:$0xff] }
 0x31f   : > { %3321 = vst [vmem:[#allocation4 + $0x3c8] sm:$0xf] %v3245_v59  ;;  %v2942_v25 = vsel %vm14183_vm10, %v2937_v27, %v2941_v51  ;;  %v2946_v32 = vrot.slane %v2944_v24, 4  ;;  %v2949_v48 = vrot.slane %v2947_v31, 5  ;;  %v12522_v33 = vld [vmem:[#allocation4 + $0xd8] sm:$0xf] }
 0x320   : > { %v6037_v37 = vrot.slane %v6035_v43, 7  ;;  %v5545_v34 = vadd.f32 %v5544_v55, %v5456_v36  ;;  %v5369_v55 = vadd.f32 %v15101_v2, %v15096_v21  ;;  %3050 = vst [vmem:[#allocation4 + $0x3e8] sm:$0xf] %v2942_v25  ;;  %v13677_v43 = vld [vmem:[#allocation5 + $0x68] sm:$0xff]  ;;  %v3248_v2 = vsel %vm14209_vm11, %v3246_v6, %v3247_v14  ;;  %v2603_v36 = vld [vmem:[#allocation2 + $0xc8] sm:$0x1] }
 0x321   : > { %10472 = vmatpush.bf16.msrb.mxu3 %v13677_v43  ;;  %v3098_v5 = vld [vmem:[#allocation2 + $0xc4] sm:$0xf]  ;;  %v2950_v60 = vor.u32 %v2949_v48, %v2946_v32  ;;  %3322 = vst [vmem:[#allocation4 + $0x3ec] sm:$0xf] %v3248_v2  ;;  %v2963_v25 = vshll.u32 %v2603_v36, 16 }
 0x322   : > { %v6040_v13 = vor.u32 %v6038_v3, %v6037_v37  ;;  %v6042_v4 = vrot.slane %v6037_v37, 4  ;;  %v5612_v0 = vmax.f32 %v5545_v34, 0.0  ;;  %v2953_v3 = vshll.u32 %v15386_v28, 16  ;;  %v6324_v34 = vld [vmem:[#allocation3 + $0x3c] sm:$0xf] }
 0x323   : > { %v15393_v22 = vpop.f32.mrf.mxu1  ;;  %v5546_v62 = vpop.f32.mrf.mxu0  ;;  %v13416_v6 = vld [vmem:[#allocation4 + $0x3c4] sm:$0xf]  ;;  %v2951_v31 = vrot.slane %v2950_v60, 4 }
 0x324   : > { %17010 = vst [vmem:[#allocation30_spill] sm:$0xff] %v15393_v22  ;;  %v6041_v1 = vsel %vm14161_vm7, %v6033_v53, %v6040_v13  ;;  %v6322_v10 = vsel %vm14289_vm13, %v6042_v4, %v6321_v7  ;;  %v5951_v38 = vpack.c.bf16 %v5612_v0, %v5612_v0  ;;  %v3097_v53 = vld [vmem:[#allocation2 + $0xc0] sm:$0xe]  ;;  %v6416_v59 = vld [vmem:[#allocation3 + $0x30] sm:$0xf]  ;;  %v2955_v24 = vrot.slane %v2953_v3, 5 }
 0x325   : > { %6320 = vst [vmem:[#allocation3 + $0x34] sm:$0xf] %v6041_v1  ;;  %v5457_v21 = vpop.f32.mrf.mxu3  ;;  %v13551_v51 = vld [vmem:[#allocation4 + $0xf8] sm:$0xf0]  ;;  %v13701_v4 = vld [vmem:[#allocation5 + $0x128] sm:$0xff]  ;;  %v11402_v43 = vrot.slane %v3097_v53, 9 }
 0x326   : > { %5868 = vmatmul.bf16.gmra.mxu1 %v13292_v17  ;;  %v5458_v45 = vadd.f32 %v5457_v21, %v5369_v55  ;;  %6323 = vst [vmem:[#allocation3 + $0x38] sm:$0x1] %v6322_v10  ;;  %v6044_v7 = vshrl.u32 %v5951_v38, 16  ;;  %v6047_v37 = vshll.u32 %v5951_v38, 16  ;;  %v12523_v14 = vor.u32 %v13551_v51, %v12522_v33  ;;  %v13685_v0 = vld [vmem:[#allocation5 + $0xa8] sm:$0xff]  ;;  %10739 = vmatpush.bf16.msrb.mxu2 %v13701_v4 }
 0x327   : > { %6448 = vst [vmem:[#allocation4 + $0x120] sm:$0xf] %v6416_v59  ;;  %v2957_v55 = vshrl.u32 %v15386_v28, 16  ;;  %v13693_v1 = vld [vmem:[#allocation5 + $0xe8] sm:$0xff]  ;;  %v3251_v3 = vrot.slane %v3098_v5, 5  ;;  %10561 = vmatpush.bf16.msrb.mxu0 %v13685_v0 }
 0x328   : > { %v5547_v27 = vadd.f32 %v5546_v62, %v5458_v45  ;;  %v15404_v13 = vrot.slane %v6044_v7, 7  ;;  %v11900_v38 = vld [vmem:[#allocation4 + $0x3e4] sm:$0xf0]  ;;  %v2956_v45 = vsel %vm14183_vm10, %v2951_v31, %v2955_v24  ;;  %v3099_v33 = vld [vmem:[#allocation2 + $0xc8] sm:$0x1]  ;;  %10650 = vmatpush.bf16.msrb.mxu1 %v13693_v1 }
 0x329   : > { %v11903_v2 = vor.u32 %v13416_v6, %v11900_v38  ;;  %v2604_v28 = vld [vmem:[#allocation2 + $0xcc] sm:$0xf]  ;;  %v11906_v7 = vld [vmem:[#allocation4 + $0x3c8] sm:$0xf]  ;;  %v2959_v60 = vrot.slane %v2957_v55, 4  ;;  %v3252_v53 = vsel %vm14209_vm11, %v11402_v43, %v3251_v3  ;;  %10404 = vmatmul.bf16.gmra.mxu2 %v12523_v14  ;;  %v3253_v6 = vrot.slane %v3251_v3, 4 }
 0x32a   : > { %v5613_v17 = vmax.f32 %v5547_v27, 0.0  ;;  %v6049_v32 = vor.u32 %v6047_v37, %v15404_v13  ;;  %v2965_v37 = vrot.slane %v2963_v25, 5  ;;  %v6328_v4 = vld [vmem:[#allocation3 + $0x44] sm:$0x1]  ;;  %3051 = vst [vmem:[#allocation4 + $0x40c] sm:$0xf] %v2956_v45 }
 0x32b   : > { %v15408_v10 = vpop.f32.mrf.mxu1  ;;  %v5549_v62 = vpop.f32.mrf.mxu0  ;;  %5499 = vmatmul.bf16.gmra.mxu3 %v11903_v2  ;;  %v3254_v0 = vrot.slane %v3099_v33, 5  ;;  %v2968_v31 = vshrl.u32 %v2604_v28, 16  ;;  %3323 = vst [vmem:[#allocation4 + $0x410] sm:$0xf] %v3252_v53  ;;  %v2605_v1 = vld [vmem:[#allocation2 + $0xd0] sm:$0xf] }
 0x32c   : > { %17011 = vst [vmem:[#allocation31_spill] sm:$0xff] %v15408_v10  ;;  %v5952_v21 = vpack.c.bf16 %v5613_v17, %v5613_v17  ;;  %v6417_v48 = vld [vmem:[#allocation3 + $0x34] sm:$0xf]  ;;  %v6325_v36 = vsel %vm14172_vm9, %v6049_v32, %v6324_v34  ;;  %v13421_v17 = vld [vmem:[#allocation4 + $0x3e8] sm:$0xf0]  ;;  %v2960_v34 = vor.u32 %v2959_v60, %v2955_v24  ;;  %v2971_v38 = vshll.u32 %v2604_v28, 16 }
 0x32d   : > { %v5460_v51 = vpop.f32.mrf.mxu3  ;;  %6449 = vst [vmem:[#allocation4 + $0x144] sm:$0xf] %v6417_v48  ;;  %v11907_v25 = vor.u32 %v13421_v17, %v11906_v7  ;;  %v3255_v14 = vsel %vm14209_vm11, %v3253_v6, %v3254_v0  ;;  %v13692_v3 = vld [vmem:[#allocation5 + $0xe0] sm:$0xff]  ;;  %v2970_v2 = vrot.slane %v2968_v31, 4  ;;  %v6050_v24 = vrot.slane %v15404_v13, 4  ;;  %v13293_v33 = vld [vmem:[%s14094_s19 + $0x68] sm:$0xff] }
 0x32e   : > { %6326 = vst [vmem:[#allocation3 + $0x3c] sm:$0xf] %v6325_v36  ;;  %v6052_v5 = vshrl.u32 %v5952_v21, 16  ;;  %v6055_v27 = vshll.u32 %v5952_v21, 16  ;;  %v5461_v59 = vadd.f32 %v5460_v51, %v15119_v26  ;;  %v2961_v43 = vrot.slane %v2960_v34, 4  ;;  %v13676_v21 = vld [vmem:[#allocation5 + $0x60] sm:$0xff]  ;;  %10651 = vmatpush.bf16.msrb.mxu1 %v13692_v3 }
 0x32f   : > { %v13684_v26 = vld [vmem:[#allocation5 + $0xa0] sm:$0xff]  ;;  %5588 = vmatmul.bf16.gmra.mxu0 %v11907_v25  ;;  %3324 = vst [vmem:[#allocation4 + $0x434] sm:$0xf] %v3255_v14  ;;  %10473 = vmatpush.bf16.msrb.mxu3 %v13676_v21  ;;  %v2973_v60 = vrot.slane %v2971_v38, 5  ;;  %v2977_v53 = vshll.u32 %v2605_v1, 16 }
 0x330   : > { %v6054_v55 = vrot.slane %v6052_v5, 7  ;;  %v5550_v32 = vadd.f32 %v5549_v62, %v5461_v59  ;;  %v5374_v62 = vadd.f32 %v15142_v35, %v15126_v61  ;;  %v2966_v51 = vsel %vm14183_vm10, %v2961_v43, %v2965_v37  ;;  %10562 = vmatpush.bf16.msrb.mxu0 %v13684_v26  ;;  %v2606_v35 = vld [vmem:[#allocation2 + $0xd4] sm:$0x1]  ;;  %v6331_v31 = vld [vmem:[#allocation3 + $0x48] sm:$0xf] }
 0x331   : > { %3052 = vst [vmem:[#allocation4 + $0x430] sm:$0xf] %v2966_v51  ;;  %v2981_v59 = vshrl.u32 %v2605_v1, 16  ;;  %v2974_v6 = vor.u32 %v2973_v60, %v2970_v2  ;;  %v13425_v25 = vld [vmem:[#allocation4 + $0x40c] sm:$0xf]  ;;  %v2987_v3 = vshll.u32 %v2606_v35, 16 }
 0x332   : > { %v6057_v48 = vor.u32 %v6055_v27, %v6054_v55  ;;  %v6059_v45 = vrot.slane %v6054_v55, 4  ;;  %v5614_v36 = vmax.f32 %v5550_v32, 0.0  ;;  %v12558_v55 = vld [vmem:[#allocation4 + $0x120] sm:$0xf]  ;;  %v2979_v32 = vrot.slane %v2977_v53, 5 }
 0x333   : > { %v15423_v28 = vpop.f32.mrf.mxu1  ;;  %v5551_v7 = vpop.f32.mrf.mxu0  ;;  %v2975_v1 = vrot.slane %v2974_v6, 4  ;;  %v2983_v14 = vrot.slane %v2981_v59, 4  ;;  %v15433_v21 = vld [vmem:[#allocation2 + $0xcc] sm:$0xe]  ;;  %v11942_v26 = vld [vmem:[#allocation4 + $0x410] sm:$0xf] }
 0x334   : > { %17012 = vst [vmem:[#allocation32_spill] sm:$0xff] %v15423_v28  ;;  %v6058_v13 = vsel %vm14161_vm7, %v6050_v24, %v6057_v48  ;;  %v6329_v5 = vsel %vm14289_vm13, %v6059_v45, %v6328_v4  ;;  %v5953_v27 = vpack.c.bf16 %v5614_v36, %v5614_v36  ;;  %v13560_v34 = vld [vmem:[#allocation4 + $0x140] sm:$0xf0]  ;;  %v2989_v53 = vrot.slane %v2987_v3, 5  ;;  %v8184_v35 = vld [vmem:[#allocation3 + $0xd4] sm:$0x1] }
 0x335   : > { %v5462_v61 = vpop.f32.mrf.mxu3  ;;  %6327 = vst [vmem:[#allocation3 + $0x40] sm:$0xf] %v6058_v13  ;;  %v6418_v43 = vld [vmem:[#allocation3 + $0x3c] sm:$0xf]  ;;  %v12559_v48 = vor.u32 %v13560_v34, %v12558_v55  ;;  %v2984_v60 = vor.u32 %v2983_v14, %v2979_v32  ;;  %v3101_v6 = vld [vmem:[#allocation2 + $0xd0] sm:$0xf] }
 0x336   : > { %5873 = vmatmul.bf16.gmra.mxu1 %v13293_v33  ;;  %v6061_v37 = vshrl.u32 %v5953_v27, 16  ;;  %v5463_v17 = vadd.f32 %v5462_v61, %v5374_v62  ;;  %6330 = vst [vmem:[#allocation3 + $0x44] sm:$0x1] %v6329_v5  ;;  %v6064_v0 = vshll.u32 %v5953_v27, 16  ;;  %v13430_v45 = vld [vmem:[#allocation4 + $0x430] sm:$0xf0] }
 0x337   : > { %6450 = vst [vmem:[#allocation4 + $0x168] sm:$0xf] %v6418_v43  ;;  %v8182_v33 = vld [vmem:[#allocation3 + $0xcc] sm:$0xf]  ;;  %v8183_v61 = vld [vmem:[#allocation3 + $0xd0] sm:$0xf] }
 0x338   : > { %v15431_v38 = vrot.slane %v6061_v37, 7  ;;  %v5552_v4 = vadd.f32 %v5551_v7, %v5463_v17  ;;  %v11936_v51 = vld [vmem:[#allocation4 + $0x42c] sm:$0xf0]  ;;  %v2980_v7 = vsel %vm14183_vm10, %v2975_v1, %v2979_v32  ;;  %v8546_v13 = vshrl.u32 %v8182_v33, 16  ;;  %v13675_v1 = vld [vmem:[#allocation5 + $0x58] sm:$0xff] }
 0x339   : > { %v11939_v59 = vor.u32 %v13425_v25, %v11936_v51  ;;  %3053 = vst [vmem:[#allocation4 + $0x454] sm:$0xf] %v2980_v7  ;;  %v15444_v37 = vadd.f32 %v15166_v44, %v15159_v30  ;;  %v11943_v17 = vor.u32 %v13430_v45, %v11942_v26  ;;  %v2985_v55 = vrot.slane %v2984_v60, 4  ;;  %10409 = vmatmul.bf16.gmra.mxu2 %v12559_v48  ;;  %v3102_v3 = vld [vmem:[#allocation2 + $0xd4] sm:$0x1] }
 0x33a   : > { %v6066_v2 = vor.u32 %v6064_v0, %v15431_v38  ;;  %v5615_v24 = vmax.f32 %v5552_v4, 0.0  ;;  %v11403_v32 = vrot.slane %v15433_v21, 9  ;;  %v8548_v25 = vrot.slane %v8546_v13, 4  ;;  %10474 = vmatpush.bf16.msrb.mxu3 %v13675_v1  ;;  %v6335_v51 = vld [vmem:[#allocation3 + $0x50] sm:$0x1] }
 0x33b   : > { %v15436_v36 = vpop.f32.mrf.mxu1  ;;  %v5554_v62 = vpop.f32.mrf.mxu0  ;;  %5504 = vmatmul.bf16.gmra.mxu3 %v11939_v59  ;;  %v8549_v43 = vshll.u32 %v8182_v33, 16  ;;  %v2990_v30 = vsel %vm14183_vm10, %v2985_v55, %v2989_v53  ;;  %v8555_v44 = vshll.u32 %v8183_v61, 16  ;;  %v8559_v14 = vshrl.u32 %v8183_v61, 16  ;;  %v8678_v1 = vld [vmem:[#allocation3 + $0xcc] sm:$0xe] }
 0x33c   : > { %17013 = vst [vmem:[#allocation33_spill] sm:$0xff] %v15436_v36  ;;  %v6332_v5 = vsel %vm14172_vm9, %v6066_v2, %v6331_v31  ;;  %v5954_v27 = vpack.c.bf16 %v5615_v24, %v5615_v24  ;;  %v6419_v0 = vld [vmem:[#allocation3 + $0x40] sm:$0xf]  ;;  %v8565_v26 = vshll.u32 %v8184_v35, 16  ;;  %v13683_v2 = vld [vmem:[#allocation5 + $0x98] sm:$0xff]  ;;  %v3258_v60 = vrot.slane %v3101_v6, 5 }
 0x33d   : > { %6333 = vst [vmem:[#allocation3 + $0x48] sm:$0xf] %v6332_v5  ;;  %v5465_v34 = vpop.f32.mrf.mxu3  ;;  %v8551_v48 = vrot.slane %v8549_v43, 5  ;;  %v8557_v33 = vrot.slane %v8555_v44, 5  ;;  %v8561_v7 = vrot.slane %v8559_v14, 4  ;;  %10563 = vmatpush.bf16.msrb.mxu0 %v13683_v2  ;;  %v13294_v5 = vld [vmem:[%s14094_s19 + $0x70] sm:$0xff] }
 0x33e   : > { %v6069_v4 = vshrl.u32 %v5954_v27, 16  ;;  %v5466_v31 = vadd.f32 %v5465_v34, %v15153_v52  ;;  %6451 = vst [vmem:[#allocation4 + $0x18c] sm:$0xf] %v6419_v0  ;;  %v6072_v21 = vshll.u32 %v5954_v27, 16  ;;  %v6067_v52 = vrot.slane %v15431_v38, 4  ;;  %v13691_v35 = vld [vmem:[#allocation5 + $0xd8] sm:$0xff] }
 0x33f   : > { %3054 = vst [vmem:[#allocation4 + $0x478] sm:$0xf] %v2990_v30  ;;  %5593 = vmatmul.bf16.gmra.mxu0 %v11943_v17  ;;  %v8552_v61 = vor.u32 %v8551_v48, %v8548_v25  ;;  %v13674_v34 = vld [vmem:[#allocation5 + $0x50] sm:$0xff]  ;;  %v8562_v0 = vor.u32 %v8561_v7, %v8557_v33  ;;  %v8567_v55 = vrot.slane %v8565_v26, 5  ;;  %v3261_v38 = vrot.slane %v3102_v3, 5  ;;  %10652 = vmatpush.bf16.msrb.mxu1 %v13691_v35 }
 0x340   : > { %v6071_v24 = vrot.slane %v6069_v4, 7  ;;  %v5555_v45 = vadd.f32 %v5554_v62, %v5466_v31  ;;  %v3260_v4 = vrot.slane %v3258_v60, 4  ;;  %v13682_v31 = vld [vmem:[#allocation5 + $0x90] sm:$0xff]  ;;  %v3259_v25 = vsel %vm14209_vm11, %v11403_v32, %v3258_v60  ;;  %v8679_v30 = vld [vmem:[#allocation3 + $0xd0] sm:$0xf]  ;;  %10475 = vmatpush.bf16.msrb.mxu3 %v13674_v34  ;;  %v13681_v32 = vld [vmem:[#allocation5 + $0x88] sm:$0xff] }
 0x341   : > { %v13690_v44 = vld [vmem:[#allocation5 + $0xd0] sm:$0xff]  ;;  %v8553_v3 = vrot.slane %v8552_v61, 4  ;;  %10564 = vmatpush.bf16.msrb.mxu0 %v13682_v31  ;;  %v8680_v48 = vld [vmem:[#allocation3 + $0xd4] sm:$0x1]  ;;  %3325 = vst [vmem:[#allocation4 + $0x458] sm:$0xf] %v3259_v25 }
 0x342   : > { %v6074_v53 = vor.u32 %v6072_v21, %v6071_v24  ;;  %v6076_v13 = vrot.slane %v6071_v24, 4  ;;  %v5616_v59 = vmax.f32 %v5555_v45, 0.0  ;;  %v13434_v2 = vld [vmem:[#allocation4 + $0x454] sm:$0xf]  ;;  %v8563_v24 = vrot.slane %v8562_v0, 4  ;;  %v13689_v34 = vld [vmem:[#allocation5 + $0xc8] sm:$0xff] }
 0x343   : > { %v15452_v27 = vpop.f32.mrf.mxu1  ;;  %v5556_v62 = vpop.f32.mrf.mxu0  ;;  %v8558_v60 = vsel %vm14183_vm10, %v8553_v3, %v8557_v33  ;;  %v12411_v35 = vrot.slane %v8678_v1, 9  ;;  %10653 = vmatpush.bf16.msrb.mxu1 %v13690_v44  ;;  %v12594_v0 = vld [vmem:[#allocation4 + $0x168] sm:$0xf]  ;;  %v13672_v33 = vld [vmem:[#allocation5 + $0x40] sm:$0xff]  ;;  %v8839_v1 = vrot.slane %v8680_v48, 5 }
 0x344   : > { %17014 = vst [vmem:[#allocation34_spill] sm:$0xff] %v15452_v27  ;;  %v6075_v6 = vsel %vm14161_vm7, %v6067_v52, %v6074_v53  ;;  %v6336_v43 = vsel %vm14289_vm13, %v6076_v13, %v6335_v51  ;;  %v5955_v17 = vpack.c.bf16 %v5616_v59, %v5616_v59  ;;  %v13673_v52 = vld [vmem:[#allocation5 + $0x48] sm:$0xff]  ;;  %v6338_v51 = vld [vmem:[#allocation3 + $0x54] sm:$0xf]  ;;  %v8568_v53 = vsel %vm14183_vm10, %v8563_v24, %v8567_v55  ;;  %v13680_v31 = vld [vmem:[#allocation5 + $0x80] sm:$0xff] }
 0x345   : > { %6334 = vst [vmem:[#allocation3 + $0x4c] sm:$0xf] %v6075_v6  ;;  %v5467_v14 = vpop.f32.mrf.mxu3  ;;  %v13569_v26 = vld [vmem:[#allocation4 + $0x188] sm:$0xf0]  ;;  %v3262_v13 = vsel %vm14209_vm11, %v3260_v4, %v3261_v38  ;;  %v8836_v59 = vrot.slane %v8679_v30, 5  ;;  %10476 = vmatpush.bf16.msrb.mxu3 %v13673_v52  ;;  %10565 = vmatpush.bf16.msrb.mxu0 %v13681_v32  ;;  %v13700_v30 = vld [vmem:[#allocation5 + $0x120] sm:$0xff] }
 0x346   : > { %6337 = vst [vmem:[#allocation3 + $0x50] sm:$0x1] %v6336_v43  ;;  %5878 = vmatmul.bf16.gmra.mxu1 %v13294_v5  ;;  %v6078_v21 = vshrl.u32 %v5955_v17, 16  ;;  %v5468_v45 = vadd.f32 %v5467_v14, %v15444_v37  ;;  %v11972_v7 = vld [vmem:[#allocation4 + $0x474] sm:$0xf0]  ;;  %v6081_v61 = vshll.u32 %v5955_v17, 16  ;;  %v12595_v4 = vor.u32 %v13569_v26, %v12594_v0  ;;  %10740 = vmatpush.bf16.msrb.mxu2 %v13700_v30 }
 0x347   : > { %8631 = vst [vmem:[#allocation4 + $0x454] sm:$0xf] %v8558_v60  ;;  %v11975_v38 = vor.u32 %v13434_v2, %v11972_v7  ;;  %v6420_v43 = vld [vmem:[#allocation3 + $0x48] sm:$0xf]  ;;  %v8838_v17 = vrot.slane %v8836_v59, 4  ;;  %v8837_v3 = vsel %vm14209_vm11, %v12411_v35, %v8836_v59  ;;  %10654 = vmatpush.bf16.msrb.mxu1 %v13689_v34  ;;  %v13688_v26 = vld [vmem:[#allocation5 + $0xc0] sm:$0xff] }
 0x348   : > { %v15467_v5 = vrot.slane %v6078_v21, 7  ;;  %v5557_v37 = vadd.f32 %v5556_v62, %v5468_v45  ;;  %8632 = vst [vmem:[#allocation4 + $0x478] sm:$0xf] %v8568_v53  ;;  %v6475_v2 = vld [vmem:[#allocation3 + $0xc] sm:$0xf] }
 0x349   : > { %3326 = vst [vmem:[#allocation4 + $0x47c] sm:$0xf] %v3262_v13  ;;  %10477 = vmatpush.bf16.msrb.mxu3 %v13672_v33  ;;  %10566 = vmatpush.bf16.msrb.mxu0 %v13680_v31  ;;  %v11978_v48 = vld [vmem:[#allocation4 + $0x458] sm:$0xf]  ;;  %v8840_v7 = vsel %vm14209_vm11, %v8838_v17, %v8839_v1  ;;  %v6477_v59 = vld [vmem:[#allocation3 + $0x14] sm:$0x1] }
 0x34a   : > { %v6083_v55 = vor.u32 %v6081_v61, %v15467_v5  ;;  %v5617_v6 = vmax.f32 %v5557_v37, 0.0  ;;  %6452 = vst [vmem:[#allocation4 + $0x1b0] sm:$0xf] %v6420_v43  ;;  %10414 = vmatmul.bf16.gmra.mxu2 %v12595_v4  ;;  %v6476_v60 = vld [vmem:[#allocation3 + $0x10] sm:$0xf]  ;;  %v6545_v61 = vshrl.u32 %v6475_v2, 16 }
 0x34b   : > { %v15470_v25 = vpop.f32.mrf.mxu1  ;;  %v5559_v62 = vpop.f32.mrf.mxu0  ;;  %5509 = vmatmul.bf16.gmra.mxu3 %v11975_v38  ;;  %8903 = vst [vmem:[#allocation4 + $0x458] sm:$0xf] %v8837_v3  ;;  %10655 = vmatpush.bf16.msrb.mxu1 %v13688_v26  ;;  %v6548_v37 = vshll.u32 %v6475_v2, 16  ;;  %v6084_v35 = vrot.slane %v15467_v5, 4  ;;  %v6558_v0 = vshrl.u32 %v6476_v60, 16  ;;  %v6564_v33 = vshll.u32 %v6477_v59, 16 }
 0x34c   : > { %17015 = vst [vmem:[#allocation35_spill] sm:$0xff] %v15470_v25  ;;  %v6339_v44 = vsel %vm14172_vm9, %v6083_v55, %v6338_v51  ;;  %v5956_v14 = vpack.c.bf16 %v5617_v6, %v5617_v6  ;;  %v6421_v24 = vld [vmem:[#allocation3 + $0x4c] sm:$0xf]  ;;  %v6342_v51 = vld [vmem:[#allocation3 + $0x5c] sm:$0x1]  ;;  %v13295_v4 = vld [vmem:[%s14094_s19 + $0x78] sm:$0xff]  ;;  %v5384_v5 = vadd.f32 %v15184_v56, %v15177_v9 }
 0x34d   : > { %6340 = vst [vmem:[#allocation3 + $0x54] sm:$0xf] %v6339_v44  ;;  %v5470_v21 = vpop.f32.mrf.mxu3  ;;  %v15481_v43 = vld [vmem:[#allocation3 + $0x18] sm:$0xf]  ;;  %v6547_v1 = vrot.slane %v6545_v61, 4  ;;  %v6550_v30 = vrot.slane %v6548_v37, 5 }
 0x34e   : > { %v6086_v45 = vshrl.u32 %v5956_v14, 16  ;;  %v5471_v52 = vadd.f32 %v5470_v21, %v15171_v57  ;;  %6453 = vst [vmem:[#allocation4 + $0x1d4] sm:$0xf] %v6421_v24  ;;  %v6089_v32 = vshll.u32 %v5956_v14, 16  ;;  %v6554_v57 = vshll.u32 %v6476_v60, 16 }
 0x34f   : > { %v6560_v14 = vrot.slane %v6558_v0, 4  ;;  %v13520_v2 = vld [vmem:[#allocation4 + $0x4] sm:$0xf]  ;;  %v12416_v21 = vld [vmem:[#allocation4 + $0x24] sm:$0xf0]  ;;  %v6566_v37 = vrot.slane %v6564_v33, 5 }
 0x350   : > { %v6088_v53 = vrot.slane %v6086_v45, 7  ;;  %v5560_v13 = vadd.f32 %v5559_v62, %v5471_v52  ;;  %v13439_v34 = vld [vmem:[#allocation4 + $0x478] sm:$0xf0]  ;;  %v6556_v44 = vrot.slane %v6554_v57, 5  ;;  %v6971_v60 = vld [vmem:[#allocation3 + $0xc] sm:$0xe]  ;;  %v12419_v59 = vor.u32 %v13520_v2, %v12416_v21 }
 0x351   : > { %v11979_v6 = vor.u32 %v13439_v34, %v11978_v48  ;;  %8904 = vst [vmem:[#allocation4 + $0x47c] sm:$0xf] %v8840_v7  ;;  %v12630_v48 = vld [vmem:[#allocation4 + $0x1b0] sm:$0xf]  ;;  %v12422_v33 = vld [vmem:[#allocation4 + $0x8] sm:$0xf] }
 0x352   : > { %v6091_v31 = vor.u32 %v6089_v32, %v6088_v53  ;;  %v6093_v55 = vrot.slane %v6088_v53, 4  ;;  %v5618_v38 = vmax.f32 %v5560_v13, 0.0  ;;  %v6551_v32 = vor.u32 %v6550_v30, %v6547_v1 }
 0x353   : > { %v15483_v17 = vpop.f32.mrf.mxu1  ;;  %v5561_v62 = vpop.f32.mrf.mxu0  ;;  %5598 = vmatmul.bf16.gmra.mxu0 %v11979_v6  ;;  %v6561_v7 = vor.u32 %v6560_v14, %v6556_v44  ;;  %v6569_v13 = vshrl.u32 %v15481_v43, 16  ;;  %v6345_v6 = vld [vmem:[#allocation3 + $0x60] sm:$0xf]  ;;  %v12365_v1 = vrot.slane %v6971_v60, 9 }
 0x354   : > { %17016 = vst [vmem:[#allocation36_spill] sm:$0xff] %v15483_v17  ;;  %v6092_v3 = vsel %vm14161_vm7, %v6084_v35, %v6091_v31  ;;  %v6343_v24 = vsel %vm14289_vm13, %v6093_v55, %v6342_v51  ;;  %v5957_v26 = vpack.c.bf16 %v5618_v38, %v5618_v38  ;;  %v6422_v53 = vld [vmem:[#allocation3 + $0x54] sm:$0xf]  ;;  %v6552_v51 = vrot.slane %v6551_v32, 4  ;;  %v6972_v31 = vld [vmem:[#allocation3 + $0x10] sm:$0xf] }
 0x355   : > { %6341 = vst [vmem:[#allocation3 + $0x58] sm:$0xf] %v6092_v3  ;;  %v5472_v45 = vpop.f32.mrf.mxu3  ;;  %v13578_v52 = vld [vmem:[#allocation4 + $0x1d0] sm:$0xf0]  ;;  %v6562_v61 = vrot.slane %v6561_v7, 4  ;;  %v7073_v30 = vrot.slane %v6972_v31, 5 }
 0x356   : > { %6344 = vst [vmem:[#allocation3 + $0x5c] sm:$0x1] %v6343_v24  ;;  %5883 = vmatmul.bf16.gmra.mxu1 %v13295_v4  ;;  %v6095_v9 = vshrl.u32 %v5957_v26, 16  ;;  %v5473_v56 = vadd.f32 %v5472_v45, %v5384_v5  ;;  %v6098_v34 = vshll.u32 %v5957_v26, 16  ;;  %v12631_v0 = vor.u32 %v13578_v52, %v12630_v48  ;;  %v6973_v55 = vld [vmem:[#allocation3 + $0x14] sm:$0x1] }
 0x357   : > { %6454 = vst [vmem:[#allocation4 + $0x1f8] sm:$0xf] %v6422_v53  ;;  %v6557_v4 = vsel %vm14183_vm10, %v6552_v51, %v6556_v44  ;;  %v6567_v38 = vsel %vm14183_vm10, %v6562_v61, %v6566_v37  ;;  %v13525_v3 = vld [vmem:[#allocation4 + $0x28] sm:$0xf0]  ;;  %v7076_v24 = vrot.slane %v6973_v55, 5  ;;  %v7074_v44 = vsel %vm14209_vm11, %v12365_v1, %v7073_v30 }
 0x358   : > { %v15492_v35 = vrot.slane %v6095_v9, 7  ;;  %v5562_v57 = vadd.f32 %v5561_v62, %v5473_v56  ;;  %6938 = vst [vmem:[#allocation4 + $0x4c] sm:$0xf] %v6557_v4  ;;  %v6571_v62 = vrot.slane %v6569_v13, 4  ;;  %v7075_v21 = vrot.slane %v7073_v30, 4 }
 0x359   : > { %6939 = vst [vmem:[#allocation4 + $0x70] sm:$0xf] %v6567_v38  ;;  %v7242_v45 = vld [vmem:[#allocation3 + $0x18] sm:$0xf]  ;;  %v6479_v48 = vld [vmem:[#allocation3 + $0x1c] sm:$0xf] }
 0x35a   : > { %v6100_v14 = vor.u32 %v6098_v34, %v15492_v35  ;;  %v5619_v5 = vmax.f32 %v5562_v57, 0.0  ;;  %v6572_v52 = vshll.u32 %v15481_v43, 16  ;;  %7210 = vst [vmem:[#allocation4 + $0x50] sm:$0xf] %v7074_v44  ;;  %v7243_v9 = vld [vmem:[#allocation3 + $0x1c] sm:$0xf]  ;;  %v7077_v53 = vsel %vm14209_vm11, %v7075_v21, %v7076_v24  ;;  %10419 = vmatmul.bf16.gmra.mxu2 %v12631_v0 }
 0x35b   : > { %v15499_v26 = vpop.f32.mrf.mxu1  ;;  %v5564_v2 = vpop.f32.mrf.mxu0  ;;  %v6578_v51 = vshll.u32 %v6479_v48, 16  ;;  %v6582_v61 = vshrl.u32 %v6479_v48, 16  ;;  %10478 = vmatmul.bf16.vlgmr.msrb.gmra.mxu3 %v12419_v59  ;;  %v6480_v34 = vld [vmem:[#allocation3 + $0x20] sm:$0x1]  ;;  %v12423_v57 = vor.u32 %v13525_v3, %v12422_v33  ;;  %7211 = vst [vmem:[#allocation4 + $0x74] sm:$0xf] %v7077_v53  ;;  %v5389_v33 = vadd.f32 %v15201_v12, %v15194_v54 }
 0x35c   : > { %17017 = vst [vmem:[#allocation37_spill] sm:$0xff] %v15499_v26  ;;  %v6346_v32 = vsel %vm14172_vm9, %v6100_v14, %v6345_v6  ;;  %v5958_v7 = vpack.c.bf16 %v5619_v5, %v5619_v5  ;;  %v6423_v60 = vld [vmem:[#allocation3 + $0x58] sm:$0xf]  ;;  %v6574_v13 = vrot.slane %v6572_v52, 5  ;;  %v12424_v38 = vld [vmem:[#allocation4 + $0x2c] sm:$0xf0] }
 0x35d   : > { %6347 = vst [vmem:[#allocation3 + $0x60] sm:$0xf] %v6346_v32  ;;  %v5475_v56 = vpop.f32.mrf.mxu3  ;;  %v6580_v31 = vrot.slane %v6578_v51, 5  ;;  %v6584_v55 = vrot.slane %v6582_v61, 4  ;;  %v6349_v14 = vld [vmem:[#allocation3 + $0x68] sm:$0x1] }
 0x35e   : > { %v6103_v37 = vshrl.u32 %v5958_v7, 16  ;;  %v5476_v43 = vadd.f32 %v5475_v56, %v15188_v41  ;;  %6455 = vst [vmem:[#allocation4 + $0x21c] sm:$0xf] %v6423_v60  ;;  %v6106_v4 = vshll.u32 %v5958_v7, 16  ;;  %v6575_v30 = vor.u32 %v6574_v13, %v6571_v62  ;;  %v13521_v44 = vld [vmem:[#allocation4 + $0xc] sm:$0xf] }
 0x35f   : > { %7274 = vst [vmem:[#allocation4 + $0x54] sm:$0xf] %v7242_v45  ;;  %v6585_v5 = vor.u32 %v6584_v55, %v6580_v31  ;;  %v6588_v24 = vshll.u32 %v6480_v34, 16  ;;  %v6101_v59 = vrot.slane %v15492_v35, 4  ;;  %v12427_v48 = vor.u32 %v13521_v44, %v12424_v38  ;;  %v15514_v45 = vld [vmem:[#allocation3 + $0x24] sm:$0xf] }
 0x360   : > { %v6105_v6 = vrot.slane %v6103_v37, 7  ;;  %v5565_v1 = vadd.f32 %v5564_v2, %v5476_v43  ;;  %7275 = vst [vmem:[#allocation4 + $0x78] sm:$0xf] %v7243_v9  ;;  %v6576_v7 = vrot.slane %v6575_v30, 4  ;;  %v6974_v54 = vld [vmem:[#allocation3 + $0x18] sm:$0xe] }
 0x361   : > { %v6586_v2 = vrot.slane %v6585_v5, 4  ;;  %v6590_v9 = vrot.slane %v6588_v24, 5  ;;  %v6975_v13 = vld [vmem:[#allocation3 + $0x1c] sm:$0xf]  ;;  %v6352_v51 = vld [vmem:[#allocation3 + $0x6c] sm:$0xf] }
 0x362   : > { %v6108_v0 = vor.u32 %v6106_v4, %v6105_v6  ;;  %v6110_v41 = vrot.slane %v6105_v6, 4  ;;  %v5620_v21 = vmax.f32 %v5565_v1, 0.0  ;;  %v6581_v53 = vsel %vm14183_vm10, %v6576_v7, %v6580_v31  ;;  %v12666_v61 = vld [vmem:[#allocation4 + $0x1f8] sm:$0xf]  ;;  %v12452_v43 = vld [vmem:[#allocation4 + $0x6c] sm:$0xf0] }
 0x363   : > { %v15512_v3 = vpop.f32.mrf.mxu1  ;;  %v5566_v52 = vpop.f32.mrf.mxu0  ;;  %10567 = vmatmul.bf16.vlgmr.msrb.gmra.mxu0 %v12423_v57  ;;  %v6591_v57 = vsel %vm14183_vm10, %v6586_v2, %v6590_v9  ;;  %v6976_v55 = vld [vmem:[#allocation3 + $0x20] sm:$0x1]  ;;  %v13699_v1 = vld [vmem:[#allocation5 + $0x118] sm:$0xff]  ;;  %v6593_v30 = vshrl.u32 %v15514_v45, 16  ;;  %6940 = vst [vmem:[#allocation4 + $0x94] sm:$0xf] %v6581_v53 }
 0x364   : > { %17018 = vst [vmem:[#allocation38_spill] sm:$0xff] %v15512_v3  ;;  %v6109_v62 = vsel %vm14161_vm7, %v6101_v59, %v6108_v0  ;;  %v6350_v35 = vsel %vm14289_vm13, %v6110_v41, %v6349_v14  ;;  %v5959_v32 = vpack.c.bf16 %v5620_v21, %v5620_v21  ;;  %v6424_v34 = vld [vmem:[#allocation3 + $0x60] sm:$0xf]  ;;  %v12366_v31 = vrot.slane %v6974_v54, 9  ;;  %v7244_v5 = vld [vmem:[#allocation3 + $0x24] sm:$0xf]  ;;  %10741 = vmatpush.bf16.msrb.mxu2 %v13699_v1 }
 0x365   : > { %6348 = vst [vmem:[#allocation3 + $0x64] sm:$0xf] %v6109_v62  ;;  %v5477_v60 = vpop.f32.mrf.mxu3  ;;  %v13587_v37 = vld [vmem:[#allocation4 + $0x218] sm:$0xf0]  ;;  %v7080_v14 = vrot.slane %v6975_v13, 5  ;;  %v6596_v53 = vshll.u32 %v15514_v45, 16 }
 0x366   : > { %6351 = vst [vmem:[#allocation3 + $0x68] sm:$0x1] %v6350_v35  ;;  %10656 = vmatmul.bf16.vlgmr.msrb.gmra.mxu1 %v12427_v48  ;;  %v6112_v12 = vshrl.u32 %v5959_v32, 16  ;;  %v5478_v56 = vadd.f32 %v5477_v60, %v5389_v33  ;;  %v6115_v4 = vshll.u32 %v5959_v32, 16  ;;  %v12667_v0 = vor.u32 %v13587_v37, %v12666_v61  ;;  %v13529_v41 = vld [vmem:[#allocation4 + $0x4c] sm:$0xf] }
 0x367   : > { %6456 = vst [vmem:[#allocation4 + $0x240] sm:$0xf] %v6424_v34  ;;  %v7081_v33 = vsel %vm14209_vm11, %v12366_v31, %v7080_v14  ;;  %v7082_v48 = vrot.slane %v7080_v14, 4  ;;  %v7245_v2 = vld [vmem:[#allocation3 + $0x28] sm:$0xf]  ;;  %v12455_v32 = vor.u32 %v13529_v41, %v12452_v43 }
 0x368   : > { %v15524_v6 = vrot.slane %v6112_v12, 7  ;;  %v5567_v38 = vadd.f32 %v5566_v52, %v5478_v56  ;;  %6941 = vst [vmem:[#allocation4 + $0xb8] sm:$0xf] %v6591_v57  ;;  %v7083_v52 = vrot.slane %v6976_v55, 5  ;;  %v13534_v7 = vld [vmem:[#allocation4 + $0x70] sm:$0xf0] }
 0x369   : > { %7276 = vst [vmem:[#allocation4 + $0x9c] sm:$0xf] %v7244_v5  ;;  %v6482_v9 = vld [vmem:[#allocation3 + $0x28] sm:$0xf]  ;;  %v6595_v56 = vrot.slane %v6593_v30, 4  ;;  %v6598_v55 = vrot.slane %v6596_v53, 5 }
 0x36a   : > { %v6117_v24 = vor.u32 %v6115_v4, %v15524_v6  ;;  %v5621_v59 = vmax.f32 %v5567_v38, 0.0  ;;  %7212 = vst [vmem:[#allocation4 + $0x98] sm:$0xf] %v7081_v33  ;;  %v7084_v12 = vsel %vm14209_vm11, %v7082_v48, %v7083_v52  ;;  %v6602_v13 = vshll.u32 %v6482_v9, 16  ;;  %10424 = vmatmul.bf16.gmra.mxu2 %v12667_v0  ;;  %v12458_v37 = vld [vmem:[#allocation4 + $0x50] sm:$0xf] }
 0x36b   : > { %v15528_v44 = vpop.f32.mrf.mxu1  ;;  %v5569_v21 = vpop.f32.mrf.mxu0  ;;  %10483 = vmatmul.bf16.gmra.mxu3 %v12455_v32  ;;  %v6606_v34 = vshrl.u32 %v6482_v9, 16  ;;  %7213 = vst [vmem:[#allocation4 + $0xbc] sm:$0xf] %v7084_v12  ;;  %v6483_v57 = vld [vmem:[#allocation3 + $0x2c] sm:$0x1]  ;;  %v6118_v14 = vrot.slane %v15524_v6, 4  ;;  %v5394_v52 = vadd.f32 %v15218_v18, %v15211_v8 }
 0x36c   : > { %17019 = vst [vmem:[#allocation39_spill] sm:$0xff] %v15528_v44  ;;  %v6353_v62 = vsel %vm14172_vm9, %v6117_v24, %v6352_v51  ;;  %v5960_v35 = vpack.c.bf16 %v5621_v59, %v5621_v59  ;;  %v6425_v60 = vld [vmem:[#allocation3 + $0x64] sm:$0xf]  ;;  %v12460_v51 = vld [vmem:[#allocation4 + $0x74] sm:$0xf0]  ;;  %v6604_v4 = vrot.slane %v6602_v13, 5  ;;  %v12459_v24 = vor.u32 %v13534_v7, %v12458_v37 }
 0x36d   : > { %6354 = vst [vmem:[#allocation3 + $0x6c] sm:$0xf] %v6353_v62  ;;  %v5480_v54 = vpop.f32.mrf.mxu3  ;;  %v6608_v30 = vrot.slane %v6606_v34, 4  ;;  %v15538_v45 = vld [vmem:[#allocation3 + $0x30] sm:$0xf]  ;;  %v6599_v59 = vor.u32 %v6598_v55, %v6595_v56  ;;  %v6612_v48 = vshll.u32 %v6483_v57, 16 }
 0x36e   : > { %v6120_v61 = vshrl.u32 %v5960_v35, 16  ;;  %v5481_v43 = vadd.f32 %v5480_v54, %v15205_v47  ;;  %6457 = vst [vmem:[#allocation4 + $0x264] sm:$0xf] %v6425_v60  ;;  %v6123_v1 = vshll.u32 %v5960_v35, 16  ;;  %v6356_v5 = vld [vmem:[#allocation3 + $0x74] sm:$0x1] }
 0x36f   : > { %7277 = vst [vmem:[#allocation4 + $0xc0] sm:$0xf] %v7245_v2  ;;  %v13530_v41 = vld [vmem:[#allocation4 + $0x54] sm:$0xf]  ;;  %v6609_v35 = vor.u32 %v6608_v30, %v6604_v4  ;;  %v6600_v60 = vrot.slane %v6599_v59, 4  ;;  %v6617_v8 = vshrl.u32 %v15538_v45, 16 }
 0x370   : > { %v6122_v38 = vrot.slane %v6120_v61, 7  ;;  %v5570_v31 = vadd.f32 %v5569_v21, %v5481_v43  ;;  %v12463_v21 = vor.u32 %v13530_v41, %v12460_v51  ;;  %v6977_v9 = vld [vmem:[#allocation3 + $0x24] sm:$0xe]  ;;  %v6978_v12 = vld [vmem:[#allocation3 + $0x28] sm:$0xf]  ;;  %v6614_v37 = vrot.slane %v6612_v48, 5  ;;  %v15552_v51 = vpop.f32.mrf.mxu2 }
 0x371   : > { %v12702_v53 = vld [vmem:[#allocation4 + $0x240] sm:$0xf]  ;;  %v6605_v61 = vsel %vm14183_vm10, %v6600_v60, %v6604_v4  ;;  %v6610_v55 = vrot.slane %v6609_v35, 4  ;;  %v12367_v30 = vrot.slane %v6977_v9, 9  ;;  %v7246_v4 = vld [vmem:[#allocation3 + $0x30] sm:$0xf] }
 0x372   : > { %v6125_v0 = vor.u32 %v6123_v1, %v6122_v38  ;;  %v6127_v47 = vrot.slane %v6122_v38, 4  ;;  %v5622_v33 = vmax.f32 %v5570_v31, 0.0  ;;  %v6359_v34 = vld [vmem:[#allocation3 + $0x78] sm:$0xf]  ;;  %v6979_v38 = vld [vmem:[#allocation3 + $0x2c] sm:$0x1] }
 0x373   : > { %v15543_v62 = vpop.f32.mrf.mxu1  ;;  %v5571_v2 = vpop.f32.mrf.mxu0  ;;  %10572 = vmatmul.bf16.gmra.mxu0 %v12459_v24  ;;  %v12488_v24 = vld [vmem:[#allocation4 + $0xb4] sm:$0xf0]  ;;  %v6615_v59 = vsel %vm14183_vm10, %v6610_v55, %v6614_v37  ;;  %6942 = vst [vmem:[#allocation4 + $0xdc] sm:$0xf] %v6605_v61  ;;  %v13538_v41 = vld [vmem:[#allocation4 + $0x94] sm:$0xf] }
 0x374   : > { %17020 = vst [vmem:[#allocation40_spill] sm:$0xff] %v15543_v62  ;;  %v6126_v32 = vsel %vm14161_vm7, %v6118_v14, %v6125_v0  ;;  %v6357_v6 = vsel %vm14289_vm13, %v6127_v47, %v6356_v5  ;;  %v5961_v7 = vpack.c.bf16 %v5622_v33, %v5622_v33  ;;  %v6426_v57 = vld [vmem:[#allocation3 + $0x6c] sm:$0xf]  ;;  %v7087_v14 = vrot.slane %v6978_v12, 5  ;;  %v7247_v35 = vld [vmem:[#allocation3 + $0x34] sm:$0xf] }
 0x375   : > { %6355 = vst [vmem:[#allocation3 + $0x70] sm:$0xf] %v6126_v32  ;;  %v5482_v54 = vpop.f32.mrf.mxu3  ;;  %v13596_v13 = vld [vmem:[#allocation4 + $0x260] sm:$0xf0]  ;;  %v7090_v48 = vrot.slane %v6979_v38, 5  ;;  %v12491_v9 = vor.u32 %v13538_v41, %v12488_v24 }
 0x376   : > { %6358 = vst [vmem:[#allocation3 + $0x74] sm:$0x1] %v6357_v6  ;;  %10661 = vmatmul.bf16.gmra.mxu1 %v12463_v21  ;;  %v6129_v18 = vshrl.u32 %v5961_v7, 16  ;;  %v5483_v56 = vadd.f32 %v5482_v54, %v5394_v52  ;;  %v6132_v43 = vshll.u32 %v5961_v7, 16  ;;  %v12703_v5 = vor.u32 %v13596_v13, %v12702_v53  ;;  %v6485_v32 = vld [vmem:[#allocation3 + $0x34] sm:$0xf] }
 0x377   : > { %6458 = vst [vmem:[#allocation4 + $0x288] sm:$0xf] %v6426_v57  ;;  %v7088_v33 = vsel %vm14209_vm11, %v12367_v30, %v7087_v14  ;;  %v6620_v6 = vshll.u32 %v15538_v45, 16  ;;  %v13543_v54 = vld [vmem:[#allocation4 + $0xb8] sm:$0xf0]  ;;  %v6626_v61 = vshll.u32 %v6485_v32, 16 }
 0x378   : > { %v15554_v1 = vrot.slane %v6129_v18, 7  ;;  %v5572_v31 = vadd.f32 %v5571_v2, %v5483_v56  ;;  %6943 = vst [vmem:[#allocation4 + $0x100] sm:$0xf] %v6615_v59  ;;  %v7089_v2 = vrot.slane %v7087_v14, 4  ;;  %v6619_v18 = vrot.slane %v6617_v8, 4  ;;  %v15569_v57 = vpop.f32.mrf.mxu2 }
 0x379   : > { %7214 = vst [vmem:[#allocation4 + $0xe0] sm:$0xf] %v7088_v33  ;;  %v6622_v13 = vrot.slane %v6620_v6, 5  ;;  %v6630_v37 = vshrl.u32 %v6485_v32, 16  ;;  %v12494_v55 = vld [vmem:[#allocation4 + $0x98] sm:$0xf] }
 0x37a   : > { %v6134_v0 = vor.u32 %v6132_v43, %v15554_v1  ;;  %v5623_v47 = vmax.f32 %v5572_v31, 0.0  ;;  %7278 = vst [vmem:[#allocation4 + $0xe4] sm:$0xf] %v7246_v4  ;;  %v7091_v53 = vsel %vm14209_vm11, %v7089_v2, %v7090_v48  ;;  %10429 = vmatmul.bf16.gmra.mxu2 %v12703_v5  ;;  %v6628_v8 = vrot.slane %v6626_v61, 5  ;;  %v12496_v14 = vld [vmem:[#allocation4 + $0xbc] sm:$0xf0] }
 0x37b   : > { %v15561_v52 = vpop.f32.mrf.mxu1  ;;  %v5574_v21 = vpop.f32.mrf.mxu0  ;;  %10488 = vmatmul.bf16.gmra.mxu3 %v12491_v9  ;;  %7215 = vst [vmem:[#allocation4 + $0x104] sm:$0xf] %v7091_v53  ;;  %v6632_v38 = vrot.slane %v6630_v37, 4  ;;  %v6623_v59 = vor.u32 %v6622_v13, %v6619_v18  ;;  %v15571_v4 = vld [vmem:[#allocation3 + $0x3c] sm:$0xf]  ;;  %v6135_v41 = vrot.slane %v15554_v1, 4 }
 0x37c   : > { %17021 = vst [vmem:[#allocation41_spill] sm:$0xff] %v15561_v52  ;;  %v6360_v7 = vsel %vm14172_vm9, %v6134_v0, %v6359_v34  ;;  %v5962_v60 = vpack.c.bf16 %v5623_v47, %v5623_v47  ;;  %v6427_v12 = vld [vmem:[#allocation3 + $0x70] sm:$0xf]  ;;  %v6486_v34 = vld [vmem:[#allocation3 + $0x38] sm:$0x1]  ;;  %v12495_v0 = vor.u32 %v13543_v54, %v12494_v55 }
 0x37d   : > { %6361 = vst [vmem:[#allocation3 + $0x78] sm:$0xf] %v6360_v7  ;;  %v5485_v56 = vpop.f32.mrf.mxu3  ;;  %v6363_v5 = vld [vmem:[#allocation3 + $0x80] sm:$0x1]  ;;  %v6633_v47 = vor.u32 %v6632_v38, %v6628_v8  ;;  %v13539_v2 = vld [vmem:[#allocation4 + $0x9c] sm:$0xf] }
 0x37e   : > { %v6137_v43 = vshrl.u32 %v5962_v60, 16  ;;  %v5486_v45 = vadd.f32 %v5485_v56, %v15222_v15  ;;  %6459 = vst [vmem:[#allocation4 + $0x2ac] sm:$0xf] %v6427_v12  ;;  %v6140_v30 = vshll.u32 %v5962_v60, 16  ;;  %v6636_v15 = vshll.u32 %v6486_v34, 16  ;;  %v17022_v6 = vld [vmem:[#allocation8_spill] sm:$0xff] }
 0x37f   : > { %7279 = vst [vmem:[#allocation4 + $0x108] sm:$0xf] %v7247_v35  ;;  %v5399_v7 = vadd.f32 %v17022_v6, %v15228_v16  ;;  %v6634_v9 = vrot.slane %v6633_v47, 4  ;;  %v6980_v12 = vld [vmem:[#allocation3 + $0x30] sm:$0xe]  ;;  %v6624_v56 = vrot.slane %v6623_v59, 4 }
 0x380   : > { %v6139_v31 = vrot.slane %v6137_v43, 7  ;;  %v5575_v24 = vadd.f32 %v5574_v21, %v5486_v45  ;;  %v12499_v21 = vor.u32 %v13539_v2, %v12496_v14  ;;  %v6981_v53 = vld [vmem:[#allocation3 + $0x34] sm:$0xf]  ;;  %v6638_v61 = vrot.slane %v6636_v15, 5  ;;  %v6982_v34 = vld [vmem:[#allocation3 + $0x38] sm:$0x1] }
 0x381   : > { %v6641_v16 = vshrl.u32 %v15571_v4, 16  ;;  %v6629_v45 = vsel %vm14183_vm10, %v6624_v56, %v6628_v8  ;;  %v12368_v55 = vrot.slane %v6980_v12, 9  ;;  %v6366_v38 = vld [vmem:[#allocation3 + $0x84] sm:$0xf]  ;;  %v13698_v14 = vld [vmem:[#allocation5 + $0x110] sm:$0xff]  ;;  %v7094_v59 = vrot.slane %v6981_v53, 5 }
 0x382   : > { %v6142_v33 = vor.u32 %v6140_v30, %v6139_v31  ;;  %v6144_v48 = vrot.slane %v6139_v31, 4  ;;  %v5624_v32 = vmax.f32 %v5575_v24, 0.0  ;;  %v6639_v24 = vsel %vm14183_vm10, %v6634_v9, %v6638_v61  ;;  %v12738_v15 = vld [vmem:[#allocation4 + $0x288] sm:$0xf]  ;;  %v12524_v8 = vld [vmem:[#allocation4 + $0xfc] sm:$0xf0]  ;;  %10742 = vmatpush.bf16.msrb.mxu2 %v13698_v14 }
 0x383   : > { %v15576_v60 = vpop.f32.mrf.mxu1  ;;  %v5576_v35 = vpop.f32.mrf.mxu0  ;;  %10577 = vmatmul.bf16.gmra.mxu0 %v12495_v0  ;;  %6944 = vst [vmem:[#allocation4 + $0x124] sm:$0xf] %v6629_v45  ;;  %v7096_v2 = vrot.slane %v7094_v59, 4  ;;  %v7248_v9 = vld [vmem:[#allocation3 + $0x3c] sm:$0xf]  ;;  %v6643_v12 = vrot.slane %v6641_v16, 4 }
 0x384   : > { %17023 = vst [vmem:[#allocation8_spill] sm:$0xff] %v15576_v60  ;;  %v6143_v54 = vsel %vm14161_vm7, %v6135_v41, %v6142_v33  ;;  %v6364_v18 = vsel %vm14289_vm13, %v6144_v48, %v6363_v5  ;;  %v5963_v1 = vpack.c.bf16 %v5624_v32, %v5624_v32  ;;  %v6428_v30 = vld [vmem:[#allocation3 + $0x78] sm:$0xf]  ;;  %v15589_v41 = vpop.f32.mrf.mxu2  ;;  %v13547_v33 = vld [vmem:[#allocation4 + $0xdc] sm:$0xf]  ;;  %v7095_v48 = vsel %vm14209_vm11, %v12368_v55, %v7094_v59 }
 0x385   : > { %6362 = vst [vmem:[#allocation3 + $0x7c] sm:$0xf] %v6143_v54  ;;  %v5487_v13 = vpop.f32.mrf.mxu3  ;;  %v13605_v31 = vld [vmem:[#allocation4 + $0x2a8] sm:$0xf0]  ;;  %v7097_v32 = vrot.slane %v6982_v34, 5  ;;  %v6644_v53 = vshll.u32 %v15571_v4, 16 }
 0x386   : > { %6365 = vst [vmem:[#allocation3 + $0x80] sm:$0x1] %v6364_v18  ;;  %10666 = vmatmul.bf16.gmra.mxu1 %v12499_v21  ;;  %v6146_v37 = vshrl.u32 %v5963_v1, 16  ;;  %v5488_v43 = vadd.f32 %v5487_v13, %v5399_v7  ;;  %v6149_v0 = vshll.u32 %v5963_v1, 16  ;;  %v12739_v21 = vor.u32 %v13605_v31, %v12738_v15  ;;  %v6489_v56 = vld [vmem:[#allocation3 + $0x44] sm:$0x1] }
 0x387   : > { %6460 = vst [vmem:[#allocation4 + $0x2d0] sm:$0xf] %v6428_v30  ;;  %v7098_v1 = vsel %vm14209_vm11, %v7096_v2, %v7097_v32  ;;  %v7249_v55 = vld [vmem:[#allocation3 + $0x40] sm:$0xf]  ;;  %v6646_v31 = vrot.slane %v6644_v53, 5  ;;  %v6660_v15 = vshll.u32 %v6489_v56, 16 }
 0x388   : > { %v15587_v5 = vrot.slane %v6146_v37, 7  ;;  %v5577_v47 = vadd.f32 %v5576_v35, %v5488_v43  ;;  %6945 = vst [vmem:[#allocation4 + $0x148] sm:$0xf] %v6639_v24  ;;  %v6488_v35 = vld [vmem:[#allocation3 + $0x40] sm:$0xf]  ;;  %v12527_v43 = vor.u32 %v13547_v33, %v12524_v8 }
 0x389   : > { %7216 = vst [vmem:[#allocation4 + $0x128] sm:$0xf] %v7095_v48  ;;  %v6650_v13 = vshll.u32 %v6488_v35, 16  ;;  %v6654_v34 = vshrl.u32 %v6488_v35, 16  ;;  %v15601_v14 = vld [vmem:[#allocation3 + $0x48] sm:$0xf] }
 0x38a   : > { %v6151_v6 = vor.u32 %v6149_v0, %v15587_v5  ;;  %v5625_v7 = vmax.f32 %v5577_v47, 0.0  ;;  %7217 = vst [vmem:[#allocation4 + $0x14c] sm:$0xf] %v7098_v1  ;;  %10434 = vmatmul.bf16.gmra.mxu2 %v12739_v21  ;;  %v13552_v0 = vld [vmem:[#allocation4 + $0x100] sm:$0xf0]  ;;  %v6647_v47 = vor.u32 %v6646_v31, %v6643_v12  ;;  %v6152_v21 = vrot.slane %v15587_v5, 4 }
 0x38b   : > { %v15594_v54 = vpop.f32.mrf.mxu1  ;;  %v5579_v18 = vpop.f32.mrf.mxu0  ;;  %v6652_v30 = vrot.slane %v6650_v13, 5  ;;  %10493 = vmatmul.bf16.gmra.mxu3 %v12527_v43  ;;  %v6656_v59 = vrot.slane %v6654_v34, 4  ;;  %7280 = vst [vmem:[#allocation4 + $0x12c] sm:$0xf] %v7248_v9  ;;  %v12532_v48 = vld [vmem:[#allocation4 + $0x104] sm:$0xf0] }
 0x38c   : > { %17024 = vst [vmem:[#allocation42_spill] sm:$0xff] %v15594_v54  ;;  %v6367_v61 = vsel %vm14172_vm9, %v6151_v6, %v6366_v38  ;;  %v5964_v37 = vpack.c.bf16 %v5625_v7, %v5625_v7  ;;  %v6429_v45 = vld [vmem:[#allocation3 + $0x7c] sm:$0xf]  ;;  %v6370_v38 = vld [vmem:[#allocation3 + $0x8c] sm:$0x1]  ;;  %v17025_v6 = vld [vmem:[#allocation9_spill] sm:$0xff]  ;;  %v15607_v1 = vpop.f32.mrf.mxu2 }
 0x38d   : > { %6368 = vst [vmem:[#allocation3 + $0x84] sm:$0xf] %v6367_v61  ;;  %v5490_v16 = vpop.f32.mrf.mxu3  ;;  %v6657_v32 = vor.u32 %v6656_v59, %v6652_v30  ;;  %v17026_v7 = vld [vmem:[#allocation10_spill] sm:$0xff]  ;;  %v13548_v53 = vld [vmem:[#allocation4 + $0xe4] sm:$0xf]  ;;  %v6648_v13 = vrot.slane %v6647_v47, 4 }
 0x38e   : > { %v6154_v24 = vshrl.u32 %v5964_v37, 16  ;;  %v5491_v4 = vadd.f32 %v5490_v16, %v15239_v11  ;;  %6461 = vst [vmem:[#allocation4 + $0x2f4] sm:$0xf] %v6429_v45  ;;  %v6157_v8 = vshll.u32 %v5964_v37, 16  ;;  %v5404_v35 = vadd.f32 %v17026_v7, %v17025_v6  ;;  %v12530_v11 = vld [vmem:[#allocation4 + $0xe0] sm:$0xf] }
 0x38f   : > { %7281 = vst [vmem:[#allocation4 + $0x150] sm:$0xf] %v7249_v55  ;;  %v12531_v12 = vor.u32 %v13552_v0, %v12530_v11  ;;  %v6983_v43 = vld [vmem:[#allocation3 + $0x3c] sm:$0xe]  ;;  %v6984_v37 = vld [vmem:[#allocation3 + $0x40] sm:$0xf]  ;;  %v6653_v59 = vsel %vm14183_vm10, %v6648_v13, %v6652_v30 }
 0x390   : > { %v6156_v33 = vrot.slane %v6154_v24, 7  ;;  %v5580_v2 = vadd.f32 %v5579_v18, %v5491_v4  ;;  %v12535_v18 = vor.u32 %v13548_v53, %v12532_v48  ;;  %v6658_v16 = vrot.slane %v6657_v32, 4  ;;  %v6985_v0 = vld [vmem:[#allocation3 + $0x44] sm:$0x1]  ;;  %v12774_v6 = vld [vmem:[#allocation4 + $0x2d0] sm:$0xf] }
 0x391   : > { %v6662_v55 = vrot.slane %v6660_v15, 5  ;;  %v6665_v31 = vshrl.u32 %v15601_v14, 16  ;;  %v12369_v15 = vrot.slane %v6983_v43, 9  ;;  %v6668_v32 = vshll.u32 %v15601_v14, 16  ;;  %6946 = vst [vmem:[#allocation4 + $0x16c] sm:$0xf] %v6653_v59 }
 0x392   : > { %v6159_v61 = vor.u32 %v6157_v8, %v6156_v33  ;;  %v6161_v9 = vrot.slane %v6156_v33, 4  ;;  %v5626_v56 = vmax.f32 %v5580_v2, 0.0  ;;  %v7101_v8 = vrot.slane %v6984_v37, 5  ;;  %v7250_v37 = vld [vmem:[#allocation3 + $0x48] sm:$0xf] }
 0x393   : > { %v15609_v45 = vpop.f32.mrf.mxu1  ;;  %v5581_v34 = vpop.f32.mrf.mxu0  ;;  %10582 = vmatmul.bf16.gmra.mxu0 %v12531_v12  ;;  %v6663_v33 = vsel %vm14183_vm10, %v6658_v16, %v6662_v55  ;;  %v7104_v53 = vrot.slane %v6985_v0, 5  ;;  %v6667_v12 = vrot.slane %v6665_v31, 4  ;;  %v6492_v31 = vld [vmem:[#allocation3 + $0x50] sm:$0x1]  ;;  %7282 = vst [vmem:[#allocation4 + $0x174] sm:$0xf] %v7250_v37 }
 0x394   : > { %17027 = vst [vmem:[#allocation9_spill] sm:$0xff] %v15609_v45  ;;  %v6160_v5 = vsel %vm14161_vm7, %v6152_v21, %v6159_v61  ;;  %v6371_v24 = vsel %vm14289_vm13, %v6161_v9, %v6370_v38  ;;  %v5965_v4 = vpack.c.bf16 %v5626_v56, %v5626_v56  ;;  %v6373_v38 = vld [vmem:[#allocation3 + $0x90] sm:$0xf]  ;;  %v12560_v21 = vld [vmem:[#allocation4 + $0x144] sm:$0xf0]  ;;  %v7102_v30 = vsel %vm14209_vm11, %v12369_v15, %v7101_v8  ;;  %v15625_v56 = vpop.f32.mrf.mxu2 }
 0x395   : > { %6369 = vst [vmem:[#allocation3 + $0x88] sm:$0xf] %v6160_v5  ;;  %v5492_v47 = vpop.f32.mrf.mxu3  ;;  %v13614_v7 = vld [vmem:[#allocation4 + $0x2f0] sm:$0xf0]  ;;  %v7103_v11 = vrot.slane %v7101_v8, 4 }
 0x396   : > { %6372 = vst [vmem:[#allocation3 + $0x8c] sm:$0x1] %v6371_v24  ;;  %10671 = vmatmul.bf16.gmra.mxu1 %v12535_v18  ;;  %v6163_v48 = vshrl.u32 %v5965_v4, 16  ;;  %v5493_v2 = vadd.f32 %v5492_v47, %v5404_v35  ;;  %v6166_v61 = vshll.u32 %v5965_v4, 16  ;;  %v13556_v35 = vld [vmem:[#allocation4 + $0x124] sm:$0xf]  ;;  %v12775_v55 = vor.u32 %v13614_v7, %v12774_v6 }
 0x397   : > { %6947 = vst [vmem:[#allocation4 + $0x190] sm:$0xf] %v6663_v33  ;;  %v6430_v14 = vld [vmem:[#allocation3 + $0x84] sm:$0xf]  ;;  %v7105_v43 = vsel %vm14209_vm11, %v7103_v11, %v7104_v53  ;;  %v7251_v5 = vld [vmem:[#allocation3 + $0x4c] sm:$0xf]  ;;  %v12563_v33 = vor.u32 %v13556_v35, %v12560_v21 }
 0x398   : > { %v15623_v13 = vrot.slane %v6163_v48, 7  ;;  %v5582_v9 = vadd.f32 %v5581_v34, %v5493_v2  ;;  %7218 = vst [vmem:[#allocation4 + $0x170] sm:$0xf] %v7102_v30  ;;  %v6670_v24 = vrot.slane %v6668_v32, 5  ;;  %v6491_v34 = vld [vmem:[#allocation3 + $0x4c] sm:$0xf] }
 0x399   : > { %6462 = vst [vmem:[#allocation4 + $0x318] sm:$0xf] %v6430_v14  ;;  %v6674_v8 = vshll.u32 %v6491_v34, 16  ;;  %v6678_v48 = vshrl.u32 %v6491_v34, 16  ;;  %v15634_v2 = vld [vmem:[#allocation3 + $0x54] sm:$0xf] }
 0x39a   : > { %v6168_v18 = vor.u32 %v6166_v61, %v15623_v13  ;;  %v5627_v16 = vmax.f32 %v5582_v9, 0.0  ;;  %7219 = vst [vmem:[#allocation4 + $0x194] sm:$0xf] %v7105_v43  ;;  %10439 = vmatmul.bf16.gmra.mxu2 %v12775_v55  ;;  %v13561_v32 = vld [vmem:[#allocation4 + $0x148] sm:$0xf0]  ;;  %v6671_v7 = vor.u32 %v6670_v24, %v6667_v12  ;;  %v17029_v9 = vld [vmem:[#allocation11_spill] sm:$0xff] }
 0x39b   : > { %v15630_v4 = vpop.f32.mrf.mxu1  ;;  %v5584_v47 = vpop.f32.mrf.mxu0  ;;  %10498 = vmatmul.bf16.gmra.mxu3 %v12563_v33  ;;  %v12566_v30 = vld [vmem:[#allocation4 + $0x128] sm:$0xf]  ;;  %7283 = vst [vmem:[#allocation4 + $0x198] sm:$0xf] %v7251_v5  ;;  %v12568_v21 = vld [vmem:[#allocation4 + $0x14c] sm:$0xf0] }
 0x39c   : > { %17028 = vst [vmem:[#allocation10_spill] sm:$0xff] %v15630_v4  ;;  %v6374_v59 = vsel %vm14172_vm9, %v6168_v18, %v6373_v38  ;;  %v5966_v0 = vpack.c.bf16 %v5627_v16, %v5627_v16  ;;  %v6431_v15 = vld [vmem:[#allocation3 + $0x88] sm:$0xf]  ;;  %v6684_v38 = vshll.u32 %v6492_v31, 16  ;;  %v6676_v14 = vrot.slane %v6674_v8, 5  ;;  %v15638_v18 = vpop.f32.mrf.mxu2 }
 0x39d   : > { %6375 = vst [vmem:[#allocation3 + $0x90] sm:$0xf] %v6374_v59  ;;  %v5495_v11 = vpop.f32.mrf.mxu3  ;;  %v6169_v43 = vrot.slane %v15623_v13, 4  ;;  %v6377_v37 = vld [vmem:[#allocation3 + $0x98] sm:$0x1]  ;;  %v12567_v16 = vor.u32 %v13561_v32, %v12566_v30  ;;  %v6680_v55 = vrot.slane %v6678_v48, 4 }
 0x39e   : > { %v6171_v6 = vshrl.u32 %v5966_v0, 16  ;;  %6463 = vst [vmem:[#allocation4 + $0x33c] sm:$0xf] %v6431_v15  ;;  %v6174_v61 = vshll.u32 %v5966_v0, 16  ;;  %v5496_v35 = vadd.f32 %v5495_v11, %v17029_v9  ;;  %v15640_v34 = vld [vmem:[#allocation3 + $0xc] sm:$0xf] }
 0x39f   : > { %v13557_v59 = vld [vmem:[#allocation4 + $0x12c] sm:$0xf]  ;;  %v6672_v31 = vrot.slane %v6671_v7, 4  ;;  %v6681_v15 = vor.u32 %v6680_v55, %v6676_v14  ;;  %v6987_v8 = vld [vmem:[#allocation3 + $0x4c] sm:$0xf]  ;;  %v6689_v13 = vshrl.u32 %v15634_v2, 16 }
 0x3a0   : > { %v6173_v53 = vrot.slane %v6171_v6, 7  ;;  %v5585_v5 = vadd.f32 %v5584_v47, %v5496_v35  ;;  %v12571_v0 = vor.u32 %v13557_v59, %v12568_v21  ;;  %v6986_v6 = vld [vmem:[#allocation3 + $0x48] sm:$0xe]  ;;  %v6686_v47 = vrot.slane %v6684_v38, 5  ;;  %v17031_v7 = vld [vmem:[#allocation12_spill] sm:$0xff]  ;;  %v17032_v30 = vld [vmem:[#allocation13_spill] sm:$0xff] }
 0x3a1   : > { %v6677_v32 = vsel %vm14183_vm10, %v6672_v31, %v6676_v14  ;;  %v6682_v9 = vrot.slane %v6681_v15, 4  ;;  %v6988_v35 = vld [vmem:[#allocation3 + $0x50] sm:$0x1]  ;;  %v7353_v55 = vshrl.u32 %v15640_v34, 16  ;;  %v12596_v59 = vld [vmem:[#allocation4 + $0x18c] sm:$0xf0] }
 0x3a2   : > { %v6176_v12 = vor.u32 %v6174_v61, %v6173_v53  ;;  %v6178_v24 = vrot.slane %v6173_v53, 4  ;;  %v5409_v53 = vadd.f32 %v17032_v30, %v17031_v7  ;;  %v5628_v61 = vmax.f32 %v5585_v5, 0.0  ;;  %v12810_v14 = vld [vmem:[#allocation4 + $0x318] sm:$0xf]  ;;  %6948 = vst [vmem:[#allocation4 + $0x1b4] sm:$0xf] %v6677_v32 }
 0x3a3   : > { %v15642_v33 = vpop.f32.mrf.mxu1  ;;  %10587 = vmatmul.bf16.gmra.mxu0 %v12567_v16  ;;  %v5586_v21 = vpop.f32.mrf.mxu0  ;;  %v7108_v16 = vrot.slane %v6987_v8, 5  ;;  %v6687_v31 = vsel %vm14183_vm10, %v6682_v9, %v6686_v47  ;;  %v7252_v5 = vld [vmem:[#allocation3 + $0x54] sm:$0xf]  ;;  %v13565_v30 = vld [vmem:[#allocation4 + $0x16c] sm:$0xf] }
 0x3a4   : > { %17030 = vst [vmem:[#allocation11_spill] sm:$0xff] %v15642_v33  ;;  %v6177_v11 = vsel %vm14161_vm7, %v6169_v43, %v6176_v12  ;;  %v6378_v48 = vsel %vm14289_vm13, %v6178_v24, %v6377_v37  ;;  %v12370_v37 = vrot.slane %v6986_v6, 9  ;;  %v5967_v12 = vpack.c.bf16 %v5628_v61, %v5628_v61  ;;  %v15659_v8 = vpop.f32.mrf.mxu2  ;;  %v7253_v61 = vld [vmem:[#allocation3 + $0x58] sm:$0xf]  ;;  %v6495_v43 = vld [vmem:[#allocation3 + $0x5c] sm:$0x1] }
 0x3a5   : > { %6376 = vst [vmem:[#allocation3 + $0x94] sm:$0xf] %v6177_v11  ;;  %v5497_v24 = vpop.f32.mrf.mxu3  ;;  %v13623_v38 = vld [vmem:[#allocation4 + $0x338] sm:$0xf0]  ;;  %v7110_v7 = vrot.slane %v7108_v16, 4  ;;  %v6691_v33 = vrot.slane %v6689_v13, 4  ;;  %v12599_v54 = vor.u32 %v13565_v30, %v12596_v59 }
 0x3a6   : > { %6379 = vst [vmem:[#allocation3 + $0x98] sm:$0x1] %v6378_v48  ;;  %10676 = vmatmul.bf16.gmra.mxu1 %v12571_v0  ;;  %v5498_v15 = vadd.f32 %v5497_v24, %v5409_v53  ;;  %v7109_v11 = vsel %vm14209_vm11, %v12370_v37, %v7108_v16  ;;  %v7111_v48 = vrot.slane %v6988_v35, 5  ;;  %v6494_v0 = vld [vmem:[#allocation3 + $0x58] sm:$0xf]  ;;  %v6180_v6 = vshrl.u32 %v5967_v12, 16 }
 0x3a7   : > { %6949 = vst [vmem:[#allocation4 + $0x1d8] sm:$0xf] %v6687_v31  ;;  %v6380_v4 = vld [vmem:[#allocation3 + $0x9c] sm:$0xf]  ;;  %v12811_v32 = vor.u32 %v13623_v38, %v12810_v14  ;;  %v6432_v9 = vld [vmem:[#allocation3 + $0x90] sm:$0xf] }
 0x3a8   : > { %7220 = vst [vmem:[#allocation4 + $0x1b8] sm:$0xf] %v7109_v11  ;;  %v5587_v47 = vadd.f32 %v5586_v21, %v5498_v15  ;;  %v13697_v53 = vld [vmem:[#allocation5 + $0x108] sm:$0xff]  ;;  %v7112_v24 = vsel %vm14209_vm11, %v7110_v7, %v7111_v48  ;;  %v6692_v35 = vshll.u32 %v15634_v2, 16  ;;  %v15664_v37 = vrot.slane %v6180_v6, 7 }
 0x3a9   : > { %7284 = vst [vmem:[#allocation4 + $0x1bc] sm:$0xf] %v7252_v5  ;;  %v6183_v16 = vshll.u32 %v5967_v12, 16  ;;  %v6698_v11 = vshll.u32 %v6494_v0, 16  ;;  %v6702_v45 = vshrl.u32 %v6494_v0, 16  ;;  %10743 = vmatpush.bf16.msrb.mxu2 %v13697_v53  ;;  %v6708_v2 = vshll.u32 %v6495_v43, 16 }
 0x3aa   : > { %6464 = vst [vmem:[#allocation4 + $0x360] sm:$0xf] %v6432_v9  ;;  %v5629_v13 = vmax.f32 %v5587_v47, 0.0  ;;  %v6694_v14 = vrot.slane %v6692_v35, 5  ;;  %v15669_v7 = vrot.slane %v7353_v55, 4  ;;  %10444 = vmatmul.bf16.gmra.mxu2 %v12811_v32 }
 0x3ab   : > { %v15666_v31 = vpop.f32.mrf.mxu1  ;;  %7221 = vst [vmem:[#allocation4 + $0x1dc] sm:$0xf] %v7112_v24  ;;  %v6185_v38 = vor.u32 %v6183_v16, %v15664_v37  ;;  %v6700_v5 = vrot.slane %v6698_v11, 5  ;;  %v6704_v15 = vrot.slane %v6702_v45, 4  ;;  %10503 = vmatmul.bf16.gmra.mxu3 %v12599_v54  ;;  %v13570_v48 = vld [vmem:[#allocation4 + $0x190] sm:$0xf0] }
 0x3ac   : > { %17033 = vst [vmem:[#allocation12_spill] sm:$0xff] %v15666_v31  ;;  %v6433_v21 = vld [vmem:[#allocation3 + $0x94] sm:$0xf]  ;;  %v5968_v12 = vpack.c.bf16 %v5629_v13, %v5629_v13  ;;  %v6695_v0 = vor.u32 %v6694_v14, %v6691_v33  ;;  %v5589_v6 = vpop.f32.mrf.mxu0  ;;  %v12602_v30 = vld [vmem:[#allocation4 + $0x170] sm:$0xf]  ;;  %v17034_v24 = vshll.u32 %v15640_v34, 16  ;;  %v15677_v32 = vpop.f32.mrf.mxu2 }
 0x3ad   : > { %6465 = vst [vmem:[#allocation4 + $0x384] sm:$0xf] %v6433_v21  ;;  %v6381_v59 = vsel %vm14172_vm9, %v6185_v38, %v6380_v4  ;;  %v13566_v47 = vld [vmem:[#allocation4 + $0x174] sm:$0xf]  ;;  %v12604_v9 = vld [vmem:[#allocation4 + $0x194] sm:$0xf0]  ;;  %v6705_v53 = vor.u32 %v6704_v15, %v6700_v5  ;;  %v12603_v54 = vor.u32 %v13570_v48, %v12602_v30 }
 0x3ae   : > { %7285 = vst [vmem:[#allocation4 + $0x1e0] sm:$0xf] %v7253_v61  ;;  %v15675_v45 = vrot.slane %v17034_v24, 5  ;;  %v6188_v55 = vshrl.u32 %v5968_v12, 16  ;;  %v6989_v43 = vld [vmem:[#allocation3 + $0x54] sm:$0xe]  ;;  %v5500_v61 = vpop.f32.mrf.mxu3  ;;  %v12607_v14 = vor.u32 %v13566_v47, %v12604_v9 }
 0x3af   : > { %6382 = vst [vmem:[#allocation3 + $0x9c] sm:$0xf] %v6381_v59  ;;  %v6696_v33 = vrot.slane %v6695_v0, 4  ;;  %v6706_v35 = vrot.slane %v6705_v53, 4  ;;  %v6710_v16 = vrot.slane %v6708_v2, 5  ;;  %v6191_v21 = vshll.u32 %v5968_v12, 16 }
 0x3b0   : > { %v6990_v4 = vld [vmem:[#allocation3 + $0x58] sm:$0xf]  ;;  %v6496_v11 = vld [vmem:[#allocation3 + $0x60] sm:$0xf]  ;;  %v6190_v13 = vrot.slane %v6188_v55, 7  ;;  %v17035_v38 = vld [vmem:[#allocation14_spill] sm:$0xff] }
 0x3b1   : > { %v5501_v15 = vadd.f32 %v5500_v61, %v17035_v38  ;;  %v6991_v34 = vld [vmem:[#allocation3 + $0x5c] sm:$0x1]  ;;  %v15680_v24 = vld [vmem:[#allocation3 + $0x10] sm:$0xf]  ;;  %v6384_v59 = vld [vmem:[#allocation3 + $0xa4] sm:$0x1]  ;;  %v6701_v48 = vsel %vm14183_vm10, %v6696_v33, %v6700_v5  ;;  %v6711_v0 = vsel %vm14183_vm10, %v6706_v35, %v6710_v16 }
 0x3b2   : > { %v12371_v2 = vrot.slane %v6989_v43, 9  ;;  %v7115_v30 = vrot.slane %v6990_v4, 5  ;;  %v6186_v53 = vrot.slane %v15664_v37, 4  ;;  %v6193_v12 = vor.u32 %v6191_v21, %v6190_v13  ;;  %6950 = vst [vmem:[#allocation4 + $0x1fc] sm:$0xf] %v6701_v48  ;;  %v17038_v21 = vld [vmem:[#allocation16_spill] sm:$0xff] }
 0x3b3   : > { %v15682_v31 = vpop.f32.mrf.mxu1  ;;  %v6195_v47 = vrot.slane %v6190_v13, 4  ;;  %10592 = vmatmul.bf16.gmra.mxu0 %v12603_v54  ;;  %v5590_v9 = vadd.f32 %v5589_v6, %v5501_v15  ;;  %6951 = vst [vmem:[#allocation4 + $0x220] sm:$0xf] %v6711_v0  ;;  %v7118_v38 = vrot.slane %v6991_v34, 5  ;;  %v12846_v54 = vld [vmem:[#allocation4 + $0x360] sm:$0xf] }
 0x3b4   : > { %17036 = vst [vmem:[#allocation13_spill] sm:$0xff] %v15682_v31  ;;  %v7116_v55 = vsel %vm14209_vm11, %v12371_v2, %v7115_v30  ;;  %v7117_v61 = vrot.slane %v7115_v30, 4  ;;  %v6713_v31 = vshrl.u32 %v6496_v11, 16  ;;  %v6194_v43 = vsel %vm14161_vm7, %v6186_v53, %v6193_v12  ;;  %v5591_v6 = vpop.f32.mrf.mxu0  ;;  %v13632_v35 = vld [vmem:[#allocation4 + $0x380] sm:$0xf0]  ;;  %v17037_v13 = vld [vmem:[#allocation15_spill] sm:$0xff] }
 0x3b5   : > { %v6385_v37 = vsel %vm14289_vm13, %v6195_v47, %v6384_v59  ;;  %v5630_v33 = vmax.f32 %v5590_v9, 0.0  ;;  %7222 = vst [vmem:[#allocation4 + $0x200] sm:$0xf] %v7116_v55  ;;  %v12632_v16 = vld [vmem:[#allocation4 + $0x1d4] sm:$0xf0]  ;;  %v5414_v15 = vadd.f32 %v17038_v21, %v17037_v13  ;;  %v6716_v47 = vshll.u32 %v6496_v11, 16 }
 0x3b6   : > { %10681 = vmatmul.bf16.gmra.mxu1 %v12607_v14  ;;  %v7119_v4 = vsel %vm14209_vm11, %v7117_v61, %v7118_v38  ;;  %v15700_v34 = vld [vmem:[#allocation3 + $0x14] sm:$0x1]  ;;  %6383 = vst [vmem:[#allocation3 + $0xa0] sm:$0xf] %v6194_v43  ;;  %v13574_v0 = vld [vmem:[#allocation4 + $0x1b4] sm:$0xf]  ;;  %v15702_v14 = vpop.f32.mrf.mxu2  ;;  %v5502_v30 = vpop.f32.mrf.mxu3  ;;  %v12847_v38 = vor.u32 %v13632_v35, %v12846_v54 }
 0x3b7   : > { %v5969_v48 = vpack.c.bf16 %v5630_v33, %v5630_v33  ;;  %v7254_v2 = vld [vmem:[#allocation3 + $0x60] sm:$0xf]  ;;  %v6497_v59 = vld [vmem:[#allocation3 + $0x64] sm:$0xf]  ;;  %6386 = vst [vmem:[#allocation3 + $0xa4] sm:$0x1] %v6385_v37  ;;  %v5503_v61 = vadd.f32 %v5502_v30, %v5414_v15  ;;  %v12635_v43 = vor.u32 %v13574_v0, %v12632_v16 }
 0x3b8   : > { %v7255_v53 = vld [vmem:[#allocation3 + $0x64] sm:$0xf]  ;;  %v6715_v12 = vrot.slane %v6713_v31, 4  ;;  %v6434_v13 = vld [vmem:[#allocation3 + $0x9c] sm:$0xf]  ;;  %v6718_v5 = vrot.slane %v6716_v47, 5 }
 0x3b9   : > { %v6197_v55 = vshrl.u32 %v5969_v48, 16  ;;  %7223 = vst [vmem:[#allocation4 + $0x224] sm:$0xf] %v7119_v4  ;;  %v6498_v33 = vld [vmem:[#allocation3 + $0x68] sm:$0x1]  ;;  %v6722_v37 = vshll.u32 %v6497_v59, 16  ;;  %v5592_v62 = vadd.f32 %v5591_v6, %v5503_v61 }
 0x3ba   : > { %6466 = vst [vmem:[#allocation4 + $0x3a8] sm:$0xf] %v6434_v13  ;;  %v6200_v52 = vshll.u32 %v5969_v48, 16  ;;  %v6726_v31 = vshrl.u32 %v6497_v59, 16  ;;  %v6387_v9 = vld [vmem:[#allocation3 + $0xa8] sm:$0xf]  ;;  %v6719_v54 = vor.u32 %v6718_v5, %v6715_v12  ;;  %10449 = vmatmul.bf16.gmra.mxu2 %v12847_v38 }
 0x3bb   : > { %v15705_v21 = vpop.f32.mrf.mxu1  ;;  %v15707_v60 = vrot.slane %v6197_v55, 7  ;;  %7286 = vst [vmem:[#allocation4 + $0x204] sm:$0xf] %v7254_v2  ;;  %v6724_v35 = vrot.slane %v6722_v37, 5  ;;  %v5631_v15 = vmax.f32 %v5592_v62, 0.0  ;;  %10508 = vmatmul.bf16.gmra.mxu3 %v12635_v43  ;;  %v6732_v59 = vshll.u32 %v6498_v33, 16 }
 0x3bc   : > { %17039 = vst [vmem:[#allocation14_spill] sm:$0xff] %v15705_v21  ;;  %v13579_v16 = vld [vmem:[#allocation4 + $0x1d8] sm:$0xf0]  ;;  %v6728_v0 = vrot.slane %v6726_v31, 4  ;;  %v6992_v30 = vld [vmem:[#allocation3 + $0x60] sm:$0xe]  ;;  %v5594_v47 = vpop.f32.mrf.mxu0 }
 0x3bd   : > { %7287 = vst [vmem:[#allocation4 + $0x228] sm:$0xf] %v7255_v53  ;;  %v6202_v4 = vor.u32 %v6200_v52, %v15707_v60  ;;  %v12638_v55 = vld [vmem:[#allocation4 + $0x1b8] sm:$0xf]  ;;  %v12640_v48 = vld [vmem:[#allocation4 + $0x1dc] sm:$0xf0]  ;;  %v5970_v53 = vpack.c.bf16 %v5631_v15, %v5631_v15 }
 0x3be   : > { %v6435_v6 = vld [vmem:[#allocation3 + $0xa0] sm:$0xf]  ;;  %v6720_v2 = vrot.slane %v6719_v54, 4  ;;  %v13575_v5 = vld [vmem:[#allocation4 + $0x1bc] sm:$0xf]  ;;  %v6729_v12 = vor.u32 %v6728_v0, %v6724_v35  ;;  %v15713_v62 = vpop.f32.mrf.mxu2  ;;  %v5505_v38 = vpop.f32.mrf.mxu3  ;;  %v12372_v37 = vrot.slane %v6992_v30, 9  ;;  %v12639_v11 = vor.u32 %v13579_v16, %v12638_v55 }
 0x3bf   : > { %v6388_v61 = vsel %vm14172_vm9, %v6202_v4, %v6387_v9  ;;  %6467 = vst [vmem:[#allocation4 + $0x3cc] sm:$0xf] %v6435_v6  ;;  %v6993_v52 = vld [vmem:[#allocation3 + $0x64] sm:$0xf]  ;;  %v6994_v43 = vld [vmem:[#allocation3 + $0x68] sm:$0x1]  ;;  %v12643_v21 = vor.u32 %v13575_v5, %v12640_v48 }
 0x3c0   : > { %6389 = vst [vmem:[#allocation3 + $0xa8] sm:$0xf] %v6388_v61  ;;  %v6725_v13 = vsel %vm14183_vm10, %v6720_v2, %v6724_v35  ;;  %v7122_v31 = vrot.slane %v6993_v52, 5  ;;  %v6499_v54 = vld [vmem:[#allocation3 + $0x6c] sm:$0xf]  ;;  %v6205_v33 = vshrl.u32 %v5970_v53, 16 }
 0x3c1   : > { %v17040_v9 = vld [vmem:[#allocation17_spill] sm:$0xff]  ;;  %6952 = vst [vmem:[#allocation4 + $0x244] sm:$0xf] %v6725_v13  ;;  %v6730_v0 = vrot.slane %v6729_v12, 4  ;;  %v6734_v6 = vrot.slane %v6732_v59, 5  ;;  %v6208_v2 = vshll.u32 %v5970_v53, 16 }
 0x3c2   : > { %v5506_v4 = vadd.f32 %v5505_v38, %v17040_v9  ;;  %v7123_v61 = vsel %vm14209_vm11, %v12372_v37, %v7122_v31  ;;  %v7124_v44 = vrot.slane %v7122_v31, 4  ;;  %v7256_v3 = vld [vmem:[#allocation3 + $0x6c] sm:$0xf]  ;;  %v6207_v35 = vrot.slane %v6205_v33, 7  ;;  %v6391_v5 = vld [vmem:[#allocation3 + $0xb0] sm:$0x1] }
 0x3c3   : > { %v15718_v15 = vpop.f32.mrf.mxu1  ;;  %10597 = vmatmul.bf16.gmra.mxu0 %v12639_v11  ;;  %v7125_v52 = vrot.slane %v6994_v43, 5  ;;  %7224 = vst [vmem:[#allocation4 + $0x248] sm:$0xf] %v7123_v61  ;;  %v17042_v16 = vshll.u32 %v15680_v24, 16  ;;  %v6203_v48 = vrot.slane %v15707_v60, 4  ;;  %v6735_v59 = vsel %vm14183_vm10, %v6730_v0, %v6734_v6  ;;  %v17043_v31 = vld [vmem:[#allocation18_spill] sm:$0xff] }
 0x3c4   : > { %17041 = vst [vmem:[#allocation15_spill] sm:$0xff] %v15718_v15  ;;  %v5595_v30 = vadd.f32 %v5594_v47, %v5506_v4  ;;  %v6210_v12 = vor.u32 %v6208_v2, %v6207_v35  ;;  %v6212_v38 = vrot.slane %v6207_v35, 4  ;;  %v5596_v47 = vpop.f32.mrf.mxu0  ;;  %v6737_v43 = vshrl.u32 %v6499_v54, 16  ;;  %v17044_v60 = vld [vmem:[#allocation19_spill] sm:$0xff]  ;;  %v12668_v0 = vld [vmem:[#allocation4 + $0x21c] sm:$0xf0] }
 0x3c5   : > { %v15724_v55 = vrot.slane %v17042_v16, 5  ;;  %7288 = vst [vmem:[#allocation4 + $0x24c] sm:$0xf] %v7256_v3  ;;  %v7126_v11 = vsel %vm14209_vm11, %v7124_v44, %v7125_v52  ;;  %v6740_v37 = vshll.u32 %v6499_v54, 16  ;;  %v5419_v33 = vadd.f32 %v17044_v60, %v17043_v31  ;;  %v13583_v4 = vld [vmem:[#allocation4 + $0x1fc] sm:$0xf] }
 0x3c6   : > { %10686 = vmatmul.bf16.gmra.mxu1 %v12643_v21  ;;  %v5632_v13 = vmax.f32 %v5595_v30, 0.0  ;;  %6953 = vst [vmem:[#allocation4 + $0x268] sm:$0xf] %v6735_v59  ;;  %v13641_v53 = vld [vmem:[#allocation4 + $0x3c8] sm:$0xf0]  ;;  %v6211_v9 = vsel %vm14161_vm7, %v6203_v48, %v6210_v12  ;;  %v6392_v3 = vsel %vm14289_vm13, %v6212_v38, %v6391_v5  ;;  %v15739_v44 = vpop.f32.mrf.mxu2  ;;  %v5507_v35 = vpop.f32.mrf.mxu3  ;;  %v6739_v2 = vrot.slane %v6737_v43, 4 }
 0x3c7   : > { %7225 = vst [vmem:[#allocation4 + $0x26c] sm:$0xf] %v7126_v11  ;;  %v6500_v6 = vld [vmem:[#allocation3 + $0x70] sm:$0xf]  ;;  %v12882_v54 = vld [vmem:[#allocation4 + $0x3a8] sm:$0xf]  ;;  %v5508_v5 = vadd.f32 %v5507_v35, %v5419_v33 }
 0x3c8   : > { %v5971_v21 = vpack.c.bf16 %v5632_v13, %v5632_v13  ;;  %v15737_v61 = vld [vmem:[#allocation3 + $0x10] sm:$0xf]  ;;  %6390 = vst [vmem:[#allocation3 + $0xac] sm:$0xf] %v6211_v9  ;;  %v6742_v30 = vrot.slane %v6740_v37, 5  ;;  %v17045_v52 = vshrl.u32 %v15680_v24, 16  ;;  %v12883_v59 = vor.u32 %v13641_v53, %v12882_v54 }
 0x3c9   : > { %6393 = vst [vmem:[#allocation3 + $0xb0] sm:$0x1] %v6392_v3  ;;  %v7257_v12 = vld [vmem:[#allocation3 + $0x70] sm:$0xf]  ;;  %v12671_v13 = vor.u32 %v13583_v4, %v12668_v0  ;;  %v6436_v11 = vld [vmem:[#allocation3 + $0xa8] sm:$0xf]  ;;  %v5597_v37 = vadd.f32 %v5596_v47, %v5508_v5 }
 0x3ca   : > { %v15743_v16 = vrot.slane %v17045_v52, 4  ;;  %v6214_v48 = vshrl.u32 %v5971_v21, 16  ;;  %v13696_v31 = vld [vmem:[#allocation5 + $0x100] sm:$0xff]  ;;  %v6501_v60 = vld [vmem:[#allocation3 + $0x74] sm:$0x1]  ;;  %v6743_v9 = vor.u32 %v6742_v30, %v6739_v2  ;;  %v6746_v15 = vshll.u32 %v6500_v6, 16  ;;  %10454 = vmatmul.bf16.gmra.mxu2 %v12883_v59 }
 0x3cb   : > { %v15745_v38 = vpop.f32.mrf.mxu1  ;;  %v6217_v43 = vshll.u32 %v5971_v21, 16  ;;  %6468 = vst [vmem:[#allocation4 + $0x3f0] sm:$0xf] %v6436_v11  ;;  %v6750_v24 = vshrl.u32 %v6500_v6, 16  ;;  %v6394_v52 = vld [vmem:[#allocation3 + $0xb4] sm:$0xf]  ;;  %10744 = vmatpush.bf16.msrb.mxu2 %v13696_v31  ;;  %10513 = vmatmul.bf16.gmra.mxu3 %v12671_v13  ;;  %v7359_v59 = vor.u32 %v15675_v45, %v15669_v7 }
 0x3cc   : > { %17046 = vst [vmem:[#allocation16_spill] sm:$0xff] %v15745_v38  ;;  %v15747_v26 = vrot.slane %v6214_v48, 7  ;;  %v6744_v33 = vrot.slane %v6743_v9, 4  ;;  %v6748_v53 = vrot.slane %v6746_v15, 5  ;;  %v5633_v0 = vmax.f32 %v5597_v37, 0.0 }
 0x3cd   : > { %7289 = vst [vmem:[#allocation4 + $0x270] sm:$0xf] %v7257_v12  ;;  %v13588_v35 = vld [vmem:[#allocation4 + $0x220] sm:$0xf0]  ;;  %v6995_v54 = vld [vmem:[#allocation3 + $0x6c] sm:$0xe]  ;;  %v7369_v13 = vor.u32 %v15743_v16, %v15724_v55 }
 0x3ce   : > { %v6219_v4 = vor.u32 %v6217_v43, %v15747_v26  ;;  %v12674_v2 = vld [vmem:[#allocation4 + $0x200] sm:$0xf]  ;;  %v6749_v47 = vsel %vm14183_vm10, %v6744_v33, %v6748_v53  ;;  %v6752_v21 = vrot.slane %v6750_v24, 4  ;;  %v6756_v6 = vshll.u32 %v6501_v60, 16  ;;  %v6996_v30 = vld [vmem:[#allocation3 + $0x70] sm:$0xf]  ;;  %v15759_v43 = vpop.f32.mrf.mxu2 }
 0x3cf   : > { %v6997_v48 = vld [vmem:[#allocation3 + $0x74] sm:$0x1]  ;;  %v5972_v5 = vpack.c.bf16 %v5633_v0, %v5633_v0  ;;  %v6437_v12 = vld [vmem:[#allocation3 + $0xac] sm:$0xf]  ;;  %6954 = vst [vmem:[#allocation4 + $0x28c] sm:$0xf] %v6749_v47  ;;  %v5510_v0 = vpop.f32.mrf.mxu3 }
 0x3d0   : > { %v6395_v15 = vsel %vm14172_vm9, %v6219_v4, %v6394_v52  ;;  %v12373_v11 = vrot.slane %v6995_v54, 9  ;;  %v7129_v31 = vrot.slane %v6996_v30, 5  ;;  %v5599_v9 = vpop.f32.mrf.mxu0  ;;  %v13584_v60 = vld [vmem:[#allocation4 + $0x204] sm:$0xf]  ;;  %v12676_v37 = vld [vmem:[#allocation4 + $0x224] sm:$0xf0]  ;;  %v6753_v24 = vor.u32 %v6752_v21, %v6748_v53 }
 0x3d1   : > { %6396 = vst [vmem:[#allocation3 + $0xb4] sm:$0xf] %v6395_v15  ;;  %v7258_v33 = vld [vmem:[#allocation3 + $0x78] sm:$0xf]  ;;  %v6222_v52 = vshrl.u32 %v5972_v5, 16  ;;  %v12675_v4 = vor.u32 %v13588_v35, %v12674_v2  ;;  %v6758_v54 = vrot.slane %v6756_v6, 5  ;;  %v12679_v21 = vor.u32 %v13584_v60, %v12676_v37 }
 0x3d2   : > { %6469 = vst [vmem:[#allocation4 + $0x414] sm:$0xf] %v6437_v12  ;;  %v7130_v47 = vsel %vm14209_vm11, %v12373_v11, %v7129_v31  ;;  %v7259_v7 = vld [vmem:[#allocation3 + $0x7c] sm:$0xf]  ;;  %v6754_v15 = vrot.slane %v6753_v24, 4  ;;  %v7131_v3 = vrot.slane %v7129_v31, 4 }
 0x3d3   : > { %v15763_v45 = vpop.f32.mrf.mxu1  ;;  %v17048_v16 = vld [vmem:[#allocation20_spill] sm:$0xff]  ;;  %v7132_v38 = vrot.slane %v6997_v48, 5  ;;  %7226 = vst [vmem:[#allocation4 + $0x290] sm:$0xf] %v7130_v47  ;;  %v6224_v17 = vrot.slane %v6222_v52, 7  ;;  %v6225_v53 = vshll.u32 %v5972_v5, 16  ;;  %10602 = vmatmul.bf16.gmra.mxu0 %v12675_v4 }
 0x3d4   : > { %17047 = vst [vmem:[#allocation17_spill] sm:$0xff] %v15763_v45  ;;  %v5511_v30 = vadd.f32 %v5510_v0, %v17048_v16  ;;  %v7800_v35 = vld [vmem:[#allocation3 + $0xc] sm:$0xe]  ;;  %v6398_v2 = vld [vmem:[#allocation3 + $0xbc] sm:$0x1]  ;;  %v6759_v12 = vsel %vm14183_vm10, %v6754_v15, %v6758_v54  ;;  %v7370_v0 = vrot.slane %v7369_v13, 4 }
 0x3d5   : > { %7290 = vst [vmem:[#allocation4 + $0x294] sm:$0xf] %v7258_v33  ;;  %v7133_v11 = vsel %vm14209_vm11, %v7131_v3, %v7132_v38  ;;  %v7802_v24 = vld [vmem:[#allocation3 + $0x14] sm:$0x1]  ;;  %v6220_v48 = vrot.slane %v15747_v26, 4  ;;  %v6227_v31 = vor.u32 %v6225_v53, %v6224_v17  ;;  %v6229_v52 = vrot.slane %v6224_v17, 4 }
 0x3d6   : > { %v5600_v6 = vadd.f32 %v5599_v9, %v5511_v30  ;;  %7291 = vst [vmem:[#allocation4 + $0x2b8] sm:$0xf] %v7259_v7  ;;  %10691 = vmatmul.bf16.gmra.mxu1 %v12679_v21  ;;  %v7360_v5 = vrot.slane %v7359_v59, 4  ;;  %v17049_v60 = vshll.u32 %v15700_v34, 16  ;;  %v17050_v9 = vrot.slane %v15737_v61, 5  ;;  %v17051_v13 = vld [vmem:[#allocation21_spill] sm:$0xff]  ;;  %v15781_v7 = vpop.f32.mrf.mxu2 }
 0x3d7   : > { %6955 = vst [vmem:[#allocation4 + $0x2b0] sm:$0xf] %v6759_v12  ;;  %v7307_v54 = vld [vmem:[#allocation3 + $0x18] sm:$0xf]  ;;  %v6228_v38 = vsel %vm14161_vm7, %v6220_v48, %v6227_v31  ;;  %v6399_v26 = vsel %vm14289_vm13, %v6229_v52, %v6398_v2  ;;  %v12918_v3 = vld [vmem:[#allocation4 + $0x3f0] sm:$0xf]  ;;  %v5424_v59 = vadd.f32 %v15552_v51, %v17051_v13  ;;  %v5512_v21 = vpop.f32.mrf.mxu3 }
 0x3d8   : > { %v7374_v37 = vrot.slane %v17049_v60, 5  ;;  %v7900_v33 = vrot.slane %v17050_v9, 4  ;;  %v5634_v4 = vmax.f32 %v5600_v6, 0.0  ;;  %7227 = vst [vmem:[#allocation4 + $0x2b4] sm:$0xf] %v7133_v11  ;;  %v5601_v47 = vpop.f32.mrf.mxu0  ;;  %v7365_v15 = vsel %vm14183_vm10, %v7360_v5, %v15724_v55  ;;  %v13711_v9 = vld [vmem:[#allocation5 + $0x178] sm:$0xff] }
 0x3d9   : > { %v12704_v17 = vld [vmem:[#allocation4 + $0x264] sm:$0xf0]  ;;  %6397 = vst [vmem:[#allocation3 + $0xb8] sm:$0xf] %v6228_v38  ;;  %v13650_v16 = vld [vmem:[#allocation4 + $0x410] sm:$0xf0]  ;;  %v5513_v31 = vadd.f32 %v5512_v21, %v5424_v59  ;;  %10826 = vmatpush.bf16.msra.mxu3 %v13711_v9 }
 0x3da   : > { %v5973_v34 = vpack.c.bf16 %v5634_v4, %v5634_v4  ;;  %v6438_v30 = vld [vmem:[#allocation3 + $0xb4] sm:$0xf]  ;;  %v12380_v53 = vrot.slane %v7800_v35, 9  ;;  %6400 = vst [vmem:[#allocation3 + $0xbc] sm:$0x1] %v6399_v26  ;;  %v12919_v2 = vor.u32 %v13650_v16, %v12918_v3  ;;  %v7375_v12 = vsel %vm14183_vm10, %v7370_v0, %v7374_v37 }
 0x3db   : > { %v13592_v6 = vld [vmem:[#allocation4 + $0x244] sm:$0xf]  ;;  %v7901_v51 = vrot.slane %v7802_v24, 5  ;;  %v15788_v48 = vpop.f32.mrf.mxu1  ;;  %6470 = vst [vmem:[#allocation4 + $0x438] sm:$0xf] %v6438_v30  ;;  %v7377_v4 = vshrl.u32 %v7307_v54, 16  ;;  %v5602_v38 = vadd.f32 %v5601_v47, %v5513_v31 }
 0x3dc   : > { %v6231_v11 = vshrl.u32 %v5973_v34, 16  ;;  %17052 = vst [vmem:[#allocation18_spill] sm:$0xff] %v15788_v48  ;;  %v7308_v52 = vld [vmem:[#allocation3 + $0x1c] sm:$0xf]  ;;  %v12707_v60 = vor.u32 %v13592_v6, %v12704_v17  ;;  %v7380_v55 = vshll.u32 %v7307_v54, 16  ;;  %v17053_v35 = vrot.slane %v15737_v61, 5  ;;  %10459 = vmatmul.bf16.gmra.mxu2 %v12919_v2 }
 0x3dd   : > { %7768 = vst [vmem:[#allocation4 + $0x10] sm:$0xf] %v7365_v15  ;;  %v15797_v0 = vld [vmem:[%s16945_s4] ss:$0 sm:$0xff]  ;;  %v6234_v37 = vshll.u32 %v5973_v34, 16  ;;  %v7902_v26 = vsel %vm14209_vm11, %v7900_v33, %v7901_v51  ;;  %v7386_v54 = vshll.u32 %v7308_v52, 16 }
 0x3de   : > { %v7899_v5 = vsel %vm14209_vm11, %v12380_v53, %v17053_v35  ;;  %v15799_v24 = vrot.slane %v6231_v11, 7  ;;  %7769 = vst [vmem:[#allocation4 + $0x34] sm:$0xf] %v7375_v12  ;;  %v6401_v3 = vld [vmem:[#allocation3 + $0xc0] sm:$0xf]  ;;  %10518 = vmatmul.bf16.gmra.mxu3 %v12707_v60  ;;  %v7390_v17 = vshrl.u32 %v7308_v52, 16  ;;  %v10391_v33 = vadd.f32 %v15797_v0, %v15569_v57  ;;  %v15812_v12 = vpop.f32.mrf.mxu2 }
 0x3df   : > { %v13597_v61 = vld [vmem:[#allocation4 + $0x268] sm:$0xf0]  ;;  %v5635_v59 = vmax.f32 %v5602_v38, 0.0  ;;  %v12710_v16 = vld [vmem:[#allocation4 + $0x248] sm:$0xf]  ;;  %v15804_v47 = vrot.slane %v7377_v4, 4  ;;  %v10479_v60 = vpop.f32.mrf.mxu3  ;;  %v10393_v23 = vadd.f32 %v15797_v0, %v15589_v41 }
 0x3e0   : > { %v6236_v13 = vor.u32 %v6234_v37, %v15799_v24  ;;  %v12712_v30 = vld [vmem:[#allocation4 + $0x26c] sm:$0xf0]  ;;  %8040 = vst [vmem:[#allocation4 + $0x14] sm:$0xf] %v7899_v5  ;;  %v6502_v15 = vld [vmem:[#allocation3 + $0x78] sm:$0xf]  ;;  %v10568_v6 = vpop.f32.mrf.mxu0  ;;  %v12711_v52 = vor.u32 %v13597_v61, %v12710_v16  ;;  %v10480_v37 = vadd.f32 %v10479_v60, %v10391_v33 }
 0x3e1   : > { %v6439_v34 = vld [vmem:[#allocation3 + $0xb8] sm:$0xf]  ;;  %v15806_v53 = vrot.slane %v7380_v55, 5  ;;  %8041 = vst [vmem:[#allocation4 + $0x38] sm:$0xf] %v7902_v26  ;;  %v5974_v2 = vpack.c.bf16 %v5635_v59, %v5635_v59  ;;  %v15820_v4 = vrot.slane %v7386_v54, 5 }
 0x3e2   : > { %v6402_v21 = vsel %vm14172_vm9, %v6236_v13, %v6401_v3  ;;  %v13593_v51 = vld [vmem:[#allocation4 + $0x24c] sm:$0xf]  ;;  %6471 = vst [vmem:[#allocation4 + $0x45c] sm:$0xf] %v6439_v34  ;;  %v15814_v11 = vld [vmem:[#allocation3 + $0x20] sm:$0x1]  ;;  %v15834_v34 = vadd.f32 %v10568_v6, %v10480_v37 }
 0x3e3   : > { %v15816_v31 = vld [vmem:[#allocation3 + $0x24] sm:$0xf]  ;;  %6403 = vst [vmem:[#allocation3 + $0xc0] sm:$0xf] %v6402_v21  ;;  %v15818_v9 = vld [vmem:[#allocation4 + $0x2ac] sm:$0xf0]  ;;  %v15826_v35 = vpop.f32.mrf.mxu1  ;;  %v12715_v5 = vor.u32 %v13593_v51, %v12712_v30  ;;  %10607 = vmatmul.bf16.gmra.mxu0 %v12711_v52 }
 0x3e4   : > { %v15822_v57 = vrot.slane %v7390_v17, 4  ;;  %v6239_v55 = vshrl.u32 %v5974_v2, 16  ;;  %v15828_v38 = vld [vmem:[#allocation4 + $0x28c] sm:$0xf]  ;;  %v13735_v26 = vld [vmem:[#allocation5 + $0x238] sm:$0xff]  ;;  %v6237_v61 = vrot.slane %v15799_v24, 4  ;;  %v7383_v17 = vor.u32 %v15806_v53, %v15804_v47 }
 0x3e5   : > { %v13719_v3 = vld [vmem:[#allocation5 + $0x1b8] sm:$0xff]  ;;  %v6242_v13 = vshll.u32 %v5974_v2, 16  ;;  %v6405_v59 = vld [vmem:[#allocation3 + $0xc8] sm:$0x1]  ;;  %v6503_v54 = vld [vmem:[#allocation3 + $0x7c] sm:$0xf]  ;;  %v12743_v30 = vor.u32 %v15828_v38, %v15818_v9  ;;  %11093 = vmatpush.bf16.msra.mxu2 %v13735_v26 }
 0x3e6   : > { %v7396_v41 = vshll.u32 %v15814_v11, 16  ;;  %v6241_v16 = vrot.slane %v6239_v55, 7  ;;  %10915 = vmatpush.bf16.msra.mxu0 %v13719_v3  ;;  %v6504_v33 = vld [vmem:[#allocation3 + $0x80] sm:$0x1]  ;;  %v6761_v21 = vshrl.u32 %v6502_v15, 16  ;;  %10696 = vmatmul.bf16.gmra.mxu1 %v12715_v5  ;;  %v6764_v2 = vshll.u32 %v6502_v15, 16 }
 0x3e7   : > { %v6998_v24 = vld [vmem:[#allocation3 + $0x78] sm:$0xe]  ;;  %v6770_v51 = vshll.u32 %v6503_v54, 16  ;;  %v6774_v52 = vshrl.u32 %v6503_v54, 16  ;;  %v6999_v60 = vld [vmem:[#allocation3 + $0x7c] sm:$0xf]  ;;  %v7393_v47 = vor.u32 %v15822_v57, %v15820_v4  ;;  %v15845_v57 = vpop.f32.mrf.mxu2  ;;  %v10481_v25 = vpop.f32.mrf.mxu3 }
 0x3e8   : > { %v6244_v53 = vor.u32 %v6242_v13, %v6241_v16  ;;  %v6246_v11 = vrot.slane %v6241_v16, 4  ;;  %v6763_v6 = vrot.slane %v6761_v21, 4  ;;  %v7000_v55 = vld [vmem:[#allocation3 + $0x80] sm:$0x1]  ;;  %v13727_v37 = vld [vmem:[#allocation5 + $0x1f8] sm:$0xff]  ;;  %v7401_v9 = vshrl.u32 %v15816_v31, 16  ;;  %v10570_v54 = vpop.f32.mrf.mxu0 }
 0x3e9   : > { %v13659_v38 = vld [vmem:[#allocation4 + $0x458] sm:$0xf0]  ;;  %v6766_v26 = vrot.slane %v6764_v2, 5  ;;  %v6772_v3 = vrot.slane %v6770_v51, 5  ;;  %v6776_v48 = vrot.slane %v6774_v52, 4  ;;  %v6780_v45 = vshll.u32 %v6504_v33, 16  ;;  %11004 = vmatpush.bf16.msra.mxu1 %v13727_v37 }
 0x3ea   : > { %v6245_v15 = vsel %vm14161_vm7, %v6237_v61, %v6244_v53  ;;  %v6406_v5 = vsel %vm14289_vm13, %v6246_v11, %v6405_v59  ;;  %v12954_v13 = vld [vmem:[#allocation4 + $0x438] sm:$0xf]  ;;  %v12374_v16 = vrot.slane %v6998_v24, 9  ;;  %v7136_v21 = vrot.slane %v6999_v60, 5  ;;  %v7260_v52 = vld [vmem:[#allocation3 + $0x84] sm:$0xf] }
 0x3eb   : > { %6404 = vst [vmem:[#allocation3 + $0xc4] sm:$0xf] %v6245_v15  ;;  %v12955_v27 = vor.u32 %v13659_v38, %v12954_v13  ;;  %v6767_v2 = vor.u32 %v6766_v26, %v6763_v6  ;;  %v6777_v51 = vor.u32 %v6776_v48, %v6772_v3  ;;  %v7404_v33 = vshll.u32 %v15816_v31, 16  ;;  %v15848_v19 = vpop.f32.mrf.mxu1  ;;  %v7311_v24 = vld [vmem:[#allocation3 + $0x28] sm:$0xf] }
 0x3ec   : > { %6407 = vst [vmem:[#allocation3 + $0xc8] sm:$0x1] %v6406_v5  ;;  %v10482_v63 = vadd.f32 %v10481_v25, %v10393_v23  ;;  %v7137_v61 = vsel %vm14209_vm11, %v12374_v16, %v7136_v21  ;;  %v7138_v59 = vrot.slane %v7136_v21, 4  ;;  %v7139_v53 = vrot.slane %v7000_v55, 5  ;;  %v13606_v15 = vld [vmem:[#allocation4 + $0x2b0] sm:$0xf0] }
 0x3ed   : > { %v6768_v60 = vrot.slane %v6767_v2, 4  ;;  %v6778_v11 = vrot.slane %v6777_v51, 4  ;;  %v6782_v37 = vrot.slane %v6780_v45, 5  ;;  %7228 = vst [vmem:[#allocation4 + $0x2d8] sm:$0xf] %v7137_v61  ;;  %v7394_v38 = vrot.slane %v7393_v47, 4  ;;  %10464 = vmatmul.bf16.gmra.mxu2 %v12955_v27 }
 0x3ee   : > { %v15852_v6 = vadd.f32 %v10570_v54, %v10482_v63  ;;  %v7140_v48 = vsel %vm14209_vm11, %v7138_v59, %v7139_v53  ;;  %7292 = vst [vmem:[#allocation4 + $0x2dc] sm:$0xf] %v7260_v52  ;;  %v7384_v31 = vrot.slane %v7383_v17, 4  ;;  %v7398_v26 = vrot.slane %v7396_v41, 5  ;;  %10523 = vmatmul.bf16.gmra.mxu3 %v12743_v30  ;;  %v7261_v45 = vld [vmem:[#allocation3 + $0x88] sm:$0xf] }
 0x3ef   : > { %v6773_v25 = vsel %vm14183_vm10, %v6768_v60, %v6772_v3  ;;  %v6783_v23 = vsel %vm14183_vm10, %v6778_v11, %v6782_v37  ;;  %7229 = vst [vmem:[#allocation4 + $0x2fc] sm:$0xf] %v7140_v48  ;;  %v7410_v55 = vshll.u32 %v7311_v24, 16  ;;  %v7414_v47 = vshrl.u32 %v7311_v24, 16  ;;  %v15863_v27 = vld [vmem:[#allocation3 + $0x30] sm:$0xf]  ;;  %v15869_v16 = vpop.f32.mrf.mxu2 }
 0x3f0   : > { %6956 = vst [vmem:[#allocation4 + $0x2d4] sm:$0xf] %v6773_v25  ;;  %v7389_v5 = vsel %vm14183_vm10, %v7384_v31, %v15820_v4  ;;  %v7403_v17 = vrot.slane %v7401_v9, 4  ;;  %v7406_v41 = vrot.slane %v7404_v33, 5  ;;  %v6505_v30 = vld [vmem:[#allocation3 + $0x84] sm:$0xf]  ;;  %v7399_v3 = vsel %vm14183_vm10, %v7394_v38, %v7398_v26  ;;  %v10573_v13 = vpop.f32.mrf.mxu0  ;;  %v10484_v4 = vpop.f32.mrf.mxu3 }
 0x3f1   : > { %6957 = vst [vmem:[#allocation4 + $0x2f8] sm:$0xf] %v6783_v23  ;;  %v10396_v54 = vadd.f32 %v15797_v0, %v15607_v1  ;;  %v12746_v21 = vld [vmem:[#allocation4 + $0x290] sm:$0xf]  ;;  %v12748_v2 = vld [vmem:[#allocation4 + $0x2b4] sm:$0xf0] }
 0x3f2   : > { %7293 = vst [vmem:[#allocation4 + $0x300] sm:$0xf] %v7261_v45  ;;  %v12747_v51 = vor.u32 %v13606_v15, %v12746_v21  ;;  %v15871_v9 = vld [vmem:[#allocation3 + $0x2c] sm:$0x1]  ;;  %v15873_v52 = vrot.slane %v7410_v55, 5  ;;  %v7416_v33 = vrot.slane %v7414_v47, 4  ;;  %v7407_v53 = vor.u32 %v7406_v41, %v7403_v17 }
 0x3f3   : > { %7770 = vst [vmem:[#allocation4 + $0x58] sm:$0xf] %v7389_v5  ;;  %v15875_v63 = vpop.f32.mrf.mxu1  ;;  %v13602_v61 = vld [vmem:[#allocation4 + $0x294] sm:$0xf]  ;;  %v10485_v59 = vadd.f32 %v10484_v4, %v10396_v54  ;;  %v6506_v1 = vld [vmem:[#allocation3 + $0x88] sm:$0xf]  ;;  %v10398_v21 = vadd.f32 %v15797_v0, %v15625_v56 }
 0x3f4   : > { %7771 = vst [vmem:[#allocation4 + $0x7c] sm:$0xf] %v7399_v3  ;;  %10612 = vmatmul.bf16.gmra.mxu0 %v12747_v51  ;;  %v12751_v24 = vor.u32 %v13602_v61, %v12748_v2  ;;  %v13526_v60 = vld [vmem:[#allocation4 + $0x30] sm:$0xf0]  ;;  %v6785_v37 = vshrl.u32 %v6505_v30, 16  ;;  %v6788_v38 = vshll.u32 %v6505_v30, 16  ;;  %v7417_v5 = vor.u32 %v7416_v33, %v15873_v52 }
 0x3f5   : > { %v6507_v11 = vld [vmem:[#allocation3 + $0x8c] sm:$0x1]  ;;  %v7425_v48 = vshrl.u32 %v15863_v27, 16  ;;  %v15878_v31 = vadd.f32 %v10573_v13, %v10485_v59  ;;  %v6794_v26 = vshll.u32 %v6506_v1, 16  ;;  %v6798_v25 = vshrl.u32 %v6506_v1, 16 }
 0x3f6   : > { %v7420_v23 = vshll.u32 %v15871_v9, 16  ;;  %v15881_v45 = vld [vmem:[#allocation3 + $0x34] sm:$0xf]  ;;  %10701 = vmatmul.bf16.gmra.mxu1 %v12751_v24  ;;  %v6787_v55 = vrot.slane %v6785_v37, 4  ;;  %v6790_v47 = vrot.slane %v6788_v38, 5  ;;  %v7428_v17 = vshll.u32 %v15863_v27, 16 }
 0x3f7   : > { %v7001_v15 = vld [vmem:[#allocation3 + $0x84] sm:$0xe]  ;;  %v12430_v41 = vld [vmem:[#allocation4 + $0x10] sm:$0xf]  ;;  %v6796_v30 = vrot.slane %v6794_v26, 5  ;;  %v6800_v3 = vrot.slane %v6798_v25, 4  ;;  %v15894_v27 = vpop.f32.mrf.mxu2 }
 0x3f8   : > { %v6804_v54 = vshll.u32 %v6507_v11, 16  ;;  %v15885_v13 = vrot.slane %v7407_v53, 4  ;;  %v12776_v2 = vld [vmem:[#allocation4 + $0x2f4] sm:$0xf0]  ;;  %v6791_v51 = vor.u32 %v6790_v47, %v6787_v55  ;;  %v7002_v4 = vld [vmem:[#allocation3 + $0x88] sm:$0xf]  ;;  %v10575_v33 = vpop.f32.mrf.mxu0  ;;  %v12431_v1 = vor.u32 %v13526_v60, %v12430_v41  ;;  %v10486_v26 = vpop.f32.mrf.mxu3 }
 0x3f9   : > { %v15889_v9 = vrot.slane %v7425_v48, 4  ;;  %v7434_v61 = vshll.u32 %v15881_v45, 16  ;;  %v15892_v59 = vld [vmem:[#allocation3 + $0x18] sm:$0xf]  ;;  %v6801_v24 = vor.u32 %v6800_v3, %v6796_v30  ;;  %v7003_v11 = vld [vmem:[#allocation3 + $0x8c] sm:$0x1]  ;;  %v10487_v28 = vadd.f32 %v10486_v26, %v10398_v21 }
 0x3fa   : > { %v12375_v53 = vrot.slane %v7001_v15, 9  ;;  %v7143_v37 = vrot.slane %v7002_v4, 5  ;;  %v7262_v38 = vld [vmem:[#allocation3 + $0x90] sm:$0xf]  ;;  %v13610_v56 = vld [vmem:[#allocation4 + $0x2d4] sm:$0xf] }
 0x3fb   : > { %v6792_v25 = vrot.slane %v6791_v51, 4  ;;  %v7418_v55 = vrot.slane %v7417_v5, 4  ;;  %v7430_v47 = vrot.slane %v7428_v17, 5  ;;  %v7438_v48 = vshrl.u32 %v15881_v45, 16  ;;  %v15897_v36 = vpop.f32.mrf.mxu1  ;;  %7294 = vst [vmem:[#allocation4 + $0x324] sm:$0xf] %v7262_v38 }
 0x3fc   : > { %v6802_v10 = vrot.slane %v6801_v24, 4  ;;  %v6806_v22 = vrot.slane %v6804_v54, 5  ;;  %v7144_v60 = vsel %vm14209_vm11, %v12375_v53, %v7143_v37  ;;  %v13710_v41 = vld [vmem:[#allocation5 + $0x170] sm:$0xff]  ;;  %v7316_v15 = vld [vmem:[#allocation3 + $0x3c] sm:$0xf]  ;;  %v12779_v3 = vor.u32 %v13610_v56, %v12776_v2 }
 0x3fd   : > { %v6797_v4 = vsel %vm14183_vm10, %v6792_v25, %v6796_v30  ;;  %v7145_v51 = vrot.slane %v7143_v37, 4  ;;  %v7146_v5 = vrot.slane %v7003_v11, 5  ;;  %7230 = vst [vmem:[#allocation4 + $0x320] sm:$0xf] %v7144_v60  ;;  %v15903_v17 = vadd.f32 %v10575_v33, %v10487_v28  ;;  %v7263_v54 = vld [vmem:[#allocation3 + $0x94] sm:$0xf]  ;;  %10827 = vmatpush.bf16.msra.mxu3 %v13710_v41  ;;  %10745 = vmatmul.bf16.vlgmr.msrb.gmra.mxu2 %v12431_v1 }
 0x3fe   : > { %v6807_v45 = vsel %vm14183_vm10, %v6802_v10, %v6806_v22  ;;  %6958 = vst [vmem:[#allocation4 + $0x31c] sm:$0xf] %v6797_v4  ;;  %v7422_v21 = vrot.slane %v7420_v23, 5  ;;  %v8186_v24 = vshrl.u32 %v15892_v59, 16  ;;  %10528 = vmatmul.bf16.gmra.mxu3 %v12779_v3  ;;  %v7413_v28 = vsel %vm14183_vm10, %v15885_v13, %v15873_v52  ;;  %v7315_v2 = vld [vmem:[#allocation3 + $0x38] sm:$0x1] }
 0x3ff   : > { %6959 = vst [vmem:[#allocation4 + $0x340] sm:$0xf] %v6807_v45  ;;  %v7147_v30 = vsel %vm14209_vm11, %v7145_v51, %v7146_v5  ;;  %v13615_v33 = vld [vmem:[#allocation4 + $0x2f8] sm:$0xf0]  ;;  %v15916_v10 = vrot.slane %v7434_v61, 5  ;;  %v7440_v23 = vrot.slane %v7438_v48, 4  ;;  %v7431_v11 = vor.u32 %v7430_v47, %v15889_v9  ;;  %v15921_v52 = vpop.f32.mrf.mxu2 }
 0x400   : > { %7231 = vst [vmem:[#allocation4 + $0x344] sm:$0xf] %v7147_v30  ;;  %v7423_v22 = vsel %vm14183_vm10, %v7418_v55, %v7422_v21  ;;  %v6508_v1 = vld [vmem:[#allocation3 + $0x90] sm:$0xf]  ;;  %v7449_v53 = vshrl.u32 %v7316_v15, 16  ;;  %v7452_v37 = vshll.u32 %v7316_v15, 16  ;;  %v10401_v38 = vadd.f32 %v15797_v0, %v15638_v18  ;;  %v10578_v26 = vpop.f32.mrf.mxu0  ;;  %v10489_v48 = vpop.f32.mrf.mxu3 }
 0x401   : > { %7295 = vst [vmem:[#allocation4 + $0x348] sm:$0xf] %v7263_v54  ;;  %v12782_v13 = vld [vmem:[#allocation4 + $0x2d8] sm:$0xf]  ;;  %v12784_v56 = vld [vmem:[#allocation4 + $0x2fc] sm:$0xf0]  ;;  %v7441_v4 = vor.u32 %v7440_v23, %v15916_v10  ;;  %v10403_v23 = vadd.f32 %v15797_v0, %v15659_v8 }
 0x402   : > { %7772 = vst [vmem:[#allocation4 + $0xa0] sm:$0xf] %v7413_v28  ;;  %v12783_v61 = vor.u32 %v13615_v33, %v12782_v13  ;;  %v13611_v55 = vld [vmem:[#allocation4 + $0x2dc] sm:$0xf]  ;;  %v7444_v60 = vshll.u32 %v7315_v2, 16  ;;  %v10490_v9 = vadd.f32 %v10489_v48, %v10401_v38  ;;  %v13734_v47 = vld [vmem:[#allocation5 + $0x230] sm:$0xff] }
 0x403   : > { %7773 = vst [vmem:[#allocation4 + $0xc4] sm:$0xf] %v7423_v22  ;;  %v15924_v41 = vpop.f32.mrf.mxu1  ;;  %v13718_v15 = vld [vmem:[#allocation5 + $0x1b0] sm:$0xff]  ;;  %v6809_v3 = vshrl.u32 %v6508_v1, 16  ;;  %v6812_v18 = vshll.u32 %v6508_v1, 16  ;;  %v12787_v5 = vor.u32 %v13611_v55, %v12784_v56  ;;  %v7432_v54 = vrot.slane %v7431_v11, 4  ;;  %11094 = vmatpush.bf16.msra.mxu2 %v13734_v47 }
 0x404   : > { %v15927_v51 = vld [vmem:[#allocation3 + $0x40] sm:$0xf]  ;;  %10617 = vmatmul.bf16.gmra.mxu0 %v12783_v61  ;;  %v6509_v45 = vld [vmem:[#allocation3 + $0x94] sm:$0xf]  ;;  %v15929_v21 = vrot.slane %v7449_v53, 4  ;;  %v7454_v30 = vrot.slane %v7452_v37, 5  ;;  %v15931_v28 = vadd.f32 %v10578_v26, %v10490_v9 }
 0x405   : > { %10916 = vmatpush.bf16.msra.mxu0 %v13718_v15  ;;  %v6510_v2 = vld [vmem:[#allocation3 + $0x98] sm:$0x1]  ;;  %v6811_v33 = vrot.slane %v6809_v3, 4  ;;  %v6814_v22 = vrot.slane %v6812_v18, 5  ;;  %v6818_v38 = vshll.u32 %v6509_v45, 16  ;;  %v15933_v1 = vrot.slane %v8186_v24, 4 }
 0x406   : > { %10706 = vmatmul.bf16.gmra.mxu1 %v12787_v5  ;;  %v6822_v13 = vshrl.u32 %v6509_v45, 16  ;;  %v7004_v56 = vld [vmem:[#allocation3 + $0x90] sm:$0xe]  ;;  %v7458_v11 = vshll.u32 %v15927_v51, 16  ;;  %v13535_v53 = vld [vmem:[#allocation4 + $0x78] sm:$0xf0]  ;;  %v7437_v55 = vsel %vm14183_vm10, %v7432_v54, %v15916_v10 }
 0x407   : > { %v6815_v37 = vor.u32 %v6814_v22, %v6811_v33  ;;  %v6820_v26 = vrot.slane %v6818_v38, 5  ;;  %v7005_v61 = vld [vmem:[#allocation3 + $0x94] sm:$0xf]  ;;  %v15941_v48 = vrot.slane %v7444_v60, 5  ;;  %v6828_v9 = vshll.u32 %v6510_v2, 16  ;;  %v15948_v5 = vpop.f32.mrf.mxu2  ;;  %v13726_v10 = vld [vmem:[#allocation5 + $0x1f0] sm:$0xff] }
 0x408   : > { %v6824_v24 = vrot.slane %v6822_v13, 4  ;;  %v7006_v47 = vld [vmem:[#allocation3 + $0x98] sm:$0x1]  ;;  %v15943_v15 = vrot.slane %v7441_v4, 4  ;;  %v7462_v8 = vshrl.u32 %v15927_v51, 16  ;;  %v10580_v18 = vpop.f32.mrf.mxu0  ;;  %v12376_v38 = vrot.slane %v7004_v56, 9  ;;  %v10491_v54 = vpop.f32.mrf.mxu3  ;;  %11005 = vmatpush.bf16.msra.mxu1 %v13726_v10 }
 0x409   : > { %v15946_v3 = vld [vmem:[#allocation3 + $0x48] sm:$0xf]  ;;  %v12466_v45 = vld [vmem:[#allocation4 + $0x58] sm:$0xf]  ;;  %v12812_v33 = vld [vmem:[#allocation4 + $0x33c] sm:$0xf0]  ;;  %v7455_v60 = vor.u32 %v7454_v30, %v15929_v21  ;;  %v10492_v49 = vadd.f32 %v10491_v54, %v10403_v23 }
 0x40a   : > { %v6816_v22 = vrot.slane %v6815_v37, 4  ;;  %v7150_v25 = vrot.slane %v7005_v61, 5  ;;  %v6825_v2 = vor.u32 %v6824_v24, %v6820_v26  ;;  %v7153_v13 = vrot.slane %v7006_v47, 5  ;;  %v7264_v4 = vld [vmem:[#allocation3 + $0x9c] sm:$0xf] }
 0x40b   : > { %7774 = vst [vmem:[#allocation4 + $0xe8] sm:$0xf] %v7437_v55  ;;  %v15951_v40 = vrot.slane %v7458_v11, 5  ;;  %v15953_v51 = vld [vmem:[#allocation3 + $0x1c] sm:$0xf]  ;;  %v15955_v58 = vpop.f32.mrf.mxu1  ;;  %v12467_v61 = vor.u32 %v13535_v53, %v12466_v45  ;;  %v6830_v24 = vrot.slane %v6828_v9, 5  ;;  %v15963_v54 = vadd.f32 %v10580_v18, %v10492_v49 }
 0x40c   : > { %17054 = vst [vmem:[#allocation19_spill] sm:$0xff] %v15955_v58  ;;  %v13619_v42 = vld [vmem:[#allocation4 + $0x31c] sm:$0xf]  ;;  %v6821_v56 = vsel %vm14183_vm10, %v6816_v22, %v6820_v26  ;;  %v7151_v37 = vsel %vm14209_vm11, %v12376_v38, %v7150_v25  ;;  %v7152_v21 = vrot.slane %v7150_v25, 4  ;;  %v7318_v30 = vld [vmem:[#allocation3 + $0x44] sm:$0x1] }
 0x40d   : > { %7296 = vst [vmem:[#allocation4 + $0x36c] sm:$0xf] %v7264_v4  ;;  %v12815_v55 = vor.u32 %v13619_v42, %v12812_v33  ;;  %v6826_v11 = vrot.slane %v6825_v2, 4  ;;  %v7265_v47 = vld [vmem:[#allocation3 + $0xa0] sm:$0xf]  ;;  %v17055_v39 = vshll.u32 %v15892_v59, 16  ;;  %10750 = vmatmul.bf16.gmra.mxu2 %v12467_v61 }
 0x40e   : > { %6960 = vst [vmem:[#allocation4 + $0x364] sm:$0xf] %v6821_v56  ;;  %v13624_v50 = vld [vmem:[#allocation4 + $0x340] sm:$0xf0]  ;;  %v7154_v26 = vsel %vm14209_vm11, %v7152_v21, %v7153_v13  ;;  %v7456_v25 = vrot.slane %v7455_v60, 4  ;;  %v7464_v49 = vrot.slane %v7462_v8, 4 }
 0x40f   : > { %v8191_v23 = vrot.slane %v17055_v39, 5  ;;  %7232 = vst [vmem:[#allocation4 + $0x368] sm:$0xf] %v7151_v37  ;;  %v7320_v22 = vld [vmem:[#allocation3 + $0x4c] sm:$0xf]  ;;  %10533 = vmatmul.bf16.gmra.mxu3 %v12815_v55  ;;  %v6831_v42 = vsel %vm14183_vm10, %v6826_v11, %v6830_v24  ;;  %v7447_v39 = vsel %vm14183_vm10, %v15943_v15, %v15941_v48  ;;  %v7473_v59 = vshrl.u32 %v15946_v3, 16  ;;  %v15982_v8 = vpop.f32.mrf.mxu2 }
 0x410   : > { %v12820_v53 = vld [vmem:[#allocation4 + $0x344] sm:$0xf0]  ;;  %7233 = vst [vmem:[#allocation4 + $0x38c] sm:$0xf] %v7154_v26  ;;  %v7461_v9 = vsel %vm14183_vm10, %v7456_v25, %v15951_v40  ;;  %v7476_v18 = vshll.u32 %v15946_v3, 16  ;;  %v7482_v45 = vshll.u32 %v7320_v22, 16  ;;  %v10406_v48 = vadd.f32 %v15797_v0, %v15677_v32  ;;  %v10583_v15 = vpop.f32.mrf.mxu0  ;;  %v10494_v37 = vpop.f32.mrf.mxu3 }
 0x411   : > { %6961 = vst [vmem:[#allocation4 + $0x388] sm:$0xf] %v6831_v42  ;;  %v7486_v33 = vshrl.u32 %v7320_v22, 16  ;;  %v6511_v10 = vld [vmem:[#allocation3 + $0x9c] sm:$0xf]  ;;  %v7468_v60 = vshll.u32 %v7318_v30, 16  ;;  %v8192_v2 = vor.u32 %v8191_v23, %v15933_v1  ;;  %v7465_v21 = vor.u32 %v7464_v49, %v15951_v40 }
 0x412   : > { %7297 = vst [vmem:[#allocation4 + $0x390] sm:$0xf] %v7265_v47  ;;  %v12818_v13 = vld [vmem:[#allocation4 + $0x320] sm:$0xf]  ;;  %v13620_v4 = vld [vmem:[#allocation4 + $0x324] sm:$0xf]  ;;  %v10495_v1 = vadd.f32 %v10494_v37, %v10406_v48 }
 0x413   : > { %7775 = vst [vmem:[#allocation4 + $0x10c] sm:$0xf] %v7447_v39  ;;  %v12819_v56 = vor.u32 %v13624_v50, %v12818_v13  ;;  %v12823_v3 = vor.u32 %v13620_v4, %v12820_v53  ;;  %v15985_v61 = vld [vmem:[#allocation3 + $0x50] sm:$0x1]  ;;  %v7475_v30 = vrot.slane %v7473_v59, 4  ;;  %v15987_v55 = vpop.f32.mrf.mxu1  ;;  %v7478_v32 = vrot.slane %v7476_v18, 5 }
 0x414   : > { %7776 = vst [vmem:[#allocation4 + $0x130] sm:$0xf] %v7461_v9  ;;  %v6512_v11 = vld [vmem:[#allocation3 + $0xa0] sm:$0xf]  ;;  %v15989_v24 = vrot.slane %v7482_v45, 5  ;;  %v7488_v47 = vrot.slane %v7486_v33, 4  ;;  %v15994_v42 = vadd.f32 %v10583_v15, %v10495_v1 }
 0x415   : > { %17056 = vst [vmem:[#allocation20_spill] sm:$0xff] %v15987_v55  ;;  %10622 = vmatmul.bf16.gmra.mxu0 %v12819_v56  ;;  %v6513_v23 = vld [vmem:[#allocation3 + $0xa4] sm:$0x1]  ;;  %v6833_v26 = vshrl.u32 %v6511_v10, 16  ;;  %v6836_v50 = vshll.u32 %v6511_v10, 16  ;;  %v6842_v25 = vshll.u32 %v6512_v11, 16 }
 0x416   : > { %v6846_v22 = vshrl.u32 %v6512_v11, 16  ;;  %v15991_v53 = vrot.slane %v8192_v2, 4  ;;  %17057 = vst [vmem:[#allocation21_spill] sm:$0xff] %v15994_v42  ;;  %v7007_v39 = vld [vmem:[#allocation3 + $0x9c] sm:$0xe]  ;;  %v15996_v49 = vrot.slane %v7468_v60, 5  ;;  %10711 = vmatmul.bf16.gmra.mxu1 %v12823_v3  ;;  %v7489_v4 = vor.u32 %v7488_v47, %v15989_v24 }
 0x417   : > { %v13544_v59 = vld [vmem:[#allocation4 + $0xc0] sm:$0xf0]  ;;  %v6835_v9 = vrot.slane %v6833_v26, 4  ;;  %v6838_v18 = vrot.slane %v6836_v50, 5  ;;  %v6844_v45 = vrot.slane %v6842_v25, 5  ;;  %v7466_v33 = vrot.slane %v7465_v21, 4  ;;  %v16002_v50 = vpop.f32.mrf.mxu2 }
 0x418   : > { %v6848_v48 = vrot.slane %v6846_v22, 4  ;;  %v6852_v13 = vshll.u32 %v6513_v23, 16  ;;  %v7008_v10 = vld [vmem:[#allocation3 + $0xa0] sm:$0xf]  ;;  %v7492_v2 = vshll.u32 %v15985_v61, 16  ;;  %v12377_v1 = vrot.slane %v7007_v39, 9  ;;  %v10585_v26 = vpop.f32.mrf.mxu0  ;;  %v10496_v61 = vpop.f32.mrf.mxu3 }
 0x419   : > { %v12502_v56 = vld [vmem:[#allocation4 + $0xa0] sm:$0xf]  ;;  %v6839_v37 = vor.u32 %v6838_v18, %v6835_v9  ;;  %v7009_v15 = vld [vmem:[#allocation3 + $0xa4] sm:$0x1]  ;;  %v7157_v11 = vrot.slane %v7008_v10, 5  ;;  %v7479_v60 = vor.u32 %v7478_v32, %v7475_v30  ;;  %v10408_v3 = vadd.f32 %v15797_v0, %v15702_v14 }
 0x41a   : > { %v7322_v40 = vld [vmem:[#allocation3 + $0x54] sm:$0xf]  ;;  %v12503_v21 = vor.u32 %v13544_v59, %v12502_v56  ;;  %v13628_v23 = vld [vmem:[#allocation4 + $0x364] sm:$0xf]  ;;  %v12848_v25 = vld [vmem:[#allocation4 + $0x384] sm:$0xf0]  ;;  %v6849_v22 = vor.u32 %v6848_v48, %v6844_v45 }
 0x41b   : > { %v7266_v47 = vld [vmem:[#allocation3 + $0xa8] sm:$0xf]  ;;  %v7267_v38 = vld [vmem:[#allocation3 + $0xac] sm:$0xf]  ;;  %v6840_v20 = vrot.slane %v6839_v37, 4  ;;  %v7158_v39 = vsel %vm14209_vm11, %v12377_v1, %v7157_v11  ;;  %v7159_v9 = vrot.slane %v7157_v11, 4  ;;  %v16006_v32 = vpop.f32.mrf.mxu1  ;;  %v10497_v14 = vadd.f32 %v10496_v61, %v10408_v3 }
 0x41c   : > { %v7160_v30 = vrot.slane %v7009_v15, 5  ;;  %7298 = vst [vmem:[#allocation4 + $0x3b4] sm:$0xf] %v7266_v47  ;;  %v6850_v18 = vrot.slane %v6849_v22, 4  ;;  %v6854_v10 = vrot.slane %v6852_v13, 5  ;;  %v13709_v59 = vld [vmem:[#allocation5 + $0x168] sm:$0xff]  ;;  %v12851_v55 = vor.u32 %v13628_v23, %v12848_v25 }
 0x41d   : > { %17058 = vst [vmem:[#allocation43_spill] sm:$0xff] %v16006_v32  ;;  %v7490_v56 = vrot.slane %v7489_v4, 4  ;;  %v6845_v48 = vsel %vm14183_vm10, %v6840_v20, %v6844_v45  ;;  %v7480_v1 = vrot.slane %v7479_v60, 4  ;;  %v7323_v11 = vld [vmem:[#allocation3 + $0x58] sm:$0xf]  ;;  %v16012_v15 = vadd.f32 %v10585_v26, %v10497_v14  ;;  %10828 = vmatpush.bf16.msra.mxu3 %v13709_v59  ;;  %10755 = vmatmul.bf16.gmra.mxu2 %v12503_v21 }
 0x41e   : > { %7234 = vst [vmem:[#allocation4 + $0x3b0] sm:$0xf] %v7158_v39  ;;  %v7161_v37 = vsel %vm14209_vm11, %v7159_v9, %v7160_v30  ;;  %v6855_v3 = vsel %vm14183_vm10, %v6850_v18, %v6854_v10  ;;  %v7471_v13 = vsel %vm14183_vm10, %v7466_v33, %v15996_v49  ;;  %v7494_v4 = vrot.slane %v7492_v2, 5  ;;  %v13633_v25 = vld [vmem:[#allocation4 + $0x388] sm:$0xf0] }
 0x41f   : > { %7299 = vst [vmem:[#allocation4 + $0x3d8] sm:$0xf] %v7267_v38  ;;  %10538 = vmatmul.bf16.gmra.mxu3 %v12851_v55  ;;  %v7485_v20 = vsel %vm14183_vm10, %v7480_v1, %v15989_v24  ;;  %v7497_v38 = vshrl.u32 %v7322_v40, 16  ;;  %v7500_v45 = vshll.u32 %v7322_v40, 16  ;;  %v7506_v60 = vshll.u32 %v7323_v11, 16  ;;  %v16032_v22 = vpop.f32.mrf.mxu2 }
 0x420   : > { %17059 = vst [vmem:[#allocation44_spill] sm:$0xff] %v16012_v15  ;;  %v17060_v26 = vshll.u32 %v15953_v51, 16  ;;  %v7495_v49 = vsel %vm14183_vm10, %v7490_v56, %v7494_v4  ;;  %v7510_v33 = vshrl.u32 %v7323_v11, 16  ;;  %v6514_v2 = vld [vmem:[#allocation3 + $0xa8] sm:$0xf]  ;;  %v10411_v24 = vadd.f32 %v15797_v0, %v15713_v62  ;;  %v10588_v40 = vpop.f32.mrf.mxu0  ;;  %v10499_v30 = vpop.f32.mrf.mxu3 }
 0x421   : > { %6962 = vst [vmem:[#allocation4 + $0x3ac] sm:$0xf] %v6845_v48  ;;  %v12854_v55 = vld [vmem:[#allocation4 + $0x368] sm:$0xf]  ;;  %v13629_v47 = vld [vmem:[#allocation4 + $0x36c] sm:$0xf] }
 0x422   : > { %6963 = vst [vmem:[#allocation4 + $0x3d0] sm:$0xf] %v6855_v3  ;;  %v16024_v23 = vrot.slane %v17060_v26, 5  ;;  %v16028_v21 = vld [vmem:[#allocation3 + $0x20] sm:$0x1]  ;;  %v12855_v9 = vor.u32 %v13633_v25, %v12854_v55  ;;  %v7499_v14 = vrot.slane %v7497_v38, 4  ;;  %v10500_v56 = vadd.f32 %v10499_v30, %v10411_v24 }
 0x423   : > { %7235 = vst [vmem:[#allocation4 + $0x3d4] sm:$0xf] %v7161_v37  ;;  %v12856_v61 = vld [vmem:[#allocation4 + $0x38c] sm:$0xf0]  ;;  %v7324_v39 = vld [vmem:[#allocation3 + $0x5c] sm:$0x1]  ;;  %v16036_v59 = vpop.f32.mrf.mxu1 }
 0x424   : > { %7777 = vst [vmem:[#allocation4 + $0x154] sm:$0xf] %v7471_v13  ;;  %v7502_v18 = vrot.slane %v7500_v45, 5  ;;  %v16034_v10 = vrot.slane %v7506_v60, 5  ;;  %v13733_v48 = vld [vmem:[#allocation5 + $0x228] sm:$0xff]  ;;  %v6857_v62 = vshrl.u32 %v6514_v2, 16  ;;  %v12859_v4 = vor.u32 %v13629_v47, %v12856_v61 }
 0x425   : > { %7778 = vst [vmem:[#allocation4 + $0x178] sm:$0xf] %v7485_v20  ;;  %v13717_v37 = vld [vmem:[#allocation5 + $0x1a8] sm:$0xff]  ;;  %v6860_v1 = vshll.u32 %v6514_v2, 16  ;;  %v7512_v11 = vrot.slane %v7510_v33, 4  ;;  %v17062_v3 = vshrl.u32 %v15953_v51, 16  ;;  %10627 = vmatmul.bf16.gmra.mxu0 %v12855_v9  ;;  %v16042_v45 = vadd.f32 %v10588_v40, %v10500_v56  ;;  %11095 = vmatpush.bf16.msra.mxu2 %v13733_v48 }
 0x426   : > { %7779 = vst [vmem:[#allocation4 + $0x19c] sm:$0xf] %v7495_v49  ;;  %v6515_v20 = vld [vmem:[#allocation3 + $0xac] sm:$0xf]  ;;  %v6516_v26 = vld [vmem:[#allocation3 + $0xb0] sm:$0x1]  ;;  %10917 = vmatpush.bf16.msra.mxu0 %v13717_v37  ;;  %10716 = vmatmul.bf16.gmra.mxu1 %v12859_v4  ;;  %v7503_v24 = vor.u32 %v7502_v18, %v7499_v14 }
 0x427   : > { %17061 = vst [vmem:[#allocation45_spill] sm:$0xff] %v16036_v59  ;;  %v16040_v13 = vrot.slane %v17062_v3, 4  ;;  %v7516_v38 = vshll.u32 %v7324_v39, 16  ;;  %v6859_v60 = vrot.slane %v6857_v62, 4  ;;  %v6862_v25 = vrot.slane %v6860_v1, 5  ;;  %v16050_v14 = vpop.f32.mrf.mxu2 }
 0x428   : > { %17063 = vst [vmem:[#allocation46_spill] sm:$0xff] %v16042_v45  ;;  %v6866_v49 = vshll.u32 %v6515_v20, 16  ;;  %v8205_v55 = vshll.u32 %v16028_v21, 16  ;;  %v13553_v33 = vld [vmem:[#allocation4 + $0x108] sm:$0xf0]  ;;  %v6870_v2 = vshrl.u32 %v6515_v20, 16  ;;  %v7513_v40 = vor.u32 %v7512_v11, %v16034_v10  ;;  %v10590_v4 = vpop.f32.mrf.mxu0  ;;  %v10501_v11 = vpop.f32.mrf.mxu3 }
 0x429   : > { %v7010_v51 = vld [vmem:[#allocation3 + $0xa8] sm:$0xe]  ;;  %v12538_v30 = vld [vmem:[#allocation4 + $0xe8] sm:$0xf]  ;;  %v6863_v9 = vor.u32 %v6862_v25, %v6859_v60  ;;  %v6876_v61 = vshll.u32 %v6516_v26, 16  ;;  %v8202_v39 = vor.u32 %v16040_v13, %v16024_v23  ;;  %v10413_v1 = vadd.f32 %v15797_v0, %v15739_v44 }
 0x42a   : > { %v6868_v47 = vrot.slane %v6866_v49, 5  ;;  %v7011_v3 = vld [vmem:[#allocation3 + $0xac] sm:$0xf]  ;;  %v6872_v56 = vrot.slane %v6870_v2, 4  ;;  %v7012_v48 = vld [vmem:[#allocation3 + $0xb0] sm:$0x1]  ;;  %v12539_v18 = vor.u32 %v13553_v33, %v12538_v30 }
 0x42b   : > { %v12378_v37 = vrot.slane %v7010_v51, 9  ;;  %v7164_v62 = vrot.slane %v7011_v3, 5  ;;  %v13725_v21 = vld [vmem:[#allocation5 + $0x1e8] sm:$0xff]  ;;  %v12884_v20 = vld [vmem:[#allocation4 + $0x3cc] sm:$0xf0]  ;;  %v6864_v26 = vrot.slane %v6863_v9, 4  ;;  %v16054_v3 = vpop.f32.mrf.mxu1  ;;  %v10502_v44 = vadd.f32 %v10501_v11, %v10413_v1 }
 0x42c   : > { %v7268_v60 = vld [vmem:[#allocation3 + $0xb4] sm:$0xf]  ;;  %v7518_v25 = vrot.slane %v7516_v38, 5  ;;  %v13637_v49 = vld [vmem:[#allocation4 + $0x3ac] sm:$0xf]  ;;  %v6873_v59 = vor.u32 %v6872_v56, %v6868_v47  ;;  %v7167_v51 = vrot.slane %v7012_v48, 5  ;;  %11006 = vmatpush.bf16.msra.mxu1 %v13725_v21 }
 0x42d   : > { %v7165_v13 = vsel %vm14209_vm11, %v12378_v37, %v7164_v62  ;;  %v7166_v2 = vrot.slane %v7164_v62, 4  ;;  %7300 = vst [vmem:[#allocation4 + $0x3fc] sm:$0xf] %v7268_v60  ;;  %v6869_v0 = vsel %vm14183_vm10, %v6864_v26, %v6868_v47  ;;  %v7269_v33 = vld [vmem:[#allocation3 + $0xb8] sm:$0xf]  ;;  %v7504_v30 = vrot.slane %v7503_v24, 4  ;;  %10760 = vmatmul.bf16.gmra.mxu2 %v12539_v18 }
 0x42e   : > { %17064 = vst [vmem:[#allocation47_spill] sm:$0xff] %v16054_v3  ;;  %v7514_v38 = vrot.slane %v7513_v40, 4  ;;  %v16058_v9 = vld [vmem:[#allocation3 + $0x24] sm:$0xf]  ;;  %v12887_v56 = vor.u32 %v13637_v49, %v12884_v20  ;;  %v6874_v45 = vrot.slane %v6873_v59, 4  ;;  %v6878_v32 = vrot.slane %v6876_v61, 5 }
 0x42f   : > { %7236 = vst [vmem:[#allocation4 + $0x3f8] sm:$0xf] %v7165_v13  ;;  %v7168_v48 = vsel %vm14209_vm11, %v7166_v2, %v7167_v51  ;;  %v16062_v37 = vadd.f32 %v10590_v4, %v10502_v44  ;;  %v7509_v47 = vsel %vm14183_vm10, %v7504_v30, %v16034_v10  ;;  %v16067_v62 = vld [vmem:[#allocation3 + $0x18] sm:$0xe]  ;;  %v16069_v24 = vld [vmem:[#allocation3 + $0x1c] sm:$0xf]  ;;  %v8198_v10 = vsel %vm14183_vm10, %v15991_v53, %v16024_v23  ;;  %v16093_v53 = vpop.f32.mrf.mxu2 }
 0x430   : > { %6964 = vst [vmem:[#allocation4 + $0x3f4] sm:$0xf] %v6869_v0  ;;  %v16071_v40 = vrot.slane %v8205_v55, 5  ;;  %v6517_v21 = vld [vmem:[#allocation3 + $0xb4] sm:$0xf]  ;;  %10543 = vmatmul.bf16.gmra.mxu3 %v12887_v56  ;;  %v6879_v59 = vsel %vm14183_vm10, %v6874_v45, %v6878_v32  ;;  %v7519_v61 = vsel %vm14183_vm10, %v7514_v38, %v7518_v25  ;;  %v16081_v55 = vrot.slane %v8202_v39, 4  ;;  %v10593_v60 = vpop.f32.mrf.mxu0  ;;  %v10504_v11 = vpop.f32.mrf.mxu3 }
 0x431   : > { %17065 = vst [vmem:[#allocation48_spill] sm:$0xff] %v16062_v37  ;;  %v13642_v1 = vld [vmem:[#allocation4 + $0x3d0] sm:$0xf0]  ;;  %v8141_v4 = vld [vmem:[#allocation3 + $0x28] sm:$0xf]  ;;  %v16949_v20 = vrot.slane %v16069_v24, 5 }
 0x432   : > { %7237 = vst [vmem:[#allocation4 + $0x41c] sm:$0xf] %v7168_v48  ;;  %v8210_v32 = vshrl.u32 %v16058_v9, 16  ;;  %v16089_v45 = vld [vmem:[%s16945_s4] ss:$0 sm:$0xff]  ;;  %v8219_v13 = vshll.u32 %v8141_v4, 16 }
 0x433   : > { %7301 = vst [vmem:[#allocation4 + $0x420] sm:$0xf] %v7269_v33  ;;  %v10416_v26 = vadd.f32 %v16089_v45, %v15759_v43  ;;  %v12890_v23 = vld [vmem:[#allocation4 + $0x3b0] sm:$0xf]  ;;  %v12892_v39 = vld [vmem:[#allocation4 + $0x3d4] sm:$0xf0]  ;;  %v16097_v43 = vpop.f32.mrf.mxu1 }
 0x434   : > { %6965 = vst [vmem:[#allocation4 + $0x418] sm:$0xf] %v6879_v59  ;;  %v12891_v25 = vor.u32 %v13642_v1, %v12890_v23  ;;  %v16095_v49 = vld [vmem:[#allocation3 + $0x2c] sm:$0x1]  ;;  %v8223_v2 = vshrl.u32 %v8141_v4, 16  ;;  %v13708_v0 = vld [vmem:[#allocation5 + $0x160] sm:$0xff] }
 0x435   : > { %7780 = vst [vmem:[#allocation4 + $0x1c0] sm:$0xf] %v7509_v47  ;;  %v13638_v51 = vld [vmem:[#allocation4 + $0x3b4] sm:$0xf]  ;;  %v10505_v44 = vadd.f32 %v10504_v11, %v10416_v26  ;;  %v13716_v33 = vld [vmem:[#allocation5 + $0x1a0] sm:$0xff]  ;;  %v6881_v30 = vshrl.u32 %v6517_v21, 16  ;;  %10829 = vmatpush.bf16.msra.mxu3 %v13708_v0 }
 0x436   : > { %7781 = vst [vmem:[#allocation4 + $0x1e4] sm:$0xf] %v7519_v61  ;;  %v6884_v38 = vshll.u32 %v6517_v21, 16  ;;  %10632 = vmatmul.bf16.gmra.mxu0 %v12891_v25  ;;  %v12895_v56 = vor.u32 %v13638_v51, %v12892_v39  ;;  %v13724_v48 = vld [vmem:[#allocation5 + $0x1e0] sm:$0xff]  ;;  %v16101_v59 = vrot.slane %v16949_v20, 4  ;;  %v16103_v61 = vrot.slane %v8210_v32, 4 }
 0x437   : > { %8601 = vst [vmem:[#allocation4 + $0x1c] sm:$0xf] %v8198_v10  ;;  %v6518_v47 = vld [vmem:[#allocation3 + $0xb8] sm:$0xf]  ;;  %v8213_v1 = vshll.u32 %v16058_v9, 16  ;;  %v16106_v10 = vadd.f32 %v10593_v60, %v10505_v44  ;;  %10918 = vmatpush.bf16.msra.mxu0 %v13716_v33  ;;  %v6883_v26 = vrot.slane %v6881_v30, 4  ;;  %11007 = vmatpush.bf16.msra.mxu1 %v13724_v48 }
 0x438   : > { %17066 = vst [vmem:[#allocation49_spill] sm:$0xff] %v16097_v43  ;;  %v16108_v4 = vld [vmem:[#allocation4 + $0x150] sm:$0xf0]  ;;  %v6519_v21 = vld [vmem:[#allocation3 + $0xbc] sm:$0x1]  ;;  %v6886_v23 = vrot.slane %v6884_v38, 5  ;;  %10721 = vmatmul.bf16.gmra.mxu1 %v12895_v56  ;;  %v10506_v15 = vpop.f32.mrf.mxu3 }
 0x439   : > { %17067 = vst [vmem:[#allocation50_spill] sm:$0xff] %v16106_v10  ;;  %v6890_v25 = vshll.u32 %v6518_v47, 16  ;;  %v6894_v11 = vshrl.u32 %v6518_v47, 16  ;;  %v13707_v51 = vld [vmem:[#allocation5 + $0x158] sm:$0xff]  ;;  %v16111_v18 = vrot.slane %v8219_v13, 5  ;;  %v16113_v32 = vrot.slane %v8223_v2, 4  ;;  %v10595_v47 = vpop.f32.mrf.mxu0  ;;  %v16119_v2 = vpop.f32.mrf.mxu2 }
 0x43a   : > { %v12574_v9 = vld [vmem:[#allocation4 + $0x130] sm:$0xf]  ;;  %v6887_v44 = vor.u32 %v6886_v23, %v6883_v26  ;;  %v7013_v20 = vld [vmem:[#allocation3 + $0xb4] sm:$0xe]  ;;  %v7014_v0 = vld [vmem:[#allocation3 + $0xb8] sm:$0xf]  ;;  %v10418_v13 = vadd.f32 %v16089_v45, %v15781_v7  ;;  %10830 = vmatpush.bf16.msra.mxu3 %v13707_v51 }
 0x43b   : > { %v12920_v60 = vld [vmem:[#allocation4 + $0x414] sm:$0xf0]  ;;  %v7015_v33 = vld [vmem:[#allocation3 + $0xbc] sm:$0x1]  ;;  %v6892_v43 = vrot.slane %v6890_v25, 5  ;;  %v6896_v30 = vrot.slane %v6894_v11, 4  ;;  %v12575_v25 = vor.u32 %v16108_v4, %v12574_v9  ;;  %v8226_v7 = vor.u32 %v16113_v32, %v16111_v18 }
 0x43c   : > { %v6900_v38 = vshll.u32 %v6519_v21, 16  ;;  %v7270_v10 = vld [vmem:[#allocation3 + $0xc0] sm:$0xf]  ;;  %v16115_v56 = vrot.slane %v8213_v1, 5  ;;  %v6888_v3 = vrot.slane %v6887_v44, 4  ;;  %v12379_v37 = vrot.slane %v7013_v20, 9 }
 0x43d   : > { %v7805_v39 = vld [vmem:[#allocation3 + $0x20] sm:$0x1]  ;;  %v7171_v48 = vrot.slane %v7014_v0, 5  ;;  %v7271_v26 = vld [vmem:[#allocation3 + $0xc4] sm:$0xf]  ;;  %v13715_v23 = vld [vmem:[#allocation5 + $0x198] sm:$0xff]  ;;  %v6897_v11 = vor.u32 %v6896_v30, %v6892_v43  ;;  %v10507_v58 = vadd.f32 %v10506_v15, %v10418_v13  ;;  %10765 = vmatmul.bf16.gmra.mxu2 %v12575_v25 }
 0x43e   : > { %v13646_v21 = vld [vmem:[#allocation4 + $0x3f4] sm:$0xf]  ;;  %v7174_v42 = vrot.slane %v7015_v33, 5  ;;  %7302 = vst [vmem:[#allocation4 + $0x444] sm:$0xf] %v7270_v10  ;;  %v13723_v1 = vld [vmem:[#allocation5 + $0x1d8] sm:$0xff]  ;;  %v6893_v44 = vsel %vm14183_vm10, %v6888_v3, %v6892_v43  ;;  %10919 = vmatpush.bf16.msra.mxu0 %v13715_v23  ;;  %v8216_v15 = vor.u32 %v16115_v56, %v16103_v61 }
 0x43f   : > { %v7172_v20 = vsel %vm14209_vm11, %v12379_v37, %v7171_v48  ;;  %v7173_v51 = vrot.slane %v7171_v48, 4  ;;  %7303 = vst [vmem:[#allocation4 + $0x468] sm:$0xf] %v7271_v26  ;;  %v13706_v0 = vld [vmem:[#allocation5 + $0x150] sm:$0xff]  ;;  %v16128_v9 = vld [vmem:[#allocation3 + $0x30] sm:$0xf]  ;;  %v12923_v33 = vor.u32 %v13646_v21, %v12920_v60  ;;  %11008 = vmatpush.bf16.msra.mxu1 %v13723_v1  ;;  %v16132_v3 = vadd.f32 %v10595_v47, %v10507_v58  ;;  %v16140_v26 = vpop.f32.mrf.mxu1 }
 0x440   : > { %v13714_v4 = vld [vmem:[#allocation5 + $0x190] sm:$0xff]  ;;  %v6898_v10 = vrot.slane %v6897_v11, 4  ;;  %v6902_v30 = vrot.slane %v6900_v38, 5  ;;  %6966 = vst [vmem:[#allocation4 + $0x43c] sm:$0xf] %v6893_v44  ;;  %10831 = vmatpush.bf16.msra.mxu3 %v13706_v0  ;;  %v13705_v13 = vld [vmem:[#allocation5 + $0x148] sm:$0xff]  ;;  %v8208_v60 = vsel %vm14183_vm10, %v16081_v55, %v16071_v40 }
 0x441   : > { %v13722_v32 = vld [vmem:[#allocation5 + $0x1d0] sm:$0xff]  ;;  %v13651_v43 = vld [vmem:[#allocation4 + $0x418] sm:$0xf0]  ;;  %v7175_v37 = vsel %vm14209_vm11, %v7173_v51, %v7174_v42  ;;  %7238 = vst [vmem:[#allocation4 + $0x440] sm:$0xf] %v7172_v20  ;;  %v7908_v38 = vrot.slane %v7805_v39, 5  ;;  %10548 = vmatmul.bf16.gmra.mxu3 %v12923_v33  ;;  %v10598_v51 = vpop.f32.mrf.mxu0  ;;  %v16157_v0 = vpop.f32.mrf.mxu2 }
 0x442   : > { %v7806_v48 = vld [vmem:[#allocation3 + $0x24] sm:$0xe]  ;;  %v6903_v58 = vsel %vm14183_vm10, %v6898_v10, %v6902_v30  ;;  %7239 = vst [vmem:[#allocation4 + $0x464] sm:$0xf] %v7175_v37  ;;  %v17068_v42 = vrot.slane %v16069_v24, 5  ;;  %v17069_v61 = vrot.slane %v16067_v62, 9  ;;  %10920 = vmatpush.bf16.msra.mxu0 %v13714_v4 }
 0x443   : > { %v8075_v47 = vld [vmem:[#allocation3 + $0x24] sm:$0xf]  ;;  %v8227_v23 = vrot.slane %v8226_v7, 4  ;;  %v7807_v40 = vld [vmem:[#allocation3 + $0x28] sm:$0xf]  ;;  %v7909_v25 = vsel %vm14209_vm11, %v16101_v59, %v7908_v38  ;;  %11009 = vmatpush.bf16.msra.mxu1 %v13722_v32  ;;  %v8217_v62 = vrot.slane %v8216_v15, 4  ;;  %v10421_v7 = vadd.f32 %v16089_v45, %v15812_v12  ;;  %v10509_v32 = vpop.f32.mrf.mxu3 }
 0x444   : > { %v7906_v56 = vsel %vm14209_vm11, %v17069_v61, %v17068_v42  ;;  %v12926_v55 = vld [vmem:[#allocation4 + $0x3f8] sm:$0xf]  ;;  %6967 = vst [vmem:[#allocation4 + $0x460] sm:$0xf] %v6903_v58  ;;  %v13713_v39 = vld [vmem:[#allocation5 + $0x188] sm:$0xff]  ;;  %v7912_v1 = vrot.slane %v7807_v40, 5  ;;  %10832 = vmatpush.bf16.msra.mxu3 %v13705_v13 }
 0x445   : > { %v8076_v21 = vld [vmem:[#allocation3 + $0x28] sm:$0xf]  ;;  %v7808_v11 = vld [vmem:[#allocation3 + $0x2c] sm:$0x1]  ;;  %v13721_v24 = vld [vmem:[#allocation5 + $0x1c8] sm:$0xff]  ;;  %v17070_v44 = vshll.u32 %v16095_v49, 16  ;;  %v12927_v10 = vor.u32 %v13651_v43, %v12926_v55  ;;  %v8222_v49 = vsel %vm14183_vm10, %v8217_v62, %v16111_v18  ;;  %v10510_v12 = vadd.f32 %v10509_v32, %v10421_v7 }
 0x446   : > { %8602 = vst [vmem:[#allocation4 + $0x40] sm:$0xf] %v8208_v60  ;;  %v12928_v4 = vld [vmem:[#allocation4 + $0x41c] sm:$0xf0]  ;;  %v7914_v59 = vrot.slane %v7912_v1, 4  ;;  %v8234_v33 = vshrl.u32 %v16128_v9, 16  ;;  %10921 = vmatpush.bf16.msra.mxu0 %v13713_v39 }
 0x447   : > { %v8231_v20 = vrot.slane %v17070_v44, 5  ;;  %8042 = vst [vmem:[#allocation4 + $0x5c] sm:$0xf] %v7906_v56  ;;  %v13647_v30 = vld [vmem:[#allocation4 + $0x3fc] sm:$0xf]  ;;  %v12382_v15 = vrot.slane %v7806_v48, 9  ;;  %10637 = vmatmul.bf16.gmra.mxu0 %v12927_v10  ;;  %11010 = vmatpush.bf16.msra.mxu1 %v13721_v24  ;;  %v16167_v56 = vadd.f32 %v10598_v51, %v10510_v12  ;;  %v16172_v62 = vpop.f32.mrf.mxu1 }
 0x448   : > { %8043 = vst [vmem:[#allocation4 + $0x80] sm:$0xf] %v7909_v25  ;;  %v7915_v37 = vrot.slane %v7808_v11, 5  ;;  %v13704_v60 = vld [vmem:[#allocation5 + $0x140] sm:$0xff]  ;;  %v8144_v58 = vld [vmem:[#allocation3 + $0x34] sm:$0xf]  ;;  %v12931_v43 = vor.u32 %v13647_v30, %v12928_v4 }
 0x449   : > { %v13712_v38 = vld [vmem:[#allocation5 + $0x180] sm:$0xff]  ;;  %8107 = vst [vmem:[#allocation4 + $0x60] sm:$0xf] %v8075_v47  ;;  %v8232_v13 = vsel %vm14183_vm10, %v8227_v23, %v8231_v20  ;;  %v7913_v18 = vsel %vm14209_vm11, %v12382_v15, %v7912_v1  ;;  %v13571_v40 = vld [vmem:[#allocation4 + $0x198] sm:$0xf0]  ;;  %10833 = vmatpush.bf16.msra.mxu3 %v13704_v60  ;;  %v8236_v23 = vrot.slane %v8234_v33, 4  ;;  %v10600_v4 = vpop.f32.mrf.mxu0 }
 0x44a   : > { %v13720_v42 = vld [vmem:[#allocation5 + $0x1c0] sm:$0xff]  ;;  %8108 = vst [vmem:[#allocation4 + $0x84] sm:$0xf] %v8076_v21  ;;  %v7916_v47 = vsel %vm14209_vm11, %v7914_v59, %v7915_v37  ;;  %v8237_v55 = vshll.u32 %v16128_v9, 16  ;;  %10726 = vmatmul.bf16.gmra.mxu1 %v12931_v43  ;;  %v8077_v39 = vld [vmem:[#allocation3 + $0x30] sm:$0xf]  ;;  %10922 = vmatpush.bf16.msra.mxu0 %v13712_v38  ;;  %v10423_v9 = vadd.f32 %v16089_v45, %v15845_v57  ;;  %v16176_v59 = vpop.f32.mrf.mxu2 }
 0x44b   : > { %v13732_v61 = vld [vmem:[#allocation5 + $0x220] sm:$0xff]  ;;  %8603 = vst [vmem:[#allocation4 + $0x64] sm:$0xf] %v8222_v49  ;;  %v8243_v25 = vshll.u32 %v8144_v58, 16  ;;  %v8247_v21 = vshrl.u32 %v8144_v58, 16  ;;  %11011 = vmatpush.bf16.msra.mxu1 %v13720_v42  ;;  %v10511_v30 = vpop.f32.mrf.mxu3 }
 0x44c   : > { %v8145_v48 = vld [vmem:[#allocation3 + $0x38] sm:$0x1]  ;;  %11096 = vmatpush.bf16.msra.mxu2 %v13732_v61  ;;  %8604 = vst [vmem:[#allocation4 + $0x88] sm:$0xf] %v8232_v13  ;;  %v8078_v11 = vld [vmem:[#allocation3 + $0x34] sm:$0xf]  ;;  %v10512_v12 = vadd.f32 %v10511_v30, %v10423_v9 }
 0x44d   : > { %8044 = vst [vmem:[#allocation4 + $0xa4] sm:$0xf] %v7913_v18  ;;  %v8239_v1 = vrot.slane %v8237_v55, 5  ;;  %v8253_v24 = vshll.u32 %v8145_v48, 16  ;;  %v12956_v44 = vld [vmem:[#allocation4 + $0x45c] sm:$0xf0] }
 0x44e   : > { %17071 = vst [vmem:[#allocation51_spill] sm:$0xff] %v16172_v62  ;;  %v8245_v20 = vrot.slane %v8243_v25, 5  ;;  %v8249_v7 = vrot.slane %v8247_v21, 4  ;;  %v8146_v51 = vld [vmem:[#allocation3 + $0x3c] sm:$0xf]  ;;  %v16178_v48 = vadd.f32 %v10600_v4, %v10512_v12 }
 0x44f   : > { %8045 = vst [vmem:[#allocation4 + $0xc8] sm:$0xf] %v7916_v47  ;;  %v12610_v33 = vld [vmem:[#allocation4 + $0x178] sm:$0xf]  ;;  %v8240_v10 = vor.u32 %v8239_v1, %v8236_v23  ;;  %v13655_v49 = vld [vmem:[#allocation4 + $0x43c] sm:$0xf] }
 0x450   : > { %8109 = vst [vmem:[#allocation4 + $0xa8] sm:$0xf] %v8077_v39  ;;  %v12611_v32 = vor.u32 %v13571_v40, %v12610_v33  ;;  %v8250_v15 = vor.u32 %v8249_v7, %v8245_v20  ;;  %v7809_v37 = vld [vmem:[#allocation3 + $0x30] sm:$0xe]  ;;  %v12959_v60 = vor.u32 %v13655_v49, %v12956_v44  ;;  %v8255_v13 = vrot.slane %v8253_v24, 5  ;;  %v16194_v49 = vpop.f32.mrf.mxu1 }
 0x451   : > { %8110 = vst [vmem:[#allocation4 + $0xcc] sm:$0xf] %v8078_v11  ;;  %v8241_v38 = vrot.slane %v8240_v10, 4  ;;  %v7810_v58 = vld [vmem:[#allocation3 + $0x34] sm:$0xf]  ;;  %v12383_v57 = vrot.slane %v7809_v37, 9  ;;  %v10426_v7 = vadd.f32 %v16089_v45, %v15869_v16  ;;  %v10603_v9 = vpop.f32.mrf.mxu0 }
 0x452   : > { %v8251_v43 = vrot.slane %v8250_v15, 4  ;;  %v7811_v42 = vld [vmem:[#allocation3 + $0x38] sm:$0x1]  ;;  %v7919_v61 = vrot.slane %v7810_v58, 5  ;;  %v8258_v18 = vshrl.u32 %v8146_v51, 16  ;;  %17072 = vst [vmem:[#allocation52_spill] sm:$0xff] %v16178_v48  ;;  %10770 = vmatmul.bf16.gmra.mxu2 %v12611_v32  ;;  %10553 = vmatmul.bf16.gmra.mxu3 %v12959_v60  ;;  %v16188_v4 = vpop.f32.mrf.mxu2 }
 0x453   : > { %v8246_v47 = vsel %vm14183_vm10, %v8241_v38, %v8245_v20  ;;  %v7325_v40 = vld [vmem:[#allocation3 + $0x60] sm:$0xf]  ;;  %v13660_v23 = vld [vmem:[#allocation4 + $0x460] sm:$0xf0]  ;;  %v7922_v1 = vrot.slane %v7811_v42, 5  ;;  %v8261_v24 = vshll.u32 %v8146_v51, 16  ;;  %v10514_v37 = vpop.f32.mrf.mxu3 }
 0x454   : > { %v8256_v55 = vsel %vm14183_vm10, %v8251_v43, %v8255_v13  ;;  %8605 = vst [vmem:[#allocation4 + $0xac] sm:$0xf] %v8246_v47  ;;  %v7920_v39 = vsel %vm14209_vm11, %v12383_v57, %v7919_v61  ;;  %v8079_v25 = vld [vmem:[#allocation3 + $0x3c] sm:$0xf]  ;;  %v12964_v21 = vld [vmem:[#allocation4 + $0x464] sm:$0xf0]  ;;  %v10515_v16 = vadd.f32 %v10514_v37, %v10426_v7 }
 0x455   : > { %8606 = vst [vmem:[#allocation4 + $0xd0] sm:$0xf] %v8256_v55  ;;  %v7921_v11 = vrot.slane %v7919_v61, 4  ;;  %v8147_v44 = vld [vmem:[#allocation3 + $0x40] sm:$0xf]  ;;  %v8260_v20 = vrot.slane %v8258_v18, 4 }
 0x456   : > { %8046 = vst [vmem:[#allocation4 + $0xec] sm:$0xf] %v7920_v39  ;;  %v12962_v33 = vld [vmem:[#allocation4 + $0x440] sm:$0xf]  ;;  %v8080_v30 = vld [vmem:[#allocation3 + $0x40] sm:$0xf]  ;;  %v16200_v55 = vadd.f32 %v10603_v9, %v10515_v16 }
 0x457   : > { %v7923_v10 = vsel %vm14209_vm11, %v7921_v11, %v7922_v1  ;;  %8111 = vst [vmem:[#allocation4 + $0xf0] sm:$0xf] %v8079_v25  ;;  %v16192_v32 = vld [vmem:[#allocation3 + $0x1c] sm:$0xf]  ;;  %v12963_v51 = vor.u32 %v13660_v23, %v12962_v33  ;;  %v8263_v12 = vrot.slane %v8261_v24, 5  ;;  %v8267_v60 = vshll.u32 %v8147_v44, 16 }
 0x458   : > { %17073 = vst [vmem:[#allocation53_spill] sm:$0xff] %v16194_v49  ;;  %v13656_v15 = vld [vmem:[#allocation4 + $0x444] sm:$0xf]  ;;  %v7326_v38 = vld [vmem:[#allocation3 + $0x64] sm:$0xf]  ;;  %v7521_v58 = vshrl.u32 %v7325_v40, 16 }
 0x459   : > { %8047 = vst [vmem:[#allocation4 + $0x110] sm:$0xf] %v7923_v10  ;;  %v7327_v13 = vld [vmem:[#allocation3 + $0x68] sm:$0x1]  ;;  %v7524_v43 = vshll.u32 %v7325_v40, 16  ;;  %10642 = vmatmul.bf16.gmra.mxu0 %v12963_v51  ;;  %v12967_v42 = vor.u32 %v13656_v15, %v12964_v21  ;;  %v7530_v18 = vshll.u32 %v7326_v38, 16  ;;  %v8264_v23 = vor.u32 %v8263_v12, %v8260_v20 }
 0x45a   : > { %v16196_v57 = vld [vmem:[#allocation4 + $0x14] sm:$0xf]  ;;  %v16198_v61 = vld [vmem:[#allocation4 + $0x34] sm:$0xf0]  ;;  %v7534_v47 = vshrl.u32 %v7326_v38, 16  ;;  %17074 = vst [vmem:[#allocation54_spill] sm:$0xff] %v16200_v55 }
 0x45b   : > { %8112 = vst [vmem:[#allocation4 + $0x114] sm:$0xf] %v8080_v30  ;;  %v7523_v39 = vrot.slane %v7521_v58, 4  ;;  %v7526_v25 = vrot.slane %v7524_v43, 5  ;;  %v8269_v11 = vrot.slane %v8267_v60, 5  ;;  %10731 = vmatmul.bf16.gmra.mxu1 %v12967_v42  ;;  %v7532_v24 = vrot.slane %v7530_v18, 5  ;;  %v10605_v58 = vpop.f32.mrf.mxu0  ;;  %v16209_v43 = vpop.f32.mrf.mxu2 }
 0x45c   : > { %v7812_v1 = vld [vmem:[#allocation3 + $0x3c] sm:$0xe]  ;;  %v7536_v7 = vrot.slane %v7534_v47, 4  ;;  %v7540_v40 = vshll.u32 %v7327_v13, 16  ;;  %v8148_v33 = vld [vmem:[#allocation3 + $0x44] sm:$0x1]  ;;  %v12435_v51 = vor.u32 %v16196_v57, %v16198_v61  ;;  %v10428_v13 = vadd.f32 %v16089_v45, %v15894_v27 }
 0x45d   : > { %v8265_v21 = vrot.slane %v8264_v23, 4  ;;  %v7527_v15 = vor.u32 %v7526_v25, %v7523_v39  ;;  %v8271_v30 = vshrl.u32 %v8147_v44, 16  ;;  %v7813_v20 = vld [vmem:[#allocation3 + $0x40] sm:$0xf]  ;;  %v8149_v9 = vld [vmem:[#allocation3 + $0x48] sm:$0xf]  ;;  %v10516_v44 = vpop.f32.mrf.mxu3 }
 0x45e   : > { %v7537_v37 = vor.u32 %v7536_v7, %v7532_v24  ;;  %v7814_v60 = vld [vmem:[#allocation3 + $0x44] sm:$0x1]  ;;  %v12384_v16 = vrot.slane %v7812_v1, 9  ;;  %v7926_v38 = vrot.slane %v7813_v20, 5  ;;  %v13580_v42 = vld [vmem:[#allocation4 + $0x1e0] sm:$0xf0]  ;;  %v10517_v7 = vadd.f32 %v10516_v44, %v10428_v13 }
 0x45f   : > { %v8270_v12 = vsel %vm14183_vm10, %v8265_v21, %v8269_v11  ;;  %v7528_v18 = vrot.slane %v7527_v15, 4  ;;  %v8273_v57 = vrot.slane %v8271_v30, 4  ;;  %v8277_v61 = vshll.u32 %v8148_v33, 16  ;;  %v16213_v1 = vld [vmem:[#allocation3 + $0x18] sm:$0xe]  ;;  %v16217_v15 = vpop.f32.mrf.mxu1 }
 0x460   : > { %v7538_v47 = vrot.slane %v7537_v37, 4  ;;  %v7542_v23 = vrot.slane %v7540_v40, 5  ;;  %8607 = vst [vmem:[#allocation4 + $0xf4] sm:$0xf] %v8270_v12  ;;  %v7927_v39 = vsel %vm14209_vm11, %v12384_v16, %v7926_v38  ;;  %v7929_v25 = vrot.slane %v7814_v60, 5 }
 0x461   : > { %v12646_v21 = vld [vmem:[#allocation4 + $0x1c0] sm:$0xf]  ;;  %v7533_v27 = vsel %vm14183_vm10, %v7528_v18, %v7532_v24  ;;  %v8274_v20 = vor.u32 %v8273_v57, %v8269_v11  ;;  %v7928_v10 = vrot.slane %v7926_v38, 4  ;;  %8048 = vst [vmem:[#allocation4 + $0x134] sm:$0xf] %v7927_v39  ;;  %v8282_v37 = vshrl.u32 %v8149_v9, 16 }
 0x462   : > { %17075 = vst [vmem:[#allocation55_spill] sm:$0xff] %v16217_v15  ;;  %v12647_v33 = vor.u32 %v13580_v42, %v12646_v21  ;;  %v7543_v40 = vsel %vm14183_vm10, %v7538_v47, %v7542_v23  ;;  %v8081_v30 = vld [vmem:[#allocation3 + $0x48] sm:$0xf]  ;;  %v8285_v12 = vshll.u32 %v8149_v9, 16  ;;  %v16221_v60 = vadd.f32 %v10605_v58, %v10517_v7  ;;  %v13527_v16 = vld [vmem:[#allocation4 + $0x38] sm:$0xf0]  ;;  %10834 = vmatmul.bf16.vlgmr.msra.gmra.mxu3 %v12435_v51 }
 0x463   : > { %7782 = vst [vmem:[#allocation4 + $0x208] sm:$0xf] %v7533_v27  ;;  %v12440_v13 = vld [vmem:[#allocation4 + $0x3c] sm:$0xf0]  ;;  %v8275_v44 = vrot.slane %v8274_v20, 4  ;;  %v8279_v24 = vrot.slane %v8277_v61, 5  ;;  %v7930_v11 = vsel %vm14209_vm11, %v7928_v10, %v7929_v25  ;;  %v10431_v51 = vadd.f32 %v16089_v45, %v15921_v52  ;;  %v10608_v25 = vpop.f32.mrf.mxu0  ;;  %v16230_v21 = vpop.f32.mrf.mxu2 }
 0x464   : > { %17076 = vst [vmem:[#allocation56_spill] sm:$0xff] %v16221_v60  ;;  %v7815_v38 = vld [vmem:[#allocation3 + $0x48] sm:$0xe]  ;;  %10775 = vmatmul.bf16.gmra.mxu2 %v12647_v33  ;;  %v8082_v42 = vld [vmem:[#allocation3 + $0x4c] sm:$0xf]  ;;  %v8284_v58 = vrot.slane %v8282_v37, 4 }
 0x465   : > { %7783 = vst [vmem:[#allocation4 + $0x22c] sm:$0xf] %v7543_v40  ;;  %v8150_v18 = vld [vmem:[#allocation3 + $0x4c] sm:$0xf]  ;;  %v12438_v47 = vld [vmem:[#allocation4 + $0x18] sm:$0xf]  ;;  %v8280_v9 = vsel %vm14183_vm10, %v8275_v44, %v8279_v24  ;;  %v10519_v52 = vpop.f32.mrf.mxu3 }
 0x466   : > { %8049 = vst [vmem:[#allocation4 + $0x158] sm:$0xf] %v7930_v11  ;;  %v7328_v57 = vld [vmem:[#allocation3 + $0x6c] sm:$0xf]  ;;  %v8287_v23 = vrot.slane %v8285_v12, 5  ;;  %v8291_v39 = vshll.u32 %v8150_v18, 16  ;;  %v12439_v44 = vor.u32 %v13527_v16, %v12438_v47 }
 0x467   : > { %8113 = vst [vmem:[#allocation4 + $0x138] sm:$0xf] %v8081_v30  ;;  %v12396_v61 = vrot.slane %v16213_v1, 9  ;;  %v8295_v7 = vshrl.u32 %v8150_v18, 16  ;;  %v7816_v10 = vld [vmem:[#allocation3 + $0x4c] sm:$0xf]  ;;  %v10433_v1 = vadd.f32 %v16089_v45, %v15948_v5  ;;  %v10520_v18 = vadd.f32 %v10519_v52, %v10431_v51 }
 0x468   : > { %8608 = vst [vmem:[#allocation4 + $0x118] sm:$0xf] %v8280_v9  ;;  %v13523_v27 = vld [vmem:[#allocation4 + $0x1c] sm:$0xf]  ;;  %v8288_v20 = vor.u32 %v8287_v23, %v8284_v58  ;;  %v12385_v33 = vrot.slane %v7815_v38, 9  ;;  %v7933_v40 = vrot.slane %v7816_v10, 5 }
 0x469   : > { %8114 = vst [vmem:[#allocation4 + $0x15c] sm:$0xf] %v8082_v42  ;;  %v16232_v30 = vld [vmem:[#allocation3 + $0x20] sm:$0x1]  ;;  %v17077_v37 = vrot.slane %v16192_v32, 5  ;;  %v12443_v24 = vor.u32 %v13523_v27, %v12440_v13  ;;  %v8293_v42 = vrot.slane %v8291_v39, 5  ;;  %10923 = vmatmul.bf16.vlgmr.msra.gmra.mxu0 %v12439_v44  ;;  %v16242_v49 = vadd.f32 %v10608_v25, %v10520_v18  ;;  %v16244_v27 = vpop.f32.mrf.mxu1 }
 0x46a   : > { %v8151_v11 = vld [vmem:[#allocation3 + $0x50] sm:$0x1]  ;;  %v7330_v60 = vld [vmem:[#allocation3 + $0x74] sm:$0x1]  ;;  %v8297_v58 = vrot.slane %v8295_v7, 4  ;;  %v7934_v38 = vsel %vm14209_vm11, %v12385_v33, %v7933_v40  ;;  %v7545_v10 = vshrl.u32 %v7328_v57, 16 }
 0x46b   : > { %v16236_v12 = vrot.slane %v17077_v37, 4  ;;  %v7329_v9 = vld [vmem:[#allocation3 + $0x70] sm:$0xf]  ;;  %v8152_v23 = vld [vmem:[#allocation3 + $0x54] sm:$0xf]  ;;  %v7548_v37 = vshll.u32 %v7328_v57, 16  ;;  %11012 = vmatmul.bf16.vlgmr.msra.gmra.mxu1 %v12443_v24 }
 0x46c   : > { %v7554_v15 = vshll.u32 %v7329_v9, 16  ;;  %v7558_v55 = vshrl.u32 %v7329_v9, 16  ;;  %17078 = vst [vmem:[#allocation57_spill] sm:$0xff] %v16242_v49  ;;  %v12468_v5 = vld [vmem:[#allocation4 + $0x7c] sm:$0xf0]  ;;  %v7564_v16 = vshll.u32 %v7330_v60, 16  ;;  %v8298_v18 = vor.u32 %v8297_v58, %v8293_v42 }
 0x46d   : > { %v13731_v13 = vld [vmem:[#allocation5 + $0x218] sm:$0xff]  ;;  %v8289_v47 = vrot.slane %v8288_v20, 4  ;;  %v8301_v51 = vshll.u32 %v8151_v11, 16  ;;  %17079 = vst [vmem:[#allocation58_spill] sm:$0xff] %v16244_v27  ;;  %v7547_v39 = vrot.slane %v7545_v10, 4  ;;  %v7550_v7 = vrot.slane %v7548_v37, 5  ;;  %v16253_v37 = vpop.f32.mrf.mxu2 }
 0x46e   : > { %v7556_v52 = vrot.slane %v7554_v15, 5  ;;  %v7560_v33 = vrot.slane %v7558_v55, 4  ;;  %v7817_v48 = vld [vmem:[#allocation3 + $0x50] sm:$0x1]  ;;  %v8734_v44 = vrot.slane %v16232_v30, 5  ;;  %11097 = vmatpush.bf16.msra.mxu2 %v13731_v13  ;;  %v17080_v60 = vrot.slane %v16192_v32, 5  ;;  %v10610_v30 = vpop.f32.mrf.mxu0 }
 0x46f   : > { %v13531_v57 = vld [vmem:[#allocation4 + $0x5c] sm:$0xf]  ;;  %v8294_v25 = vsel %vm14183_vm10, %v8289_v47, %v8293_v42  ;;  %8050 = vst [vmem:[#allocation4 + $0x17c] sm:$0xf] %v7934_v38  ;;  %v12682_v24 = vld [vmem:[#allocation4 + $0x208] sm:$0xf]  ;;  %v7551_v15 = vor.u32 %v7550_v7, %v7547_v39  ;;  %v10521_v38 = vpop.f32.mrf.mxu3 }
 0x470   : > { %v8732_v20 = vsel %vm14209_vm11, %v12396_v61, %v17080_v60  ;;  %v13589_v11 = vld [vmem:[#allocation4 + $0x228] sm:$0xf0]  ;;  %v12471_v9 = vor.u32 %v13531_v57, %v12468_v5  ;;  %v7561_v55 = vor.u32 %v7560_v33, %v7556_v52  ;;  %8609 = vst [vmem:[#allocation4 + $0x13c] sm:$0xf] %v8294_v25  ;;  %v7935_v10 = vrot.slane %v7933_v40, 4 }
 0x471   : > { %v8299_v13 = vrot.slane %v8298_v18, 4  ;;  %v8303_v49 = vrot.slane %v8301_v51, 5  ;;  %v7936_v47 = vrot.slane %v7817_v48, 5  ;;  %v8083_v42 = vld [vmem:[#allocation3 + $0x54] sm:$0xf]  ;;  %v8306_v58 = vshrl.u32 %v8152_v23, 16 }
 0x472   : > { %v7552_v32 = vrot.slane %v7551_v15, 4  ;;  %v7562_v27 = vrot.slane %v7561_v55, 4  ;;  %v7566_v62 = vrot.slane %v7564_v16, 5  ;;  %8115 = vst [vmem:[#allocation4 + $0x180] sm:$0xf] %v8083_v42  ;;  %v8309_v61 = vshll.u32 %v8152_v23, 16  ;;  %10839 = vmatmul.bf16.gmra.mxu3 %v12471_v9 }
 0x473   : > { %v10522_v60 = vadd.f32 %v10521_v38, %v10433_v1  ;;  %v12683_v5 = vor.u32 %v13589_v11, %v12682_v24  ;;  %v8304_v39 = vsel %vm14183_vm10, %v8299_v13, %v8303_v49  ;;  %v7937_v40 = vsel %vm14209_vm11, %v7935_v10, %v7936_v47  ;;  %8873 = vst [vmem:[#allocation4 + $0x20] sm:$0xf] %v8732_v20  ;;  %v8084_v1 = vld [vmem:[#allocation3 + $0x58] sm:$0xf]  ;;  %v13536_v49 = vld [vmem:[#allocation4 + $0x80] sm:$0xf0] }
 0x474   : > { %v7557_v48 = vsel %vm14183_vm10, %v7552_v32, %v7556_v52  ;;  %v7567_v51 = vsel %vm14183_vm10, %v7562_v27, %v7566_v62  ;;  %8610 = vst [vmem:[#allocation4 + $0x160] sm:$0xf] %v8304_v39  ;;  %v8308_v7 = vrot.slane %v8306_v58, 4  ;;  %v8311_v16 = vrot.slane %v8309_v61, 5  ;;  %v8153_v23 = vld [vmem:[#allocation3 + $0x58] sm:$0xf]  ;;  %v16268_v27 = vpop.f32.mrf.mxu1 }
 0x475   : > { %v16263_v33 = vadd.f32 %v10610_v30, %v10522_v60  ;;  %7784 = vst [vmem:[#allocation4 + $0x250] sm:$0xf] %v7557_v48  ;;  %v7331_v57 = vld [vmem:[#allocation3 + $0x78] sm:$0xf]  ;;  %10780 = vmatmul.bf16.gmra.mxu2 %v12683_v5  ;;  %v8154_v18 = vld [vmem:[#allocation3 + $0x5c] sm:$0x1]  ;;  %v8735_v62 = vsel %vm14209_vm11, %v16236_v12, %v8734_v44  ;;  %v10436_v15 = vadd.f32 %v16089_v45, %v15982_v8  ;;  %v16272_v55 = vpop.f32.mrf.mxu2 }
 0x476   : > { %7785 = vst [vmem:[#allocation4 + $0x274] sm:$0xf] %v7567_v51  ;;  %v8312_v25 = vor.u32 %v8311_v16, %v8308_v7  ;;  %v8315_v52 = vshll.u32 %v8153_v23, 16  ;;  %v8319_v20 = vshrl.u32 %v8153_v23, 16  ;;  %v12474_v24 = vld [vmem:[#allocation4 + $0x60] sm:$0xf]  ;;  %v10613_v9 = vpop.f32.mrf.mxu0 }
 0x477   : > { %8051 = vst [vmem:[#allocation4 + $0x1a0] sm:$0xf] %v7937_v40  ;;  %v12476_v11 = vld [vmem:[#allocation4 + $0x84] sm:$0xf0]  ;;  %v13532_v10 = vld [vmem:[#allocation4 + $0x64] sm:$0xf]  ;;  %v12475_v42 = vor.u32 %v13536_v49, %v12474_v24  ;;  %v10524_v58 = vpop.f32.mrf.mxu3 }
 0x478   : > { %8116 = vst [vmem:[#allocation4 + $0x1a4] sm:$0xf] %v8084_v1  ;;  %v8317_v30 = vrot.slane %v8315_v52, 5  ;;  %v8321_v13 = vrot.slane %v8319_v20, 4  ;;  %v7819_v47 = vld [vmem:[#allocation3 + $0x58] sm:$0xf]  ;;  %v12479_v44 = vor.u32 %v13532_v10, %v12476_v11  ;;  %v10525_v61 = vadd.f32 %v10524_v58, %v10436_v15 }
 0x479   : > { %v8313_v38 = vrot.slane %v8312_v25, 4  ;;  %v8325_v32 = vshll.u32 %v8154_v18, 16  ;;  %v7818_v12 = vld [vmem:[#allocation3 + $0x54] sm:$0xe]  ;;  %8874 = vst [vmem:[#allocation4 + $0x44] sm:$0xf] %v8735_v62  ;;  %10928 = vmatmul.bf16.gmra.mxu0 %v12475_v42 }
 0x47a   : > { %v7332_v60 = vld [vmem:[#allocation3 + $0x7c] sm:$0xf]  ;;  %v7333_v5 = vld [vmem:[#allocation3 + $0x80] sm:$0x1]  ;;  %v7569_v39 = vshrl.u32 %v7331_v57, 16  ;;  %v7572_v40 = vshll.u32 %v7331_v57, 16  ;;  %v16276_v1 = vadd.f32 %v10613_v9, %v10525_v61  ;;  %v8322_v25 = vor.u32 %v8321_v13, %v8317_v30 }
 0x47b   : > { %v7578_v8 = vshll.u32 %v7332_v60, 16  ;;  %v7582_v48 = vshrl.u32 %v7332_v60, 16  ;;  %v8318_v51 = vsel %vm14183_vm10, %v8313_v38, %v8317_v30  ;;  %v7940_v7 = vrot.slane %v7819_v47, 5  ;;  %v8155_v16 = vld [vmem:[#allocation3 + $0x60] sm:$0xf]  ;;  %11017 = vmatmul.bf16.gmra.mxu1 %v12479_v44 }
 0x47c   : > { %v7571_v23 = vrot.slane %v7569_v39, 4  ;;  %v7574_v49 = vrot.slane %v7572_v40, 5  ;;  %v7588_v20 = vshll.u32 %v7333_v5, 16  ;;  %v7820_v62 = vld [vmem:[#allocation3 + $0x5c] sm:$0x1]  ;;  %v12386_v24 = vrot.slane %v7818_v12, 9  ;;  %v16286_v39 = vpop.f32.mrf.mxu1 }
 0x47d   : > { %v7580_v18 = vrot.slane %v7578_v8, 5  ;;  %v7584_v52 = vrot.slane %v7582_v48, 4  ;;  %v12504_v57 = vld [vmem:[#allocation4 + $0xc4] sm:$0xf0]  ;;  %v8323_v15 = vrot.slane %v8322_v25, 4  ;;  %v8327_v10 = vrot.slane %v8325_v32, 5  ;;  %v16282_v61 = vpop.f32.mrf.mxu2 }
 0x47e   : > { %v7575_v11 = vor.u32 %v7574_v49, %v7571_v23  ;;  %8611 = vst [vmem:[#allocation4 + $0x184] sm:$0xf] %v8318_v51  ;;  %v10438_v47 = vadd.f32 %v16089_v45, %v16002_v50  ;;  %v13598_v42 = vld [vmem:[#allocation4 + $0x270] sm:$0xf0]  ;;  %v13540_v9 = vld [vmem:[#allocation4 + $0xa4] sm:$0xf]  ;;  %v7941_v30 = vsel %vm14209_vm11, %v12386_v24, %v7940_v7  ;;  %v10615_v44 = vpop.f32.mrf.mxu0 }
 0x47f   : > { %v7585_v58 = vor.u32 %v7584_v52, %v7580_v18  ;;  %v7942_v13 = vrot.slane %v7940_v7, 4  ;;  %v8085_v38 = vld [vmem:[#allocation3 + $0x60] sm:$0xf]  ;;  %v8328_v60 = vsel %vm14183_vm10, %v8323_v15, %v8327_v10  ;;  %v7943_v32 = vrot.slane %v7820_v62, 5  ;;  %8052 = vst [vmem:[#allocation4 + $0x1c4] sm:$0xf] %v7941_v30  ;;  %v10526_v50 = vpop.f32.mrf.mxu3 }
 0x480   : > { %v7576_v12 = vrot.slane %v7575_v11, 4  ;;  %v8330_v5 = vshrl.u32 %v8155_v16, 16  ;;  %v7590_v8 = vrot.slane %v7588_v20, 5  ;;  %8612 = vst [vmem:[#allocation4 + $0x1a8] sm:$0xf] %v8328_v60  ;;  %v8333_v48 = vshll.u32 %v8155_v16, 16 }
 0x481   : > { %v7586_v40 = vrot.slane %v7585_v58, 4  ;;  %v10527_v51 = vadd.f32 %v10526_v50, %v10438_v47  ;;  %v12718_v7 = vld [vmem:[#allocation4 + $0x250] sm:$0xf]  ;;  %v12507_v23 = vor.u32 %v13540_v9, %v12504_v57  ;;  %v13545_v49 = vld [vmem:[#allocation4 + $0xc8] sm:$0xf0]  ;;  %v7944_v62 = vsel %vm14209_vm11, %v7942_v13, %v7943_v32 }
 0x482   : > { %v16288_v25 = vld [vmem:[#allocation4 + $0xcc] sm:$0xf0]  ;;  %v7581_v52 = vsel %vm14183_vm10, %v7576_v12, %v7580_v18  ;;  %8117 = vst [vmem:[#allocation4 + $0x1c8] sm:$0xf] %v8085_v38  ;;  %v12719_v24 = vor.u32 %v13598_v42, %v12718_v7  ;;  %v8332_v16 = vrot.slane %v8330_v5, 4  ;;  %v8335_v15 = vrot.slane %v8333_v48, 5 }
 0x483   : > { %v7591_v11 = vsel %vm14183_vm10, %v7586_v40, %v7590_v8  ;;  %7786 = vst [vmem:[#allocation4 + $0x298] sm:$0xf] %v7581_v52  ;;  %v16296_v20 = vld [vmem:[#allocation4 + $0x10c] sm:$0xf0]  ;;  %v16298_v57 = vadd.f32 %v10615_v44, %v10527_v51  ;;  %v12510_v10 = vld [vmem:[#allocation4 + $0xa8] sm:$0xf]  ;;  %10844 = vmatmul.bf16.gmra.mxu3 %v12507_v23  ;;  %v10441_v12 = vadd.f32 %v16089_v45, %v16032_v22 }
 0x484   : > { %v13541_v47 = vld [vmem:[#allocation4 + $0xac] sm:$0xf]  ;;  %7787 = vst [vmem:[#allocation4 + $0x2bc] sm:$0xf] %v7591_v11  ;;  %v8157_v42 = vld [vmem:[#allocation3 + $0x68] sm:$0x1]  ;;  %v8336_v13 = vor.u32 %v8335_v15, %v8332_v16  ;;  %v16308_v44 = vadd.f32 %v16089_v45, %v16050_v14  ;;  %v10658_v50 = vadd.f32 %v15826_v35, %v15834_v34  ;;  %v12511_v40 = vor.u32 %v13545_v49, %v12510_v10 }
 0x485   : > { %v16300_v9 = vld [vmem:[#allocation4 + $0xec] sm:$0xf]  ;;  %10785 = vmatmul.bf16.gmra.mxu2 %v12719_v24  ;;  %8053 = vst [vmem:[#allocation4 + $0x1e8] sm:$0xf] %v7944_v62  ;;  %v16302_v38 = vld [vmem:[#allocation3 + $0x28] sm:$0xf]  ;;  %v12515_v8 = vor.u32 %v13541_v47, %v16288_v25  ;;  %v10746_v23 = vpop.f32.mrf.mxu2 }
 0x486   : > { %v8086_v18 = vld [vmem:[#allocation3 + $0x64] sm:$0xf]  ;;  %v7821_v5 = vld [vmem:[#allocation3 + $0x60] sm:$0xe]  ;;  %v10618_v22 = vpop.f32.mrf.mxu0  ;;  %v8337_v52 = vrot.slane %v8336_v13, 4  ;;  %v8349_v62 = vshll.u32 %v8157_v42, 16  ;;  %v16315_v24 = vadd.f32 %v10746_v23, %v10658_v50 }
 0x487   : > { %v8156_v58 = vld [vmem:[#allocation3 + $0x64] sm:$0xf]  ;;  %8118 = vst [vmem:[#allocation4 + $0x1ec] sm:$0xf] %v8086_v18  ;;  %v10529_v11 = vpop.f32.mrf.mxu3  ;;  %v12387_v16 = vrot.slane %v7821_v5, 9  ;;  %v8738_v35 = vrot.slane %v16302_v38, 5 }
 0x488   : > { %v8636_v30 = vld [vmem:[#allocation3 + $0x24] sm:$0xe]  ;;  %v8339_v60 = vshll.u32 %v8156_v58, 16  ;;  %v8343_v32 = vshrl.u32 %v8156_v58, 16  ;;  %v10530_v34 = vadd.f32 %v10529_v11, %v10441_v12  ;;  %v7335_v49 = vld [vmem:[#allocation3 + $0x88] sm:$0xf]  ;;  %v16320_v58 = vpop.f32.mrf.mxu1 }
 0x489   : > { %v7822_v51 = vld [vmem:[#allocation3 + $0x64] sm:$0xf]  ;;  %v12397_v15 = vrot.slane %v8636_v30, 9  ;;  %v7336_v25 = vld [vmem:[#allocation3 + $0x8c] sm:$0x1]  ;;  %10933 = vmatmul.bf16.gmra.mxu0 %v12511_v40  ;;  %v8351_v23 = vrot.slane %v8349_v62, 5  ;;  %v10660_v40 = vadd.f32 %v15848_v19, %v15852_v6 }
 0x48a   : > { %v7334_v7 = vld [vmem:[#allocation3 + $0x84] sm:$0xf]  ;;  %v8341_v14 = vrot.slane %v8339_v60, 5  ;;  %v8345_v45 = vrot.slane %v8343_v32, 4  ;;  %v7947_v18 = vrot.slane %v7822_v51, 5  ;;  %v7602_v60 = vshll.u32 %v7335_v49, 16 }
 0x48b   : > { %v7593_v13 = vshrl.u32 %v7334_v7, 16  ;;  %v7596_v42 = vshll.u32 %v7334_v7, 16  ;;  %v7606_v32 = vshrl.u32 %v7335_v49, 16  ;;  %v8158_v50 = vld [vmem:[#allocation3 + $0x6c] sm:$0xf]  ;;  %v16322_v5 = vadd.f32 %v10618_v22, %v10530_v34  ;;  %11022 = vmatmul.bf16.gmra.mxu1 %v12515_v8 }
 0x48c   : > { %v8342_v10 = vsel %vm14183_vm10, %v8337_v52, %v8341_v14  ;;  %v8346_v47 = vor.u32 %v8345_v45, %v8341_v14  ;;  %v7612_v30 = vshll.u32 %v7336_v25, 16  ;;  %v13730_v38 = vld [vmem:[#allocation5 + $0x210] sm:$0xff]  ;;  %v7604_v52 = vrot.slane %v7602_v60, 5  ;;  %v12754_v62 = vld [vmem:[#allocation4 + $0x298] sm:$0xf] }
 0x48d   : > { %17081 = vst [vmem:[#allocation59_spill] sm:$0xff] %v16322_v5  ;;  %v7595_v11 = vrot.slane %v7593_v13, 4  ;;  %v7598_v48 = vrot.slane %v7596_v42, 5  ;;  %v7608_v14 = vrot.slane %v7606_v32, 4  ;;  %v7823_v51 = vld [vmem:[#allocation3 + $0x68] sm:$0x1]  ;;  %11098 = vmatpush.bf16.msra.mxu2 %v13730_v38  ;;  %v8739_v34 = vsel %vm14209_vm11, %v12397_v15, %v8738_v35  ;;  %v10748_v6 = vpop.f32.mrf.mxu2 }
 0x48e   : > { %v8347_v12 = vrot.slane %v8346_v47, 4  ;;  %8613 = vst [vmem:[#allocation4 + $0x1cc] sm:$0xf] %v8342_v10  ;;  %v8087_v22 = vld [vmem:[#allocation3 + $0x6c] sm:$0xf]  ;;  %v7948_v47 = vsel %vm14209_vm11, %v12387_v16, %v7947_v18  ;;  %v7949_v13 = vrot.slane %v7947_v18, 4  ;;  %v10620_v19 = vpop.f32.mrf.mxu0  ;;  %v16332_v38 = vadd.f32 %v10748_v6, %v10660_v40 }
 0x48f   : > { %v8638_v45 = vld [vmem:[#allocation3 + $0x2c] sm:$0x1]  ;;  %v13607_v8 = vld [vmem:[#allocation4 + $0x2b8] sm:$0xf0]  ;;  %v7599_v49 = vor.u32 %v7598_v48, %v7595_v11  ;;  %v7609_v25 = vor.u32 %v7608_v14, %v7604_v52  ;;  %v7950_v42 = vrot.slane %v7823_v51, 5  ;;  %v8354_v60 = vshrl.u32 %v8158_v50, 16 }
 0x490   : > { %v8352_v7 = vsel %vm14183_vm10, %v8347_v12, %v8351_v23  ;;  %8054 = vst [vmem:[#allocation4 + $0x20c] sm:$0xf] %v7948_v47  ;;  %v8357_v10 = vshll.u32 %v8158_v50, 16  ;;  %v8740_v32 = vrot.slane %v8738_v35, 4  ;;  %v10531_v12 = vpop.f32.mrf.mxu3  ;;  %v7614_v5 = vrot.slane %v7612_v30, 5 }
 0x491   : > { %8614 = vst [vmem:[#allocation4 + $0x1f0] sm:$0xf] %v8352_v7  ;;  %v7600_v15 = vrot.slane %v7599_v49, 4  ;;  %v7610_v23 = vrot.slane %v7609_v25, 4  ;;  %v10532_v48 = vadd.f32 %v10531_v12, %v16308_v44  ;;  %v12755_v11 = vor.u32 %v13607_v8, %v12754_v62  ;;  %v8088_v30 = vld [vmem:[#allocation3 + $0x70] sm:$0xf] }
 0x492   : > { %8119 = vst [vmem:[#allocation4 + $0x210] sm:$0xf] %v8087_v22  ;;  %v7951_v16 = vsel %vm14209_vm11, %v7949_v13, %v7950_v42  ;;  %v8356_v18 = vrot.slane %v8354_v60, 4  ;;  %v8359_v50 = vrot.slane %v8357_v10, 5  ;;  %v8741_v51 = vrot.slane %v8638_v45, 5  ;;  %v16343_v22 = vpop.f32.mrf.mxu1 }
 0x493   : > { %8875 = vst [vmem:[#allocation4 + $0x68] sm:$0xf] %v8739_v34  ;;  %v7605_v14 = vsel %vm14183_vm10, %v7600_v15, %v7604_v52  ;;  %v7615_v35 = vsel %vm14183_vm10, %v7610_v23, %v7614_v5  ;;  %v16341_v40 = vadd.f32 %v10620_v19, %v10532_v48  ;;  %v8159_v44 = vld [vmem:[#allocation3 + $0x70] sm:$0xf]  ;;  %v17082_v34 = vor.u32 %v16300_v9, %v16296_v20  ;;  %v13554_v52 = vld [vmem:[#allocation4 + $0x110] sm:$0xf0] }
 0x494   : > { %8055 = vst [vmem:[#allocation4 + $0x230] sm:$0xf] %v7951_v16  ;;  %v7337_v7 = vld [vmem:[#allocation3 + $0x90] sm:$0xf]  ;;  %v8360_v62 = vor.u32 %v8359_v50, %v8356_v18  ;;  %v8160_v5 = vld [vmem:[#allocation3 + $0x74] sm:$0x1]  ;;  %v8742_v49 = vsel %vm14209_vm11, %v8740_v32, %v8741_v51  ;;  %v10663_v20 = vadd.f32 %v15875_v63, %v15878_v31 }
 0x495   : > { %7788 = vst [vmem:[#allocation4 + $0x2e0] sm:$0xf] %v7605_v14  ;;  %10790 = vmatmul.bf16.gmra.mxu2 %v12755_v11  ;;  %10849 = vmatmul.bf16.gmra.mxu3 %v17082_v34  ;;  %v8363_v8 = vshll.u32 %v8159_v44, 16  ;;  %v8367_v45 = vshrl.u32 %v8159_v44, 16  ;;  %v16353_v25 = vld [vmem:[%s16945_s4] ss:$0 sm:$0xff]  ;;  %v10751_v60 = vpop.f32.mrf.mxu2 }
 0x496   : > { %7789 = vst [vmem:[#allocation4 + $0x304] sm:$0xf] %v7615_v35  ;;  %v10446_v47 = vadd.f32 %v16353_v25, %v16093_v53  ;;  %v12546_v9 = vld [vmem:[#allocation4 + $0xf0] sm:$0xf]  ;;  %v12548_v13 = vld [vmem:[#allocation4 + $0x114] sm:$0xf0]  ;;  %v16361_v6 = vadd.f32 %v16353_v25, %v16119_v2  ;;  %v10623_v42 = vpop.f32.mrf.mxu0  ;;  %v16363_v48 = vadd.f32 %v10751_v60, %v10663_v20 }
 0x497   : > { %8120 = vst [vmem:[#allocation4 + $0x234] sm:$0xf] %v8088_v30  ;;  %v7825_v19 = vld [vmem:[#allocation3 + $0x70] sm:$0xf]  ;;  %v12547_v10 = vor.u32 %v13554_v52, %v12546_v9  ;;  %v13550_v32 = vld [vmem:[#allocation4 + $0xf4] sm:$0xf] }
 0x498   : > { %v8365_v12 = vrot.slane %v8363_v8, 5  ;;  %v8369_v15 = vrot.slane %v8367_v45, 4  ;;  %v7824_v23 = vld [vmem:[#allocation3 + $0x6c] sm:$0xe]  ;;  %v10534_v53 = vpop.f32.mrf.mxu3  ;;  %v8361_v11 = vrot.slane %v8360_v62, 4  ;;  %v8373_v16 = vshll.u32 %v8160_v5, 16 }
 0x499   : > { %v7954_v63 = vrot.slane %v7825_v19, 5  ;;  %8876 = vst [vmem:[#allocation4 + $0x8c] sm:$0xf] %v8742_v49  ;;  %v12551_v31 = vor.u32 %v13550_v32, %v12548_v13  ;;  %v10535_v18 = vadd.f32 %v10534_v53, %v10446_v47  ;;  %v7338_v14 = vld [vmem:[#allocation3 + $0x94] sm:$0xf]  ;;  %v7617_v2 = vshrl.u32 %v7337_v7, 16  ;;  %10938 = vmatmul.bf16.gmra.mxu0 %v12547_v10 }
 0x49a   : > { %v7339_v35 = vld [vmem:[#allocation3 + $0x98] sm:$0x1]  ;;  %v7620_v50 = vshll.u32 %v7337_v7, 16  ;;  %v7626_v51 = vshll.u32 %v7338_v14, 16  ;;  %v7630_v30 = vshrl.u32 %v7338_v14, 16  ;;  %v8366_v34 = vsel %vm14183_vm10, %v8361_v11, %v8365_v12 }
 0x49b   : > { %v7636_v44 = vshll.u32 %v7339_v35, 16  ;;  %v7826_v52 = vld [vmem:[#allocation3 + $0x74] sm:$0x1]  ;;  %v8161_v8 = vld [vmem:[#allocation3 + $0x78] sm:$0xf]  ;;  %v16367_v45 = vadd.f32 %v10623_v42, %v10535_v18  ;;  %v7619_v62 = vrot.slane %v7617_v2, 4  ;;  %v8370_v49 = vor.u32 %v8369_v15, %v8365_v12  ;;  %11027 = vmatmul.bf16.gmra.mxu1 %v12551_v31  ;;  %v16373_v18 = vpop.f32.mrf.mxu1 }
 0x49c   : > { %v7622_v5 = vrot.slane %v7620_v50, 5  ;;  %v12576_v47 = vld [vmem:[#allocation4 + $0x154] sm:$0xf0]  ;;  %v7628_v20 = vrot.slane %v7626_v51, 5  ;;  %v7632_v9 = vrot.slane %v7630_v30, 4  ;;  %v8375_v13 = vrot.slane %v8373_v16, 5 }
 0x49d   : > { %v12388_v7 = vrot.slane %v7824_v23, 9  ;;  %v10665_v19 = vadd.f32 %v15897_v36, %v15903_v17  ;;  %v8371_v10 = vrot.slane %v8370_v49, 4  ;;  %8615 = vst [vmem:[#allocation4 + $0x214] sm:$0xf] %v8366_v34  ;;  %v7957_v32 = vrot.slane %v7826_v52, 5  ;;  %v10753_v36 = vpop.f32.mrf.mxu2 }
 0x49e   : > { %v7623_v60 = vor.u32 %v7622_v5, %v7619_v62  ;;  %v8089_v53 = vld [vmem:[#allocation3 + $0x78] sm:$0xf]  ;;  %v8639_v11 = vld [vmem:[#allocation3 + $0x30] sm:$0xe]  ;;  %v16371_v42 = vld [vmem:[#allocation3 + $0x34] sm:$0xf]  ;;  %v7633_v15 = vor.u32 %v7632_v9, %v7628_v20  ;;  %v10625_v14 = vpop.f32.mrf.mxu0 }
 0x49f   : > { %v13616_v12 = vld [vmem:[#allocation4 + $0x300] sm:$0xf0]  ;;  %v7955_v31 = vsel %vm14209_vm11, %v12388_v7, %v7954_v63  ;;  %v7956_v16 = vrot.slane %v7954_v63, 4  ;;  %8121 = vst [vmem:[#allocation4 + $0x258] sm:$0xf] %v8089_v53  ;;  %v8378_v23 = vshrl.u32 %v8161_v8, 16  ;;  %v8376_v2 = vsel %vm14183_vm10, %v8371_v10, %v8375_v13 }
 0x4a0   : > { %v7624_v17 = vrot.slane %v7623_v60, 4  ;;  %v7638_v35 = vrot.slane %v7636_v44, 5  ;;  %8056 = vst [vmem:[#allocation4 + $0x254] sm:$0xf] %v7955_v31  ;;  %v8381_v50 = vshll.u32 %v8161_v8, 16  ;;  %v16379_v51 = vadd.f32 %v10753_v36, %v10665_v19  ;;  %v10536_v30 = vpop.f32.mrf.mxu3 }
 0x4a1   : > { %v13558_v34 = vld [vmem:[#allocation4 + $0x134] sm:$0xf]  ;;  %v7634_v52 = vrot.slane %v7633_v15, 4  ;;  %8616 = vst [vmem:[#allocation4 + $0x238] sm:$0xf] %v8376_v2  ;;  %v7958_v63 = vsel %vm14209_vm11, %v7956_v16, %v7957_v32  ;;  %v8380_v62 = vrot.slane %v8378_v23, 4  ;;  %v10537_v5 = vadd.f32 %v10536_v30, %v16361_v6 }
 0x4a2   : > { %v12790_v49 = vld [vmem:[#allocation4 + $0x2e0] sm:$0xf]  ;;  %v12579_v9 = vor.u32 %v13558_v34, %v12576_v47  ;;  %v7629_v44 = vsel %vm14183_vm10, %v7624_v17, %v7628_v20  ;;  %8057 = vst [vmem:[#allocation4 + $0x278] sm:$0xf] %v7958_v63  ;;  %v8383_v13 = vrot.slane %v8381_v50, 5  ;;  %v12398_v19 = vrot.slane %v8639_v11, 9 }
 0x4a3   : > { %v12791_v8 = vor.u32 %v13616_v12, %v12790_v49  ;;  %v7639_v7 = vsel %vm14183_vm10, %v7634_v52, %v7638_v35  ;;  %7790 = vst [vmem:[#allocation4 + $0x328] sm:$0xf] %v7629_v44  ;;  %v8745_v60 = vrot.slane %v16371_v42, 5  ;;  %v16389_v10 = vadd.f32 %v10625_v14, %v10537_v5  ;;  %v8090_v32 = vld [vmem:[#allocation3 + $0x7c] sm:$0xf] }
 0x4a4   : > { %7791 = vst [vmem:[#allocation4 + $0x34c] sm:$0xf] %v7639_v7  ;;  %v8162_v6 = vld [vmem:[#allocation3 + $0x7c] sm:$0xf]  ;;  %v8384_v53 = vor.u32 %v8383_v13, %v8380_v62  ;;  %v13563_v20 = vld [vmem:[#allocation4 + $0x158] sm:$0xf0]  ;;  %v10451_v16 = vadd.f32 %v16353_v25, %v16157_v0  ;;  %v10668_v23 = vadd.f32 %v15924_v41, %v15931_v28  ;;  %v16401_v35 = vadd.f32 %v16353_v25, %v16176_v59  ;;  %v16403_v62 = vpop.f32.mrf.mxu1 }
 0x4a5   : > { %10795 = vmatmul.bf16.gmra.mxu2 %v12791_v8  ;;  %10854 = vmatmul.bf16.gmra.mxu3 %v12579_v9  ;;  %8122 = vst [vmem:[#allocation4 + $0x27c] sm:$0xf] %v8090_v32  ;;  %v7340_v47 = vld [vmem:[#allocation3 + $0x9c] sm:$0xf]  ;;  %v12584_v15 = vld [vmem:[#allocation4 + $0x15c] sm:$0xf0]  ;;  %v8746_v11 = vsel %vm14209_vm11, %v12398_v19, %v8745_v60  ;;  %v10756_v50 = vpop.f32.mrf.mxu2 }
 0x4a6   : > { %v8387_v12 = vshll.u32 %v8162_v6, 16  ;;  %v8391_v31 = vshrl.u32 %v8162_v6, 16  ;;  %v12582_v14 = vld [vmem:[#allocation4 + $0x138] sm:$0xf]  ;;  %v8163_v36 = vld [vmem:[#allocation3 + $0x80] sm:$0x1]  ;;  %v10628_v2 = vpop.f32.mrf.mxu0  ;;  %v16405_v5 = vadd.f32 %v10756_v50, %v10668_v23 }
 0x4a7   : > { %v7828_v17 = vld [vmem:[#allocation3 + $0x7c] sm:$0xf]  ;;  %v13559_v30 = vld [vmem:[#allocation4 + $0x13c] sm:$0xf]  ;;  %v8385_v34 = vrot.slane %v8384_v53, 4  ;;  %v12583_v0 = vor.u32 %v13563_v20, %v12582_v14  ;;  %v8397_v32 = vshll.u32 %v8163_v36, 16 }
 0x4a8   : > { %v8389_v52 = vrot.slane %v8387_v12, 5  ;;  %v8393_v63 = vrot.slane %v8391_v31, 4  ;;  %v12587_v49 = vor.u32 %v13559_v30, %v12584_v15  ;;  %v10539_v41 = vpop.f32.mrf.mxu3  ;;  %v17083_v28 = vld [vmem:[#allocation19_spill] sm:$0xff]  ;;  %v7827_v44 = vld [vmem:[#allocation3 + $0x78] sm:$0xe]  ;;  %v7961_v6 = vrot.slane %v7828_v17, 5 }
 0x4a9   : > { %v10670_v9 = vadd.f32 %v17083_v28, %v15963_v54  ;;  %8877 = vst [vmem:[#allocation4 + $0xb0] sm:$0xf] %v8746_v11  ;;  %v8164_v59 = vld [vmem:[#allocation3 + $0x84] sm:$0xf]  ;;  %v10540_v13 = vadd.f32 %v10539_v41, %v10451_v16  ;;  %v7341_v8 = vld [vmem:[#allocation3 + $0xa0] sm:$0xf]  ;;  %10943 = vmatmul.bf16.gmra.mxu0 %v12583_v0 }
 0x4aa   : > { %v7342_v7 = vld [vmem:[#allocation3 + $0xa4] sm:$0x1]  ;;  %v8390_v19 = vsel %vm14183_vm10, %v8385_v34, %v8389_v52  ;;  %v7641_v53 = vshrl.u32 %v7340_v47, 16  ;;  %v7644_v12 = vshll.u32 %v7340_v47, 16  ;;  %v7650_v20 = vshll.u32 %v7341_v8, 16 }
 0x4ab   : > { %v7654_v15 = vshrl.u32 %v7341_v8, 16  ;;  %v7829_v31 = vld [vmem:[#allocation3 + $0x80] sm:$0x1]  ;;  %v16411_v23 = vadd.f32 %v10628_v2, %v10540_v13  ;;  %v7660_v54 = vshll.u32 %v7342_v7, 16  ;;  %v8394_v11 = vor.u32 %v8393_v63, %v8389_v52  ;;  %8617 = vst [vmem:[#allocation4 + $0x25c] sm:$0xf] %v8390_v19  ;;  %11032 = vmatmul.bf16.gmra.mxu1 %v12587_v49 }
 0x4ac   : > { %v13729_v14 = vld [vmem:[#allocation5 + $0x208] sm:$0xff]  ;;  %v12389_v16 = vrot.slane %v7827_v44, 9  ;;  %v7643_v50 = vrot.slane %v7641_v53, 4  ;;  %v7646_v30 = vrot.slane %v7644_v12, 5  ;;  %v7652_v41 = vrot.slane %v7650_v20, 5 }
 0x4ad   : > { %17084 = vst [vmem:[#allocation19_spill] sm:$0xff] %v16411_v23  ;;  %v7656_v34 = vrot.slane %v7654_v15, 4  ;;  %v8091_v36 = vld [vmem:[#allocation3 + $0x84] sm:$0xf]  ;;  %v12612_v17 = vld [vmem:[#allocation4 + $0x19c] sm:$0xf0]  ;;  %11099 = vmatpush.bf16.msra.mxu2 %v13729_v14  ;;  %v10758_v7 = vpop.f32.mrf.mxu2 }
 0x4ae   : > { %v8395_v0 = vrot.slane %v8394_v11, 4  ;;  %v8399_v47 = vrot.slane %v8397_v32, 5  ;;  %v7962_v28 = vsel %vm14209_vm11, %v12389_v16, %v7961_v6  ;;  %v7964_v2 = vrot.slane %v7829_v31, 5  ;;  %8123 = vst [vmem:[#allocation4 + $0x2a0] sm:$0xf] %v8091_v36  ;;  %v10630_v44 = vpop.f32.mrf.mxu0  ;;  %v17091_v23 = vld [vmem:[#allocation43_spill] sm:$0xff] }
 0x4af   : > { %v7647_v13 = vor.u32 %v7646_v30, %v7643_v50  ;;  %v7657_v8 = vor.u32 %v7656_v34, %v7652_v41  ;;  %v7963_v52 = vrot.slane %v7961_v6, 4  ;;  %8058 = vst [vmem:[#allocation4 + $0x29c] sm:$0xf] %v7962_v28  ;;  %v8402_v63 = vshrl.u32 %v8164_v59, 16  ;;  %v8641_v49 = vld [vmem:[#allocation3 + $0x38] sm:$0x1] }
 0x4b0   : > { %v13625_v19 = vld [vmem:[#allocation4 + $0x348] sm:$0xf0]  ;;  %v13567_v53 = vld [vmem:[#allocation4 + $0x17c] sm:$0xf]  ;;  %v7662_v12 = vrot.slane %v7660_v54, 5  ;;  %v8400_v20 = vsel %vm14183_vm10, %v8395_v0, %v8399_v47  ;;  %v8405_v32 = vshll.u32 %v8164_v59, 16  ;;  %v16419_v31 = vadd.f32 %v10758_v7, %v10670_v9  ;;  %v10541_v14 = vpop.f32.mrf.mxu3  ;;  %v16424_v59 = vpop.f32.mrf.mxu1 }
 0x4b1   : > { %v8747_v15 = vrot.slane %v8745_v60, 4  ;;  %v12826_v11 = vld [vmem:[#allocation4 + $0x328] sm:$0xf]  ;;  %v7648_v6 = vrot.slane %v7647_v13, 4  ;;  %v7658_v16 = vrot.slane %v7657_v8, 4  ;;  %v7965_v50 = vsel %vm14209_vm11, %v7963_v52, %v7964_v2 }
 0x4b2   : > { %8618 = vst [vmem:[#allocation4 + $0x280] sm:$0xf] %v8400_v20  ;;  %v10542_v30 = vadd.f32 %v10541_v14, %v16401_v35  ;;  %v8404_v54 = vrot.slane %v8402_v63, 4  ;;  %v8407_v34 = vrot.slane %v8405_v32, 5  ;;  %v8748_v36 = vrot.slane %v8641_v49, 5  ;;  %v17087_v20 = vld [vmem:[#allocation20_spill] sm:$0xff] }
 0x4b3   : > { %8059 = vst [vmem:[#allocation4 + $0x2c0] sm:$0xf] %v7965_v50  ;;  %v12827_v42 = vor.u32 %v13625_v19, %v12826_v11  ;;  %v12615_v60 = vor.u32 %v13567_v53, %v12612_v17  ;;  %v13572_v9 = vld [vmem:[#allocation4 + $0x1a0] sm:$0xf0]  ;;  %v7653_v0 = vsel %vm14183_vm10, %v7648_v6, %v7652_v41  ;;  %v7663_v47 = vsel %vm14183_vm10, %v7658_v16, %v7662_v12  ;;  %v8092_v2 = vld [vmem:[#allocation3 + $0x88] sm:$0xf] }
 0x4b4   : > { %v16430_v28 = vadd.f32 %v10630_v44, %v10542_v30  ;;  %7792 = vst [vmem:[#allocation4 + $0x370] sm:$0xf] %v7653_v0  ;;  %v8165_v35 = vld [vmem:[#allocation3 + $0x88] sm:$0xf]  ;;  %v8749_v13 = vsel %vm14209_vm11, %v8747_v15, %v8748_v36  ;;  %v12618_v52 = vld [vmem:[#allocation4 + $0x180] sm:$0xf]  ;;  %v8408_v49 = vor.u32 %v8407_v34, %v8404_v54  ;;  %v10456_v44 = vadd.f32 %v16353_v25, %v16188_v4 }
 0x4b5   : > { %v7343_v8 = vld [vmem:[#allocation3 + $0xa8] sm:$0xf]  ;;  %10800 = vmatmul.bf16.gmra.mxu2 %v12827_v42  ;;  %10859 = vmatmul.bf16.gmra.mxu3 %v12615_v60  ;;  %v13568_v17 = vld [vmem:[#allocation4 + $0x184] sm:$0xf]  ;;  %v12620_v63 = vld [vmem:[#allocation4 + $0x1a4] sm:$0xf0]  ;;  %v16438_v53 = vadd.f32 %v16353_v25, %v16209_v43  ;;  %v10761_v16 = vpop.f32.mrf.mxu2  ;;  %v12619_v50 = vor.u32 %v13572_v9, %v12618_v52 }
 0x4b6   : > { %17085 = vst [vmem:[#allocation60_spill] sm:$0xff] %v16430_v28  ;;  %v8642_v41 = vld [vmem:[#allocation3 + $0x3c] sm:$0xe]  ;;  %v8411_v7 = vshll.u32 %v8165_v35, 16  ;;  %v8643_v19 = vld [vmem:[#allocation3 + $0x40] sm:$0xf]  ;;  %v10633_v6 = vpop.f32.mrf.mxu0  ;;  %v12623_v30 = vor.u32 %v13568_v17, %v12620_v63 }
 0x4b7   : > { %7793 = vst [vmem:[#allocation4 + $0x394] sm:$0xf] %v7663_v47  ;;  %v17086_v12 = vld [vmem:[#allocation21_spill] sm:$0xff]  ;;  %v16442_v15 = vld [vmem:[#allocation4 + $0x1c4] sm:$0xf]  ;;  %v8415_v11 = vshrl.u32 %v8165_v35, 16 }
 0x4b8   : > { %8124 = vst [vmem:[#allocation4 + $0x2c4] sm:$0xf] %v8092_v2  ;;  %v10673_v32 = vadd.f32 %v17087_v20, %v17086_v12  ;;  %v16444_v14 = vld [vmem:[#allocation4 + $0x1e4] sm:$0xf0]  ;;  %v8166_v54 = vld [vmem:[#allocation3 + $0x8c] sm:$0x1]  ;;  %v10544_v43 = vpop.f32.mrf.mxu3 }
 0x4b9   : > { %8878 = vst [vmem:[#allocation4 + $0xd4] sm:$0xf] %v8749_v13  ;;  %v8413_v34 = vrot.slane %v8411_v7, 5  ;;  %v12399_v4 = vrot.slane %v8642_v41, 9  ;;  %v8646_v36 = vld [vmem:[#allocation3 + $0x4c] sm:$0xf]  ;;  %v10545_v12 = vadd.f32 %v10544_v43, %v10456_v44  ;;  %10948 = vmatmul.bf16.gmra.mxu0 %v12619_v50 }
 0x4ba   : > { %v16446_v42 = vadd.f32 %v10761_v16, %v10673_v32  ;;  %v8409_v60 = vrot.slane %v8408_v49, 4  ;;  %v8417_v0 = vrot.slane %v8415_v11, 4  ;;  %v8752_v47 = vrot.slane %v8643_v19, 5  ;;  %v8645_v2 = vld [vmem:[#allocation3 + $0x48] sm:$0xe]  ;;  %v16454_v11 = vpop.f32.mrf.mxu1  ;;  %v17090_v50 = vld [vmem:[#allocation44_spill] sm:$0xff] }
 0x4bb   : > { %v7344_v13 = vld [vmem:[#allocation3 + $0xac] sm:$0xf]  ;;  %v7345_v20 = vld [vmem:[#allocation3 + $0xb0] sm:$0x1]  ;;  %v7665_v28 = vshrl.u32 %v7343_v8, 16  ;;  %v7668_v9 = vshll.u32 %v7343_v8, 16  ;;  %v16450_v7 = vadd.f32 %v10633_v6, %v10545_v12  ;;  %11037 = vmatmul.bf16.gmra.mxu1 %v12623_v30 }
 0x4bc   : > { %v7674_v52 = vshll.u32 %v7344_v13, 16  ;;  %v7678_v17 = vshrl.u32 %v7344_v13, 16  ;;  %v8421_v63 = vshll.u32 %v8166_v54, 16  ;;  %v8759_v41 = vrot.slane %v8646_v36, 5  ;;  %v8644_v44 = vld [vmem:[#allocation3 + $0x44] sm:$0x1] }
 0x4bd   : > { %17088 = vst [vmem:[#allocation21_spill] sm:$0xff] %v16450_v7  ;;  %v7667_v32 = vrot.slane %v7665_v28, 4  ;;  %v7670_v49 = vrot.slane %v7668_v9, 5  ;;  %v8414_v19 = vsel %vm14183_vm10, %v8409_v60, %v8413_v34  ;;  %v7684_v35 = vshll.u32 %v7345_v20, 16  ;;  %v8647_v6 = vld [vmem:[#allocation3 + $0x50] sm:$0x1]  ;;  %v10763_v20 = vpop.f32.mrf.mxu2 }
 0x4be   : > { %17089 = vst [vmem:[#allocation20_spill] sm:$0xff] %v16454_v11  ;;  %v7676_v16 = vrot.slane %v7674_v52, 5  ;;  %v7680_v43 = vrot.slane %v7678_v17, 4  ;;  %v12400_v8 = vrot.slane %v8645_v2, 9  ;;  %v10675_v13 = vadd.f32 %v17091_v23, %v17090_v50  ;;  %v8648_v12 = vld [vmem:[#allocation3 + $0x54] sm:$0xe]  ;;  %v10635_v2 = vpop.f32.mrf.mxu0 }
 0x4bf   : > { %v7671_v54 = vor.u32 %v7670_v49, %v7667_v32  ;;  %v8418_v36 = vor.u32 %v8417_v0, %v8413_v34  ;;  %8619 = vst [vmem:[#allocation4 + $0x2a4] sm:$0xf] %v8414_v19  ;;  %v8753_v28 = vsel %vm14209_vm11, %v12399_v4, %v8752_v47  ;;  %v13634_v60 = vld [vmem:[#allocation4 + $0x390] sm:$0xf0]  ;;  %v8754_v7 = vrot.slane %v8752_v47, 4 }
 0x4c0   : > { %v7681_v9 = vor.u32 %v7680_v43, %v7676_v16  ;;  %v8755_v11 = vrot.slane %v8644_v44, 5  ;;  %8879 = vst [vmem:[#allocation4 + $0xf8] sm:$0xf] %v8753_v28  ;;  %v8760_v30 = vsel %vm14209_vm11, %v12400_v8, %v8759_v41  ;;  %v8423_v17 = vrot.slane %v8421_v63, 5  ;;  %v7346_v0 = vld [vmem:[#allocation3 + $0xb4] sm:$0xf]  ;;  %v10546_v4 = vpop.f32.mrf.mxu3 }
 0x4c1   : > { %v7672_v52 = vrot.slane %v7671_v54, 4  ;;  %v8419_v23 = vrot.slane %v8418_v36, 4  ;;  %v8761_v34 = vrot.slane %v8759_v41, 4  ;;  %8881 = vst [vmem:[#allocation4 + $0x140] sm:$0xf] %v8760_v30  ;;  %v16462_v32 = vadd.f32 %v10763_v20, %v10675_v13  ;;  %v17093_v28 = vld [vmem:[#allocation45_spill] sm:$0xff] }
 0x4c2   : > { %v7682_v49 = vrot.slane %v7681_v9, 4  ;;  %v7686_v19 = vrot.slane %v7684_v35, 5  ;;  %v8756_v47 = vsel %vm14209_vm11, %v8754_v7, %v8755_v11  ;;  %v8649_v44 = vld [vmem:[#allocation3 + $0x58] sm:$0xf]  ;;  %v10547_v43 = vadd.f32 %v10546_v4, %v16438_v53  ;;  %v12862_v8 = vld [vmem:[#allocation4 + $0x370] sm:$0xf] }
 0x4c3   : > { %v7677_v50 = vsel %vm14183_vm10, %v7672_v52, %v7676_v16  ;;  %v8424_v63 = vsel %vm14183_vm10, %v8419_v23, %v8423_v17  ;;  %8880 = vst [vmem:[#allocation4 + $0x11c] sm:$0xf] %v8756_v47  ;;  %v8762_v41 = vrot.slane %v8647_v6, 5  ;;  %v12863_v13 = vor.u32 %v13634_v60, %v12862_v8  ;;  %v8650_v35 = vld [vmem:[#allocation3 + $0x5c] sm:$0x1]  ;;  %v17092_v53 = vld [vmem:[#allocation46_spill] sm:$0xff]  ;;  %v16484_v47 = vpop.f32.mrf.mxu1 }
 0x4c4   : > { %v7687_v54 = vsel %vm14183_vm10, %v7682_v49, %v7686_v19  ;;  %7794 = vst [vmem:[#allocation4 + $0x3b8] sm:$0xf] %v7677_v50  ;;  %v12401_v36 = vrot.slane %v8648_v12, 9  ;;  %v8766_v7 = vrot.slane %v8649_v44, 5  ;;  %v16473_v11 = vadd.f32 %v10635_v2, %v10547_v43  ;;  %v7347_v16 = vld [vmem:[#allocation3 + $0xb8] sm:$0xf] }
 0x4c5   : > { %v10678_v9 = vadd.f32 %v17093_v28, %v17092_v53  ;;  %7795 = vst [vmem:[#allocation4 + $0x3dc] sm:$0xf] %v7687_v54  ;;  %v7348_v30 = vld [vmem:[#allocation3 + $0xbc] sm:$0x1]  ;;  %v8763_v20 = vsel %vm14209_vm11, %v8761_v34, %v8762_v41  ;;  %10805 = vmatmul.bf16.gmra.mxu2 %v12863_v13  ;;  %v17094_v6 = vor.u32 %v16442_v15, %v16444_v14  ;;  %v7689_v60 = vshrl.u32 %v7346_v0, 16 }
 0x4c6   : > { %v7692_v52 = vshll.u32 %v7346_v0, 16  ;;  %v7698_v12 = vshll.u32 %v7347_v16, 16  ;;  %v7702_v23 = vshrl.u32 %v7347_v16, 16  ;;  %8620 = vst [vmem:[#allocation4 + $0x2c8] sm:$0xf] %v8424_v63  ;;  %v7708_v17 = vshll.u32 %v7348_v30, 16  ;;  %v10638_v14 = vpop.f32.mrf.mxu0  ;;  %v10766_v0 = vpop.f32.mrf.mxu2 }
 0x4c7   : > { %10864 = vmatmul.bf16.gmra.mxu3 %v17094_v6  ;;  %v13581_v2 = vld [vmem:[#allocation4 + $0x1e8] sm:$0xf0]  ;;  %v8767_v4 = vsel %vm14209_vm11, %v12401_v36, %v8766_v7  ;;  %v8768_v49 = vrot.slane %v8766_v7, 4  ;;  %v8769_v19 = vrot.slane %v8650_v35, 5  ;;  %v7691_v34 = vrot.slane %v7689_v60, 4  ;;  %v13728_v16 = vld [vmem:[#allocation5 + $0x200] sm:$0xff] }
 0x4c8   : > { %v7694_v44 = vrot.slane %v7692_v52, 5  ;;  %v7700_v43 = vrot.slane %v7698_v12, 5  ;;  %v7704_v8 = vrot.slane %v7702_v23, 4  ;;  %8882 = vst [vmem:[#allocation4 + $0x164] sm:$0xf] %v8763_v20  ;;  %v10461_v15 = vadd.f32 %v16353_v25, %v16230_v21  ;;  %v10549_v35 = vpop.f32.mrf.mxu3  ;;  %11100 = vmatpush.bf16.msra.mxu2 %v13728_v16  ;;  %v17095_v12 = vld [vmem:[#allocation48_spill] sm:$0xff] }
 0x4c9   : > { %v12654_v50 = vld [vmem:[#allocation4 + $0x1c8] sm:$0xf]  ;;  %v12656_v63 = vld [vmem:[#allocation4 + $0x1ec] sm:$0xf0]  ;;  %v8770_v41 = vsel %vm14209_vm11, %v8768_v49, %v8769_v19  ;;  %8883 = vst [vmem:[#allocation4 + $0x188] sm:$0xf] %v8767_v4  ;;  %v16490_v13 = vadd.f32 %v10766_v0, %v10678_v9  ;;  %v10463_v49 = vadd.f32 %v16353_v25, %v16253_v37 }
 0x4ca   : > { %v12655_v54 = vor.u32 %v13581_v2, %v12654_v50  ;;  %v7695_v36 = vor.u32 %v7694_v44, %v7691_v34  ;;  %v7705_v7 = vor.u32 %v7704_v8, %v7700_v43  ;;  %8884 = vst [vmem:[#allocation4 + $0x1ac] sm:$0xf] %v8770_v41  ;;  %v13577_v53 = vld [vmem:[#allocation4 + $0x1cc] sm:$0xf]  ;;  %v10550_v28 = vadd.f32 %v10549_v35, %v10461_v15  ;;  %v17096_v23 = vld [vmem:[#allocation47_spill] sm:$0xff] }
 0x4cb   : > { %v12659_v21 = vor.u32 %v13577_v53, %v12656_v63  ;;  %v7710_v6 = vrot.slane %v7708_v17, 5  ;;  %v10680_v2 = vadd.f32 %v17096_v23, %v17095_v12  ;;  %v8651_v4 = vld [vmem:[#allocation3 + $0x60] sm:$0xe]  ;;  %v12684_v44 = vld [vmem:[#allocation4 + $0x22c] sm:$0xf0]  ;;  %v16502_v15 = vpop.f32.mrf.mxu1 }
 0x4cc   : > { %10953 = vmatmul.bf16.gmra.mxu0 %v12655_v54  ;;  %v7696_v30 = vrot.slane %v7695_v36, 4  ;;  %v7706_v20 = vrot.slane %v7705_v7, 4  ;;  %v16492_v60 = vadd.f32 %v10638_v14, %v10550_v28  ;;  %v13643_v34 = vld [vmem:[#allocation4 + $0x3d8] sm:$0xf0]  ;;  %v7349_v8 = vld [vmem:[#allocation3 + $0xc0] sm:$0xf] }
 0x4cd   : > { %11042 = vmatmul.bf16.gmra.mxu1 %v12659_v21  ;;  %v8652_v0 = vld [vmem:[#allocation3 + $0x64] sm:$0xf]  ;;  %v12898_v63 = vld [vmem:[#allocation4 + $0x3b8] sm:$0xf]  ;;  %v12402_v54 = vrot.slane %v8651_v4, 9  ;;  %v7713_v21 = vshrl.u32 %v7349_v8, 16 }
 0x4ce   : > { %v7701_v9 = vsel %vm14183_vm10, %v7696_v30, %v7700_v43  ;;  %v7711_v52 = vsel %vm14183_vm10, %v7706_v20, %v7710_v6  ;;  %v10640_v17 = vpop.f32.mrf.mxu0  ;;  %v10768_v19 = vpop.f32.mrf.mxu2  ;;  %v13585_v41 = vld [vmem:[#allocation4 + $0x20c] sm:$0xf]  ;;  %v8773_v35 = vrot.slane %v8652_v0, 5  ;;  %v12899_v36 = vor.u32 %v13643_v34, %v12898_v63  ;;  %v8653_v53 = vld [vmem:[#allocation3 + $0x68] sm:$0x1] }
 0x4cf   : > { %7796 = vst [vmem:[#allocation4 + $0x400] sm:$0xf] %v7701_v9  ;;  %v16504_v43 = vadd.f32 %v10768_v19, %v10680_v2  ;;  %v12687_v7 = vor.u32 %v13585_v41, %v12684_v44  ;;  %v7350_v28 = vld [vmem:[#allocation3 + $0xc4] sm:$0xf]  ;;  %v7351_v16 = vld [vmem:[#allocation3 + $0xc8] sm:$0x1] }
 0x4d0   : > { %7797 = vst [vmem:[#allocation4 + $0x424] sm:$0xf] %v7711_v52  ;;  %v10551_v14 = vpop.f32.mrf.mxu3  ;;  %v7716_v30 = vshll.u32 %v7349_v8, 16  ;;  %v8774_v20 = vsel %vm14209_vm11, %v12402_v54, %v8773_v35  ;;  %v13590_v6 = vld [vmem:[#allocation4 + $0x230] sm:$0xf0]  ;;  %v7722_v9 = vshll.u32 %v7350_v28, 16  ;;  %v10466_v8 = vadd.f32 %v16353_v25, %v16272_v55 }
 0x4d1   : > { %17097 = vst [vmem:[#allocation44_spill] sm:$0xff] %v16504_v43  ;;  %v10552_v50 = vadd.f32 %v10551_v14, %v10463_v49  ;;  %v7726_v52 = vshrl.u32 %v7350_v28, 16  ;;  %v8775_v12 = vrot.slane %v8773_v35, 4  ;;  %v7715_v23 = vrot.slane %v7713_v21, 4  ;;  %v17098_v49 = vld [vmem:[#allocation50_spill] sm:$0xff] }
 0x4d2   : > { %v7718_v2 = vrot.slane %v7716_v30, 5  ;;  %v8776_v4 = vrot.slane %v8653_v53, 5  ;;  %8885 = vst [vmem:[#allocation4 + $0x1d0] sm:$0xf] %v8774_v20  ;;  %v7724_v34 = vrot.slane %v7722_v9, 5  ;;  %v7732_v14 = vshll.u32 %v7351_v16, 16 }
 0x4d3   : > { %v16506_v37 = vadd.f32 %v10640_v17, %v10552_v50  ;;  %v17099_v17 = vld [vmem:[#allocation49_spill] sm:$0xff]  ;;  %v7728_v44 = vrot.slane %v7726_v52, 4  ;;  %v12690_v63 = vld [vmem:[#allocation4 + $0x210] sm:$0xf]  ;;  %v12692_v41 = vld [vmem:[#allocation4 + $0x234] sm:$0xf0]  ;;  %v16518_v20 = vpop.f32.mrf.mxu1 }
 0x4d4   : > { %v10683_v19 = vadd.f32 %v17099_v17, %v17098_v49  ;;  %v7719_v54 = vor.u32 %v7718_v2, %v7715_v23  ;;  %v8777_v35 = vsel %vm14209_vm11, %v8775_v12, %v8776_v4  ;;  %v13586_v21 = vld [vmem:[#allocation4 + $0x214] sm:$0xf]  ;;  %v7734_v52 = vrot.slane %v7732_v14, 5  ;;  %v12720_v14 = vld [vmem:[#allocation4 + $0x274] sm:$0xf0] }
 0x4d5   : > { %10810 = vmatmul.bf16.gmra.mxu2 %v12899_v36  ;;  %v7729_v28 = vor.u32 %v7728_v44, %v7724_v34  ;;  %8886 = vst [vmem:[#allocation4 + $0x1f4] sm:$0xf] %v8777_v35  ;;  %v12695_v55 = vor.u32 %v13586_v21, %v12692_v41  ;;  %v10685_v23 = vadd.f32 %v16140_v26, %v16132_v3  ;;  %v8654_v2 = vld [vmem:[#allocation3 + $0x6c] sm:$0xe] }
 0x4d6   : > { %v10643_v0 = vpop.f32.mrf.mxu0  ;;  %v10771_v50 = vpop.f32.mrf.mxu2  ;;  %v7720_v16 = vrot.slane %v7719_v54, 4  ;;  %v10468_v4 = vadd.f32 %v16353_v25, %v16282_v61  ;;  %v12934_v41 = vld [vmem:[#allocation4 + $0x400] sm:$0xf]  ;;  %v13594_v54 = vld [vmem:[#allocation4 + $0x254] sm:$0xf]  ;;  %v12403_v35 = vrot.slane %v8654_v2, 9 }
 0x4d7   : > { %10869 = vmatmul.bf16.gmra.mxu3 %v12687_v7  ;;  %v16516_v36 = vadd.f32 %v10771_v50, %v10683_v19  ;;  %v12691_v7 = vor.u32 %v13590_v6, %v12690_v63  ;;  %v7730_v9 = vrot.slane %v7729_v28, 4  ;;  %v13652_v44 = vld [vmem:[#allocation4 + $0x420] sm:$0xf0]  ;;  %v8656_v50 = vld [vmem:[#allocation3 + $0x74] sm:$0x1]  ;;  %v12723_v3 = vor.u32 %v13594_v54, %v12720_v14 }
 0x4d8   : > { %v10554_v53 = vpop.f32.mrf.mxu3  ;;  %v7725_v12 = vsel %vm14183_vm10, %v7720_v16, %v7724_v34  ;;  %v8783_v28 = vrot.slane %v8656_v50, 5  ;;  %v13599_v16 = vld [vmem:[#allocation4 + $0x278] sm:$0xf0]  ;;  %v8167_v14 = vld [vmem:[#allocation3 + $0x90] sm:$0xf] }
 0x4d9   : > { %17100 = vst [vmem:[#allocation43_spill] sm:$0xff] %v16516_v36  ;;  %v10555_v30 = vadd.f32 %v10554_v53, %v10466_v8  ;;  %v7735_v6 = vsel %vm14183_vm10, %v7730_v9, %v7734_v52  ;;  %v12935_v53 = vor.u32 %v13652_v44, %v12934_v41  ;;  %v17102_v9 = vld [vmem:[#allocation51_spill] sm:$0xff] }
 0x4da   : > { %7798 = vst [vmem:[#allocation4 + $0x448] sm:$0xf] %v7725_v12  ;;  %v10688_v52 = vadd.f32 %v17102_v9, %v16167_v56  ;;  %v7831_v12 = vld [vmem:[#allocation3 + $0x88] sm:$0xf] }
 0x4db   : > { %v16520_v49 = vadd.f32 %v10643_v0, %v10555_v30  ;;  %7799 = vst [vmem:[#allocation4 + $0x46c] sm:$0xf] %v7735_v6  ;;  %v8655_v0 = vld [vmem:[#allocation3 + $0x70] sm:$0xf]  ;;  %v16536_v21 = vpop.f32.mrf.mxu1  ;;  %v7830_v30 = vld [vmem:[#allocation3 + $0x84] sm:$0xe] }
 0x4dc   : > { %10958 = vmatmul.bf16.gmra.mxu0 %v12691_v7  ;;  %v8780_v7 = vrot.slane %v8655_v0, 5  ;;  %v7832_v6 = vld [vmem:[#allocation3 + $0x8c] sm:$0x1]  ;;  %v7968_v44 = vrot.slane %v7831_v12, 5 }
 0x4dd   : > { %11047 = vmatmul.bf16.gmra.mxu1 %v12695_v55 }
 0x4de   : > { %v10645_v17 = vpop.f32.mrf.mxu0  ;;  %v10773_v19 = vpop.f32.mrf.mxu2  ;;  %v8781_v61 = vsel %vm14209_vm11, %v12403_v35, %v8780_v7  ;;  %v8782_v25 = vrot.slane %v8780_v7, 4  ;;  %v7970_v54 = vrot.slane %v7968_v44, 4  ;;  %v7971_v35 = vrot.slane %v7832_v6, 5  ;;  %v8093_v7 = vld [vmem:[#allocation3 + $0x90] sm:$0xf] }
 0x4df   : > { %v16530_v8 = vadd.f32 %v10773_v19, %v10685_v23  ;;  %8887 = vst [vmem:[#allocation4 + $0x218] sm:$0xf] %v8781_v61  ;;  %v12390_v19 = vrot.slane %v7830_v30, 9  ;;  %v8168_v61 = vld [vmem:[#allocation3 + $0x94] sm:$0xf] }
 0x4e0   : > { %v10556_v34 = vpop.f32.mrf.mxu3  ;;  %v8784_v55 = vsel %vm14209_vm11, %v8782_v25, %v8783_v28  ;;  %v7972_v28 = vsel %vm14209_vm11, %v7970_v54, %v7971_v35  ;;  %8125 = vst [vmem:[#allocation4 + $0x2e8] sm:$0xf] %v8093_v7  ;;  %v8169_v30 = vld [vmem:[#allocation3 + $0x98] sm:$0x1]  ;;  %v8439_v9 = vshrl.u32 %v8168_v61, 16 }
 0x4e1   : > { %17101 = vst [vmem:[#allocation46_spill] sm:$0xff] %v16530_v8  ;;  %v10557_v63 = vadd.f32 %v10556_v34, %v10468_v4  ;;  %v12726_v4 = vld [vmem:[#allocation4 + $0x258] sm:$0xf]  ;;  %v7969_v56 = vsel %vm14209_vm11, %v12390_v19, %v7968_v44 }
 0x4e2   : > { %8888 = vst [vmem:[#allocation4 + $0x23c] sm:$0xf] %v8784_v55  ;;  %v12727_v0 = vor.u32 %v13599_v16, %v12726_v4  ;;  %v8426_v16 = vshrl.u32 %v8167_v14, 16  ;;  %v8435_v55 = vshll.u32 %v8168_v61, 16  ;;  %v17104_v4 = vld [vmem:[#allocation52_spill] sm:$0xff]  ;;  %v8441_v44 = vrot.slane %v8439_v9, 4 }
 0x4e3   : > { %v16532_v26 = vadd.f32 %v10645_v17, %v10557_v63  ;;  %v12728_v17 = vld [vmem:[#allocation4 + $0x27c] sm:$0xf0]  ;;  %v13595_v63 = vld [vmem:[#allocation4 + $0x25c] sm:$0xf]  ;;  %8060 = vst [vmem:[#allocation4 + $0x2e4] sm:$0xf] %v7969_v56 }
 0x4e4   : > { %8061 = vst [vmem:[#allocation4 + $0x308] sm:$0xf] %v7972_v28  ;;  %v8428_v12 = vrot.slane %v8426_v16, 4  ;;  %v8437_v19 = vrot.slane %v8435_v55, 5  ;;  %v13603_v56 = vld [vmem:[#allocation4 + $0x29c] sm:$0xf] }
 0x4e5   : > { %10815 = vmatmul.bf16.gmra.mxu2 %v12935_v53  ;;  %v12731_v53 = vor.u32 %v13595_v63, %v12728_v17  ;;  %v8658_v61 = vld [vmem:[#allocation3 + $0x7c] sm:$0xf]  ;;  %v8659_v28 = vld [vmem:[#allocation3 + $0x80] sm:$0x1] }
 0x4e6   : > { %v10924_v23 = vpop.f32.mrf.mxu0  ;;  %v8787_v9 = vrot.slane %v8658_v61, 5  ;;  %v8790_v8 = vrot.slane %v8659_v28, 5 }
 0x4e7   : > { %10874 = vmatmul.bf16.gmra.mxu3 %v12723_v3  ;;  %v10776_v2 = vpop.f32.mrf.mxu2  ;;  %v8094_v3 = vld [vmem:[#allocation3 + $0x94] sm:$0xf] }
 0x4e8   : > { %v16542_v34 = vadd.f32 %v10776_v2, %v10688_v52  ;;  %v10835_v50 = vpop.f32.mrf.mxu3  ;;  %v12756_v52 = vld [vmem:[#allocation4 + $0x2bc] sm:$0xf0]  ;;  %8126 = vst [vmem:[#allocation4 + $0x30c] sm:$0xf] %v8094_v3  ;;  %v16551_v2 = vpop.f32.mrf.mxu1  ;;  %v8442_v3 = vor.u32 %v8441_v44, %v8437_v19 }
 0x4e9   : > { %v10836_v41 = vadd.f32 %v10835_v50, %v16315_v24  ;;  %v8429_v24 = vshll.u32 %v8167_v14, 16  ;;  %v8657_v50 = vld [vmem:[#allocation3 + $0x78] sm:$0xe]  ;;  %v13661_v14 = vld [vmem:[#allocation4 + $0x468] sm:$0xf0] }
 0x4ea   : > { %17103 = vst [vmem:[#allocation45_spill] sm:$0xff] %v16542_v34  ;;  %v12404_v55 = vrot.slane %v8657_v50, 9  ;;  %v17107_v50 = vld [vmem:[#allocation54_spill] sm:$0xff] }
 0x4eb   : > { %v16547_v25 = vadd.f32 %v10924_v23, %v10836_v41  ;;  %v8431_v6 = vrot.slane %v8429_v24, 5  ;;  %v17105_v23 = vld [vmem:[#allocation53_spill] sm:$0xff] }
 0x4ec   : > { %10963 = vmatmul.bf16.gmra.mxu0 %v12727_v0  ;;  %v10690_v17 = vadd.f32 %v17105_v23, %v17104_v4  ;;  %v8445_v0 = vshll.u32 %v8169_v30, 16  ;;  %v12970_v24 = vld [vmem:[#allocation4 + $0x448] sm:$0xf]  ;;  %v8443_v23 = vrot.slane %v8442_v3, 4  ;;  %v13604_v3 = vld [vmem:[#allocation4 + $0x2a4] sm:$0xf] }
 0x4ed   : > { %11052 = vmatmul.bf16.gmra.mxu1 %v12731_v53  ;;  %v8432_v54 = vor.u32 %v8431_v6, %v8428_v12  ;;  %v12759_v53 = vor.u32 %v13603_v56, %v12756_v52  ;;  %v12971_v30 = vor.u32 %v13661_v14, %v12970_v24  ;;  %v8788_v52 = vsel %vm14209_vm11, %v12404_v55, %v8787_v9  ;;  %v12762_v56 = vld [vmem:[#allocation4 + $0x2a0] sm:$0xf] }
 0x4ee   : > { %v10926_v63 = vpop.f32.mrf.mxu0  ;;  %v8447_v34 = vrot.slane %v8445_v0, 5  ;;  %v8789_v6 = vrot.slane %v8787_v9, 4  ;;  %v8170_v0 = vld [vmem:[#allocation3 + $0x9c] sm:$0xf]  ;;  %8889 = vst [vmem:[#allocation4 + $0x260] sm:$0xf] %v8788_v52 }
 0x4ef   : > { %v10778_v41 = vpop.f32.mrf.mxu2  ;;  %v8433_v4 = vrot.slane %v8432_v54, 4  ;;  %v12764_v54 = vld [vmem:[#allocation4 + $0x2c4] sm:$0xf0]  ;;  %v7835_v24 = vld [vmem:[#allocation3 + $0x98] sm:$0x1] }
 0x4f0   : > { %v16555_v35 = vadd.f32 %v10778_v41, %v10690_v17  ;;  %v10837_v7 = vpop.f32.mrf.mxu3  ;;  %v13608_v17 = vld [vmem:[#allocation4 + $0x2c0] sm:$0xf0]  ;;  %v8791_v44 = vsel %vm14209_vm11, %v8789_v6, %v8790_v8  ;;  %v7833_v8 = vld [vmem:[#allocation3 + $0x90] sm:$0xe]  ;;  %v8096_v52 = vld [vmem:[#allocation3 + $0xa0] sm:$0xf] }
 0x4f1   : > { %v10838_v16 = vadd.f32 %v10837_v7, %v16332_v38  ;;  %v8438_v12 = vsel %vm14183_vm10, %v8433_v4, %v8437_v19  ;;  %v8448_v38 = vsel %vm14183_vm10, %v8443_v23, %v8447_v34  ;;  %8890 = vst [vmem:[#allocation4 + $0x284] sm:$0xf] %v8791_v44  ;;  %v16570_v7 = vpop.f32.mrf.mxu1  ;;  %v12763_v34 = vor.u32 %v13608_v17, %v12762_v56  ;;  %v13528_v6 = vld [vmem:[#allocation4 + $0x40] sm:$0xf0]  ;;  %v8172_v56 = vld [vmem:[#allocation3 + $0xa4] sm:$0x1] }
 0x4f2   : > { %17106 = vst [vmem:[#allocation48_spill] sm:$0xff] %v16555_v35  ;;  %v12767_v4 = vor.u32 %v13604_v3, %v12764_v54  ;;  %v12391_v55 = vrot.slane %v7833_v8, 9  ;;  %v8450_v23 = vshrl.u32 %v8170_v0, 16  ;;  %v12446_v54 = vld [vmem:[#allocation4 + $0x20] sm:$0xf] }
 0x4f3   : > { %v16558_v36 = vadd.f32 %v10926_v63, %v10838_v16  ;;  %8621 = vst [vmem:[#allocation4 + $0x2ec] sm:$0xf] %v8438_v12  ;;  %v17108_v63 = vld [vmem:[#allocation55_spill] sm:$0xff] }
 0x4f4   : > { %8622 = vst [vmem:[#allocation4 + $0x310] sm:$0xf] %v8448_v38  ;;  %v10693_v41 = vadd.f32 %v17108_v63, %v17107_v50  ;;  %v7834_v16 = vld [vmem:[#allocation3 + $0x94] sm:$0xf]  ;;  %v8452_v44 = vrot.slane %v8450_v23, 4  ;;  %v17110_v50 = vld [vmem:[#allocation56_spill] sm:$0xff] }
 0x4f5   : > { %10820 = vmatmul.bf16.gmra.mxu2 %v12971_v30  ;;  %v7975_v9 = vrot.slane %v7834_v16, 5  ;;  %v8095_v30 = vld [vmem:[#allocation3 + $0x9c] sm:$0xf]  ;;  %8128 = vst [vmem:[#allocation4 + $0x354] sm:$0xf] %v8096_v52  ;;  %v17111_v63 = vld [vmem:[#allocation58_spill] sm:$0xff] }
 0x4f6   : > { %v10929_v19 = vpop.f32.mrf.mxu0  ;;  %8127 = vst [vmem:[#allocation4 + $0x330] sm:$0xf] %v8095_v30 }
 0x4f7   : > { %10879 = vmatmul.bf16.gmra.mxu3 %v12759_v53  ;;  %v7976_v38 = vsel %vm14209_vm11, %v12391_v55, %v7975_v9  ;;  %v7977_v17 = vrot.slane %v7975_v9, 4  ;;  %v8660_v55 = vld [vmem:[#allocation3 + $0x84] sm:$0xe] }
 0x4f8   : > { %v10781_v14 = vpop.f32.mrf.mxu2  ;;  %v10840_v61 = vpop.f32.mrf.mxu3  ;;  %8062 = vst [vmem:[#allocation4 + $0x32c] sm:$0xf] %v7976_v38 }
 0x4f9   : > { %v16572_v53 = vadd.f32 %v10781_v14, %v10693_v41  ;;  %v10841_v28 = vadd.f32 %v10840_v61, %v16363_v48  ;;  %v7978_v48 = vrot.slane %v7835_v24, 5  ;;  %v10695_v41 = vadd.f32 %v17111_v63, %v17110_v50  ;;  %v8171_v14 = vld [vmem:[#allocation3 + $0xa0] sm:$0xf]  ;;  %v8661_v50 = vld [vmem:[#allocation3 + $0x88] sm:$0xf] }
 0x4fa   : > { %v8453_v61 = vshll.u32 %v8170_v0, 16  ;;  %v8463_v8 = vshrl.u32 %v8171_v14, 16  ;;  %v8469_v24 = vshll.u32 %v8172_v56, 16  ;;  %v8794_v43 = vrot.slane %v8661_v50, 5 }
 0x4fb   : > { %17109 = vst [vmem:[#allocation47_spill] sm:$0xff] %v16572_v53  ;;  %v16575_v12 = vadd.f32 %v10929_v19, %v10841_v28  ;;  %v13612_v19 = vld [vmem:[#allocation4 + $0x2e4] sm:$0xf]  ;;  %v7979_v3 = vsel %vm14209_vm11, %v7977_v17, %v7978_v48  ;;  %v8459_v28 = vshll.u32 %v8171_v14, 16  ;;  %v12447_v53 = vor.u32 %v13528_v6, %v12446_v54  ;;  %v16586_v17 = vpop.f32.mrf.mxu1  ;;  %v8173_v6 = vld [vmem:[#allocation3 + $0xa8] sm:$0xf] }
 0x4fc   : > { %10968 = vmatmul.bf16.gmra.mxu0 %v12763_v34  ;;  %v12792_v34 = vld [vmem:[#allocation4 + $0x304] sm:$0xf0]  ;;  %8063 = vst [vmem:[#allocation4 + $0x350] sm:$0xf] %v7979_v3  ;;  %v8455_v23 = vrot.slane %v8453_v61, 5  ;;  %v8465_v38 = vrot.slane %v8463_v8, 4 }
 0x4fd   : > { %11057 = vmatmul.bf16.gmra.mxu1 %v12767_v4  ;;  %v8461_v52 = vrot.slane %v8459_v28, 5  ;;  %v12795_v35 = vor.u32 %v13612_v19, %v12792_v34  ;;  %v12405_v14 = vrot.slane %v8660_v55, 9  ;;  %v8471_v61 = vrot.slane %v8469_v24, 5  ;;  %v13617_v8 = vld [vmem:[#allocation4 + $0x308] sm:$0xf0] }
 0x4fe   : > { %v10931_v16 = vpop.f32.mrf.mxu0  ;;  %v8456_v0 = vor.u32 %v8455_v23, %v8452_v44  ;;  %v17112_v54 = vld [vmem:[#allocation57_spill] sm:$0xff]  ;;  %v8796_v24 = vrot.slane %v8794_v43, 4 }
 0x4ff   : > { %v8466_v48 = vor.u32 %v8465_v38, %v8461_v52  ;;  %v8795_v28 = vsel %vm14209_vm11, %v12405_v14, %v8794_v43  ;;  %v10698_v44 = vadd.f32 %v16268_v27, %v17112_v54  ;;  %v12798_v19 = vld [vmem:[#allocation4 + $0x2e8] sm:$0xf]  ;;  %v13613_v23 = vld [vmem:[#allocation4 + $0x2ec] sm:$0xf]  ;;  %v8098_v43 = vld [vmem:[#allocation3 + $0xac] sm:$0xf] }
 0x500   : > { %v10783_v4 = vpop.f32.mrf.mxu2  ;;  %v10842_v30 = vpop.f32.mrf.mxu3  ;;  %8891 = vst [vmem:[#allocation4 + $0x2a8] sm:$0xf] %v8795_v28 }
 0x501   : > { %v16583_v9 = vadd.f32 %v10783_v4, %v10695_v41  ;;  %v10843_v63 = vadd.f32 %v10842_v30, %v16379_v51  ;;  %v8457_v41 = vrot.slane %v8456_v0, 4  ;;  %v8467_v56 = vrot.slane %v8466_v48, 4  ;;  %v8662_v51 = vld [vmem:[#allocation3 + $0x8c] sm:$0x1]  ;;  %v12800_v4 = vld [vmem:[#allocation4 + $0x30c] sm:$0xf0] }
 0x502   : > { %v12799_v30 = vor.u32 %v13617_v8, %v12798_v19  ;;  %v8797_v50 = vrot.slane %v8662_v51, 5  ;;  %v7837_v0 = vld [vmem:[#allocation3 + $0xa0] sm:$0xf]  ;;  %v12803_v48 = vor.u32 %v13613_v23, %v12800_v4  ;;  %v8174_v8 = vld [vmem:[#allocation3 + $0xac] sm:$0xf] }
 0x503   : > { %v16588_v3 = vadd.f32 %v10931_v16, %v10843_v63  ;;  %v8462_v34 = vsel %vm14183_vm10, %v8457_v41, %v8461_v52  ;;  %v7836_v63 = vld [vmem:[#allocation3 + $0x9c] sm:$0xe]  ;;  %v7838_v52 = vld [vmem:[#allocation3 + $0xa4] sm:$0x1]  ;;  %v7982_v41 = vrot.slane %v7837_v0, 5  ;;  %v16605_v51 = vpop.f32.mrf.mxu1  ;;  %v8487_v4 = vshrl.u32 %v8174_v8, 16 }
 0x504   : > { %8623 = vst [vmem:[#allocation4 + $0x334] sm:$0xf] %v8462_v34  ;;  %v12392_v14 = vrot.slane %v7836_v63, 9  ;;  %v8798_v54 = vsel %vm14209_vm11, %v8796_v24, %v8797_v50  ;;  %v7985_v19 = vrot.slane %v7838_v52, 5  ;;  %v8175_v34 = vld [vmem:[#allocation3 + $0xb0] sm:$0x1] }
 0x505   : > { %11101 = vmatmul.bf16.vlgmr.msra.gmra.mxu2 %v12447_v53  ;;  %8130 = vst [vmem:[#allocation4 + $0x39c] sm:$0xf] %v8098_v43  ;;  %v13537_v23 = vld [vmem:[#allocation4 + $0x88] sm:$0xf0]  ;;  %v12828_v63 = vld [vmem:[#allocation4 + $0x34c] sm:$0xf0] }
 0x506   : > { %v10934_v53 = vpop.f32.mrf.mxu0  ;;  %8892 = vst [vmem:[#allocation4 + $0x2cc] sm:$0xf] %v8798_v54 }
 0x507   : > { %10884 = vmatmul.bf16.gmra.mxu3 %v12795_v35  ;;  %v8472_v35 = vsel %vm14183_vm10, %v8467_v56, %v8471_v61  ;;  %v8097_v56 = vld [vmem:[#allocation3 + $0xa8] sm:$0xf]  ;;  %v8474_v61 = vshrl.u32 %v8173_v6, 16 }
 0x508   : > { %v10786_v16 = vpop.f32.mrf.mxu2  ;;  %v10845_v38 = vpop.f32.mrf.mxu3  ;;  %8624 = vst [vmem:[#allocation4 + $0x358] sm:$0xf] %v8472_v35 }
 0x509   : > { %v16598_v55 = vadd.f32 %v10786_v16, %v10698_v44  ;;  %v10846_v27 = vadd.f32 %v10845_v38, %v16405_v5  ;;  %8129 = vst [vmem:[#allocation4 + $0x378] sm:$0xf] %v8097_v56  ;;  %v7983_v5 = vsel %vm14209_vm11, %v12392_v14, %v7982_v41  ;;  %v7984_v44 = vrot.slane %v7982_v41, 4  ;;  %v8663_v38 = vld [vmem:[#allocation3 + $0x90] sm:$0xe] }
 0x50a   : > { %8064 = vst [vmem:[#allocation4 + $0x374] sm:$0xf] %v7983_v5  ;;  %v8476_v35 = vrot.slane %v8474_v61, 4  ;;  %v8483_v16 = vshll.u32 %v8174_v8, 16  ;;  %v12482_v14 = vld [vmem:[#allocation4 + $0x68] sm:$0xf] }
 0x50b   : > { %17113 = vst [vmem:[#allocation50_spill] sm:$0xff] %v16598_v55  ;;  %v16601_v28 = vadd.f32 %v10934_v53, %v10846_v27  ;;  %v8477_v53 = vshll.u32 %v8173_v6, 16  ;;  %v7986_v24 = vsel %vm14209_vm11, %v7984_v44, %v7985_v19  ;;  %v8489_v41 = vrot.slane %v8487_v4, 4  ;;  %v8664_v61 = vld [vmem:[#allocation3 + $0x94] sm:$0xf] }
 0x50c   : > { %10973 = vmatmul.bf16.gmra.mxu0 %v12799_v30  ;;  %v10700_v30 = vadd.f32 %v16286_v39, %v16263_v33  ;;  %8065 = vst [vmem:[#allocation4 + $0x398] sm:$0xf] %v7986_v24  ;;  %v8485_v52 = vrot.slane %v8483_v16, 5  ;;  %v8493_v56 = vshll.u32 %v8175_v34, 16  ;;  %v13621_v39 = vld [vmem:[#allocation4 + $0x32c] sm:$0xf]  ;;  %v12483_v44 = vor.u32 %v13537_v23, %v12482_v14 }
 0x50d   : > { %11062 = vmatmul.bf16.gmra.mxu1 %v12803_v48  ;;  %v8479_v0 = vrot.slane %v8477_v53, 5  ;;  %v8665_v8 = vld [vmem:[#allocation3 + $0x98] sm:$0x1]  ;;  %v12406_v54 = vrot.slane %v8663_v38, 9  ;;  %v8801_v5 = vrot.slane %v8664_v61, 5  ;;  %v12831_v19 = vor.u32 %v13621_v39, %v12828_v63 }
 0x50e   : > { %v10936_v50 = vpop.f32.mrf.mxu0  ;;  %v8490_v55 = vor.u32 %v8489_v41, %v8485_v52  ;;  %v8804_v24 = vrot.slane %v8665_v8, 5  ;;  %v10703_v63 = vadd.f32 %v16320_v58, %v16276_v1  ;;  %v13622_v61 = vld [vmem:[#allocation4 + $0x334] sm:$0xf]  ;;  %v7841_v1 = vld [vmem:[#allocation3 + $0xb0] sm:$0x1] }
 0x50f   : > { %v8480_v43 = vor.u32 %v8479_v0, %v8476_v35  ;;  %v8803_v4 = vrot.slane %v8801_v5, 4  ;;  %v13626_v35 = vld [vmem:[#allocation4 + $0x350] sm:$0xf0]  ;;  %v12836_v14 = vld [vmem:[#allocation4 + $0x354] sm:$0xf0] }
 0x510   : > { %v10788_v27 = vpop.f32.mrf.mxu2  ;;  %v10847_v6 = vpop.f32.mrf.mxu3  ;;  %v8491_v34 = vrot.slane %v8490_v55, 4  ;;  %v7840_v8 = vld [vmem:[#allocation3 + $0xac] sm:$0xf]  ;;  %v12839_v58 = vor.u32 %v13622_v61, %v12836_v14 }
 0x511   : > { %v16613_v48 = vadd.f32 %v10788_v27, %v10700_v30  ;;  %v10848_v33 = vadd.f32 %v10847_v6, %v16419_v31  ;;  %v8481_v16 = vrot.slane %v8480_v43, 4  ;;  %v8802_v30 = vsel %vm14209_vm11, %v12406_v54, %v8801_v5  ;;  %v8176_v27 = vld [vmem:[#allocation3 + $0xb4] sm:$0xf]  ;;  %v12834_v6 = vld [vmem:[#allocation4 + $0x330] sm:$0xf] }
 0x512   : > { %v8495_v31 = vrot.slane %v8493_v56, 5  ;;  %8893 = vst [vmem:[#allocation4 + $0x2f0] sm:$0xf] %v8802_v30  ;;  %v8805_v23 = vsel %vm14209_vm11, %v8803_v4, %v8804_v24  ;;  %v7839_v43 = vld [vmem:[#allocation3 + $0xa8] sm:$0xe]  ;;  %v7989_v5 = vrot.slane %v7840_v8, 5 }
 0x513   : > { %v16616_v53 = vadd.f32 %v10936_v50, %v10848_v33  ;;  %v8486_v38 = vsel %vm14183_vm10, %v8481_v16, %v8485_v52  ;;  %v16624_v50 = vpop.f32.mrf.mxu1  ;;  %v12835_v52 = vor.u32 %v13626_v35, %v12834_v6  ;;  %8894 = vst [vmem:[#allocation4 + $0x314] sm:$0xf] %v8805_v23  ;;  %v12393_v54 = vrot.slane %v7839_v43, 9  ;;  %v8100_v16 = vld [vmem:[#allocation3 + $0xb8] sm:$0xf] }
 0x514   : > { %v8496_v0 = vsel %vm14183_vm10, %v8491_v34, %v8495_v31  ;;  %8625 = vst [vmem:[#allocation4 + $0x37c] sm:$0xf] %v8486_v38  ;;  %v8177_v30 = vld [vmem:[#allocation3 + $0xb8] sm:$0xf]  ;;  %v13546_v4 = vld [vmem:[#allocation4 + $0xd0] sm:$0xf0] }
 0x515   : > { %11106 = vmatmul.bf16.gmra.mxu2 %v12483_v44  ;;  %8626 = vst [vmem:[#allocation4 + $0x3a0] sm:$0xf] %v8496_v0  ;;  %v8099_v44 = vld [vmem:[#allocation3 + $0xb4] sm:$0xf]  ;;  %v7990_v34 = vsel %vm14209_vm11, %v12393_v54, %v7989_v5  ;;  %v7992_v31 = vrot.slane %v7841_v1, 5  ;;  %v8501_v23 = vshll.u32 %v8176_v27, 16  ;;  %v10705_v0 = vadd.f32 %v16343_v22, %v16298_v57 }
 0x516   : > { %v10939_v41 = vpop.f32.mrf.mxu0  ;;  %8131 = vst [vmem:[#allocation4 + $0x3c0] sm:$0xf] %v8099_v44  ;;  %v8178_v35 = vld [vmem:[#allocation3 + $0xbc] sm:$0x1]  ;;  %v8511_v14 = vshrl.u32 %v8177_v30, 16 }
 0x517   : > { %10889 = vmatmul.bf16.gmra.mxu3 %v12831_v19  ;;  %v8498_v19 = vshrl.u32 %v8176_v27, 16  ;;  %8132 = vst [vmem:[#allocation4 + $0x3e4] sm:$0xf] %v8100_v16  ;;  %v8503_v61 = vrot.slane %v8501_v23, 5  ;;  %v12518_v1 = vld [vmem:[#allocation4 + $0xb0] sm:$0xf] }
 0x518   : > { %v10791_v55 = vpop.f32.mrf.mxu2  ;;  %v10850_v33 = vpop.f32.mrf.mxu3  ;;  %8066 = vst [vmem:[#allocation4 + $0x3bc] sm:$0xf] %v7990_v34  ;;  %v8667_v54 = vld [vmem:[#allocation3 + $0xa0] sm:$0xf]  ;;  %v12519_v22 = vor.u32 %v13546_v4, %v12518_v1  ;;  %v12870_v1 = vld [vmem:[#allocation4 + $0x378] sm:$0xf] }
 0x519   : > { %v16630_v56 = vadd.f32 %v10791_v55, %v10703_v63  ;;  %v10851_v39 = vadd.f32 %v10850_v33, %v16446_v42  ;;  %v7991_v42 = vrot.slane %v7989_v5, 4  ;;  %v8500_v38 = vrot.slane %v8498_v19, 4  ;;  %v12864_v55 = vld [vmem:[#allocation4 + $0x394] sm:$0xf0]  ;;  %v13630_v5 = vld [vmem:[#allocation4 + $0x374] sm:$0xf] }
 0x51a   : > { %v8507_v63 = vshll.u32 %v8177_v30, 16  ;;  %v8668_v19 = vld [vmem:[#allocation3 + $0xa4] sm:$0x1]  ;;  %v12867_v30 = vor.u32 %v13630_v5, %v12864_v55  ;;  %v8179_v55 = vld [vmem:[#allocation3 + $0xc0] sm:$0xf] }
 0x51b   : > { %v16633_v24 = vadd.f32 %v10939_v41, %v10851_v39  ;;  %v7993_v6 = vsel %vm14209_vm11, %v7991_v42, %v7992_v31  ;;  %v8666_v41 = vld [vmem:[#allocation3 + $0x9c] sm:$0xe]  ;;  %v8517_v39 = vshll.u32 %v8178_v35, 16  ;;  %v16641_v43 = vpop.f32.mrf.mxu1  ;;  %v8504_v44 = vor.u32 %v8503_v61, %v8500_v38  ;;  %v7843_v5 = vld [vmem:[#allocation3 + $0xb8] sm:$0xf] }
 0x51c   : > { %10978 = vmatmul.bf16.gmra.mxu0 %v12835_v52  ;;  %8067 = vst [vmem:[#allocation4 + $0x3e0] sm:$0xf] %v7993_v6  ;;  %v8509_v33 = vrot.slane %v8507_v63, 5  ;;  %v12407_v42 = vrot.slane %v8666_v41, 9  ;;  %v8808_v31 = vrot.slane %v8667_v54, 5  ;;  %v8811_v4 = vrot.slane %v8668_v19, 5 }
 0x51d   : > { %11067 = vmatmul.bf16.gmra.mxu1 %v12839_v58  ;;  %v8513_v58 = vrot.slane %v8511_v14, 4  ;;  %v8505_v23 = vrot.slane %v8504_v44, 4  ;;  %v8519_v63 = vrot.slane %v8517_v39, 5  ;;  %v13635_v14 = vld [vmem:[#allocation4 + $0x398] sm:$0xf0] }
 0x51e   : > { %v10941_v16 = vpop.f32.mrf.mxu0  ;;  %v8809_v6 = vsel %vm14209_vm11, %v12407_v42, %v8808_v31  ;;  %v17114_v41 = vld [vmem:[#allocation59_spill] sm:$0xff]  ;;  %v7844_v44 = vld [vmem:[#allocation3 + $0xbc] sm:$0x1]  ;;  %v8522_v42 = vshrl.u32 %v8179_v55, 16 }
 0x51f   : > { %v8514_v34 = vor.u32 %v8513_v58, %v8509_v33  ;;  %v8510_v38 = vsel %vm14183_vm10, %v8505_v23, %v8509_v33  ;;  %8895 = vst [vmem:[#allocation4 + $0x338] sm:$0xf] %v8809_v6  ;;  %v12872_v58 = vld [vmem:[#allocation4 + $0x39c] sm:$0xf0]  ;;  %v13631_v33 = vld [vmem:[#allocation4 + $0x37c] sm:$0xf] }
 0x520   : > { %v10793_v52 = vpop.f32.mrf.mxu2  ;;  %v10852_v27 = vpop.f32.mrf.mxu3  ;;  %8627 = vst [vmem:[#allocation4 + $0x3c4] sm:$0xf] %v8510_v38  ;;  %v12875_v19 = vor.u32 %v13631_v33, %v12872_v58  ;;  %v8180_v23 = vld [vmem:[#allocation3 + $0xc4] sm:$0xf]  ;;  %v8525_v38 = vshll.u32 %v8179_v55, 16 }
 0x521   : > { %v16643_v8 = vadd.f32 %v10793_v52, %v10705_v0  ;;  %v10853_v57 = vadd.f32 %v10852_v27, %v16462_v32  ;;  %v8515_v0 = vrot.slane %v8514_v34, 4  ;;  %v8810_v32 = vrot.slane %v8808_v31, 4  ;;  %v8101_v34 = vld [vmem:[#allocation3 + $0xc0] sm:$0xf]  ;;  %v8102_v31 = vld [vmem:[#allocation3 + $0xc4] sm:$0xf] }
 0x522   : > { %v10708_v52 = vadd.f32 %v16373_v18, %v17114_v41  ;;  %8133 = vst [vmem:[#allocation4 + $0x408] sm:$0xf] %v8101_v34  ;;  %v8531_v41 = vshll.u32 %v8180_v23, 16  ;;  %v8670_v55 = vld [vmem:[#allocation3 + $0xac] sm:$0xf] }
 0x523   : > { %v16646_v35 = vadd.f32 %v10941_v16, %v10853_v57  ;;  %v8520_v61 = vsel %vm14183_vm10, %v8515_v0, %v8519_v63  ;;  %v8812_v39 = vsel %vm14209_vm11, %v8810_v32, %v8811_v4  ;;  %v12871_v57 = vor.u32 %v13635_v14, %v12870_v1  ;;  %v16660_v18 = vpop.f32.mrf.mxu1  ;;  %v13555_v63 = vld [vmem:[#allocation4 + $0x118] sm:$0xf0]  ;;  %8134 = vst [vmem:[#allocation4 + $0x42c] sm:$0xf] %v8102_v31  ;;  %v8181_v4 = vld [vmem:[#allocation3 + $0xc8] sm:$0x1] }
 0x524   : > { %8628 = vst [vmem:[#allocation4 + $0x3e8] sm:$0xf] %v8520_v61  ;;  %v7999_v32 = vrot.slane %v7844_v44, 5  ;;  %v8524_v14 = vrot.slane %v8522_v42, 4  ;;  %v12900_v61 = vld [vmem:[#allocation4 + $0x3dc] sm:$0xf0] }
 0x525   : > { %11111 = vmatmul.bf16.gmra.mxu2 %v12519_v22  ;;  %8896 = vst [vmem:[#allocation4 + $0x35c] sm:$0xf] %v8812_v39  ;;  %v7842_v22 = vld [vmem:[#allocation3 + $0xb4] sm:$0xe]  ;;  %v8669_v1 = vld [vmem:[#allocation3 + $0xa8] sm:$0xe] }
 0x526   : > { %v12394_v16 = vrot.slane %v7842_v22, 9  ;;  %v8533_v33 = vrot.slane %v8531_v41, 5  ;;  %v8541_v22 = vshll.u32 %v8181_v4, 16  ;;  %v12554_v44 = vld [vmem:[#allocation4 + $0xf8] sm:$0xf]  ;;  %v12408_v31 = vrot.slane %v8669_v1, 9 }
 0x527   : > { %10894 = vmatmul.bf16.gmra.mxu3 %v12867_v30  ;;  %v7996_v30 = vrot.slane %v7843_v5, 5 }
 0x528   : > { %v10796_v27 = vpop.f32.mrf.mxu2 }
 0x529   : > { %v16658_v54 = vadd.f32 %v10796_v27, %v10708_v52  ;;  %v7997_v0 = vsel %vm14209_vm11, %v12394_v16, %v7996_v30  ;;  %v7998_v6 = vrot.slane %v7996_v30, 4  ;;  %v10710_v52 = vadd.f32 %v16403_v62, %v16341_v40  ;;  %v13639_v30 = vld [vmem:[#allocation4 + $0x3bc] sm:$0xf]  ;;  %v8671_v40 = vld [vmem:[#allocation3 + $0xb0] sm:$0x1] }
 0x52a   : > { %8068 = vst [vmem:[#allocation4 + $0x404] sm:$0xf] %v7997_v0  ;;  %v8535_v27 = vshrl.u32 %v8180_v23, 16  ;;  %v12555_v16 = vor.u32 %v13555_v63, %v12554_v44  ;;  %v12903_v62 = vor.u32 %v13639_v30, %v12900_v61  ;;  %v8815_v0 = vrot.slane %v8670_v55, 5  ;;  %v13644_v63 = vld [vmem:[#allocation4 + $0x3e0] sm:$0xf0] }
 0x52b   : > { %v8000_v39 = vsel %vm14209_vm11, %v7998_v6, %v7999_v32  ;;  %v8543_v6 = vrot.slane %v8541_v22, 5  ;;  %v16670_v32 = vpop.f32.mrf.mxu1  ;;  %v10713_v61 = vadd.f32 %v16424_v59, %v16367_v45  ;;  %v7846_v55 = vld [vmem:[#allocation3 + $0xc4] sm:$0xf] }
 0x52c   : > { %10983 = vmatmul.bf16.gmra.mxu0 %v12871_v57  ;;  %8069 = vst [vmem:[#allocation4 + $0x428] sm:$0xf] %v8000_v39  ;;  %v8527_v57 = vrot.slane %v8525_v38, 5  ;;  %v8816_v38 = vsel %vm14209_vm11, %v12408_v31, %v8815_v0  ;;  %v8817_v41 = vrot.slane %v8815_v0, 4  ;;  %v8003_v59 = vrot.slane %v7846_v55, 5 }
 0x52d   : > { %11072 = vmatmul.bf16.gmra.mxu1 %v12875_v19  ;;  %v8537_v19 = vrot.slane %v8535_v27, 4  ;;  %8897 = vst [vmem:[#allocation4 + $0x380] sm:$0xf] %v8816_v38  ;;  %v13564_v0 = vld [vmem:[#allocation4 + $0x160] sm:$0xf0] }
 0x52e   : > { %v8528_v34 = vor.u32 %v8527_v57, %v8524_v14  ;;  %v12908_v57 = vld [vmem:[#allocation4 + $0x3e4] sm:$0xf0]  ;;  %v8672_v38 = vld [vmem:[#allocation3 + $0xb4] sm:$0xe] }
 0x52f   : > { %v8538_v42 = vor.u32 %v8537_v19, %v8533_v33  ;;  %v13640_v19 = vld [vmem:[#allocation4 + $0x3c4] sm:$0xf] }
 0x530   : > { %v10798_v58 = vpop.f32.mrf.mxu2  ;;  %v8529_v23 = vrot.slane %v8528_v34, 4  ;;  %v12911_v45 = vor.u32 %v13640_v19, %v12908_v57  ;;  %v8005_v34 = vrot.slane %v8003_v59, 4  ;;  %v13653_v19 = vld [vmem:[#allocation4 + $0x428] sm:$0xf0] }
 0x531   : > { %v16668_v5 = vadd.f32 %v10798_v58, %v10710_v52  ;;  %v8539_v4 = vrot.slane %v8538_v42, 4  ;;  %v8818_v52 = vrot.slane %v8671_v40, 5  ;;  %v12906_v58 = vld [vmem:[#allocation4 + $0x3c0] sm:$0xf] }
 0x532   : > { %v8534_v14 = vsel %vm14183_vm10, %v8529_v23, %v8533_v33  ;;  %v12907_v44 = vor.u32 %v13644_v63, %v12906_v58  ;;  %v7845_v33 = vld [vmem:[#allocation3 + $0xc0] sm:$0xe]  ;;  %v17115_v42 = vld [vmem:[#allocation20_spill] sm:$0xff] }
 0x533   : > { %v8544_v39 = vsel %vm14183_vm10, %v8539_v4, %v8543_v6  ;;  %8629 = vst [vmem:[#allocation4 + $0x40c] sm:$0xf] %v8534_v14  ;;  %v8819_v27 = vsel %vm14209_vm11, %v8817_v41, %v8818_v52  ;;  %v12395_v29 = vrot.slane %v7845_v33, 9  ;;  %v10715_v31 = vadd.f32 %v17115_v42, %v16389_v10  ;;  %v12936_v4 = vld [vmem:[#allocation4 + $0x424] sm:$0xf0]  ;;  %v17116_v33 = vld [vmem:[#allocation19_spill] sm:$0xff] }
 0x534   : > { %8630 = vst [vmem:[#allocation4 + $0x430] sm:$0xf] %v8544_v39  ;;  %v8673_v52 = vld [vmem:[#allocation3 + $0xb8] sm:$0xf]  ;;  %v13648_v14 = vld [vmem:[#allocation4 + $0x404] sm:$0xf]  ;;  %v10718_v55 = vadd.f32 %v16484_v47, %v17116_v33 }
 0x535   : > { %11116 = vmatmul.bf16.gmra.mxu2 %v12555_v16  ;;  %8898 = vst [vmem:[#allocation4 + $0x3a4] sm:$0xf] %v8819_v27  ;;  %v7847_v16 = vld [vmem:[#allocation3 + $0xc8] sm:$0x1]  ;;  %v8004_v30 = vsel %vm14209_vm11, %v12395_v29, %v8003_v59  ;;  %v12590_v63 = vld [vmem:[#allocation4 + $0x140] sm:$0xf]  ;;  %v12939_v27 = vor.u32 %v13648_v14, %v12936_v4 }
 0x536   : > { %v8006_v40 = vrot.slane %v7847_v16, 5  ;;  %8070 = vst [vmem:[#allocation4 + $0x44c] sm:$0xf] %v8004_v30  ;;  %v12591_v39 = vor.u32 %v13564_v0, %v12590_v63  ;;  %v8822_v58 = vrot.slane %v8673_v52, 5  ;;  %v12942_v29 = vld [vmem:[#allocation4 + $0x408] sm:$0xf] }
 0x537   : > { %10899 = vmatmul.bf16.gmra.mxu3 %v12903_v62  ;;  %v16686_v62 = vpop.f32.mrf.mxu1  ;;  %v17117_v0 = vld [vmem:[#allocation60_spill] sm:$0xff]  ;;  %v8675_v47 = vld [vmem:[#allocation3 + $0xc0] sm:$0xe]  ;;  %v13573_v4 = vld [vmem:[#allocation4 + $0x1a8] sm:$0xf0] }
 0x538   : > { %v10801_v1 = vpop.f32.mrf.mxu2  ;;  %v8007_v23 = vsel %vm14209_vm11, %v8005_v34, %v8006_v40  ;;  %v8824_v57 = vrot.slane %v8822_v58, 4  ;;  %v12943_v40 = vor.u32 %v13653_v19, %v12942_v29  ;;  %v8676_v63 = vld [vmem:[#allocation3 + $0xc4] sm:$0xf]  ;;  %v8677_v14 = vld [vmem:[#allocation3 + $0xc8] sm:$0x1] }
 0x539   : > { %v16682_v22 = vadd.f32 %v10801_v1, %v10713_v61  ;;  %8071 = vst [vmem:[#allocation4 + $0x470] sm:$0xf] %v8007_v23  ;;  %v8674_v61 = vld [vmem:[#allocation3 + $0xbc] sm:$0x1]  ;;  %v12409_v1 = vrot.slane %v8672_v38, 9  ;;  %v10720_v23 = vadd.f32 %v16502_v15, %v17117_v0 }
 0x53a   : > { %v13649_v42 = vld [vmem:[#allocation4 + $0x40c] sm:$0xf]  ;;  %v13662_v19 = vld [vmem:[#allocation4 + $0x470] sm:$0xf0] }
 0x53b   : > { %v8823_v10 = vsel %vm14209_vm11, %v12409_v1, %v8822_v58  ;;  %v12944_v59 = vld [vmem:[#allocation4 + $0x42c] sm:$0xf0]  ;;  %v8829_v1 = vrot.slane %v8676_v63, 5 }
 0x53c   : > { %10988 = vmatmul.bf16.gmra.mxu0 %v12907_v44  ;;  %v8825_v44 = vrot.slane %v8674_v61, 5  ;;  %8899 = vst [vmem:[#allocation4 + $0x3c8] sm:$0xf] %v8823_v10  ;;  %v12626_v61 = vld [vmem:[#allocation4 + $0x188] sm:$0xf] }
 0x53d   : > { %11077 = vmatmul.bf16.gmra.mxu1 %v12911_v45  ;;  %v12627_v10 = vor.u32 %v13573_v4, %v12626_v61  ;;  %v8831_v33 = vrot.slane %v8829_v1, 4  ;;  %v12662_v63 = vld [vmem:[#allocation4 + $0x1d0] sm:$0xf] }
 0x53e   : > { %v8826_v16 = vsel %vm14209_vm11, %v8824_v57, %v8825_v44  ;;  %v12978_v44 = vld [vmem:[#allocation4 + $0x450] sm:$0xf] }
 0x53f   : > { %8900 = vst [vmem:[#allocation4 + $0x3ec] sm:$0xf] %v8826_v16  ;;  %v16700_v30 = vpop.f32.mrf.mxu1  ;;  %v13658_v16 = vld [vmem:[#allocation4 + $0x454] sm:$0xf] }
 0x540   : > { %v10803_v6 = vpop.f32.mrf.mxu2  ;;  %v12972_v38 = vld [vmem:[#allocation4 + $0x46c] sm:$0xf0] }
 0x541   : > { %v16692_v41 = vadd.f32 %v10803_v6, %v10715_v31  ;;  %v12947_v31 = vor.u32 %v13649_v42, %v12944_v59  ;;  %v17118_v59 = vld [vmem:[#allocation21_spill] sm:$0xff]  ;;  %v12979_v42 = vor.u32 %v13662_v19, %v12978_v44  ;;  %v10733_v44 = vadd.f32 %v16586_v17, %v16520_v49 }
 0x542   : > { %v11014_v49 = vadd.f32 %v16624_v50, %v16547_v25  ;;  %v11016_v25 = vadd.f32 %v16641_v43, %v16558_v36  ;;  %v11019_v36 = vadd.f32 %v16660_v18, %v16575_v12 }
 0x545   : > { %11121 = vmatmul.bf16.gmra.mxu2 %v12591_v39  ;;  %v13657_v39 = vld [vmem:[#allocation4 + $0x44c] sm:$0xf] }
 0x546   : > { %v12975_v57 = vor.u32 %v13657_v39, %v12972_v38  ;;  %v13582_v38 = vld [vmem:[#allocation4 + $0x1f0] sm:$0xf0] }
 0x547   : > { %10904 = vmatmul.bf16.gmra.mxu3 %v12939_v27  ;;  %v12410_v27 = vrot.slane %v8675_v47, 9  ;;  %v16708_v58 = vpop.f32.mrf.mxu1 }
 0x548   : > { %v10806_v45 = vpop.f32.mrf.mxu2 }
 0x549   : > { %v16702_v34 = vadd.f32 %v10806_v45, %v10718_v55  ;;  %v8830_v15 = vsel %vm14209_vm11, %v12410_v27, %v8829_v1  ;;  %v8832_v55 = vrot.slane %v8677_v14, 5  ;;  %v12980_v45 = vld [vmem:[#allocation4 + $0x474] sm:$0xf0]  ;;  %v12663_v14 = vor.u32 %v13582_v38, %v12662_v63 }
 0x54a   : > { %8901 = vst [vmem:[#allocation4 + $0x410] sm:$0xf] %v8830_v15  ;;  %v10730_v27 = vadd.f32 %v16570_v7, %v16506_v37  ;;  %v12734_v7 = vld [vmem:[#allocation4 + $0x260] sm:$0xf] }
 0x54b   : > { %v8833_v29 = vsel %vm14209_vm11, %v8831_v33, %v8832_v55  ;;  %v13600_v33 = vld [vmem:[#allocation4 + $0x280] sm:$0xf0] }
 0x54c   : > { %10993 = vmatmul.bf16.gmra.mxu0 %v12943_v40  ;;  %v10723_v40 = vadd.f32 %v16518_v20, %v17118_v59  ;;  %8902 = vst [vmem:[#allocation4 + $0x434] sm:$0xf] %v8833_v29  ;;  %v10728_v20 = vadd.f32 %v16551_v2, %v16492_v60  ;;  %v10735_v60 = vadd.f32 %v16605_v51, %v16532_v26 }
 0x54d   : > { %11082 = vmatmul.bf16.gmra.mxu1 %v12947_v31  ;;  %v12735_v55 = vor.u32 %v13600_v33, %v12734_v7  ;;  %v13618_v33 = vld [vmem:[#allocation4 + $0x310] sm:$0xf0]  ;;  %v17122_v7 = vld [vmem:[#allocation25_spill] sm:$0xff] }
 0x54f   : > { %v16718_v47 = vpop.f32.mrf.mxu1 }
 0x550   : > { %v10808_v6 = vpop.f32.mrf.mxu2 }
 0x551   : > { %v16706_v52 = vadd.f32 %v10808_v6, %v10720_v23  ;;  %v12983_v23 = vor.u32 %v13658_v16, %v12980_v45  ;;  %v10725_v6 = vadd.f32 %v16536_v21, %v16473_v11  ;;  %v12698_v11 = vld [vmem:[#allocation4 + $0x218] sm:$0xf]  ;;  %v16743_v16 = vld [vmem:[%s16947_s6] ss:$0 sm:$0xff] }
 0x552   : > { %v17119_v45 = vld [vmem:[#allocation22_spill] sm:$0xff]  ;;  %v5817_v12 = vadd.f32 %v16743_v16, %v17122_v7 }
 0x553   : > { %v5810_v29 = vadd.f32 %v16743_v16, %v17119_v45 }
 0x555   : > { %11126 = vmatmul.bf16.gmra.mxu2 %v12627_v10  ;;  %v13591_v10 = vld [vmem:[#allocation4 + $0x238] sm:$0xf0] }
 0x556   : > { %v12699_v21 = vor.u32 %v13591_v10, %v12698_v11 }
 0x557   : > { %10909 = vmatmul.bf16.gmra.mxu3 %v12975_v57 }
 0x558   : > { %v10811_v31 = vpop.f32.mrf.mxu2 }
 0x559   : > { %v16716_v0 = vadd.f32 %v10811_v31, %v10723_v40  ;;  %v16755_v40 = vpop.f32.mrf.mxu3  ;;  %v17120_v31 = vld [vmem:[#allocation23_spill] sm:$0xff] }
 0x55c   : > { %10998 = vmatmul.bf16.gmra.mxu0 %v12979_v42  ;;  %v13609_v42 = vld [vmem:[#allocation4 + $0x2c8] sm:$0xf0] }
 0x55d   : > { %11087 = vmatmul.bf16.gmra.mxu1 %v12983_v23  ;;  %v5812_v23 = vadd.f32 %v16743_v16, %v17120_v31 }
 0x560   : > { %v10813_v4 = vpop.f32.mrf.mxu2 }
 0x561   : > { %v16722_v46 = vadd.f32 %v10813_v4, %v10725_v6  ;;  %v12770_v4 = vld [vmem:[#allocation4 + $0x2a8] sm:$0xf]  ;;  %v16769_v43 = vpop.f32.mrf.mxu3 }
 0x562   : > { %v12771_v63 = vor.u32 %v13609_v42, %v12770_v4  ;;  %v11026_v4 = vadd.f32 %v16700_v30, %v16616_v53  ;;  %v11029_v53 = vadd.f32 %v16708_v58, %v16633_v24 }
 0x565   : > { %11131 = vmatmul.bf16.gmra.mxu2 %v12663_v14  ;;  %v16762_v14 = vpop.f32.mrf.mxu0 }
 0x568   : > { %v10816_v61 = vpop.f32.mrf.mxu2 }
 0x569   : > { %v16726_v39 = vadd.f32 %v10816_v61, %v10728_v20  ;;  %v16764_v61 = vpop.f32.mrf.mxu1 }
 0x570   : > { %v10818_v1 = vpop.f32.mrf.mxu2 }
 0x571   : > { %v16730_v57 = vadd.f32 %v10818_v1, %v10730_v27  ;;  %v17121_v1 = vld [vmem:[#allocation24_spill] sm:$0xff]  ;;  %v16780_v18 = vpop.f32.mrf.mxu1 }
 0x572   : > { %v5815_v10 = vadd.f32 %v16743_v16, %v17121_v1 }
 0x575   : > { %11136 = vmatmul.bf16.gmra.mxu2 %v12699_v21 }
 0x578   : > { %v10821_v19 = vpop.f32.mrf.mxu2 }
 0x579   : > { %v16734_v15 = vadd.f32 %v10821_v19, %v10733_v44  ;;  %v16773_v19 = vpop.f32.mrf.mxu0  ;;  %v16791_v42 = vpop.f32.mrf.mxu1 }
 0x580   : > { %v10823_v2 = vpop.f32.mrf.mxu2 }
 0x581   : > { %v16738_v37 = vadd.f32 %v10823_v2, %v10735_v60  ;;  %v11021_v60 = vadd.f32 %v16670_v32, %v16588_v3  ;;  %v11024_v3 = vadd.f32 %v16686_v62, %v16601_v28  ;;  %v16787_v32 = vpop.f32.mrf.mxu0  ;;  %v13627_v28 = vld [vmem:[#allocation4 + $0x358] sm:$0xf0] }
 0x582   : > { %v17124_v62 = vld [vmem:[#allocation27_spill] sm:$0xff] }
 0x585   : > { %11141 = vmatmul.bf16.gmra.mxu2 %v12735_v55 }
 0x588   : > { %v11102_v17 = vpop.f32.mrf.mxu2 }
 0x589   : > { %v11103_v26 = vadd.f32 %v11102_v17, %v11014_v49  ;;  %v16782_v49 = vpop.f32.mrf.mxu3  ;;  %v12806_v17 = vld [vmem:[#allocation4 + $0x2f0] sm:$0xf] }
 0x58b   : > { %v11182_v51 = vadd.f32 %v11103_v26, %v5810_v29  ;;  %v12807_v29 = vor.u32 %v13618_v33, %v12806_v17  ;;  %v10856_v17 = vadd.f32 %v16755_v40, %v16490_v13 }
 0x58d   : > { %v11214_v59 = vmax.f32 %v11182_v51, 0.0 }
 0x58f   : > { %11246 = vst [vmem:[%s16753_s9] sm:$0xff] %v11214_v59  ;;  %v17123_v59 = vld [vmem:[#allocation26_spill] sm:$0xff] }
 0x590   : > { %v11104_v50 = vpop.f32.mrf.mxu2 }
 0x591   : > { %v11105_v6 = vadd.f32 %v11104_v50, %v11016_v25  ;;  %v5820_v25 = vadd.f32 %v16743_v16, %v17123_v59 }
 0x593   : > { %v11183_v38 = vadd.f32 %v11105_v6, %v5812_v23  ;;  %v16793_v23 = vpop.f32.mrf.mxu3 }
 0x595   : > { %v11215_v20 = vmax.f32 %v11183_v38, 0.0  ;;  %11146 = vmatmul.bf16.gmra.mxu2 %v12771_v63  ;;  %v5822_v63 = vadd.f32 %v16743_v16, %v17124_v62 }
 0x597   : > { %11247 = vst [vmem:[%s16753_s9 + $0x8] sm:$0xff] %v11215_v20 }
 0x598   : > { %v11107_v27 = vpop.f32.mrf.mxu2 }
 0x599   : > { %v11108_v11 = vadd.f32 %v11107_v27, %v11019_v36  ;;  %v16800_v36 = vpop.f32.mrf.mxu0  ;;  %v12842_v27 = vld [vmem:[#allocation4 + $0x338] sm:$0xf] }
 0x59b   : > { %v11184_v21 = vadd.f32 %v11108_v11, %v5815_v10  ;;  %v12843_v10 = vor.u32 %v13627_v28, %v12842_v27  ;;  %v16802_v11 = vpop.f32.mrf.mxu1  ;;  %v17128_v28 = vld [vmem:[#allocation30_spill] sm:$0xff] }
 0x59c   : > { %v5830_v62 = vadd.f32 %v16743_v16, %v17128_v28 }
 0x59d   : > { %v11216_v44 = vmax.f32 %v11184_v21, 0.0 }
 0x59f   : > { %11248 = vst [vmem:[%s16753_s9 + $0x10] sm:$0xff] %v11216_v44  ;;  %v16804_v44 = vpop.f32.mrf.mxu3 }
 0x5a0   : > { %v11109_v2 = vpop.f32.mrf.mxu2 }
 0x5a1   : > { %v11110_v55 = vadd.f32 %v11109_v2, %v11021_v60  ;;  %v17125_v60 = vld [vmem:[#allocation28_spill] sm:$0xff] }
 0x5a2   : > { %v5825_v2 = vadd.f32 %v16743_v16, %v17125_v60  ;;  %v13645_v60 = vld [vmem:[#allocation4 + $0x3e8] sm:$0xf0] }
 0x5a3   : > { %v11185_v45 = vadd.f32 %v11110_v55, %v5817_v12  ;;  %v16811_v12 = vpop.f32.mrf.mxu0 }
 0x5a5   : > { %v11217_v26 = vmax.f32 %v11185_v45, 0.0  ;;  %11151 = vmatmul.bf16.gmra.mxu2 %v12807_v29  ;;  %v16815_v45 = vpop.f32.mrf.mxu1  ;;  %v11031_v29 = vadd.f32 %v16718_v47, %v16646_v35 }
 0x5a7   : > { %11249 = vst [vmem:[%s16753_s9 + $0x18] sm:$0xff] %v11217_v26  ;;  %v16820_v24 = vpop.f32.mrf.mxu3  ;;  %v13636_v26 = vld [vmem:[#allocation4 + $0x3a0] sm:$0xf0] }
 0x5a8   : > { %v11112_v51 = vpop.f32.mrf.mxu2 }
 0x5a9   : > { %v11113_v50 = vadd.f32 %v11112_v51, %v11024_v3  ;;  %v17126_v3 = vld [vmem:[#allocation29_spill] sm:$0xff] }
 0x5aa   : > { %v5827_v51 = vadd.f32 %v16743_v16, %v17126_v3  ;;  %v17131_v3 = vld [vmem:[#allocation46_spill] sm:$0xff] }
 0x5ab   : > { %v11186_v31 = vadd.f32 %v11113_v50, %v5820_v25  ;;  %v12878_v25 = vld [vmem:[#allocation4 + $0x380] sm:$0xf]  ;;  %v10945_v50 = vadd.f32 %v16762_v14, %v10856_v17 }
 0x5ac   : > { %v12879_v13 = vor.u32 %v13636_v26, %v12878_v25  ;;  %v17132_v25 = vld [vmem:[#allocation32_spill] sm:$0xff] }
 0x5ad   : > { %v11218_v6 = vmax.f32 %v11186_v31, 0.0  ;;  %v11034_v47 = vadd.f32 %v16764_v61, %v10945_v50  ;;  %v5835_v50 = vadd.f32 %v16743_v16, %v17132_v25 }
 0x5af   : > { %11250 = vst [vmem:[%s16753_s9 + $0x20] sm:$0xff] %v11218_v6  ;;  %v10956_v6 = vpop.f32.mrf.mxu0  ;;  %v10870_v14 = vpop.f32.mrf.mxu3 }
 0x5b0   : > { %v11114_v38 = vpop.f32.mrf.mxu2 }
 0x5b1   : > { %v11115_v20 = vadd.f32 %v11114_v38, %v11026_v4  ;;  %v17127_v4 = vld [vmem:[#allocation44_spill] sm:$0xff] }
 0x5b2   : > { %v10858_v35 = vadd.f32 %v16769_v43, %v17127_v4 }
 0x5b3   : > { %v11187_v1 = vadd.f32 %v11115_v20, %v5822_v63  ;;  %v16831_v63 = vpop.f32.mrf.mxu1 }
 0x5b4   : > { %v10947_v27 = vadd.f32 %v16773_v19, %v10858_v35 }
 0x5b5   : > { %v11219_v21 = vmax.f32 %v11187_v1, 0.0  ;;  %11156 = vmatmul.bf16.gmra.mxu2 %v12843_v10 }
 0x5b6   : > { %v11036_v43 = vadd.f32 %v16780_v18, %v10947_v27  ;;  %v10863_v18 = vadd.f32 %v16793_v23, %v17131_v3 }
 0x5b7   : > { %11251 = vst [vmem:[%s16753_s9 + $0x28] sm:$0xff] %v11219_v21  ;;  %v17129_v21 = vld [vmem:[#allocation43_spill] sm:$0xff]  ;;  %v10959_v61 = vpop.f32.mrf.mxu0  ;;  %v10872_v26 = vpop.f32.mrf.mxu3 }
 0x5b8   : > { %v11117_v30 = vpop.f32.mrf.mxu2 }
 0x5b9   : > { %v11118_v33 = vadd.f32 %v11117_v30, %v11029_v53  ;;  %v10861_v53 = vadd.f32 %v16782_v49, %v17129_v21 }
 0x5bb   : > { %v11188_v7 = vadd.f32 %v11118_v33, %v5825_v2  ;;  %v17130_v2 = vld [vmem:[#allocation31_spill] sm:$0xff]  ;;  %v10950_v17 = vadd.f32 %v16787_v32, %v10861_v53  ;;  %v11048_v19 = vpop.f32.mrf.mxu1  ;;  %v10952_v32 = vadd.f32 %v16800_v36, %v10863_v18 }
 0x5bc   : > { %v5832_v33 = vadd.f32 %v16743_v16, %v17130_v2  ;;  %v12986_v18 = vld [vmem:[#allocation4 + $0x458] sm:$0xf] }
 0x5bd   : > { %v11220_v55 = vmax.f32 %v11188_v7, 0.0  ;;  %v11041_v23 = vadd.f32 %v16802_v11, %v10952_v32 }
 0x5bf   : > { %11252 = vst [vmem:[%s16753_s9 + $0x30] sm:$0xff] %v11220_v55  ;;  %v12914_v55 = vld [vmem:[#allocation4 + $0x3c8] sm:$0xf] }
 0x5c0   : > { %v11119_v58 = vpop.f32.mrf.mxu2 }
 0x5c1   : > { %v11120_v59 = vadd.f32 %v11119_v58, %v11031_v29  ;;  %v12915_v58 = vor.u32 %v13645_v60, %v12914_v55  ;;  %v17135_v60 = vld [vmem:[#allocation48_spill] sm:$0xff]  ;;  %v17136_v55 = vld [vmem:[#allocation34_spill] sm:$0xff] }
 0x5c3   : > { %v11189_v31 = vadd.f32 %v11120_v59, %v5827_v51  ;;  %v11039_v51 = vadd.f32 %v16791_v42, %v10950_v17  ;;  %v11050_v4 = vpop.f32.mrf.mxu1  ;;  %v5840_v17 = vadd.f32 %v16743_v16, %v17136_v55 }
 0x5c5   : > { %v11221_v40 = vmax.f32 %v11189_v31, 0.0  ;;  %11161 = vmatmul.bf16.gmra.mxu2 %v12879_v13  ;;  %v10961_v13 = vpop.f32.mrf.mxu0 }
 0x5c7   : > { %11253 = vst [vmem:[%s16753_s9 + $0x38] sm:$0xff] %v11221_v40 }
 0x5c8   : > { %v11122_v38 = vpop.f32.mrf.mxu2 }
 0x5c9   : > { %v11123_v20 = vadd.f32 %v11122_v38, %v11034_v47  ;;  %v10875_v47 = vpop.f32.mrf.mxu3  ;;  %v17133_v38 = vld [vmem:[#allocation45_spill] sm:$0xff] }
 0x5ca   : > { %v10866_v28 = vadd.f32 %v16804_v44, %v17133_v38  ;;  %v10868_v44 = vadd.f32 %v16820_v24, %v17135_v60 }
 0x5cb   : > { %v11190_v1 = vadd.f32 %v11123_v20, %v5830_v62  ;;  %v13654_v62 = vld [vmem:[#allocation4 + $0x430] sm:$0xf0]  ;;  %v17134_v20 = vld [vmem:[#allocation33_spill] sm:$0xff]  ;;  %v11053_v2 = vpop.f32.mrf.mxu1 }
 0x5cc   : > { %v5837_v27 = vadd.f32 %v16743_v16, %v17134_v20  ;;  %v10955_v36 = vadd.f32 %v16811_v12, %v10866_v28  ;;  %v10957_v12 = vadd.f32 %v10956_v6, %v10868_v44 }
 0x5cd   : > { %v11222_v10 = vmax.f32 %v11190_v1, 0.0 }
 0x5ce   : > { %v11044_v11 = vadd.f32 %v16815_v45, %v10955_v36  ;;  %v11046_v24 = vadd.f32 %v16831_v63, %v10957_v12  ;;  %v17138_v45 = vld [vmem:[#allocation35_spill] sm:$0xff]  ;;  %v17139_v63 = vld [vmem:[#allocation36_spill] sm:$0xff] }
 0x5cf   : > { %11254 = vst [vmem:[%s16753_s9 + $0x40] sm:$0xff] %v11222_v10  ;;  %v12950_v10 = vld [vmem:[#allocation4 + $0x410] sm:$0xf] }
 0x5d0   : > { %v11124_v30 = vpop.f32.mrf.mxu2  ;;  %v12951_v53 = vor.u32 %v13654_v62, %v12950_v10 }
 0x5d1   : > { %v11125_v7 = vadd.f32 %v11124_v30, %v11036_v43  ;;  %v10964_v43 = vpop.f32.mrf.mxu0 }
 0x5d3   : > { %v11191_v29 = vadd.f32 %v11125_v7, %v5832_v33  ;;  %v10877_v33 = vpop.f32.mrf.mxu3  ;;  %v11055_v32 = vpop.f32.mrf.mxu1 }
 0x5d5   : > { %v11223_v49 = vmax.f32 %v11191_v29, 0.0  ;;  %11166 = vmatmul.bf16.gmra.mxu2 %v12915_v58 }
 0x5d7   : > { %11255 = vst [vmem:[%s16753_s9 + $0x48] sm:$0xff] %v11223_v49 }
 0x5d8   : > { %v11127_v59 = vpop.f32.mrf.mxu2 }
 0x5d9   : > { %v11128_v31 = vadd.f32 %v11127_v59, %v11039_v51  ;;  %v10966_v3 = vpop.f32.mrf.mxu0  ;;  %v13663_v51 = vld [vmem:[#allocation4 + $0x478] sm:$0xf0] }
 0x5da   : > { %v17137_v59 = vld [vmem:[#allocation47_spill] sm:$0xff] }
 0x5db   : > { %v11192_v40 = vadd.f32 %v11128_v31, %v5835_v50  ;;  %v10871_v25 = vadd.f32 %v10870_v14, %v17137_v59  ;;  %v5842_v31 = vadd.f32 %v16743_v16, %v17138_v45  ;;  %v10880_v38 = vpop.f32.mrf.mxu3  ;;  %v11058_v36 = vpop.f32.mrf.mxu1 }
 0x5dd   : > { %v11224_v35 = vmax.f32 %v11192_v40, 0.0  ;;  %v10960_v6 = vadd.f32 %v10959_v61, %v10871_v25 }
 0x5df   : > { %11256 = vst [vmem:[%s16753_s9 + $0x50] sm:$0xff] %v11224_v35  ;;  %v12987_v35 = vor.u32 %v13663_v51, %v12986_v18  ;;  %v11049_v14 = vadd.f32 %v11048_v19, %v10960_v6 }
 0x5e0   : > { %v11129_v42 = vpop.f32.mrf.mxu2 }
 0x5e1   : > { %v11130_v1 = vadd.f32 %v11129_v42, %v11041_v23  ;;  %v10873_v42 = vadd.f32 %v10872_v26, %v16583_v9  ;;  %v10969_v62 = vpop.f32.mrf.mxu0  ;;  %v17141_v9 = vld [vmem:[#allocation37_spill] sm:$0xff] }
 0x5e2   : > { %v5847_v19 = vadd.f32 %v16743_v16, %v17141_v9 }
 0x5e3   : > { %v11193_v21 = vadd.f32 %v11130_v1, %v5837_v27  ;;  %v5845_v27 = vadd.f32 %v16743_v16, %v17139_v63  ;;  %v10962_v10 = vadd.f32 %v10961_v13, %v10873_v42 }
 0x5e5   : > { %v11225_v30 = vmax.f32 %v11193_v21, 0.0  ;;  %11171 = vmatmul.bf16.gmra.mxu2 %v12951_v53  ;;  %v10882_v53 = vpop.f32.mrf.mxu3  ;;  %v11051_v44 = vadd.f32 %v11050_v4, %v10962_v10 }
 0x5e6   : > { %v10883_v42 = vadd.f32 %v10882_v53, %v16643_v8  ;;  %v17145_v8 = vld [vmem:[#allocation41_spill] sm:$0xff] }
 0x5e7   : > { %11257 = vst [vmem:[%s16753_s9 + $0x58] sm:$0xff] %v11225_v30  ;;  %v17140_v30 = vld [vmem:[#allocation50_spill] sm:$0xff] }
 0x5e8   : > { %v11132_v7 = vpop.f32.mrf.mxu2  ;;  %v10876_v60 = vadd.f32 %v10875_v47, %v17140_v30  ;;  %v17142_v47 = vld [vmem:[#allocation38_spill] sm:$0xff] }
 0x5e9   : > { %v11133_v29 = vadd.f32 %v11132_v7, %v11044_v11  ;;  %v10971_v7 = vpop.f32.mrf.mxu0  ;;  %v5850_v4 = vadd.f32 %v16743_v16, %v17142_v47 }
 0x5ea   : > { %v10965_v55 = vadd.f32 %v10964_v43, %v10876_v60  ;;  %v10881_v43 = vadd.f32 %v10880_v38, %v16630_v56  ;;  %v17144_v56 = vld [vmem:[#allocation40_spill] sm:$0xff] }
 0x5eb   : > { %v11194_v58 = vadd.f32 %v11133_v29, %v5840_v17  ;;  %v11060_v29 = vpop.f32.mrf.mxu1  ;;  %v5855_v38 = vadd.f32 %v16743_v16, %v17144_v56 }
 0x5ec   : > { %v10970_v6 = vadd.f32 %v10969_v62, %v10881_v43 }
 0x5ed   : > { %v11226_v49 = vmax.f32 %v11194_v58, 0.0  ;;  %v10885_v12 = vpop.f32.mrf.mxu3  ;;  %v10878_v58 = vadd.f32 %v10877_v33, %v16613_v48  ;;  %v17143_v48 = vld [vmem:[#allocation39_spill] sm:$0xff] }
 0x5ee   : > { %v10886_v62 = vadd.f32 %v10885_v12, %v16658_v54  ;;  %v17146_v54 = vld [vmem:[#allocation8_spill] sm:$0xff] }
 0x5ef   : > { %11258 = vst [vmem:[%s16753_s9 + $0x60] sm:$0xff] %v11226_v49  ;;  %v11054_v49 = vadd.f32 %v11053_v2, %v10965_v55  ;;  %v10967_v59 = vadd.f32 %v10966_v3, %v10878_v58  ;;  %v5852_v2 = vadd.f32 %v16743_v16, %v17143_v48 }
 0x5f0   : > { %v11134_v50 = vpop.f32.mrf.mxu2 }
 0x5f1   : > { %v11135_v40 = vadd.f32 %v11134_v50, %v11046_v24  ;;  %v10974_v24 = vpop.f32.mrf.mxu0 }
 0x5f3   : > { %v11195_v28 = vadd.f32 %v11135_v40, %v5842_v31  ;;  %v11063_v45 = vpop.f32.mrf.mxu1  ;;  %v11056_v31 = vadd.f32 %v11055_v32, %v10967_v59 }
 0x5f5   : > { %v11227_v23 = vmax.f32 %v11195_v28, 0.0  ;;  %11176 = vmatmul.bf16.gmra.mxu2 %v12987_v35  ;;  %v10887_v40 = vpop.f32.mrf.mxu3 }
 0x5f7   : > { %11259 = vst [vmem:[%s16753_s9 + $0x68] sm:$0xff] %v11227_v23 }
 0x5f8   : > { %v11137_v20 = vpop.f32.mrf.mxu2 }
 0x5f9   : > { %v11138_v1 = vadd.f32 %v11137_v20, %v11049_v14  ;;  %v10976_v3 = vpop.f32.mrf.mxu0  ;;  %v11059_v14 = vadd.f32 %v11058_v36, %v10970_v6  ;;  %v5857_v36 = vadd.f32 %v16743_v16, %v17145_v8 }
 0x5fb   : > { %v11196_v21 = vadd.f32 %v11138_v1, %v5845_v27  ;;  %v11065_v32 = vpop.f32.mrf.mxu1  ;;  %v10972_v1 = vadd.f32 %v10971_v7, %v10883_v42  ;;  %v10888_v7 = vadd.f32 %v10887_v40, %v16668_v5  ;;  %v17147_v5 = vld [vmem:[#allocation42_spill] sm:$0xff] }
 0x5fd   : > { %v11228_v61 = vmax.f32 %v11196_v21, 0.0  ;;  %v10890_v27 = vpop.f32.mrf.mxu3  ;;  %v10977_v58 = vadd.f32 %v10976_v3, %v10888_v7 }
 0x5ff   : > { %11260 = vst [vmem:[%s16753_s9 + $0x70] sm:$0xff] %v11228_v61  ;;  %v11061_v61 = vadd.f32 %v11060_v29, %v10972_v1  ;;  %v5860_v29 = vadd.f32 %v16743_v16, %v17146_v54  ;;  %v11066_v59 = vadd.f32 %v11065_v32, %v10977_v58 }
 0x600   : > { %v11139_v11 = vpop.f32.mrf.mxu2 }
 0x601   : > { %v11140_v26 = vadd.f32 %v11139_v11, %v11051_v44  ;;  %v10979_v30 = vpop.f32.mrf.mxu0  ;;  %v10975_v44 = vadd.f32 %v10974_v24, %v10886_v62  ;;  %v5862_v24 = vadd.f32 %v16743_v16, %v17147_v5 }
 0x603   : > { %v11197_v17 = vadd.f32 %v11140_v26, %v5847_v19  ;;  %v11068_v11 = vpop.f32.mrf.mxu1  ;;  %v11064_v55 = vadd.f32 %v11063_v45, %v10975_v44 }
 0x605   : > { %v11229_v13 = vmax.f32 %v11197_v17, 0.0  ;;  %v10892_v19 = vpop.f32.mrf.mxu3 }
 0x607   : > { %11261 = vst [vmem:[%s16753_s9 + $0x78] sm:$0xff] %v11229_v13 }
 0x608   : > { %v11142_v18 = vpop.f32.mrf.mxu2 }
 0x609   : > { %v11143_v51 = vadd.f32 %v11142_v18, %v11054_v49  ;;  %v10981_v12 = vpop.f32.mrf.mxu0 }
 0x60b   : > { %v11198_v25 = vadd.f32 %v11143_v51, %v5850_v4  ;;  %v11070_v18 = vpop.f32.mrf.mxu1  ;;  %v10891_v51 = vadd.f32 %v10890_v27, %v16682_v22  ;;  %v17148_v22 = vld [vmem:[#allocation9_spill] sm:$0xff] }
 0x60d   : > { %v11230_v50 = vmax.f32 %v11198_v25, 0.0  ;;  %v10895_v4 = vpop.f32.mrf.mxu3  ;;  %v10980_v43 = vadd.f32 %v10979_v30, %v10891_v51 }
 0x60e   : > { %v10896_v56 = vadd.f32 %v10895_v4, %v16702_v34  ;;  %v17150_v34 = vld [vmem:[#allocation11_spill] sm:$0xff] }
 0x60f   : > { %11262 = vst [vmem:[%s16753_s9 + $0x80] sm:$0xff] %v11230_v50 }
 0x610   : > { %v11144_v35 = vpop.f32.mrf.mxu2 }
 0x611   : > { %v11145_v33 = vadd.f32 %v11144_v35, %v11056_v31  ;;  %v10984_v31 = vpop.f32.mrf.mxu0  ;;  %v10893_v35 = vadd.f32 %v10892_v19, %v16692_v41  ;;  %v17149_v41 = vld [vmem:[#allocation10_spill] sm:$0xff] }
 0x613   : > { %v11199_v28 = vadd.f32 %v11145_v33, %v5852_v2  ;;  %v11073_v48 = vpop.f32.mrf.mxu1  ;;  %v11069_v2 = vadd.f32 %v11068_v11, %v10980_v43  ;;  %v10982_v3 = vadd.f32 %v10981_v12, %v10893_v35 }
 0x615   : > { %v11231_v23 = vmax.f32 %v11199_v28, 0.0  ;;  %v10897_v33 = vpop.f32.mrf.mxu3  ;;  %v5865_v28 = vadd.f32 %v16743_v16, %v17148_v22 }
 0x616   : > { %v10898_v30 = vadd.f32 %v10897_v33, %v16706_v52  ;;  %v17151_v52 = vld [vmem:[#allocation12_spill] sm:$0xff] }
 0x617   : > { %11263 = vst [vmem:[%s16753_s9 + $0x88] sm:$0xff] %v11231_v23 }
 0x618   : > { %v11147_v20 = vpop.f32.mrf.mxu2 }
 0x619   : > { %v11148_v63 = vadd.f32 %v11147_v20, %v11059_v14  ;;  %v10986_v20 = vpop.f32.mrf.mxu0 }
 0x61a   : > { %v10987_v11 = vadd.f32 %v10986_v20, %v10898_v30 }
 0x61b   : > { %v11200_v10 = vadd.f32 %v11148_v63, %v5855_v38  ;;  %v11071_v38 = vadd.f32 %v11070_v18, %v10982_v3  ;;  %v5867_v63 = vadd.f32 %v16743_v16, %v17149_v41  ;;  %v11075_v27 = vpop.f32.mrf.mxu1 }
 0x61d   : > { %v11232_v21 = vmax.f32 %v11200_v10, 0.0  ;;  %v10900_v10 = vpop.f32.mrf.mxu3 }
 0x61f   : > { %11264 = vst [vmem:[%s16753_s9 + $0x90] sm:$0xff] %v11232_v21  ;;  %v10985_v21 = vadd.f32 %v10984_v31, %v10896_v56 }
 0x620   : > { %v11149_v60 = vpop.f32.mrf.mxu2 }
 0x621   : > { %v11150_v53 = vadd.f32 %v11149_v60, %v11061_v61  ;;  %v11074_v60 = vadd.f32 %v11073_v48, %v10985_v21  ;;  %v10989_v8 = vpop.f32.mrf.mxu0 }
 0x623   : > { %v11201_v9 = vadd.f32 %v11150_v53, %v5857_v36  ;;  %v5870_v53 = vadd.f32 %v16743_v16, %v17150_v34 }
 0x625   : > { %v11233_v26 = vmax.f32 %v11201_v9, 0.0  ;;  %v11078_v9 = vpop.f32.mrf.mxu1 }
 0x627   : > { %11265 = vst [vmem:[%s16753_s9 + $0x98] sm:$0xff] %v11233_v26  ;;  %v10902_v26 = vpop.f32.mrf.mxu3 }
 0x628   : > { %v11152_v17 = vpop.f32.mrf.mxu2  ;;  %v10903_v51 = vadd.f32 %v10902_v26, %v16722_v46  ;;  %v17153_v46 = vld [vmem:[#allocation14_spill] sm:$0xff] }
 0x629   : > { %v11153_v13 = vadd.f32 %v11152_v17, %v11064_v55  ;;  %v10901_v55 = vadd.f32 %v10900_v10, %v16716_v0  ;;  %v11076_v17 = vadd.f32 %v11075_v27, %v10987_v11  ;;  %v10991_v12 = vpop.f32.mrf.mxu0  ;;  %v17152_v0 = vld [vmem:[#allocation13_spill] sm:$0xff] }
 0x62a   : > { %v5875_v5 = vadd.f32 %v16743_v16, %v17152_v0 }
 0x62b   : > { %v11202_v49 = vadd.f32 %v11153_v13, %v5860_v29  ;;  %v5872_v29 = vadd.f32 %v16743_v16, %v17151_v52  ;;  %v10990_v58 = vadd.f32 %v10989_v8, %v10901_v55 }
 0x62d   : > { %v11234_v47 = vmax.f32 %v11202_v49, 0.0  ;;  %v11080_v18 = vpop.f32.mrf.mxu1 }
 0x62f   : > { %11266 = vst [vmem:[%s16753_s9 + $0xa0] sm:$0xff] %v11234_v47  ;;  %v10905_v4 = vpop.f32.mrf.mxu3 }
 0x630   : > { %v11154_v25 = vpop.f32.mrf.mxu2  ;;  %v10906_v35 = vadd.f32 %v10905_v4, %v16726_v39 }
 0x631   : > { %v11155_v50 = vadd.f32 %v11154_v25, %v11066_v59  ;;  %v11079_v59 = vadd.f32 %v11078_v9, %v10990_v58 }
 0x633   : > { %v11203_v45 = vadd.f32 %v11155_v50, %v5862_v24  ;;  %v10992_v50 = vadd.f32 %v10991_v12, %v10903_v51 }
 0x635   : > { %v11235_v40 = vmax.f32 %v11203_v45, 0.0  ;;  %v10994_v45 = vpop.f32.mrf.mxu0  ;;  %v11081_v48 = vadd.f32 %v11080_v18, %v10992_v50 }
 0x637   : > { %11267 = vst [vmem:[%s16753_s9 + $0xa8] sm:$0xff] %v11235_v40  ;;  %v11083_v40 = vpop.f32.mrf.mxu1 }
 0x638   : > { %v11157_v6 = vpop.f32.mrf.mxu2 }
 0x639   : > { %v11158_v23 = vadd.f32 %v11157_v6, %v11069_v2  ;;  %v10907_v2 = vpop.f32.mrf.mxu3  ;;  %v5877_v6 = vadd.f32 %v16743_v16, %v17153_v46 }
 0x63b   : > { %v11204_v42 = vadd.f32 %v11158_v23, %v5865_v28  ;;  %v10995_v28 = vadd.f32 %v10994_v45, %v10906_v35 }
 0x63d   : > { %v11236_v14 = vmax.f32 %v11204_v42, 0.0  ;;  %v10996_v42 = vpop.f32.mrf.mxu0  ;;  %v11084_v20 = vadd.f32 %v11083_v40, %v10995_v28 }
 0x63f   : > { %11268 = vst [vmem:[%s16753_s9 + $0xb0] sm:$0xff] %v11236_v14  ;;  %v10908_v14 = vadd.f32 %v10907_v2, %v16730_v57  ;;  %v11085_v41 = vpop.f32.mrf.mxu1  ;;  %v17155_v57 = vld [vmem:[#allocation16_spill] sm:$0xff] }
 0x640   : > { %v11159_v32 = vpop.f32.mrf.mxu2 }
 0x641   : > { %v11160_v1 = vadd.f32 %v11159_v32, %v11071_v38  ;;  %v17154_v38 = vld [vmem:[#allocation15_spill] sm:$0xff]  ;;  %v10997_v27 = vadd.f32 %v10996_v42, %v10908_v14 }
 0x642   : > { %v5880_v39 = vadd.f32 %v16743_v16, %v17154_v38 }
 0x643   : > { %v11205_v62 = vadd.f32 %v11160_v1, %v5867_v63  ;;  %v10910_v63 = vpop.f32.mrf.mxu3 }
 0x645   : > { %v11237_v61 = vmax.f32 %v11205_v62, 0.0  ;;  %v10999_v21 = vpop.f32.mrf.mxu0  ;;  %v10911_v62 = vadd.f32 %v10910_v63, %v16734_v15 }
 0x647   : > { %11269 = vst [vmem:[%s16753_s9 + $0xb8] sm:$0xff] %v11237_v61  ;;  %v11086_v61 = vadd.f32 %v11085_v41, %v10997_v27  ;;  %v11000_v34 = vadd.f32 %v10999_v21, %v10911_v62 }
 0x648   : > { %v11162_v36 = vpop.f32.mrf.mxu2 }
 0x649   : > { %v11163_v44 = vadd.f32 %v11162_v36, %v11074_v60  ;;  %v5882_v60 = vadd.f32 %v16743_v16, %v17155_v57  ;;  %v11088_v36 = vpop.f32.mrf.mxu1 }
 0x64a   : > { %v11089_v9 = vadd.f32 %v11088_v36, %v11000_v34 }
 0x64b   : > { %v11206_v19 = vadd.f32 %v11163_v44, %v5870_v53  ;;  %v10912_v44 = vpop.f32.mrf.mxu3 }
 0x64d   : > { %v11238_v7 = vmax.f32 %v11206_v19, 0.0  ;;  %v10913_v19 = vadd.f32 %v10912_v44, %v16738_v37  ;;  %v11001_v26 = vpop.f32.mrf.mxu0 }
 0x64f   : > { %11270 = vst [vmem:[%s16753_s9 + $0xc0] sm:$0xff] %v11238_v7  ;;  %v17156_v7 = vld [vmem:[#allocation17_spill] sm:$0xff] }
 0x650   : > { %v11164_v54 = vpop.f32.mrf.mxu2  ;;  %v5885_v55 = vadd.f32 %v16743_v16, %v17156_v7 }
 0x651   : > { %v11165_v13 = vadd.f32 %v11164_v54, %v11076_v17  ;;  %v11002_v54 = vadd.f32 %v11001_v26, %v10913_v19 }
 0x653   : > { %v11207_v49 = vadd.f32 %v11165_v13, %v5872_v29  ;;  %v11090_v29 = vpop.f32.mrf.mxu1 }
 0x654   : > { %v11091_v12 = vadd.f32 %v11090_v29, %v11002_v54 }
 0x655   : > { %v11239_v47 = vmax.f32 %v11207_v49, 0.0  ;;  %v17157_v49 = vld [vmem:[#allocation18_spill] sm:$0xff] }
 0x656   : > { %v5887_v18 = vadd.f32 %v16743_v16, %v17157_v49 }
 0x657   : > { %11271 = vst [vmem:[%s16753_s9 + $0xc8] sm:$0xff] %v11239_v47 }
 0x658   : > { %v11167_v25 = vpop.f32.mrf.mxu2 }
 0x659   : > { %v11168_v24 = vadd.f32 %v11167_v25, %v11079_v59 }
 0x65b   : > { %v11208_v43 = vadd.f32 %v11168_v24, %v5875_v5 }
 0x65d   : > { %v11240_v31 = vmax.f32 %v11208_v43, 0.0 }
 0x65f   : > { %11272 = vst [vmem:[%s16753_s9 + $0xd0] sm:$0xff] %v11240_v31 }
 0x660   : > { %v11169_v33 = vpop.f32.mrf.mxu2 }
 0x661   : > { %v11170_v22 = vadd.f32 %v11169_v33, %v11081_v48 }
 0x663   : > { %v11209_v23 = vadd.f32 %v11170_v22, %v5877_v6 }
 0x665   : > { %v11241_v3 = vmax.f32 %v11209_v23, 0.0 }
 0x667   : > { %11273 = vst [vmem:[%s16753_s9 + $0xd8] sm:$0xff] %v11241_v3 }
 0x668   : > { %v11172_v56 = vpop.f32.mrf.mxu2 }
 0x669   : > { %v11173_v32 = vadd.f32 %v11172_v56, %v11084_v20 }
 0x66b   : > { %v11210_v1 = vadd.f32 %v11173_v32, %v5880_v39 }
 0x66d   : > { %v11242_v10 = vmax.f32 %v11210_v1, 0.0 }
 0x66f   : > { %11274 = vst [vmem:[%s16753_s9 + $0xe0] sm:$0xff] %v11242_v10 }
 0x670   : > { %v11174_v30 = vpop.f32.mrf.mxu2 }
 0x671   : > { %v11175_v8 = vadd.f32 %v11174_v30, %v11086_v61 }
 0x673   : > { %v11211_v53 = vadd.f32 %v11175_v8, %v5882_v60 }
 0x675   : > { %v11243_v11 = vmax.f32 %v11211_v53, 0.0 }
 0x677   : > { %11275 = vst [vmem:[%s16753_s9 + $0xe8] sm:$0xff] %v11243_v11 }
 0x678   : > { %v11177_v15 = vpop.f32.mrf.mxu2 }
 0x679   : > { %v11178_v17 = vadd.f32 %v11177_v15, %v11089_v9 }
 0x67b   : > { %v11212_v52 = vadd.f32 %v11178_v17, %v5885_v55 }
 0x67d   : > { %v11244_v13 = vmax.f32 %v11212_v52, 0.0 }
 0x67f   : > { %11276 = vst [vmem:[%s16753_s9 + $0xf0] sm:$0xff] %v11244_v13 }
 0x680   : > { %v11179_v58 = vpop.f32.mrf.mxu2 }
 0x681   : > { %v11180_v47 = vadd.f32 %v11179_v58, %v11091_v12 }
 0x683   : > { %v11213_v37 = vadd.f32 %v11180_v47, %v5887_v18 }
 0x685   : > { %v11245_v4 = vmax.f32 %v11213_v37, 0.0 }
 0x687   : > { %11277 = vst [vmem:[%s16753_s9 + $0xf8] sm:$0xff] %v11245_v4 }
 0x688 PF: > { %s18_s24 = sadd.s32 1, %s13830_s24  }
 0x689   : > { %p15_p7 = scmp.ge.s32.totalorder %s18_s24, 4  }
 0x68b   :  { %17 = sbr.rel (!%p15_p7) target bundleno = 1 (0x1), region = 87 }
 0x690   :  { %11299 = vsyncpa [#allocation6], 1 }
 0x691   :  { %11301 = vsyncpa [#allocation6 + $0x1], 1 }

</bundles_post_ra>
